<compile_context>
chip_gen: v5e
topology: v5e:2x2
jax: 0.10.0
libtpu: 0.0.40
codegen_flags: <defaults>
</compile_context>

<pallas_src>
import functools

import jax
import jax.numpy as jnp
from jax import lax
from jax.experimental import pallas as pl
from jax.experimental.pallas import tpu as pltpu

_BN_EPS = 1e-5


# ----------------------------------------------------------------------------
# Fused Pallas kernel: one batch element per grid step, whole block in VMEM.
# ----------------------------------------------------------------------------
def _shake_block_kernel(x_ref, wa_ref, sa_ref, ba_ref, wb_ref, sb_ref, bb_ref,
                        *rest, stride, has_shortcut):
    """Fused ShakeBlock forward for one batch element.

    x_ref:  (1, Cin, H, W)          input (NCHW, unpadded)
    wa_ref: (2, Cout, 9*Cin)        conv1 weights of both branches (tap-major, ch-minor)
    sa_ref, ba_ref: (2, Cout, 1)    folded BN1 scale / bias of both branches
    wb_ref: (2, Cout, 9*Cout)       conv2 weights of both branches
    sb_ref, bb_ref: (2, Cout, 1)    folded BN2 scale / bias of both branches
    [wsc_ref (Cout, Cin), ssc_ref/bsc_ref (Cout, 1)]  projection shortcut (optional)
    o_ref:  (1, Cout, Ho*Wo)        output, spatial axis on lanes (lane-dense store)
    xp_ref: (Cin, H+2, W+2)   VMEM scratch: zero-padded relu(x)
    hp_ref: (Cout, Ho+2, Wo+2) VMEM scratch: zero-padded branch intermediate
    """
    if has_shortcut:
        wsc_ref, ssc_ref, bsc_ref, o_ref, xp_ref, hp_ref = rest
    else:
        o_ref, xp_ref, hp_ref = rest

    Cin, Hp, Wp = xp_ref.shape
    H, W = Hp - 2, Wp - 2
    Cout, Hop, Wop = hp_ref.shape
    Ho, Wo = Hop - 2, Wop - 2

    x = x_ref[0]                                     # (Cin, H, W)

    # 3x3 im2col from a zero-padded (C, Hp, Wp) plane -> (9*C, Ho*Wo).
    def im2col(padded, s, ho, wo):
        c = padded.shape[0]
        if s == 1:
            taps = [padded[:, dy:dy + ho, dx:dx + wo]
                    for dy in range(3) for dx in range(3)]
        else:
            # s*s strided "phase" planes computed once; every tap is then a
            # contiguous static slice (no 4x over-compute for strided convs).
            phases = [[padded[:, a::s, b::s] for b in range(s)] for a in range(s)]
            taps = [phases[dy % s][dx % s][:, dy // s:dy // s + ho,
                                           dx // s:dx // s + wo]
                    for dy in range(3) for dx in range(3)]
        return jnp.concatenate([t.reshape(c, ho * wo) for t in taps], axis=0)

    # Zero-pad relu(x) once into VMEM (shared by both branches; pad handled in-kernel).
    xp_ref[...] = jnp.zeros(xp_ref.shape, jnp.float32)
    xp_ref[:, 1:H + 1, 1:W + 1] = jnp.maximum(x, 0.0)
    cols1 = im2col(xp_ref[...], stride, Ho, Wo)      # (9*Cin, Ho*Wo)

    h_sum = jnp.zeros((Cout, Ho * Wo), jnp.float32)
    for br in range(2):                              # the two shake-shake branches
        # conv1 (single im2col matmul, K = 9*Cin) + folded BN1 + ReLU
        h = jnp.dot(wa_ref[br], cols1, preferred_element_type=jnp.float32)
        h = jnp.maximum(h * sa_ref[br] + ba_ref[br], 0.0)
        # zero-pad the intermediate in VMEM and run conv2 (stride 1) + folded BN2
        hp_ref[...] = jnp.zeros(hp_ref.shape, jnp.float32)
        hp_ref[:, 1:Ho + 1, 1:Wo + 1] = h.reshape(Cout, Ho, Wo)
        cols2 = im2col(hp_ref[...], 1, Ho, Wo)       # (9*Cout, Ho*Wo)
        h = jnp.dot(wb_ref[br], cols2, preferred_element_type=jnp.float32)
        h = h * sb_ref[br] + bb_ref[br]
        h_sum = h_sum + h

    h_mix = 0.5 * h_sum                              # eval-mode ShakeShake mix

    # Shortcut path (fused into the same kernel).
    if has_shortcut:
        xs = x if stride == 1 else x[:, ::stride, ::stride]   # (Cin, Ho, Wo)
        h0 = jnp.dot(wsc_ref[...], xs.reshape(Cin, Ho * Wo),
                     preferred_element_type=jnp.float32)
        h0 = h0 * ssc_ref[...] + bsc_ref[...]
    else:
        h0 = x.reshape(Cin, H * W)                   # identity (Cin==Cout, stride==1)

    o_ref[0] = (h_mix + h0).astype(o_ref.dtype)


# ----------------------------------------------------------------------------
# Wrapper: parameter folding / packing + one pallas_call for the whole block.
# ----------------------------------------------------------------------------
def _fold_bn(p):
    scale = p["gamma"] / jnp.sqrt(p["var"] + _BN_EPS)
    bias = p["beta"] - p["mean"] * scale
    return (scale.reshape(-1, 1).astype(jnp.float32),
            bias.reshape(-1, 1).astype(jnp.float32))


def _flatten_w3x3(w_oihw):
    # (Cout, Cin, 3, 3) -> (Cout, 9*Cin), tap-major / channel-minor to match im2col.
    cout, cin = w_oihw.shape[0], w_oihw.shape[1]
    return jnp.transpose(w_oihw, (0, 2, 3, 1)).reshape(cout, 9 * cin).astype(jnp.float32)


def shake_block_forward(params, x_nchw, stride):
    """Inference-mode ShakeBlock forward. Input/output are NCHW (PyTorch layout)."""
    x = x_nchw.astype(jnp.float32)
    N, Cin, H, W = x.shape
    b1, b2 = params["branch1"], params["branch2"]
    Cout = b1["conv1_w"].shape[0]
    Ho = (H + 2 - 3) // stride + 1
    Wo = (W + 2 - 3) // stride + 1

    wa = jnp.stack([_flatten_w3x3(b1["conv1_w"]), _flatten_w3x3(b2["conv1_w"])])
    wb = jnp.stack([_flatten_w3x3(b1["conv2_w"]), _flatten_w3x3(b2["conv2_w"])])
    s1a, o1a = _fold_bn(b1["bn1"]); s2a, o2a = _fold_bn(b2["bn1"])
    s1b, o1b = _fold_bn(b1["bn2"]); s2b, o2b = _fold_bn(b2["bn2"])
    sa, ba = jnp.stack([s1a, s2a]), jnp.stack([o1a, o2a])
    sb, bb = jnp.stack([s1b, s2b]), jnp.stack([o1b, o2b])

    has_shortcut = params["shortcut"] is not None
    inputs = [x, wa, sa, ba, wb, sb, bb]
    in_specs = [
        pl.BlockSpec((1, Cin, H, W), lambda n: (n, 0, 0, 0)),
        pl.BlockSpec((2, Cout, 9 * Cin), lambda n: (0, 0, 0)),
        pl.BlockSpec((2, Cout, 1), lambda n: (0, 0, 0)),
        pl.BlockSpec((2, Cout, 1), lambda n: (0, 0, 0)),
        pl.BlockSpec((2, Cout, 9 * Cout), lambda n: (0, 0, 0)),
        pl.BlockSpec((2, Cout, 1), lambda n: (0, 0, 0)),
        pl.BlockSpec((2, Cout, 1), lambda n: (0, 0, 0)),
    ]
    if has_shortcut:
        sp = params["shortcut"]
        wsc = sp["conv_w"].reshape(Cout, Cin).astype(jnp.float32)
        ssc, bsc = _fold_bn(sp["bn"])
        inputs += [wsc, ssc, bsc]
        in_specs += [
            pl.BlockSpec((Cout, Cin), lambda n: (0, 0)),
            pl.BlockSpec((Cout, 1), lambda n: (0, 0)),
            pl.BlockSpec((Cout, 1), lambda n: (0, 0)),
        ]

    out = pl.pallas_call(
        functools.partial(_shake_block_kernel, stride=stride,
                          has_shortcut=has_shortcut),
        out_shape=jax.ShapeDtypeStruct((N, Cout, Ho * Wo), jnp.float32),
        grid_spec=pltpu.PrefetchScalarGridSpec(
            num_scalar_prefetch=0,
            grid=(N,),
            in_specs=in_specs,
            out_specs=pl.BlockSpec((1, Cout, Ho * Wo), lambda n: (n, 0, 0)),
            scratch_shapes=[
                pltpu.VMEM((Cin, H + 2, W + 2), jnp.float32),
                pltpu.VMEM((Cout, Ho + 2, Wo + 2), jnp.float32),
            ],
        ),
        compiler_params=pltpu.CompilerParams(dimension_semantics=("parallel",)),
    )(*inputs)
    return out.reshape(N, Cout, Ho, Wo)  # free contiguous reshape; already NCHW


# ----------------------------------------------------------------------------
# Parameter init (PyTorch OIHW layout, synthetic running stats)
# ----------------------------------------------------------------------------
def _init_bn(keys, ch):
    return dict(
        gamma=jax.random.uniform(keys[0], (ch,), jnp.float32, 0.5, 1.5),
        beta=0.1 * jax.random.normal(keys[1], (ch,), jnp.float32),
        mean=0.1 * jax.random.normal(keys[2], (ch,), jnp.float32),
        var=jax.random.uniform(keys[3], (ch,), jnp.float32, 0.5, 1.5),
    )


def _init_branch(key, in_ch, out_ch):
    ks = jax.random.split(key, 10)
    return dict(
        conv1_w=0.1 * jax.random.normal(ks[0], (out_ch, in_ch, 3, 3), jnp.float32),
        bn1=_init_bn(ks[1:5], out_ch),
        conv2_w=0.1 * jax.random.normal(ks[5], (out_ch, out_ch, 3, 3), jnp.float32),
        bn2=_init_bn(ks[6:10], out_ch),
    )


def init_shake_block_params(key, in_ch, out_ch, stride):
    kb1, kb2, ksc = jax.random.split(key, 3)
    params = dict(branch1=_init_branch(kb1, in_ch, out_ch),
                  branch2=_init_branch(kb2, in_ch, out_ch),
                  shortcut=None)
    if not (in_ch == out_ch and stride == 1):
        ks = jax.random.split(ksc, 5)
        params["shortcut"] = dict(
            conv_w=0.1 * jax.random.normal(ks[0], (out_ch, in_ch, 1, 1), jnp.float32),
            bn=_init_bn(ks[1:5], out_ch),
        )
    return params


# ----------------------------------------------------------------------------
# Pure-JAX reference (NCHW throughout; 1x1 shortcut uses padding=0 — bug fixed)
# ----------------------------------------------------------------------------
def _ref_conv(x, w, stride, pad):
    return lax.conv_general_dilated(
        x, w, (stride, stride), ((pad, pad), (pad, pad)),
        dimension_numbers=("NCHW", "OIHW", "NCHW"))


def _ref_bn(y, p):
    def r(a):
        return a.reshape(1, -1, 1, 1)
    return (y - r(p["mean"])) / jnp.sqrt(r(p["var"]) + _BN_EPS) * r(p["gamma"]) + r(p["beta"])


def _ref_branch(x, p, stride):
    h = jnp.maximum(x, 0.0)
    h = _ref_bn(_ref_conv(h, p["conv1_w"], stride, 1), p["bn1"])
    h = jnp.maximum(h, 0.0)
    h = _ref_bn(_ref_conv(h, p["conv2_w"], 1, 1), p["bn2"])
    return h


def ref_shake_block(params, x_nchw, stride):
    x = x_nchw.astype(jnp.float32)
    h1 = _ref_branch(x, params["branch1"], stride)
    h2 = _ref_branch(x, params["branch2"], stride)
    if params["shortcut"] is None:
        h0 = x
    else:
        sp = params["shortcut"]
        h0 = _ref_bn(_ref_conv(x, sp["conv_w"], stride, 0), sp["bn"])  # padding=0
    return 0.5 * (h1 + h2) + h0


# ----------------------------------------------------------------------------
if __name__ == "__main__":
    key = jax.random.PRNGKey(0)
    kx, kp1, kp2 = jax.random.split(key, 3)

    N, C, H, W = 2, 4, 16, 16
    x = jax.random.normal(kx, (N, C, H, W), jnp.float32)

    # Case 1: identity shortcut (in_ch == out_ch, stride == 1).
    params1 = init_shake_block_params(kp1, in_ch=4, out_ch=4, stride=1)
    out1 = jax.block_until_ready(shake_block_forward(params1, x, stride=1))
    ref1 = ref_shake_block(params1, x, stride=1)
    assert out1.shape == (N, 4, H, W)
    assert jnp.allclose(out1, ref1, rtol=2e-2, atol=2e-2), "case-1 mismatch"

    # Case 2: projection shortcut (out_ch != in_ch, stride == 2).
    params2 = init_shake_block_params(kp2, in_ch=4, out_ch=8, stride=2)
    out2 = jax.block_until_ready(shake_block_forward(params2, x, stride=2))
    ref2 = ref_shake_block(params2, x, stride=2)
    assert out2.shape == (N, 8, H // 2, W // 2)
    assert jnp.allclose(out2, ref2, rtol=2e-2, atol=2e-2), "case-2 mismatch"

    print("KERNEL_OK")
</pallas_src>

<mosaic_0001>
module attributes {stable_mosaic.version = 11 : i64} {
  func.func @_shake_block_kernel(%arg0: i32, %arg1: memref<1x4x16x16xf32, #tpu.memory_space<vmem>>, %arg2: memref<2x4x36xf32, #tpu.memory_space<vmem>>, %arg3: memref<2x4x1xf32, #tpu.memory_space<vmem>>, %arg4: memref<2x4x1xf32, #tpu.memory_space<vmem>>, %arg5: memref<2x4x36xf32, #tpu.memory_space<vmem>>, %arg6: memref<2x4x1xf32, #tpu.memory_space<vmem>>, %arg7: memref<2x4x1xf32, #tpu.memory_space<vmem>>, %arg8: memref<1x4x256xf32, #tpu.memory_space<vmem>>, %arg9: memref<4x18x18xf32, #tpu.memory_space<vmem>>, %arg10: memref<4x18x18xf32, #tpu.memory_space<vmem>>) attributes {dimension_semantics = [#tpu.dimension_semantics<parallel>], iteration_bounds = array<i64: 2>, scalar_prefetch = 0 : i64, scratch_operands = 2 : i64, tpu.core_type = #tpu.core_type<tc>, window_params = [{transform_indices = @transform_0, window_bounds = array<i64: 1, 4, 16, 16>}, {pipeline_mode = #tpu.pipeline_mode<synchronous>, transform_indices = @transform_1, window_bounds = array<i64: 2, 4, 36>}, {pipeline_mode = #tpu.pipeline_mode<synchronous>, transform_indices = @transform_2, window_bounds = array<i64: 2, 4, 1>}, {pipeline_mode = #tpu.pipeline_mode<synchronous>, transform_indices = @transform_3, window_bounds = array<i64: 2, 4, 1>}, {pipeline_mode = #tpu.pipeline_mode<synchronous>, transform_indices = @transform_4, window_bounds = array<i64: 2, 4, 36>}, {pipeline_mode = #tpu.pipeline_mode<synchronous>, transform_indices = @transform_5, window_bounds = array<i64: 2, 4, 1>}, {pipeline_mode = #tpu.pipeline_mode<synchronous>, transform_indices = @transform_6, window_bounds = array<i64: 2, 4, 1>}, {transform_indices = @transform_7, window_bounds = array<i64: 1, 4, 256>}]} {
    %c0 = arith.constant 0 : index
    %c0_0 = arith.constant 0 : index
    %c0_1 = arith.constant 0 : index
    %c0_2 = arith.constant 0 : index
    %0 = vector.load %arg1[%c0, %c0_0, %c0_1, %c0_2] : memref<1x4x16x16xf32, #tpu.memory_space<vmem>>, vector<1x4x16x16xf32>
    %1 = vector.shape_cast %0 : vector<1x4x16x16xf32> to vector<4x16x16xf32>
    %cst = arith.constant 0.000000e+00 : f32
    %2 = vector.broadcast %cst : f32 to vector<4x18x18xf32>
    %c0_3 = arith.constant 0 : index
    %c0_4 = arith.constant 0 : index
    %c0_5 = arith.constant 0 : index
    %3 = vector.load %arg9[%c0_3, %c0_4, %c0_5] : memref<4x18x18xf32, #tpu.memory_space<vmem>>, vector<4x18x18xf32>
    tpu.vector_store %arg9[%c0_3, %c0_4, %c0_5], %2 {strides = array<i32>} : memref<4x18x18xf32, #tpu.memory_space<vmem>>, vector<4x18x18xf32>,
    %cst_6 = arith.constant 0.000000e+00 : f32
    %4 = vector.broadcast %cst_6 : f32 to vector<4x16x16xf32>
    %5 = arith.maximumf %1, %4 : vector<4x16x16xf32>
    %c0_7 = arith.constant 0 : index
    %c1 = arith.constant 1 : index
    %c1_8 = arith.constant 1 : index
    %6 = vector.load %arg9[%c0_7, %c1, %c1_8] : memref<4x18x18xf32, #tpu.memory_space<vmem>>, vector<4x16x16xf32>
    tpu.vector_store %arg9[%c0_7, %c1, %c1_8], %5 {strides = array<i32>} : memref<4x18x18xf32, #tpu.memory_space<vmem>>, vector<4x16x16xf32>,
    %c0_9 = arith.constant 0 : index
    %c0_10 = arith.constant 0 : index
    %c0_11 = arith.constant 0 : index
    %7 = vector.load %arg9[%c0_9, %c0_10, %c0_11] : memref<4x18x18xf32, #tpu.memory_space<vmem>>, vector<4x18x18xf32>
    %8 = vector.extract_strided_slice %7 {offsets = [0, 0, 0], sizes = [4, 16, 16], strides = [1, 1, 1]} : vector<4x18x18xf32> to vector<4x16x16xf32>
    %9 = vector.extract_strided_slice %7 {offsets = [0, 0, 1], sizes = [4, 16, 16], strides = [1, 1, 1]} : vector<4x18x18xf32> to vector<4x16x16xf32>
    %10 = vector.extract_strided_slice %7 {offsets = [0, 0, 2], sizes = [4, 16, 16], strides = [1, 1, 1]} : vector<4x18x18xf32> to vector<4x16x16xf32>
    %11 = vector.extract_strided_slice %7 {offsets = [0, 1, 0], sizes = [4, 16, 16], strides = [1, 1, 1]} : vector<4x18x18xf32> to vector<4x16x16xf32>
    %12 = vector.extract_strided_slice %7 {offsets = [0, 1, 1], sizes = [4, 16, 16], strides = [1, 1, 1]} : vector<4x18x18xf32> to vector<4x16x16xf32>
    %13 = vector.extract_strided_slice %7 {offsets = [0, 1, 2], sizes = [4, 16, 16], strides = [1, 1, 1]} : vector<4x18x18xf32> to vector<4x16x16xf32>
    %14 = vector.extract_strided_slice %7 {offsets = [0, 2, 0], sizes = [4, 16, 16], strides = [1, 1, 1]} : vector<4x18x18xf32> to vector<4x16x16xf32>
    %15 = vector.extract_strided_slice %7 {offsets = [0, 2, 1], sizes = [4, 16, 16], strides = [1, 1, 1]} : vector<4x18x18xf32> to vector<4x16x16xf32>
    %16 = vector.extract_strided_slice %7 {offsets = [0, 2, 2], sizes = [4, 16, 16], strides = [1, 1, 1]} : vector<4x18x18xf32> to vector<4x16x16xf32>
    %17 = vector.shape_cast %8 : vector<4x16x16xf32> to vector<4x256xf32>
    %18 = vector.shape_cast %9 : vector<4x16x16xf32> to vector<4x256xf32>
    %19 = vector.shape_cast %10 : vector<4x16x16xf32> to vector<4x256xf32>
    %20 = vector.shape_cast %11 : vector<4x16x16xf32> to vector<4x256xf32>
    %21 = vector.shape_cast %12 : vector<4x16x16xf32> to vector<4x256xf32>
    %22 = vector.shape_cast %13 : vector<4x16x16xf32> to vector<4x256xf32>
    %23 = vector.shape_cast %14 : vector<4x16x16xf32> to vector<4x256xf32>
    %24 = vector.shape_cast %15 : vector<4x16x16xf32> to vector<4x256xf32>
    %25 = vector.shape_cast %16 : vector<4x16x16xf32> to vector<4x256xf32>
    %26 = tpu.concatenate %17, %18, %19, %20, %21, %22, %23, %24, %25 in 0 : vector<4x256xf32>, vector<4x256xf32>, vector<4x256xf32>, vector<4x256xf32>, vector<4x256xf32>, vector<4x256xf32>, vector<4x256xf32>, vector<4x256xf32>, vector<4x256xf32> -> vector<36x256xf32>
    %cst_12 = arith.constant 0.000000e+00 : f32
    %27 = vector.broadcast %cst_12 : f32 to vector<4x256xf32>
    %c0_13 = arith.constant 0 : index
    %c0_14 = arith.constant 0 : index
    %c0_15 = arith.constant 0 : index
    %28 = vector.load %arg2[%c0_13, %c0_14, %c0_15] : memref<2x4x36xf32, #tpu.memory_space<vmem>>, vector<1x4x36xf32>
    %29 = vector.shape_cast %28 : vector<1x4x36xf32> to vector<4x36xf32>
    %cst_16 = arith.constant dense<0.000000e+00> : vector<4x256xf32>
    %30 = tpu.matmul %29, %26, %cst_16 {dimension_numbers = #tpu.dot_dimension_numbers<[1], [0], [0], [1], [0, 0, 1, 1], [], []>} : vector<4x36xf32>, vector<36x256xf32>, vector<4x256xf32> -> vector<4x256xf32>
    %c0_17 = arith.constant 0 : index
    %c0_18 = arith.constant 0 : index
    %c0_19 = arith.constant 0 : index
    %31 = vector.load %arg3[%c0_17, %c0_18, %c0_19] : memref<2x4x1xf32, #tpu.memory_space<vmem>>, vector<1x4x1xf32>
    %32 = vector.shape_cast %31 : vector<1x4x1xf32> to vector<4x1xf32>
    %33 = vector.broadcast %32 : vector<4x1xf32> to vector<4x256xf32>
    %34 = arith.mulf %30, %33 : vector<4x256xf32>
    %c0_20 = arith.constant 0 : index
    %c0_21 = arith.constant 0 : index
    %c0_22 = arith.constant 0 : index
    %35 = vector.load %arg4[%c0_20, %c0_21, %c0_22] : memref<2x4x1xf32, #tpu.memory_space<vmem>>, vector<1x4x1xf32>
    %36 = vector.shape_cast %35 : vector<1x4x1xf32> to vector<4x1xf32>
    %37 = vector.broadcast %36 : vector<4x1xf32> to vector<4x256xf32>
    %38 = arith.addf %34, %37 : vector<4x256xf32>
    %cst_23 = arith.constant 0.000000e+00 : f32
    %39 = vector.broadcast %cst_23 : f32 to vector<4x256xf32>
    %40 = arith.maximumf %38, %39 : vector<4x256xf32>
    %cst_24 = arith.constant 0.000000e+00 : f32
    %41 = vector.broadcast %cst_24 : f32 to vector<4x18x18xf32>
    %c0_25 = arith.constant 0 : index
    %c0_26 = arith.constant 0 : index
    %c0_27 = arith.constant 0 : index
    %42 = vector.load %arg10[%c0_25, %c0_26, %c0_27] : memref<4x18x18xf32, #tpu.memory_space<vmem>>, vector<4x18x18xf32>
    tpu.vector_store %arg10[%c0_25, %c0_26, %c0_27], %41 {strides = array<i32>} : memref<4x18x18xf32, #tpu.memory_space<vmem>>, vector<4x18x18xf32>,
    %43 = vector.shape_cast %40 : vector<4x256xf32> to vector<4x16x16xf32>
    %c0_28 = arith.constant 0 : index
    %c1_29 = arith.constant 1 : index
    %c1_30 = arith.constant 1 : index
    %44 = vector.load %arg10[%c0_28, %c1_29, %c1_30] : memref<4x18x18xf32, #tpu.memory_space<vmem>>, vector<4x16x16xf32>
    tpu.vector_store %arg10[%c0_28, %c1_29, %c1_30], %43 {strides = array<i32>} : memref<4x18x18xf32, #tpu.memory_space<vmem>>, vector<4x16x16xf32>,
    %c0_31 = arith.constant 0 : index
    %c0_32 = arith.constant 0 : index
    %c0_33 = arith.constant 0 : index
    %45 = vector.load %arg10[%c0_31, %c0_32, %c0_33] : memref<4x18x18xf32, #tpu.memory_space<vmem>>, vector<4x18x18xf32>
    %46 = vector.extract_strided_slice %45 {offsets = [0, 0, 0], sizes = [4, 16, 16], strides = [1, 1, 1]} : vector<4x18x18xf32> to vector<4x16x16xf32>
    %47 = vector.extract_strided_slice %45 {offsets = [0, 0, 1], sizes = [4, 16, 16], strides = [1, 1, 1]} : vector<4x18x18xf32> to vector<4x16x16xf32>
    %48 = vector.extract_strided_slice %45 {offsets = [0, 0, 2], sizes = [4, 16, 16], strides = [1, 1, 1]} : vector<4x18x18xf32> to vector<4x16x16xf32>
    %49 = vector.extract_strided_slice %45 {offsets = [0, 1, 0], sizes = [4, 16, 16], strides = [1, 1, 1]} : vector<4x18x18xf32> to vector<4x16x16xf32>
    %50 = vector.extract_strided_slice %45 {offsets = [0, 1, 1], sizes = [4, 16, 16], strides = [1, 1, 1]} : vector<4x18x18xf32> to vector<4x16x16xf32>
    %51 = vector.extract_strided_slice %45 {offsets = [0, 1, 2], sizes = [4, 16, 16], strides = [1, 1, 1]} : vector<4x18x18xf32> to vector<4x16x16xf32>
    %52 = vector.extract_strided_slice %45 {offsets = [0, 2, 0], sizes = [4, 16, 16], strides = [1, 1, 1]} : vector<4x18x18xf32> to vector<4x16x16xf32>
    %53 = vector.extract_strided_slice %45 {offsets = [0, 2, 1], sizes = [4, 16, 16], strides = [1, 1, 1]} : vector<4x18x18xf32> to vector<4x16x16xf32>
    %54 = vector.extract_strided_slice %45 {offsets = [0, 2, 2], sizes = [4, 16, 16], strides = [1, 1, 1]} : vector<4x18x18xf32> to vector<4x16x16xf32>
    %55 = vector.shape_cast %46 : vector<4x16x16xf32> to vector<4x256xf32>
    %56 = vector.shape_cast %47 : vector<4x16x16xf32> to vector<4x256xf32>
    %57 = vector.shape_cast %48 : vector<4x16x16xf32> to vector<4x256xf32>
    %58 = vector.shape_cast %49 : vector<4x16x16xf32> to vector<4x256xf32>
    %59 = vector.shape_cast %50 : vector<4x16x16xf32> to vector<4x256xf32>
    %60 = vector.shape_cast %51 : vector<4x16x16xf32> to vector<4x256xf32>
    %61 = vector.shape_cast %52 : vector<4x16x16xf32> to vector<4x256xf32>
    %62 = vector.shape_cast %53 : vector<4x16x16xf32> to vector<4x256xf32>
    %63 = vector.shape_cast %54 : vector<4x16x16xf32> to vector<4x256xf32>
    %64 = tpu.concatenate %55, %56, %57, %58, %59, %60, %61, %62, %63 in 0 : vector<4x256xf32>, vector<4x256xf32>, vector<4x256xf32>, vector<4x256xf32>, vector<4x256xf32>, vector<4x256xf32>, vector<4x256xf32>, vector<4x256xf32>, vector<4x256xf32> -> vector<36x256xf32>
    %c0_34 = arith.constant 0 : index
    %c0_35 = arith.constant 0 : index
    %c0_36 = arith.constant 0 : index
    %65 = vector.load %arg5[%c0_34, %c0_35, %c0_36] : memref<2x4x36xf32, #tpu.memory_space<vmem>>, vector<1x4x36xf32>
    %66 = vector.shape_cast %65 : vector<1x4x36xf32> to vector<4x36xf32>
    %cst_37 = arith.constant dense<0.000000e+00> : vector<4x256xf32>
    %67 = tpu.matmul %66, %64, %cst_37 {dimension_numbers = #tpu.dot_dimension_numbers<[1], [0], [0], [1], [0, 0, 1, 1], [], []>} : vector<4x36xf32>, vector<36x256xf32>, vector<4x256xf32> -> vector<4x256xf32>
    %c0_38 = arith.constant 0 : index
    %c0_39 = arith.constant 0 : index
    %c0_40 = arith.constant 0 : index
    %68 = vector.load %arg6[%c0_38, %c0_39, %c0_40] : memref<2x4x1xf32, #tpu.memory_space<vmem>>, vector<1x4x1xf32>
    %69 = vector.shape_cast %68 : vector<1x4x1xf32> to vector<4x1xf32>
    %70 = vector.broadcast %69 : vector<4x1xf32> to vector<4x256xf32>
    %71 = arith.mulf %67, %70 : vector<4x256xf32>
    %c0_41 = arith.constant 0 : index
    %c0_42 = arith.constant 0 : index
    %c0_43 = arith.constant 0 : index
    %72 = vector.load %arg7[%c0_41, %c0_42, %c0_43] : memref<2x4x1xf32, #tpu.memory_space<vmem>>, vector<1x4x1xf32>
    %73 = vector.shape_cast %72 : vector<1x4x1xf32> to vector<4x1xf32>
    %74 = vector.broadcast %73 : vector<4x1xf32> to vector<4x256xf32>
    %75 = arith.addf %71, %74 : vector<4x256xf32>
    %76 = arith.addf %27, %75 : vector<4x256xf32>
    %c1_44 = arith.constant 1 : index
    %c0_45 = arith.constant 0 : index
    %c0_46 = arith.constant 0 : index
    %77 = vector.load %arg2[%c1_44, %c0_45, %c0_46] : memref<2x4x36xf32, #tpu.memory_space<vmem>>, vector<1x4x36xf32>
    %78 = vector.shape_cast %77 : vector<1x4x36xf32> to vector<4x36xf32>
    %cst_47 = arith.constant dense<0.000000e+00> : vector<4x256xf32>
    %79 = tpu.matmul %78, %26, %cst_47 {dimension_numbers = #tpu.dot_dimension_numbers<[1], [0], [0], [1], [0, 0, 1, 1], [], []>} : vector<4x36xf32>, vector<36x256xf32>, vector<4x256xf32> -> vector<4x256xf32>
    %c1_48 = arith.constant 1 : index
    %c0_49 = arith.constant 0 : index
    %c0_50 = arith.constant 0 : index
    %80 = vector.load %arg3[%c1_48, %c0_49, %c0_50] : memref<2x4x1xf32, #tpu.memory_space<vmem>>, vector<1x4x1xf32>
    %81 = vector.shape_cast %80 : vector<1x4x1xf32> to vector<4x1xf32>
    %82 = vector.broadcast %81 : vector<4x1xf32> to vector<4x256xf32>
    %83 = arith.mulf %79, %82 : vector<4x256xf32>
    %c1_51 = arith.constant 1 : index
    %c0_52 = arith.constant 0 : index
    %c0_53 = arith.constant 0 : index
    %84 = vector.load %arg4[%c1_51, %c0_52, %c0_53] : memref<2x4x1xf32, #tpu.memory_space<vmem>>, vector<1x4x1xf32>
    %85 = vector.shape_cast %84 : vector<1x4x1xf32> to vector<4x1xf32>
    %86 = vector.broadcast %85 : vector<4x1xf32> to vector<4x256xf32>
    %87 = arith.addf %83, %86 : vector<4x256xf32>
    %cst_54 = arith.constant 0.000000e+00 : f32
    %88 = vector.broadcast %cst_54 : f32 to vector<4x256xf32>
    %89 = arith.maximumf %87, %88 : vector<4x256xf32>
    %cst_55 = arith.constant 0.000000e+00 : f32
    %90 = vector.broadcast %cst_55 : f32 to vector<4x18x18xf32>
    %c0_56 = arith.constant 0 : index
    %c0_57 = arith.constant 0 : index
    %c0_58 = arith.constant 0 : index
    %91 = vector.load %arg10[%c0_56, %c0_57, %c0_58] : memref<4x18x18xf32, #tpu.memory_space<vmem>>, vector<4x18x18xf32>
    tpu.vector_store %arg10[%c0_56, %c0_57, %c0_58], %90 {strides = array<i32>} : memref<4x18x18xf32, #tpu.memory_space<vmem>>, vector<4x18x18xf32>,
    %92 = vector.shape_cast %89 : vector<4x256xf32> to vector<4x16x16xf32>
    %c0_59 = arith.constant 0 : index
    %c1_60 = arith.constant 1 : index
    %c1_61 = arith.constant 1 : index
    %93 = vector.load %arg10[%c0_59, %c1_60, %c1_61] : memref<4x18x18xf32, #tpu.memory_space<vmem>>, vector<4x16x16xf32>
    tpu.vector_store %arg10[%c0_59, %c1_60, %c1_61], %92 {strides = array<i32>} : memref<4x18x18xf32, #tpu.memory_space<vmem>>, vector<4x16x16xf32>,
    %c0_62 = arith.constant 0 : index
    %c0_63 = arith.constant 0 : index
    %c0_64 = arith.constant 0 : index
    %94 = vector.load %arg10[%c0_62, %c0_63, %c0_64] : memref<4x18x18xf32, #tpu.memory_space<vmem>>, vector<4x18x18xf32>
    %95 = vector.extract_strided_slice %94 {offsets = [0, 0, 0], sizes = [4, 16, 16], strides = [1, 1, 1]} : vector<4x18x18xf32> to vector<4x16x16xf32>
    %96 = vector.extract_strided_slice %94 {offsets = [0, 0, 1], sizes = [4, 16, 16], strides = [1, 1, 1]} : vector<4x18x18xf32> to vector<4x16x16xf32>
    %97 = vector.extract_strided_slice %94 {offsets = [0, 0, 2], sizes = [4, 16, 16], strides = [1, 1, 1]} : vector<4x18x18xf32> to vector<4x16x16xf32>
    %98 = vector.extract_strided_slice %94 {offsets = [0, 1, 0], sizes = [4, 16, 16], strides = [1, 1, 1]} : vector<4x18x18xf32> to vector<4x16x16xf32>
    %99 = vector.extract_strided_slice %94 {offsets = [0, 1, 1], sizes = [4, 16, 16], strides = [1, 1, 1]} : vector<4x18x18xf32> to vector<4x16x16xf32>
    %100 = vector.extract_strided_slice %94 {offsets = [0, 1, 2], sizes = [4, 16, 16], strides = [1, 1, 1]} : vector<4x18x18xf32> to vector<4x16x16xf32>
    %101 = vector.extract_strided_slice %94 {offsets = [0, 2, 0], sizes = [4, 16, 16], strides = [1, 1, 1]} : vector<4x18x18xf32> to vector<4x16x16xf32>
    %102 = vector.extract_strided_slice %94 {offsets = [0, 2, 1], sizes = [4, 16, 16], strides = [1, 1, 1]} : vector<4x18x18xf32> to vector<4x16x16xf32>
    %103 = vector.extract_strided_slice %94 {offsets = [0, 2, 2], sizes = [4, 16, 16], strides = [1, 1, 1]} : vector<4x18x18xf32> to vector<4x16x16xf32>
    %104 = vector.shape_cast %95 : vector<4x16x16xf32> to vector<4x256xf32>
    %105 = vector.shape_cast %96 : vector<4x16x16xf32> to vector<4x256xf32>
    %106 = vector.shape_cast %97 : vector<4x16x16xf32> to vector<4x256xf32>
    %107 = vector.shape_cast %98 : vector<4x16x16xf32> to vector<4x256xf32>
    %108 = vector.shape_cast %99 : vector<4x16x16xf32> to vector<4x256xf32>
    %109 = vector.shape_cast %100 : vector<4x16x16xf32> to vector<4x256xf32>
    %110 = vector.shape_cast %101 : vector<4x16x16xf32> to vector<4x256xf32>
    %111 = vector.shape_cast %102 : vector<4x16x16xf32> to vector<4x256xf32>
    %112 = vector.shape_cast %103 : vector<4x16x16xf32> to vector<4x256xf32>
    %113 = tpu.concatenate %104, %105, %106, %107, %108, %109, %110, %111, %112 in 0 : vector<4x256xf32>, vector<4x256xf32>, vector<4x256xf32>, vector<4x256xf32>, vector<4x256xf32>, vector<4x256xf32>, vector<4x256xf32>, vector<4x256xf32>, vector<4x256xf32> -> vector<36x256xf32>
    %c1_65 = arith.constant 1 : index
    %c0_66 = arith.constant 0 : index
    %c0_67 = arith.constant 0 : index
    %114 = vector.load %arg5[%c1_65, %c0_66, %c0_67] : memref<2x4x36xf32, #tpu.memory_space<vmem>>, vector<1x4x36xf32>
    %115 = vector.shape_cast %114 : vector<1x4x36xf32> to vector<4x36xf32>
    %cst_68 = arith.constant dense<0.000000e+00> : vector<4x256xf32>
    %116 = tpu.matmul %115, %113, %cst_68 {dimension_numbers = #tpu.dot_dimension_numbers<[1], [0], [0], [1], [0, 0, 1, 1], [], []>} : vector<4x36xf32>, vector<36x256xf32>, vector<4x256xf32> -> vector<4x256xf32>
    %c1_69 = arith.constant 1 : index
    %c0_70 = arith.constant 0 : index
    %c0_71 = arith.constant 0 : index
    %117 = vector.load %arg6[%c1_69, %c0_70, %c0_71] : memref<2x4x1xf32, #tpu.memory_space<vmem>>, vector<1x4x1xf32>
    %118 = vector.shape_cast %117 : vector<1x4x1xf32> to vector<4x1xf32>
    %119 = vector.broadcast %118 : vector<4x1xf32> to vector<4x256xf32>
    %120 = arith.mulf %116, %119 : vector<4x256xf32>
    %c1_72 = arith.constant 1 : index
    %c0_73 = arith.constant 0 : index
    %c0_74 = arith.constant 0 : index
    %121 = vector.load %arg7[%c1_72, %c0_73, %c0_74] : memref<2x4x1xf32, #tpu.memory_space<vmem>>, vector<1x4x1xf32>
    %122 = vector.shape_cast %121 : vector<1x4x1xf32> to vector<4x1xf32>
    %123 = vector.broadcast %122 : vector<4x1xf32> to vector<4x256xf32>
    %124 = arith.addf %120, %123 : vector<4x256xf32>
    %125 = arith.addf %76, %124 : vector<4x256xf32>
    %cst_75 = arith.constant 5.000000e-01 : f32
    %126 = vector.broadcast %cst_75 : f32 to vector<4x256xf32>
    %127 = arith.mulf %126, %125 : vector<4x256xf32>
    %128 = vector.shape_cast %1 : vector<4x16x16xf32> to vector<4x256xf32>
    %129 = arith.addf %127, %128 : vector<4x256xf32>
    %c0_76 = arith.constant 0 : index
    %c0_77 = arith.constant 0 : index
    %c0_78 = arith.constant 0 : index
    %130 = vector.load %arg8[%c0_76, %c0_77, %c0_78] : memref<1x4x256xf32, #tpu.memory_space<vmem>>, vector<1x4x256xf32>
    %131 = vector.shape_cast %130 : vector<1x4x256xf32> to vector<4x256xf32>
    %132 = vector.shape_cast %129 : vector<4x256xf32> to vector<1x4x256xf32>
    tpu.vector_store %arg8[%c0_76, %c0_77, %c0_78], %132 {strides = array<i32>} : memref<1x4x256xf32, #tpu.memory_space<vmem>>, vector<1x4x256xf32>,
    return
  }
  func.func @transform_0(%arg0: i32) -> (i32, i32, i32, i32) {
    %c0_i32 = arith.constant 0 : i32
    %c0_i32_0 = arith.constant 0 : i32
    %c0_i32_1 = arith.constant 0 : i32
    %c0_i32_2 = arith.constant 0 : i32
    return %arg0, %c0_i32, %c0_i32_0, %c0_i32_1 : i32, i32, i32, i32
  }
  func.func @transform_1(%arg0: i32) -> (i32, i32, i32) {
    %c0_i32 = arith.constant 0 : i32
    %c0_i32_0 = arith.constant 0 : i32
    %c0_i32_1 = arith.constant 0 : i32
    %c0_i32_2 = arith.constant 0 : i32
    return %c0_i32, %c0_i32_0, %c0_i32_1 : i32, i32, i32
  }
  func.func @transform_2(%arg0: i32) -> (i32, i32, i32) {
    %c0_i32 = arith.constant 0 : i32
    %c0_i32_0 = arith.constant 0 : i32
    %c0_i32_1 = arith.constant 0 : i32
    %c0_i32_2 = arith.constant 0 : i32
    return %c0_i32, %c0_i32_0, %c0_i32_1 : i32, i32, i32
  }
  func.func @transform_3(%arg0: i32) -> (i32, i32, i32) {
    %c0_i32 = arith.constant 0 : i32
    %c0_i32_0 = arith.constant 0 : i32
    %c0_i32_1 = arith.constant 0 : i32
    %c0_i32_2 = arith.constant 0 : i32
    return %c0_i32, %c0_i32_0, %c0_i32_1 : i32, i32, i32
  }
  func.func @transform_4(%arg0: i32) -> (i32, i32, i32) {
    %c0_i32 = arith.constant 0 : i32
    %c0_i32_0 = arith.constant 0 : i32
    %c0_i32_1 = arith.constant 0 : i32
    %c0_i32_2 = arith.constant 0 : i32
    return %c0_i32, %c0_i32_0, %c0_i32_1 : i32, i32, i32
  }
  func.func @transform_5(%arg0: i32) -> (i32, i32, i32) {
    %c0_i32 = arith.constant 0 : i32
    %c0_i32_0 = arith.constant 0 : i32
    %c0_i32_1 = arith.constant 0 : i32
    %c0_i32_2 = arith.constant 0 : i32
    return %c0_i32, %c0_i32_0, %c0_i32_1 : i32, i32, i32
  }
  func.func @transform_6(%arg0: i32) -> (i32, i32, i32) {
    %c0_i32 = arith.constant 0 : i32
    %c0_i32_0 = arith.constant 0 : i32
    %c0_i32_1 = arith.constant 0 : i32
    %c0_i32_2 = arith.constant 0 : i32
    return %c0_i32, %c0_i32_0, %c0_i32_1 : i32, i32, i32
  }
  func.func @transform_7(%arg0: i32) -> (i32, i32, i32) {
    %c0_i32 = arith.constant 0 : i32
    %c0_i32_0 = arith.constant 0 : i32
    %c0_i32_1 = arith.constant 0 : i32
    return %arg0, %c0_i32, %c0_i32_0 : i32, i32, i32
  }
}

</mosaic_0001>

<bundles_post_ra>
// kernel: tpu_custom_call.1
= control target key start
LH: loop header
LB: loop body
LE: loop exit
PB: predicated region body
PF: predicated region fallthrough
CT: control target
= control target key end

     0   :  { %12 = vsyncpa [#allocation5], 0  ;;  %s14793_s0 = inlined_call_operand.hbm [shape: f32[2,4,16,16], index: 0, kind: input, shape index: {}]   ;;  %s14794_s1 = inlined_call_operand.vmem [shape: f32[2,4,36], index: 1, kind: input, shape index: {}]   ;;  %s14795_s2 = inlined_call_operand.vmem [shape: f32[2,4,1], index: 2, kind: input, shape index: {}]   ;;  %s14796_s3 = inlined_call_operand.vmem [shape: f32[2,4,1], index: 3, kind: input, shape index: {}]   ;;  %s14797_s4 = inlined_call_operand.vmem [shape: f32[2,4,36], index: 4, kind: input, shape index: {}]   ;;  %s14798_s5 = inlined_call_operand.vmem [shape: f32[2,4,1], index: 5, kind: input, shape index: {}]   ;;  %s14799_s6 = inlined_call_operand.vmem [shape: f32[2,4,1], index: 6, kind: input, shape index: {}]   ;;  %s14800_s7 = inlined_call_operand.hbm [shape: f32[2,4,256], index: 7, kind: output, shape index: {}]  }
   0x1   :  { %14 = vsyncpa [#allocation5 + $0x1], 0 }
   0x2   :  { %15 = vsyncpa [#allocation6], 0 }
   0x3   :  { %17 = vsyncpa [#allocation6 + $0x1], 0  ;;  %s8398_s24 = smov 0   ;;  %s8400_s25 = smov 0  }
   0x4   :  { %s8402_s26 = smov 0   ;;  %s8404_s27 = smov 0  }
   0x5 LB: > { %s8419_s28 = sadd.s32 4294967295, %s8340_s27   ;;  %s7031_s29 = sadd.s32 4294967294, %s8340_s27   ;;  %s8340_s27 = sphi %s8404_s27, %s15832_s27   ;;  %s8336_s26 = sphi %s8402_s26, %s15831_s26   ;;  %s8332_s25 = sphi %s8400_s25, %s15830_s25   ;;  %s8328_s24 = sphi %s8398_s24, %s15829_s24  }
   0x6   : > { %s8423_s30 = sadd.s32 1, %s8340_s27   ;;  %s30_s8 = sadd.s32 1, %s8336_s26 }
   0x7   : > { %s27_s9 = ssub.s32 %s8340_s27, %s8423_s30  ;;  %p37_p0 = scmp.ne.s32.totalorder %s8336_s26, %s8332_s25 }
   0x8   : > { %p28_p1 = scmp.eq.s32.totalorder %s27_s9, 0  ;;  %p38_p2 = scmp.eq.s32.totalorder %s8340_s27, 0 }
   0x9   : > { %p43_p3 = scmp.ne.s32.totalorder %s8332_s25, %s8328_s24  ;;  %p44_p4 = scmp.eq.s32.totalorder %s8419_s28, 0 }
   0xa   : > { %s8435_s10 = scalar_select %p28_p1, %s8336_s26, %s30_s8  }
   0xb   : > { %p8437_p5 = por %p38_p2, %p37_p0  ;;  %p8441_p6 = por %p44_p4, %p43_p3 }
   0xc   : > { %15045 = sst [smem:[#allocation10_spill]] %s8435_s10  ;;  %p193_p7 = scmp.eq.s32.totalorder %s8419_s28, 1 }
   0xd   : > { %p199_p8 = scmp.eq.s32.totalorder %s7031_s29, 1  ;;  %p7081_p10 = scmp.lt.s32.totalorder %s8340_s27, 2 }
   0xe   : > { %p8448_p11 = por %p193_p7, %p37_p0  ;;  %s237_s15 = sand.u32 1, %s8336_s26  }
   0xf   : > { %p8452_p12 = por %p199_p8, %p43_p3  ;;  %s7067_s16 = sshll.u32 %s8340_s27, 6 }
  0x10   : > { %s7034_s17 = sshll.u32 %s237_s15, 6  ;;  %s246_s20 = scalar_lea.hbm %s14793_s0, %s7067_s16 }
  0x11   : > { %s247_s21 = sshll.u32 %s246_s20, 4  ;;  %s241_s22 = scalar_lea.vmem [#allocation4], %s7034_s17  ;;  %s248_s21 = int_to_ptr.hbm [resolvable:$true] %s247_s21 }
  0x12   : > { %s249_s23 = sshll.u32 %s241_s22, 4  ;;  %p8463_p13 = pnand %p7081_p10, %p8437_p5  ;;  %s250_s23 = int_to_ptr.vmem [resolvable:$true] %s249_s23 }
  0x13   : > { %p7037_p0 = scmp.ge.s32.totalorder %s8340_s27, 1  ;;  %p257_p1 = scmp.lt.s32.totalorder %s8340_s27, 3 }
  0x14   : > { %s238_s8 = scalar_lea.sflag [#allocation5], %s237_s15  ;;  %s8244_s9 = sshra.s32 %s248_s21, 4  ;;  %s8245_s9 = int_to_ptr.hbm [resolvable:$true] %s8244_s9 }
  0x15   : > { %s8246_s10 = scalar_lea.hbm %s8245_s9, 64  ;;  %p8248_p3 = pneg %p8463_p13 }
  0x16   : > { %p8247_p2 = scmp.ne.s32.totalorder %s8245_s9, %s8246_s10  ;;  %s8251_s11 = scalar_lea.hbm %s14793_s0, 128 }
  0x17   : > { %p8252_p5 = scmp.lt.s32.totalorder %s8245_s9, %s14793_s0  ;;  %p8253_p8 = scmp.lt.s32.totalorder %s8251_s11, %s8246_s10 }
  0x18   : > { %p8249_p4 = pnand %p8248_p3, %p8247_p2 }
  0x19   : > { %p8254_p10 = por %p8253_p8, %p8252_p5 }
  0x1a   : > { %p8250_p7 = pneg %p8249_p4 }
  0x1c   : > { %p8255_p9 = pnand %p8254_p10, %p8250_p7 }
  0x1e   : > { %8258 = shalt.err (!%p8255_p9)
}
  0x1f   : > { %s8342_s15 = smov 128   ;;  %s8343_s20 = smov 8  }
  0x20   : > { %7076 = dma.hbm_to_vmem [thread:$0]  (!%p8463_p13), %s248_s21, 1024, %s250_s23, %s238_s8, %s8342_s15, %s8342_s15, %s8343_s20  }
  0x21   : > { %p258_p2 = pnand %p7037_p0, %p257_p1 }
  0x23   : > { %261 = sbr.rel (%p258_p2) target bundleno = 1854 (0x73e), region = 48 }
  0x28   : > { %s8484_s22 = sand.u32 1, %s8332_s25  }
  0x29   : > { %s7038_s10 = sshll.u32 %s8484_s22, 6  ;;  %s264_s9 = scalar_lea.sflag [#allocation5], %s8484_s22 }
  0x2a   : > { %s8488_s16 = scalar_lea.vmem [#allocation4], %s7038_s10 }
  0x2b   : > { %8319 = dma.done.wait (%p8441_p6), %s264_s9, 1024  }
  0x2c   : > { %8321 = vsyncadd (%p8441_p6), %s264_s9, 4294966272  ;;  %vm307_vm0 = vcmask 146432   ;;  %v14801_v0 = vmov 0.0   ;;  %v301_v1 = vld [vmem:[%s8488_s16 + $0x10] sm:$0xff]  ;;  %v299_v3 = vld [vmem:[%s8488_s16] sm:$0xff]  ;;  %vm383_vm1 = vcmask 1047556  }
  0x2d   : > { %315 = vst.msk [vmem:[#allocation2 + $0x30] sm:$0xff] %vm307_vm0, %v14801_v0  ;;  %v305_v2 = vld [vmem:[%s8488_s16 + $0x30] sm:$0xff]  ;;  %v323_v4 = vmax.f32 %v301_v1, 0.0  ;;  %v6768_v6 = vrot.slane %v301_v1, 4  ;;  %v321_v7 = vmax.f32 %v299_v3, 0.0  ;;  %v302_v8 = vld [vmem:[%s8488_s16 + $0x18] sm:$0xff] }
  0x2e   : > { %316 = vst.msk [vmem:[#allocation2 + $0x38] sm:$0xff] %vm307_vm0, %v14801_v0  ;;  %v6766_v5 = vrot.slane %v305_v2, 4  ;;  %v6756_v9 = vrot.slane %v299_v3, 4  ;;  %v6824_v10 = vrot.slane %v302_v8, 4  ;;  %v303_v11 = vld [vmem:[%s8488_s16 + $0x20] sm:$0xff]  ;;  %s8345_s12 = smov 1  }
  0x2f   : > { %308 = vst.msk [vmem:[#allocation2] sm:$0xff] %vm307_vm0, %v14801_v0  ;;  %v8515_v13 = vsel %vm383_vm1, %v305_v2, %v6768_v6  ;;  %341 = vrot.lane.b32.xlu1 %v323_v4, %s8345_s12  ;;  %337 = vrot.lane.b32.xlu0 %v321_v7, %s8345_s12  ;;  %v300_v14 = vld [vmem:[%s8488_s16 + $0x8] sm:$0xff]  ;;  %v325_v15 = vmax.f32 %v303_v11, 0.0  ;;  %v6754_v17 = vrot.slane %v303_v11, 4  ;;  %v306_v19 = vld [vmem:[%s8488_s16 + $0x38] sm:$0xff]  ;;  %v324_v24 = vmax.f32 %v302_v8, 0.0 }
  0x30   : > { %309 = vst.msk [vmem:[#allocation2 + $0x8] sm:$0xff] %vm307_vm0, %v14801_v0  ;;  %v8512_v12 = vsel %vm383_vm1, %v6766_v5, %v301_v1  ;;  %v6812_v16 = vrot.slane %v300_v14, 4  ;;  %v8523_v18 = vsel %vm383_vm1, %v303_v11, %v6756_v9  ;;  %v6822_v20 = vrot.slane %v306_v19, 4  ;;  %v304_v23 = vld [vmem:[%s8488_s16 + $0x28] sm:$0xff]  ;;  %s8346_s21 = smov 127   ;;  %s8348_s23 = smov 126  }
  0x31   : > { %312 = vst.msk [vmem:[#allocation2 + $0x18] sm:$0xff] %vm307_vm0, %v14801_v0  ;;  %345 = vrot.lane.b32.xlu2 %v325_v15, %s8345_s12  ;;  %v8530_v21 = vsel %vm383_vm1, %v306_v19, %v6824_v10  ;;  %v8535_v22 = vsel %vm383_vm1, %v6754_v17, %v299_v3  ;;  %v322_v25 = vmax.f32 %v300_v14, 0.0  ;;  %v6810_v27 = vrot.slane %v304_v23, 4  ;;  %s8350_s29 = smov 64   ;;  %s8351_s8 = smov 96  }
  0x32   : > { %313 = vst.msk [vmem:[#allocation2 + $0x20] sm:$0xff] %vm307_vm0, %v14801_v0  ;;  %v8541_v26 = vsel %vm383_vm1, %v6822_v20, %v302_v8  ;;  %v8546_v28 = vsel %vm383_vm1, %v304_v23, %v6812_v16  ;;  %v326_v29 = vmax.f32 %v304_v23, 0.0  ;;  %v328_v31 = vmax.f32 %v306_v19, 0.0  ;;  %s8352_s17 = smov 32   ;;  %s8353_s11 = smov 16  }
  0x33   : > { %15051 = vst [vmem:[#allocation11_spill] sm:$0xff] %v8512_v12  ;;  %v8553_v30 = vsel %vm383_vm1, %v6810_v27, %v300_v14  ;;  %v327_v32 = vmax.f32 %v305_v2, 0.0  ;;  %vm310_vm2 = vcmask 140288   ;;  %vm361_vm3 = vcmask 138248   ;;  %s8354_s18 = smov 48   ;;  %s8355_s19 = smov 80  }
  0x34   : > { %15052 = vst [vmem:[#allocation12_spill] sm:$0xff] %v8515_v13  ;;  %v8347_v46 = vmov 1983009808   ;;  %vm996_vm4 = vcmask 1046528   ;;  %vm1619_vm5 = vcmask 1045504   ;;  %s8356_s15 = smov 112  }
  0x35   : > { %318 = vst.msk [vmem:[#allocation2 + $0x48] sm:$0xff] %vm307_vm0, %v14801_v0  ;;  %v388_v47 = vunpack.c.l.s4 %v8347_v46  ;;  %v8349_v8 = vmov 1934713408   ;;  %vm551_vm6 = vcmask 130048   ;;  %vm553_vm7 = vcmask 261120  }
  0x36   : > { %15053 = vst [vmem:[#allocation13_spill] sm:$0xff] %v8523_v18  ;;  %v412_v9 = vunpack.c.l.s4 %v8349_v8  ;;  %vm555_vm8 = vcmask 392192   ;;  %vm557_vm9 = vcmask 523264   ;;  %vm559_vm10 = vcmask 654336  }
  0x37   : > { %319 = vst.msk [vmem:[#allocation2 + $0x50] sm:$0xff] %vm307_vm0, %v14801_v0  ;;  %343 = vrot.lane.b32.xlu1 %v324_v24, %s8345_s12  ;;  %339 = vrot.lane.b32.xlu0 %v322_v25, %s8345_s12  ;;  %v8623_v59 = vunpack.c.0.s8 %v388_v47  ;;  %vm561_vm11 = vcmask 785408   ;;  %vm563_vm12 = vcmask 916480   ;;  %vm2266_vm13 = vcmask 1043456  }
  0x38   : > { %15054 = vst [vmem:[#allocation14_spill] sm:$0xff] %v8530_v21  ;;  %vm2276_vm14 = vcmask 293888  }
  0x39   : > { %2344 = vst.msk [vmem:[#allocation3] sm:$0xff] %vm307_vm0, %v14801_v0  ;;  %347 = vrot.lane.b32.xlu2 %v326_v29, %s8345_s12 }
  0x3a   : > { %15055 = vst [vmem:[#allocation15_spill] sm:$0xff] %v8535_v22 }
  0x3b   : > { %2345 = vst.msk [vmem:[#allocation3 + $0x8] sm:$0xff] %vm307_vm0, %v14801_v0 }
  0x3c   : > { %15056 = vst [vmem:[#allocation16_spill] sm:$0xff] %v8541_v26 }
  0x3d   : > { %2347 = vst.msk [vmem:[#allocation3 + $0x18] sm:$0xff] %vm307_vm0, %v14801_v0 }
  0x3e   : > { %15057 = vst [vmem:[#allocation17_spill] sm:$0xff] %v8546_v28 }
  0x3f   : > { %2348 = vst.msk [vmem:[#allocation3 + $0x20] sm:$0xff] %vm307_vm0, %v14801_v0  ;;  %351 = vrot.lane.b32.xlu1 %v328_v31, %s8345_s12  ;;  %349 = vrot.lane.b32.xlu0 %v327_v32, %s8345_s12 }
  0x40   : > { %2350 = vst.msk [vmem:[#allocation3 + $0x30] sm:$0xff] %vm307_vm0, %v14801_v0 }
  0x41   : > { %15058 = vst [vmem:[#allocation18_spill] sm:$0xff] %v8553_v30 }
  0x42   : > { %2351 = vst.msk [vmem:[#allocation3 + $0x38] sm:$0xff] %vm307_vm0, %v14801_v0 }
  0x43   : > { %2353 = vst.msk [vmem:[#allocation3 + $0x48] sm:$0xff] %vm307_vm0, %v14801_v0 }
  0x44   : > { %2354 = vst.msk [vmem:[#allocation3 + $0x50] sm:$0xff] %vm307_vm0, %v14801_v0 }
  0x45   : > { %317 = vst.msk [vmem:[#allocation2 + $0x40] sm:$0x3] %vm310_vm2, %v14801_v0 }
  0x46   : > { %311 = vst.msk [vmem:[#allocation2 + $0x10] sm:$0x3] %vm310_vm2, %v14801_v0 }
  0x47   : > { %314 = vst.msk [vmem:[#allocation2 + $0x28] sm:$0x3] %vm310_vm2, %v14801_v0 }
  0x48   : > { %320 = vst.msk [vmem:[#allocation2 + $0x58] sm:$0x3] %vm310_vm2, %v14801_v0 }
  0x49   : > { %2346 = vst.msk [vmem:[#allocation3 + $0x10] sm:$0x3] %vm310_vm2, %v14801_v0 }
  0x4a   : > { %2349 = vst.msk [vmem:[#allocation3 + $0x28] sm:$0x3] %vm310_vm2, %v14801_v0 }
  0x4b   : > { %2352 = vst.msk [vmem:[#allocation3 + $0x40] sm:$0x3] %vm310_vm2, %v14801_v0 }
  0x4c   : > { %2355 = vst.msk [vmem:[#allocation3 + $0x58] sm:$0x3] %vm310_vm2, %v14801_v0 }
  0x4d   : > { %15059 = vst [vmem:[#allocation19_spill] sm:$0xff] %v8623_v59 }
  0x8b   : > { %v346_v33 = vpop.permute.xlu2 %345 }
  0x8c   : > { %366 = vst.msk [vmem:[#allocation2 + $0x31] sm:$0xff] %vm361_vm3, %v346_v33 }
  0x93   : > { %v348_v34 = vpop.permute.xlu2 %347  ;;  %v8584_v35 = vld [vmem:[#allocation2 + $0x30] sm:$0xff] }
  0x94   : > { %367 = vst.msk [vmem:[#allocation2 + $0x39] sm:$0xff] %vm361_vm3, %v348_v34  ;;  %v1007_v52 = vrot.slane %v8584_v35, 1  ;;  %v382_v56 = vrot.slane %v8584_v35, 4  ;;  %v1630_v62 = vrot.slane %v8584_v35, 2 }
  0x9b   : > { %v8586_v36 = vld [vmem:[#allocation2 + $0x38] sm:$0xff]  ;;  %v378_v42 = vld [vmem:[#allocation2 + $0x40] sm:$0x3] }
  0x9c   : > { %v8590_v37 = vpack.i.bf16 %v8586_v36, %v8584_v35  ;;  %v1008_v44 = vrot.slane %v8586_v36, 1  ;;  %v1010_v45 = vrot.slane %v378_v42, 1  ;;  %v1631_v63 = vrot.slane %v8586_v36, 2 }
  0x9d   : > { %v1633_v5 = vrot.slane %v378_v42, 2  ;;  %v439_v29 = vrot.slane %v8586_v36, 4 }
  0x9e   : > { %7142 = vrot.lane.b32.xlu2 %v8590_v37, %s8346_s21  ;;  %v8621_v58 = vsel %vm996_vm4, %v1008_v44, %v1010_v45  ;;  %v8628_v60 = vsel %vm996_vm4, %v1007_v52, %v1008_v44  ;;  %v8660_v24 = vsel %vm1619_vm5, %v1630_v62, %v1631_v63 }
  0x9f   : > { %v1081_v3 = vrot.slane %v8621_v58, 4  ;;  %v8643_v6 = vpack.i.bf16 %v8621_v58, %v8628_v60  ;;  %v1025_v7 = vrot.slane %v8628_v60, 4  ;;  %v8665_v27 = vsel %vm1619_vm5, %v1631_v63, %v1633_v5 }
  0xa1   : > { %v342_v38 = vpop.permute.xlu1 %341  ;;  %v338_v39 = vpop.permute.xlu0 %337 }
  0xa2   : > { %364 = vst.msk [vmem:[#allocation2 + $0x19] sm:$0xff] %vm361_vm3, %v342_v38 }
  0xa3   : > { %362 = vst.msk [vmem:[#allocation2 + $0x1] sm:$0xff] %vm361_vm3, %v338_v39 }
  0xa9   : > { %v344_v40 = vpop.permute.xlu1 %343  ;;  %v340_v41 = vpop.permute.xlu0 %339  ;;  %v8601_v50 = vld [vmem:[#allocation2 + $0x18] sm:$0xff] }
  0xaa   : > { %365 = vst.msk [vmem:[#allocation2 + $0x21] sm:$0xff] %vm361_vm3, %v344_v40  ;;  %v8598_v43 = vld [vmem:[#allocation2] sm:$0xff]  ;;  %v1002_v31 = vrot.slane %v8601_v50, 1  ;;  %v1625_v33 = vrot.slane %v8601_v50, 2  ;;  %v397_v34 = vrot.slane %v8601_v50, 4 }
  0xab   : > { %363 = vst.msk [vmem:[#allocation2 + $0x9] sm:$0xff] %vm361_vm3, %v340_v41  ;;  %v385_v55 = vrot.slane %v8598_v43, 4  ;;  %v384_v2 = vsel %vm383_vm1, %v382_v56, %v8598_v43  ;;  %v997_v19 = vrot.slane %v8598_v43, 1  ;;  %v1620_v39 = vrot.slane %v8598_v43, 2 }
  0xac   : > { %v8650_v15 = vperm.slane %v384_v2, %v8623_v59 }
  0xad   : > { %v386_v1 = vsel %vm383_vm1, %v8584_v35, %v385_v55  ;;  %v8675_v35 = vunpack.c.0.s8 %v412_v9 }
  0xae   : > { %v394_v14 = vperm.slane %v386_v1, %v8623_v59  ;;  %v409_v40 = vrot.slane %v8650_v15, 4 }
  0xaf   : > { %15060 = vst [vmem:[#allocation20_spill] sm:$0xff] %v8675_v35 }
  0xb1   : > { %v352_v48 = vpop.permute.xlu1 %351  ;;  %v350_v49 = vpop.permute.xlu0 %349  ;;  %v8603_v51 = vld [vmem:[#allocation2 + $0x20] sm:$0xff]  ;;  %v8630_v61 = vld [vmem:[#allocation2 + $0x28] sm:$0x3] }
  0xb2   : > { %369 = vst.msk [vmem:[#allocation2 + $0x51] sm:$0xff] %vm361_vm3, %v352_v48  ;;  %v8609_v53 = vpack.i.bf16 %v8603_v51, %v8601_v50  ;;  %v8611_v54 = vld [vmem:[#allocation2 + $0x8] sm:$0xff]  ;;  %v8639_v4 = vld [vmem:[#allocation2 + $0x10] sm:$0x3]  ;;  %v1003_v10 = vrot.slane %v8603_v51, 1  ;;  %v1005_v11 = vrot.slane %v8630_v61, 1 }
  0xb3   : > { %368 = vst.msk [vmem:[#allocation2 + $0x49] sm:$0xff] %vm361_vm3, %v350_v49  ;;  %v7151_v57 = vpack.i.bf16 %v8611_v54, %v8598_v43  ;;  %v998_v20 = vrot.slane %v8611_v54, 1  ;;  %v1000_v23 = vrot.slane %v8639_v4, 1  ;;  %v1621_v55 = vrot.slane %v8611_v54, 2 }
  0xb4   : > { %7137 = vrot.lane.b32.xlu1 %v8609_v53, %s8346_s21  ;;  %v8680_v38 = vsel %vm996_vm4, %v1003_v10, %v1005_v11  ;;  %v8691_v44 = vsel %vm996_vm4, %v1002_v31, %v1003_v10  ;;  %v441_v1 = vrot.slane %v8611_v54, 4 }
  0xb5   : > { %7152 = vrot.lane.b32.xlu2 %v7151_v57, %s8348_s23  ;;  %7132 = vrot.lane.b32.xlu0 %v7151_v57, %s8346_s21  ;;  %v8685_v41 = vsel %vm996_vm4, %v997_v19, %v998_v20  ;;  %v8688_v42 = vsel %vm996_vm4, %v998_v20, %v1000_v23  ;;  %v1095_v52 = vrot.slane %v8680_v38, 4  ;;  %v8707_v62 = vpack.i.bf16 %v8680_v38, %v8691_v44 }
  0xb6   : > { %v1082_v46 = vsel %vm383_vm1, %v1081_v3, %v8688_v42  ;;  %v7171_v57 = vpack.i.bf16 %v8688_v42, %v8685_v41  ;;  %v1083_v2 = vrot.slane %v8688_v42, 4  ;;  %v1026_v5 = vsel %vm383_vm1, %v1025_v7, %v8685_v41 }
  0xb7   : > { %v8713_v3 = vperm.slane %v1082_v46, %v8623_v59  ;;  %v1027_v8 = vrot.slane %v8685_v41, 4  ;;  %v442_v19 = vsel %vm383_vm1, %v8586_v36, %v441_v1  ;;  %v453_v23 = vrot.slane %v8603_v51, 4 }
  0xb8   : > { %v450_v20 = vperm.slane %v442_v19, %v8623_v59 }
  0xb9   : > { %v8671_v32 = vld [vmem:[#allocation2 + $0x58] sm:$0x3] }
  0xba   : > { %v8652_v16 = vld [vmem:[#allocation2 + $0x48] sm:$0xff]  ;;  %v8654_v17 = vld [vmem:[#allocation2 + $0x50] sm:$0xff]  ;;  %v1015_v49 = vrot.slane %v8671_v32, 1  ;;  %v477_v46 = vrot.slane %v450_v20, 4 }
  0xbb   : > { %v7166_v25 = vpack.i.bf16 %v8654_v17, %v8652_v16  ;;  %v398_v45 = vsel %vm383_vm1, %v8652_v16, %v397_v34  ;;  %v1012_v47 = vrot.slane %v8652_v16, 1  ;;  %v1013_v48 = vrot.slane %v8654_v17, 1 }
  0xbc   : > { %7162 = vrot.lane.b32.xlu1 %v8590_v37, %s8348_s23  ;;  %v421_v37 = vrot.slane %v394_v14, 4  ;;  %v406_v63 = vperm.slane %v398_v45, %v8623_v59  ;;  %v440_v34 = vsel %vm383_vm1, %v439_v29, %v8611_v54  ;;  %v451_v41 = vrot.slane %v8654_v17, 4 }
  0xbd   : > { %7167 = vrot.lane.b32.xlu2 %v7166_v25, %s8348_s23  ;;  %7147 = vrot.lane.b32.xlu0 %v7166_v25, %s8346_s21  ;;  %v8719_v9 = vsel %vm996_vm4, %v1012_v47, %v1013_v48  ;;  %v8722_v10 = vsel %vm996_vm4, %v1013_v48, %v1015_v49  ;;  %v395_v25 = vrot.slane %v8652_v16, 4  ;;  %v8754_v48 = vperm.slane %v440_v34, %v8623_v59 }
  0xbe   : > { %v419_v11 = vrot.slane %v406_v63, 4  ;;  %v422_v7 = vsel %vm383_vm1, %v406_v63, %v421_v37  ;;  %v454_v37 = vsel %vm383_vm1, %v8654_v17, %v453_v23  ;;  %v452_v29 = vsel %vm383_vm1, %v451_v41, %v8603_v51 }
  0xbf   : > { %v8737_v36 = vperm.slane %v422_v7, %v8675_v35  ;;  %v7186_v49 = vpack.i.bf16 %v8722_v10, %v8719_v9  ;;  %v8761_v63 = vperm.slane %v452_v29, %v8623_v59  ;;  %v465_v7 = vrot.slane %v8754_v48, 4 }
  0xc0   : > { %v420_v31 = vsel %vm383_vm1, %v419_v11, %v394_v14  ;;  %v462_v14 = vperm.slane %v454_v37, %v8623_v59  ;;  %v1093_v37 = vrot.slane %v8722_v10, 4 }
  0xc1   : > { %v8743_v45 = vperm.slane %v420_v31, %v8675_v35  ;;  %v437_v1 = vrot.slane %v8737_v36, 4 }
  0xc2   : > { %v475_v11 = vrot.slane %v462_v14, 4  ;;  %v478_v19 = vsel %vm383_vm1, %v462_v14, %v477_v46  ;;  %v1096_v46 = vsel %vm383_vm1, %v8722_v10, %v1095_v52  ;;  %v1094_v42 = vsel %vm383_vm1, %v1093_v37, %v8680_v38 }
  0xc3   : > { %v8770_v31 = vperm.slane %v478_v19, %v8675_v35  ;;  %v435_v41 = vrot.slane %v8743_v45, 4  ;;  %v8826_v19 = vperm.slane %v1026_v5, %v8623_v59  ;;  %v1626_v5 = vrot.slane %v8603_v51, 2 }
  0xc4   : > { %7182 = vrot.lane.b32.xlu1 %v8643_v6, %s8346_s21 }
  0xc5   : > { %7172 = vrot.lane.b32.xlu2 %v7171_v57, %s8346_s21  ;;  %7157 = vrot.lane.b32.xlu0 %v8609_v53, %s8348_s23  ;;  %v396_v53 = vsel %vm383_vm1, %v395_v25, %v8601_v50  ;;  %v1039_v25 = vrot.slane %v8691_v44, 4  ;;  %v493_v10 = vrot.slane %v8770_v31, 4 }
  0xc6   : > { %v8751_v47 = vperm.slane %v396_v53, %v8623_v59  ;;  %v476_v53 = vsel %vm383_vm1, %v475_v11, %v450_v20  ;;  %v1028_v20 = vsel %vm383_vm1, %v8628_v60, %v1027_v8 }
  0xc7   : > { %v1040_v14 = vsel %vm383_vm1, %v8719_v9, %v1039_v25  ;;  %v8786_v29 = vperm.slane %v476_v53, %v8675_v35  ;;  %v8808_v25 = vsel %vm383_vm1, 0.0, %v435_v41  ;;  %v8817_v60 = vsel %vm383_vm1, 0.0, %v493_v10 }
  0xc8   : > { %v410_v23 = vsel %vm383_vm1, %v8751_v47, %v409_v40  ;;  %v466_v40 = vsel %vm383_vm1, %v8761_v63, %v465_v7  ;;  %v1036_v41 = vperm.slane %v1028_v20, %v8623_v59  ;;  %v1048_v10 = vperm.slane %v1040_v14, %v8623_v59 }
  0xc9   : > { %v8773_v34 = vperm.slane %v410_v23, %v8675_v35  ;;  %v8791_v23 = vperm.slane %v466_v40, %v8675_v35  ;;  %v491_v53 = vrot.slane %v8786_v29, 4  ;;  %v1037_v40 = vrot.slane %v8719_v9, 4 }
  0xca   : > { %v1063_v11 = vrot.slane %v1036_v41, 4  ;;  %v1084_v20 = vsel %vm383_vm1, %v8621_v58, %v1083_v2  ;;  %v1104_v9 = vperm.slane %v1096_v46, %v8623_v59  ;;  %v1061_v56 = vrot.slane %v1048_v10, 4 }
  0xcb   : > { %v433_v52 = vrot.slane %v8773_v34, 4  ;;  %v489_v0 = vrot.slane %v8791_v23, 4  ;;  %v8820_v8 = vsel %vm383_vm1, 0.0, %v491_v53  ;;  %v1092_v7 = vperm.slane %v1084_v20, %v8623_v59 }
  0xcc   : > { %7192 = vrot.lane.b32.xlu1 %v7171_v57, %s8348_s23  ;;  %v8798_v57 = vsel %vm383_vm1, 0.0, %v437_v1  ;;  %v1064_v14 = vsel %vm383_vm1, %v1048_v10, %v1063_v11  ;;  %v1038_v53 = vsel %vm383_vm1, %v1037_v40, %v8691_v44  ;;  %v1062_v58 = vsel %vm383_vm1, %v1061_v56, %v1036_v41 }
  0xcd   : > { %7177 = vrot.lane.b32.xlu0 %v8707_v62, %s8346_s21  ;;  %7187 = vrot.lane.b32.xlu2 %v7186_v49, %s8346_s21  ;;  %v8813_v1 = vsel %vm383_vm1, 0.0, %v433_v52  ;;  %v8831_v52 = vsel %vm383_vm1, 0.0, %v489_v0  ;;  %v1628_v0 = vrot.slane %v8630_v61, 2  ;;  %v1119_v51 = vrot.slane %v1092_v7, 4 }
  0xce   : > { %v1117_v2 = vrot.slane %v1104_v9, 4  ;;  %v1051_v61 = vrot.slane %v8826_v19, 4  ;;  %v8860_v44 = vperm.slane %v1062_v58, %v8675_v35  ;;  %v8863_v38 = vperm.slane %v1038_v53, %v8623_v59 }
  0xcf   : > { %v1120_v56 = vsel %vm383_vm1, %v1104_v9, %v1119_v51  ;;  %v1107_v46 = vrot.slane %v8713_v3, 4  ;;  %v8877_v11 = vsel %vm1619_vm5, %v1626_v5, %v1628_v0  ;;  %v1635_v0 = vrot.slane %v8652_v16, 2 }
  0xd0   : > { %v1118_v37 = vsel %vm383_vm1, %v1117_v2, %v1092_v7  ;;  %v8880_v40 = vperm.slane %v1120_v56, %v8675_v35  ;;  %v1052_v50 = vsel %vm383_vm1, %v8863_v38, %v1051_v61  ;;  %v15061_v7 = vrot.slane %v8639_v4, 2 }
  0xd1   : > { %v8883_v41 = vperm.slane %v1118_v37, %v8675_v35  ;;  %v8902_v10 = vperm.slane %v1052_v50, %v8675_v35 }
  0xd2   : > { %v8899_v9 = vsel %vm1619_vm5, %v1621_v55, %v15061_v7 }
  0xd3   : > { %v7271_v4 = vpack.i.bf16 %v8883_v41, %v8860_v44  ;;  %v1075_v51 = vrot.slane %v8902_v10, 4  ;;  %v1133_v50 = vrot.slane %v8883_v41, 4 }
  0xd4   : > { %7207 = vrot.lane.b32.xlu1 %v7186_v49, %s8348_s23  ;;  %v8857_v49 = vperm.slane %v1064_v14, %v8675_v35  ;;  %v1636_v14 = vrot.slane %v8654_v17, 2  ;;  %v1077_v17 = vrot.slane %v8860_v44, 4 }
  0xd5   : > { %7202 = vrot.lane.b32.xlu0 %v8643_v6, %s8348_s23  ;;  %7197 = vrot.lane.b32.xlu2 %v8707_v62, %s8348_s23  ;;  %v8866_v6 = vperm.slane %v1094_v42, %v8623_v59  ;;  %v8871_v62 = vsel %vm1619_vm5, %v1625_v33, %v1626_v5  ;;  %v8892_v33 = vsel %vm1619_vm5, %v1620_v39, %v1621_v55  ;;  %v1638_v42 = vrot.slane %v8671_v32, 2 }
  0xd6   : > { %v7211_v20 = vpack.i.bf16 %v8899_v9, %v8892_v33  ;;  %v7276_v43 = vpack.i.bf16 %v8880_v40, %v8857_v49  ;;  %v7221_v39 = vpack.i.bf16 %v8665_v27, %v8660_v24  ;;  %v7216_v55 = vpack.i.bf16 %v8877_v11, %v8871_v62 }
  0xd7   : > { %v1108_v53 = vsel %vm383_vm1, %v8866_v6, %v1107_v46  ;;  %v8929_v58 = vsel %vm1619_vm5, %v1635_v0, %v1636_v14  ;;  %v8932_v2 = vsel %vm1619_vm5, %v1636_v14, %v1638_v42  ;;  %v8935_v61 = vsel %vm383_vm1, 0.0, %v1075_v51 }
  0xd8   : > { %v8913_v54 = vperm.slane %v1108_v53, %v8675_v35  ;;  %v7226_v16 = vpack.i.bf16 %v8932_v2, %v8929_v58  ;;  %v8948_v46 = vsel %vm383_vm1, 0.0, %v1077_v17  ;;  %v8956_v7 = vsel %vm383_vm1, 0.0, %v1133_v50 }
  0xd9   : > { %v1079_v53 = vrot.slane %v8857_v49, 4  ;;  %v463_v0 = vrot.slane %v8761_v63, 4  ;;  %v407_v14 = vrot.slane %v8751_v47, 4 }
  0xda   : > { %v7266_v5 = vpack.i.bf16 %v8913_v54, %v8902_v10  ;;  %v1131_v56 = vrot.slane %v8913_v54, 4 }
  0xdb   : > { %v408_v63 = vsel %vm383_vm1, %v407_v14, %v8650_v15  ;;  %v464_v47 = vsel %vm383_vm1, %v463_v0, %v8754_v48  ;;  %v15062_v15 = vpack.i.bf16 %v8786_v29, %v8743_v45  ;;  %v15063_v0 = vpack.i.bf16 %v8770_v31, %v8737_v36 }
  0xdc   : > { %7212 = vrot.lane.b32.xlu1 %v7211_v20, %s8346_s21  ;;  %v8942_v32 = vsel %vm383_vm1, 0.0, %v1131_v56  ;;  %v7306_v20 = vpack.i.bf16 %v8956_v7, %v8948_v46  ;;  %v8983_v56 = vperm.slane %v408_v63, %v8675_v35  ;;  %v15064_v14 = vpack.i.bf16 %v8791_v23, %v8773_v34 }
  0xdd   : > { %7222 = vrot.lane.b32.xlu0 %v7221_v39, %s8346_s21  ;;  %7217 = vrot.lane.b32.xlu2 %v7216_v55, %s8346_s21  ;;  %v7301_v37 = vpack.i.bf16 %v8942_v32, %v8935_v61  ;;  %v1135_v39 = vrot.slane %v8880_v40, 4  ;;  %v8963_v55 = vsel %vm383_vm1, 0.0, %v1079_v53  ;;  %v1704_v45 = vrot.slane %v8665_v27, 4 }
  0xde   : > { %v431_v17 = vrot.slane %v8983_v56, 4  ;;  %v1648_v29 = vrot.slane %v8660_v24, 4  ;;  %v1718_v63 = vrot.slane %v8877_v11, 4  ;;  %v1706_v36 = vrot.slane %v8899_v9, 4 }
  0xdf   : > { %v8968_v42 = vsel %vm383_vm1, 0.0, %v1135_v39  ;;  %v1650_v31 = vrot.slane %v8892_v33, 4  ;;  %v1660_v23 = vrot.slane %v8929_v58, 4 }
  0xe0   : > { %v7311_v51 = vpack.i.bf16 %v8968_v42, %v8963_v55  ;;  %v432_v48 = vsel %vm383_vm1, 0.0, %v431_v17  ;;  %v1716_v17 = vrot.slane %v8932_v2, 4  ;;  %v1719_v34 = vsel %vm383_vm1, %v8932_v2, %v1718_v63 }
  0xe4   : > { %7227 = vrot.lane.b32.xlu1 %v7226_v16, %s8346_s21  ;;  %v8986_v16 = vperm.slane %v464_v47, %v8675_v35  ;;  %v1662_v47 = vrot.slane %v8871_v62, 4 }
  0xe5   : > { %2036 = vrot.lane.b32.xlu0 %v8892_v33, %s8348_s23  ;;  %2040 = vrot.lane.b32.xlu2 %v8871_v62, %s8348_s23 }
  0xe6   : > { %v487_v50 = vrot.slane %v8986_v16, 4 }
  0xe8   : > { %v488_v53 = vsel %vm383_vm1, 0.0, %v487_v50  ;;  %v1663_v50 = vsel %vm383_vm1, %v8929_v58, %v1662_v47 }
  0xe9   : > { %v7246_v39 = vpack.i.bf16 %v488_v53, %v432_v48  ;;  %v1649_v48 = vsel %vm383_vm1, %v1648_v29, %v8892_v33  ;;  %v1727_v53 = vperm.slane %v1719_v34, %v8623_v59  ;;  %v1717_v33 = vsel %vm383_vm1, %v1716_v17, %v8877_v11 }
  0xea   : > { %v1655_v29 = vperm.slane %v1649_v48, %v8623_v59  ;;  %v1723_v47 = vperm.slane %v1717_v33, %v8623_v59 }
  0xec   : > { %2038 = vrot.lane.b32.xlu1 %v8899_v9, %s8348_s23  ;;  %v1728_v10 = vrot.slane %v1723_v47, 4 }
  0xed   : > { %2042 = vrot.lane.b32.xlu0 %v8877_v11, %s8348_s23  ;;  %2046 = vrot.lane.b32.xlu2 %v8665_v27, %s8348_s23  ;;  %v1740_v11 = vrot.slane %v1727_v53, 4 }
  0xf4   : > { %2044 = vrot.lane.b32.xlu1 %v8660_v24, %s8348_s23 }
  0xf5   : > { %2048 = vrot.lane.b32.xlu0 %v8929_v58, %s8348_s23  ;;  %7237 = vrot.lane.b32.xlu2 %v15062_v15, %s8350_s29  ;;  %v1705_v15 = vsel %vm383_vm1, %v1704_v45, %v8899_v9  ;;  %v15065_v58 = vpack.i.bf16 %v8831_v52, %v8813_v1  ;;  %v1661_v9 = vsel %vm383_vm1, %v1660_v23, %v8871_v62 }
  0xf6   : > { %v1711_v45 = vperm.slane %v1705_v15, %v8623_v59  ;;  %v1667_v63 = vperm.slane %v1661_v9, %v8623_v59 }
  0xfc   : > { %7242 = vrot.lane.b32.xlu1 %v15063_v0, %s8351_s8  ;;  %v1651_v0 = vsel %vm383_vm1, %v8660_v24, %v1650_v31  ;;  %v15066_v24 = vpack.i.bf16 %v8820_v8, %v8808_v25  ;;  %v1049_v25 = vrot.slane %v8863_v38, 4  ;;  %v1674_v8 = vrot.slane %v1655_v29, 4 }
  0xfd   : > { %7232 = vrot.lane.b32.xlu0 %v15064_v14, %s8352_s17  ;;  %7247 = vrot.lane.b32.xlu2 %v7246_v39, %s8353_s11  ;;  %v1671_v39 = vperm.slane %v1663_v50, %v8623_v59  ;;  %v1707_v14 = vsel %vm383_vm1, %v8665_v27, %v1706_v36  ;;  %v15067_v27 = vpack.i.bf16 %v8817_v60, %v8798_v57  ;;  %v1105_v36 = vrot.slane %v8866_v6, 4  ;;  %v9055_v57 = vpop.permute.xlu2 %7142 }
  0xfe   : > { %v1659_v1 = vperm.slane %v1651_v0, %v8623_v59  ;;  %v1715_v52 = vperm.slane %v1707_v14, %v8623_v59  ;;  %v1730_v31 = vrot.slane %v1711_v45, 4  ;;  %v1675_v50 = vsel %vm383_vm1, %v1667_v63, %v1674_v8 }
  0xff   : > { %v1684_v62 = vrot.slane %v1671_v39, 4  ;;  %v1050_v48 = vsel %vm383_vm1, %v1049_v25, %v8826_v19  ;;  %v1106_v0 = vsel %vm383_vm1, %v1105_v36, %v8713_v3 }
 0x100   : > { %v1686_v17 = vrot.slane %v1659_v1, 4  ;;  %v1742_v34 = vrot.slane %v1715_v52, 4  ;;  %v1741_v23 = vsel %vm383_vm1, %v1740_v11, %v1715_v52  ;;  %v1731_v15 = vsel %vm383_vm1, %v1723_v47, %v1730_v31 }
 0x101   : > { %v1685_v60 = vsel %vm383_vm1, %v1684_v62, %v1659_v1  ;;  %v1747_v41 = vperm.slane %v1741_v23, %v8675_v35  ;;  %v1739_v19 = vperm.slane %v1731_v15, %v8675_v35  ;;  %v9086_v49 = vperm.slane %v1050_v48, %v8675_v35 }
 0x102   : > { %v1687_v38 = vsel %vm383_vm1, %v1671_v39, %v1686_v17  ;;  %v1743_v6 = vsel %vm383_vm1, %v1727_v53, %v1742_v34  ;;  %v1691_v44 = vperm.slane %v1685_v60, %v8675_v35  ;;  %v9089_v40 = vperm.slane %v1106_v0, %v8675_v35 }
 0x103   : > { %v1695_v3 = vperm.slane %v1687_v38, %v8675_v35  ;;  %v1751_v53 = vperm.slane %v1743_v6, %v8675_v35  ;;  %v1073_v14 = vrot.slane %v9086_v49, 4  ;;  %v1754_v36 = vrot.slane %v1739_v19, 4 }
 0x104   : > { %7252 = vrot.lane.b32.xlu1 %v15065_v58, %s8354_s18  ;;  %v1129_v58 = vrot.slane %v9089_v40, 4  ;;  %v1700_v23 = vrot.slane %v1691_v44, 4  ;;  %v1756_v61 = vrot.slane %v1747_v41, 4 }
 0x105   : > { %7257 = vrot.lane.b32.xlu0 %v15066_v24, %s8355_s19  ;;  %7262 = vrot.lane.b32.xlu2 %v15067_v27, %s8356_s15  ;;  %v7291_v39 = vpack.i.bf16 %v1751_v53, %v1695_v3  ;;  %v1729_v24 = vsel %vm383_vm1, %v1728_v10, %v1711_v45  ;;  %v1074_v27 = vsel %vm383_vm1, 0.0, %v1073_v14  ;;  %v1755_v17 = vsel %vm383_vm1, 0.0, %v1754_v36 }
 0x106   : > { %v1130_v1 = vsel %vm383_vm1, 0.0, %v1129_v58  ;;  %v9106_v62 = vperm.slane %v1729_v24, %v8675_v35  ;;  %v1702_v32 = vrot.slane %v1695_v3, 4 }
 0x107   : > { %v7296_v11 = vpack.i.bf16 %v1130_v1, %v1074_v27 }
 0x108   : > { %v1752_v47 = vrot.slane %v9106_v62, 4  ;;  %v1703_v15 = vsel %vm383_vm1, 0.0, %v1702_v32 }
 0x10a   : > { %v1753_v8 = vsel %vm383_vm1, 0.0, %v1752_v47 }
 0x10c   : > { %7272 = vrot.lane.b32.xlu1 %v7271_v4, %s8350_s29  ;;  %v1683_v4 = vperm.slane %v1675_v50, %v8675_v35  ;;  %v1757_v50 = vsel %vm383_vm1, 0.0, %v1756_v61 }
 0x10d   : > { %7277 = vrot.lane.b32.xlu0 %v7276_v43, %s8351_s8  ;;  %7267 = vrot.lane.b32.xlu2 %v7266_v5, %s8352_s17  ;;  %v1672_v43 = vrot.slane %v1667_v63, 4  ;;  %v7286_v5 = vpack.i.bf16 %v1747_v41, %v1691_v44  ;;  %v7144_v44 = vunpack.i.l.bf16 %v9055_v57 }
 0x10e   : > { %v7281_v54 = vpack.i.bf16 %v1739_v19, %v1683_v4 }
 0x10f   : > { %v9094_v9 = vpop.permute.xlu2 %7152  ;;  %v1673_v33 = vsel %vm383_vm1, %v1672_v43, %v1655_v29  ;;  %v1698_v29 = vrot.slane %v1683_v4, 4  ;;  %v604_v14 = vrot.slane %v7144_v44, 4 }
 0x110   : > { %v9103_v52 = vperm.slane %v1673_v33, %v8675_v35  ;;  %v7155_v4 = vunpack.i.h.bf16 %v9094_v9  ;;  %v7154_v19 = vunpack.i.l.bf16 %v9094_v9 }
 0x111   : > { %v1699_v31 = vsel %vm383_vm1, 0.0, %v1698_v29 }
 0x112   : > { %v1696_v63 = vrot.slane %v9103_v52, 4  ;;  %v7321_v60 = vpack.i.bf16 %v1755_v17, %v1699_v31  ;;  %v868_v24 = vrot.slane %v7155_v4, 4 }
 0x114   : > { %7282 = vrot.lane.b32.xlu1 %v7281_v54, %s8352_s17  ;;  %v1697_v25 = vsel %vm383_vm1, 0.0, %v1696_v63 }
 0x115   : > { %7287 = vrot.lane.b32.xlu0 %v7286_v5, %s8350_s29  ;;  %7292 = vrot.lane.b32.xlu2 %v7291_v39, %s8351_s8  ;;  %v7316_v34 = vpack.i.bf16 %v1753_v8, %v1697_v25 }
 0x117   : > { %v9119_v45 = vpop.permute.xlu2 %7167 }
 0x118   : > { %v7170_v58 = vunpack.i.h.bf16 %v9119_v45 }
 0x11a   : > { %v9157_v17 = vrot.slane %v7170_v58, 4 }
 0x11c   : > { %7297 = vrot.lane.b32.xlu1 %v7296_v11, %s8353_s11  ;;  %v7169_v11 = vunpack.i.l.bf16 %v9119_v45 }
 0x11d   : > { %7302 = vrot.lane.b32.xlu0 %v7301_v37, %s8354_s18  ;;  %7307 = vrot.lane.b32.xlu2 %v7306_v20, %s8355_s19  ;;  %v1758_v37 = vrot.slane %v1751_v53, 4  ;;  %v1701_v20 = vsel %vm383_vm1, 0.0, %v1700_v23 }
 0x11e   : > { %v7326_v55 = vpack.i.bf16 %v1757_v50, %v1701_v20 }
 0x11f   : > { %v1759_v38 = vsel %vm383_vm1, 0.0, %v1758_v37  ;;  %v9135_v6 = vpop.permute.xlu2 %7172 }
 0x120   : > { %v7331_v42 = vpack.i.bf16 %v1759_v38, %v1703_v15  ;;  %v14804_v20 = vunpack.i.h.bf16 %v9135_v6  ;;  %v7174_v38 = vunpack.i.l.bf16 %v9135_v6 }
 0x124   : > { %7312 = vrot.lane.b32.xlu1 %v7311_v51, %s8356_s15  ;;  %v7145_v51 = vunpack.i.h.bf16 %v9055_v57  ;;  %v812_v57 = vrot.slane %v7154_v19, 4 }
 0x125   : > { %7317 = vrot.lane.b32.xlu0 %v7316_v34, %s8353_s11  ;;  %7322 = vrot.lane.b32.xlu2 %v7321_v60, %s8354_s18 }
 0x126   : > { %v7138_v46 = vpop.permute.xlu1 %7137  ;;  %v660_v43 = vrot.slane %v7145_v51, 4 }
 0x127   : > { %v7133_v7 = vpop.permute.xlu0 %7132  ;;  %v7140_v53 = vunpack.i.h.bf16 %v7138_v46  ;;  %v7139_v10 = vunpack.i.l.bf16 %v7138_v46  ;;  %v9148_v27 = vpop.permute.xlu2 %7187 }
 0x128   : > { %v7135_v48 = vunpack.i.h.bf16 %v7133_v7  ;;  %v7134_v0 = vunpack.i.l.bf16 %v7133_v7  ;;  %v822_v7 = vrot.slane %v7169_v11, 4  ;;  %v15074_v12 = vunpack.i.l.bf16 %v9148_v27 }
 0x129   : > { %v674_v63 = vrot.slane %v7140_v53, 4  ;;  %v618_v47 = vrot.slane %v7139_v10, 4 }
 0x12a   : > { %v662_v54 = vrot.slane %v7135_v48, 4  ;;  %v606_v5 = vrot.slane %v7134_v0, 4  ;;  %v661_v1 = vsel %vm383_vm1, %v660_v43, %v7135_v48  ;;  %v605_v29 = vsel %vm383_vm1, %v604_v14, %v7134_v0 }
 0x12b   : > { %v9160_v34 = vperm.slane %v661_v1, %v8623_v59  ;;  %v9166_v61 = vperm.slane %v605_v29, %v8623_v59 }
 0x12c   : > { %7327 = vrot.lane.b32.xlu1 %v7326_v55, %s8355_s19  ;;  %v663_v36 = vsel %vm383_vm1, %v7145_v51, %v662_v54  ;;  %v607_v25 = vsel %vm383_vm1, %v7144_v44, %v606_v5  ;;  %v14803_v55 = vunpack.i.h.bf16 %v9148_v27 }
 0x12d   : > { %7332 = vrot.lane.b32.xlu0 %v7331_v42, %s8356_s15  ;;  %v671_v50 = vperm.slane %v663_v36, %v8623_v59  ;;  %v615_v15 = vperm.slane %v607_v25, %v8623_v59  ;;  %v686_v48 = vrot.slane %v9160_v34, 4 }
 0x12e   : > { %v7163_v41 = vpop.permute.xlu1 %7162 }
 0x12f   : > { %v7148_v3 = vpop.permute.xlu0 %7147  ;;  %v7164_v8 = vunpack.i.l.bf16 %v7163_v41  ;;  %v642_v14 = vrot.slane %v615_v15, 4 }
 0x130   : > { %v7149_v39 = vunpack.i.l.bf16 %v7148_v3  ;;  %v7150_v33 = vunpack.i.h.bf16 %v7148_v3  ;;  %v630_v3 = vrot.slane %v9166_v61, 4 }
 0x131   : > { %v813_v42 = vsel %vm383_vm1, %v7164_v8, %v812_v57  ;;  %v9188_v57 = vpop.permute.xlu2 %7197 }
 0x132   : > { %v616_v31 = vrot.slane %v7149_v39, 4  ;;  %v672_v60 = vrot.slane %v7150_v33, 4  ;;  %v619_v45 = vsel %vm383_vm1, %v7149_v39, %v618_v47  ;;  %v675_v32 = vsel %vm383_vm1, %v7150_v33, %v674_v63 }
 0x133   : > { %v627_v51 = vperm.slane %v619_v45, %v8623_v59  ;;  %v683_v44 = vperm.slane %v675_v32, %v8623_v59  ;;  %v9186_v39 = vperm.slane %v813_v42, %v8623_v59  ;;  %v698_v33 = vrot.slane %v671_v50, 4 }
 0x134   : > { %2050 = vrot.lane.b32.xlu1 %v8932_v2, %s8348_s23  ;;  %v7165_v2 = vunpack.i.h.bf16 %v7163_v41  ;;  %v617_v37 = vsel %vm383_vm1, %v616_v31, %v7139_v10  ;;  %v673_v0 = vsel %vm383_vm1, %v672_v60, %v7140_v53  ;;  %v810_v10 = vrot.slane %v7164_v8, 4 }
 0x135   : > { %v9181_v41 = vperm.slane %v617_v37, %v8623_v59  ;;  %v9191_v53 = vperm.slane %v673_v0, %v8623_v59  ;;  %v640_v1 = vrot.slane %v627_v51, 4  ;;  %v699_v36 = vsel %vm383_vm1, %v683_v44, %v698_v33 }
 0x136   : > { %v9163_v23 = vpop.permute.xlu1 %7182  ;;  %v869_v43 = vsel %vm383_vm1, %v7165_v2, %v868_v24  ;;  %v866_v5 = vrot.slane %v7165_v2, 4  ;;  %v643_v24 = vsel %vm383_vm1, %v627_v51, %v642_v14  ;;  %v811_v31 = vsel %vm383_vm1, %v810_v10, %v7154_v19 }
 0x137   : > { %v7158_v46 = vpop.permute.xlu0 %7157  ;;  %v9194_v29 = vperm.slane %v869_v43, %v8623_v59  ;;  %v631_v25 = vsel %vm383_vm1, %v9181_v41, %v630_v3  ;;  %v696_v60 = vrot.slane %v683_v44, 4  ;;  %v9206_v2 = vperm.slane %v643_v24, %v8675_v35 }
 0x138   : > { %v7160_v54 = vunpack.i.h.bf16 %v7158_v46  ;;  %v7159_v47 = vunpack.i.l.bf16 %v7158_v46  ;;  %v867_v37 = vsel %vm383_vm1, %v866_v5, %v7155_v4  ;;  %v9216_v51 = vperm.slane %v699_v36, %v8675_v35 }
 0x139   : > { %v9220_v0 = vperm.slane %v631_v25, %v8675_v35  ;;  %v687_v44 = vsel %vm383_vm1, %v9191_v53, %v686_v48  ;;  %v641_v3 = vsel %vm383_vm1, %v640_v1, %v615_v15  ;;  %v9226_v9 = vperm.slane %v811_v31, %v8623_v59 }
 0x13a   : > { %v880_v63 = vrot.slane %v7160_v54, 4  ;;  %v824_v45 = vrot.slane %v7159_v47, 4  ;;  %v823_v42 = vsel %vm383_vm1, %v822_v7, %v7159_v47  ;;  %v9232_v7 = vperm.slane %v687_v44, %v8675_v35 }
 0x13b   : > { %v9237_v43 = vperm.slane %v641_v3, %v8675_v35  ;;  %v697_v15 = vsel %vm383_vm1, %v696_v60, %v671_v50  ;;  %v9241_v48 = vperm.slane %v867_v37, %v8623_v59  ;;  %v9244_v5 = vperm.slane %v823_v42, %v8623_v59 }
 0x13c   : > { %v881_v46 = vsel %vm383_vm1, %v7170_v58, %v880_v63  ;;  %v825_v19 = vsel %vm383_vm1, %v7169_v11, %v824_v45  ;;  %v7346_v58 = vpack.i.bf16 %v9216_v51, %v9206_v2  ;;  %v848_v11 = vrot.slane %v9186_v39, 4 }
 0x13d   : > { %v833_v4 = vperm.slane %v825_v19, %v8623_v59  ;;  %v889_v10 = vperm.slane %v881_v46, %v8623_v59  ;;  %v7336_v14 = vpack.i.bf16 %v9232_v7, %v9220_v0  ;;  %v9250_v33 = vperm.slane %v697_v15, %v8675_v35 }
 0x13e   : > { %v9200_v8 = vpop.permute.xlu1 %7192  ;;  %7347 = vrot.lane.b32.xlu0 %v7346_v58, %s8351_s8  ;;  %v904_v1 = vrot.slane %v9194_v29, 4  ;;  %v7185_v63 = vunpack.i.h.bf16 %v9163_v23  ;;  %v879_v50 = vsel %vm383_vm1, %v9157_v17, %v7160_v54  ;;  %v7184_v24 = vunpack.i.l.bf16 %v9163_v23  ;;  %v9269_v17 = vpop.permute.xlu2 %7217 }
 0x13f   : > { %v9208_v32 = vpop.permute.xlu0 %7177  ;;  %v849_v47 = vsel %vm383_vm1, %v833_v4, %v848_v11  ;;  %7337 = vrot.lane.b32.xlu2 %v7336_v14, %s8352_s17  ;;  %v7341_v36 = vpack.i.bf16 %v9250_v33, %v9237_v43  ;;  %v836_v31 = vrot.slane %v9226_v9, 4  ;;  %v1233_v45 = vrot.slane %v7174_v38, 4 }
 0x140   : > { %v9262_v25 = vperm.slane %v849_v47, %v8675_v35  ;;  %v905_v54 = vsel %vm383_vm1, %v889_v10, %v904_v1  ;;  %v14805_v23 = vunpack.i.l.bf16 %v9148_v27  ;;  %v9274_v37 = vperm.slane %v879_v50, %v8623_v59 }
 0x141   : > { %7342 = vrot.lane.b32.xlu1 %v7341_v36, %s8350_s29  ;;  %v9278_v46 = vperm.slane %v905_v54, %v8675_v35  ;;  %v837_v42 = vsel %vm383_vm1, %v9244_v5, %v836_v31  ;;  %v1289_v19 = vrot.slane %v14804_v20, 4  ;;  %v1299_v44 = vrot.slane %v14803_v55, 4 }
 0x142   : > { %v1287_v3 = vrot.slane %v7185_v63, 4  ;;  %v1231_v11 = vrot.slane %v7184_v24, 4  ;;  %v1234_v15 = vsel %vm383_vm1, %v7184_v24, %v1233_v45  ;;  %v892_v1 = vrot.slane %v9241_v48, 4 }
 0x143   : > { %v7361_v14 = vpack.i.bf16 %v9278_v46, %v9262_v25  ;;  %v1290_v50 = vsel %vm383_vm1, %v7185_v63, %v1289_v19  ;;  %v9294_v47 = vperm.slane %v837_v42, %v8675_v35  ;;  %v846_v36 = vrot.slane %v833_v4, 4 }
 0x144   : > { %v902_v31 = vrot.slane %v889_v10, 4  ;;  %v9298_v54 = vrot.slane %v14805_v23, 4  ;;  %v14807_v55 = vunpack.i.h.bf16 %v9188_v57  ;;  %v14806_v24 = vunpack.i.l.bf16 %v9188_v57 }
 0x145   : > { %v893_v45 = vsel %vm383_vm1, %v9274_v37, %v892_v1  ;;  %v14808_v20 = vunpack.i.h.bf16 %v9269_v17  ;;  %v847_v4 = vsel %vm383_vm1, %v846_v36, %v9186_v39  ;;  %v9313_v42 = vperm.slane %v1234_v15, %v8623_v59 }
 0x146   : > { %v9265_v60 = vpop.permute.xlu1 %7207  ;;  %v9306_v63 = vperm.slane %v893_v45, %v8675_v35  ;;  %v903_v10 = vsel %vm383_vm1, %v902_v31, %v9194_v29  ;;  %v9316_v19 = vperm.slane %v1290_v50, %v8623_v59  ;;  %v9320_v1 = vperm.slane %v847_v4, %v8675_v35 }
 0x147   : > { %v9286_v58 = vpop.permute.xlu0 %7202  ;;  %7362 = vrot.lane.b32.xlu2 %v7361_v14, %s8351_s8  ;;  %v9323_v45 = vperm.slane %v903_v10, %v8675_v35  ;;  %v1232_v39 = vsel %vm383_vm1, %v1231_v11, %v7174_v38  ;;  %v15068_v29 = vunpack.i.h.bf16 %v9135_v6  ;;  %v14809_v50 = vunpack.i.l.bf16 %v9269_v17  ;;  %v9349_v10 = vpop.permute.xlu2 %2040 }
 0x148   : > { %v7351_v14 = vpack.i.bf16 %v9306_v63, %v9294_v47  ;;  %v1507_v36 = vrot.slane %v14807_v55, 4  ;;  %v1451_v31 = vrot.slane %v14806_v24, 4  ;;  %v684_v6 = vrot.slane %v9191_v53, 4 }
 0x149   : > { %v1288_v15 = vsel %vm383_vm1, %v1287_v3, %v15068_v29  ;;  %v7356_v38 = vpack.i.bf16 %v9323_v45, %v9320_v1  ;;  %v628_v3 = vrot.slane %v9181_v41, 4  ;;  %v9347_v11 = vrot.slane %v14808_v20, 4 }
 0x14a   : > { %v7180_v29 = vunpack.i.h.bf16 %v9208_v32  ;;  %7352 = vrot.lane.b32.xlu1 %v7351_v14, %s8352_s17  ;;  %v9354_v24 = vperm.slane %v1232_v39, %v8623_v59  ;;  %v9358_v4 = vperm.slane %v1288_v15, %v8623_v59  ;;  %v9364_v53 = vrot.slane %v14809_v50, 4 }
 0x14b   : > { %7357 = vrot.lane.b32.xlu0 %v7356_v38, %s8350_s29  ;;  %v656_v39 = vrot.slane %v9237_v43, 4  ;;  %v15069_v55 = vunpack.i.h.bf16 %v9200_v8  ;;  %v7179_v28 = vunpack.i.l.bf16 %v9208_v32  ;;  %v712_v14 = vrot.slane %v9250_v33, 4 }
 0x14c   : > { %v1300_v50 = vsel %vm383_vm1, %v1299_v44, %v7180_v29  ;;  %v629_v43 = vsel %vm383_vm1, %v628_v3, %v9166_v61  ;;  %v1301_v13 = vrot.slane %v7180_v29, 4  ;;  %v654_v38 = vrot.slane %v9220_v0, 4 }
 0x14d   : > { %v9373_v15 = vrot.slane %v15069_v55, 4  ;;  %v657_v20 = vsel %vm383_vm1, 0.0, %v656_v39  ;;  %v9384_v30 = vperm.slane %v629_v43, %v8675_v35  ;;  %v685_v55 = vsel %vm383_vm1, %v684_v6, %v9160_v34 }
 0x14e   : > { %v9325_v23 = vpop.permute.xlu1 %7212  ;;  %v7210_v32 = vunpack.i.h.bf16 %v9265_v60  ;;  %v713_v44 = vsel %vm383_vm1, 0.0, %v712_v14  ;;  %v9394_v33 = vperm.slane %v685_v55, %v8675_v35  ;;  %v710_v61 = vrot.slane %v9232_v7, 4 }
 0x14f   : > { %v9369_v22 = vpop.permute.xlu0 %7222  ;;  %15070 = vst [vmem:[#allocation21_spill] sm:$0xff] %v9384_v30  ;;  %v1245_v3 = vrot.slane %v7179_v28, 4  ;;  %v7376_v29 = vpack.i.bf16 %v713_v44, %v657_v20  ;;  %v652_v39 = vrot.slane %v9384_v30, 4  ;;  %v655_v43 = vsel %vm383_vm1, 0.0, %v654_v38 }
 0x150   : > { %15071 = vst [vmem:[#allocation22_spill] sm:$0xff] %v9394_v33  ;;  %v15072_v34 = vunpack.i.l.bf16 %v9200_v8  ;;  %v7209_v6 = vunpack.i.l.bf16 %v9265_v60  ;;  %v708_v18 = vrot.slane %v9394_v33, 4  ;;  %v711_v14 = vsel %vm383_vm1, 0.0, %v710_v61 }
 0x151   : > { %v9405_v55 = vperm.slane %v1300_v50, %v8623_v59  ;;  %v1244_v7 = vsel %vm383_vm1, %v9298_v54, %v7179_v28  ;;  %7377 = vrot.lane.b32.xlu2 %v7376_v29, %s8355_s19  ;;  %v653_v20 = vsel %vm383_vm1, 0.0, %v652_v39  ;;  %v7371_v38 = vpack.i.bf16 %v711_v14, %v655_v43  ;;  %v9420_v54 = vpop.permute.xlu2 %2046 }
 0x152   : > { %v1439_v0 = vrot.slane %v15072_v34, 4  ;;  %v1505_v44 = vrot.slane %v7210_v32, 4  ;;  %v7205_v34 = vunpack.i.h.bf16 %v9286_v58  ;;  %v709_v60 = vsel %vm383_vm1, 0.0, %v708_v18 }
 0x153   : > { %v860_v21 = vrot.slane %v9294_v47, 4  ;;  %v15073_v61 = vunpack.i.h.bf16 %v9148_v27  ;;  %v1246_v28 = vsel %vm383_vm1, %v15074_v12, %v1245_v3  ;;  %v7366_v29 = vpack.i.bf16 %v709_v60, %v653_v20  ;;  %7372 = vrot.lane.b32.xlu0 %v7371_v38, %s8354_s18 }
 0x154   : > { %v916_v39 = vrot.slane %v9306_v63, 4  ;;  %v1452_v43 = vsel %vm383_vm1, %v7209_v6, %v1451_v31  ;;  %v1508_v18 = vsel %vm383_vm1, %v7210_v32, %v1507_v36  ;;  %v658_v47 = vrot.slane %v9206_v2, 4 }
 0x155   : > { %v1302_v50 = vsel %vm383_vm1, %v15073_v61, %v1301_v13  ;;  %v714_v14 = vrot.slane %v9216_v51, 4  ;;  %v9431_v27 = vperm.slane %v1244_v7, %v8623_v59  ;;  %v1449_v12 = vrot.slane %v7209_v6, 4  ;;  %7367 = vrot.lane.b32.xlu1 %v7366_v29, %s8353_s11 }
 0x156   : > { %v9389_v41 = vpop.permute.xlu1 %7227  ;;  %v861_v3 = vsel %vm383_vm1, 0.0, %v860_v21  ;;  %v917_v63 = vsel %vm383_vm1, 0.0, %v916_v39  ;;  %v9439_v36 = vperm.slane %v1302_v50, %v8623_v59  ;;  %v15075_v2 = vunpack.i.h.bf16 %v9188_v57 }
 0x157   : > { %v9428_v13 = vpop.permute.xlu0 %2036  ;;  %v1493_v31 = vrot.slane %v7205_v34, 4  ;;  %v7204_v32 = vunpack.i.l.bf16 %v9286_v58  ;;  %v9446_v6 = vperm.slane %v1246_v28, %v8623_v59  ;;  %v9449_v7 = vperm.slane %v1452_v43, %v8623_v59 }
 0x158   : > { %v1506_v51 = vsel %vm383_vm1, %v1505_v44, %v15075_v2  ;;  %v9452_v21 = vperm.slane %v1508_v18, %v8623_v59  ;;  %v7391_v38 = vpack.i.bf16 %v917_v63, %v861_v3  ;;  %v659_v60 = vsel %vm383_vm1, 0.0, %v658_v47 }
 0x159   : > { %v715_v61 = vsel %vm383_vm1, 0.0, %v714_v14  ;;  %v15076_v44 = vrot.slane %v9244_v5, 4  ;;  %v15077_v58 = vrot.slane %v9274_v37, 4  ;;  %v15078_v29 = vunpack.i.l.bf16 %v9188_v57 }
 0x15a   : > { %v9468_v43 = vperm.slane %v1506_v51, %v8623_v59  ;;  %7392 = vrot.lane.b32.xlu2 %v7391_v38, %s8354_s18  ;;  %v1496_v57 = vsel %vm383_vm1, %v7205_v34, %v9373_v15  ;;  %v14811_v47 = vunpack.i.h.bf16 %v9325_v23  ;;  %v14810_v14 = vunpack.i.l.bf16 %v9325_v23 }
 0x15b   : > { %v835_v50 = vsel %vm383_vm1, %v15076_v44, %v9226_v9  ;;  %v891_v28 = vsel %vm383_vm1, %v15077_v58, %v9241_v48  ;;  %v1450_v39 = vsel %vm383_vm1, %v1449_v12, %v15078_v29  ;;  %v15081_v9 = vunpack.i.h.bf16 %v9200_v8 }
 0x15c   : > { %v9472_v18 = vperm.slane %v835_v50, %v8675_v35  ;;  %v9475_v5 = vperm.slane %v891_v28, %v8675_v35  ;;  %v1437_v48 = vrot.slane %v7204_v32, 4  ;;  %v7381_v12 = vpack.i.bf16 %v715_v61, %v659_v60  ;;  %v9498_v60 = vpop.permute.xlu2 %7237 }
 0x15d   : > { %v1494_v37 = vsel %vm383_vm1, %v1493_v31, %v15081_v9  ;;  %v9487_v2 = vperm.slane %v1450_v39, %v8623_v59  ;;  %v1473_v51 = vrot.slane %v9449_v7, 4  ;;  %v1529_v31 = vrot.slane %v9452_v21, 4 }
 0x15e   : > { %v9436_v20 = vpop.permute.xlu1 %2038  ;;  %15079 = vst [vmem:[#allocation23_spill] sm:$0xff] %v9472_v18  ;;  %v858_v3 = vrot.slane %v9472_v18, 4  ;;  %v914_v63 = vrot.slane %v9475_v5, 4  ;;  %v1440_v38 = vsel %vm383_vm1, %v7204_v32, %v1439_v0  ;;  %v9493_v15 = vperm.slane %v1494_v37, %v8623_v59  ;;  %7382 = vrot.lane.b32.xlu1 %v7381_v12, %s8356_s15 }
 0x15f   : > { %15080 = vst [vmem:[#allocation24_spill] sm:$0xff] %v9475_v5  ;;  %v9496_v34 = vperm.slane %v1496_v57, %v8623_v59  ;;  %v15082_v58 = vunpack.i.l.bf16 %v9200_v8  ;;  %v14813_v28 = vunpack.i.h.bf16 %v9389_v41  ;;  %v14812_v29 = vunpack.i.l.bf16 %v9389_v41  ;;  %v9512_v39 = vpop.permute.xlu0 %2042 }
 0x160   : > { %v859_v61 = vsel %vm383_vm1, 0.0, %v858_v3  ;;  %v915_v44 = vsel %vm383_vm1, 0.0, %v914_v63  ;;  %v9515_v9 = vperm.slane %v1440_v38, %v8623_v59  ;;  %v1912_v37 = vrot.slane %v14811_v47, 4 }
 0x161   : > { %v9508_v0 = vsel %vm383_vm1, %v1437_v48, %v15082_v58  ;;  %v7386_v32 = vpack.i.bf16 %v915_v44, %v859_v61  ;;  %v1856_v57 = vrot.slane %v14810_v14, 4  ;;  %v15083_v8 = vrot.slane %v9313_v42, 4 }
 0x162   : > { %v7225_v12 = vunpack.i.h.bf16 %v9369_v22  ;;  %v15084_v63 = vrot.slane %v9316_v19, 4  ;;  %v862_v61 = vrot.slane %v9320_v1, 4  ;;  %v7224_v44 = vunpack.i.l.bf16 %v9369_v22 }
 0x163   : > { %v1270_v48 = vsel %vm383_vm1, %v9446_v6, %v15083_v8  ;;  %7387 = vrot.lane.b32.xlu0 %v7386_v32, %s8353_s11  ;;  %v918_v8 = vrot.slane %v9323_v45, 4  ;;  %v864_v14 = vrot.slane %v9262_v25, 4  ;;  %v1869_v32 = vsel %vm383_vm1, %v14812_v29, %v9364_v53 }
 0x164   : > { %v9528_v3 = vperm.slane %v1270_v48, %v8675_v35  ;;  %v1326_v38 = vsel %vm383_vm1, %v9439_v36, %v15084_v63  ;;  %v1925_v48 = vsel %vm383_vm1, %v14813_v28, %v9347_v11  ;;  %v863_v1 = vsel %vm383_vm1, 0.0, %v862_v61 }
 0x165   : > { %v9537_v58 = vperm.slane %v1326_v38, %v8675_v35  ;;  %v920_v22 = vrot.slane %v9278_v46, 4  ;;  %v1475_v63 = vrot.slane %v9515_v9, 4  ;;  %v919_v25 = vsel %vm383_vm1, 0.0, %v918_v8 }
 0x166   : > { %v9503_v50 = vpop.permute.xlu1 %2044  ;;  %v865_v38 = vsel %vm383_vm1, 0.0, %v864_v14  ;;  %v1910_v47 = vrot.slane %v7225_v12, 4  ;;  %v1913_v53 = vsel %vm383_vm1, %v7225_v12, %v1912_v37  ;;  %v7396_v29 = vpack.i.bf16 %v919_v25, %v863_v1 }
 0x167   : > { %v7416_v45 = vpack.i.bf16 %v9537_v58, %v9528_v3  ;;  %v921_v26 = vsel %vm383_vm1, 0.0, %v920_v22  ;;  %v1854_v11 = vrot.slane %v7224_v44, 4  ;;  %v1857_v61 = vsel %vm383_vm1, %v7224_v44, %v1856_v57  ;;  %v9574_v44 = vpop.permute.xlu2 %7247 }
 0x168   : > { %v9560_v46 = vperm.slane %v1869_v32, %v8623_v59  ;;  %v9563_v28 = vperm.slane %v1925_v48, %v8623_v59  ;;  %7397 = vrot.lane.b32.xlu1 %v7396_v29, %s8355_s19  ;;  %v7401_v14 = vpack.i.bf16 %v921_v26, %v865_v38  ;;  %v1474_v37 = vsel %vm383_vm1, %v1473_v51, %v9515_v9 }
 0x169   : > { %7417 = vrot.lane.b32.xlu2 %v7416_v45, %s8351_s8  ;;  %v1530_v12 = vsel %vm383_vm1, %v1529_v31, %v9496_v34  ;;  %v1257_v57 = vrot.slane %v9354_v24, 4  ;;  %v9577_v32 = vperm.slane %v1474_v37, %v8675_v35  ;;  %v1313_v1 = vrot.slane %v9358_v4, 4  ;;  %v9594_v45 = vpop.permute.xlu0 %2048 }
 0x16a   : > { %v9580_v48 = vperm.slane %v1530_v12, %v8675_v35  ;;  %v1267_v26 = vrot.slane %v9446_v6, 4  ;;  %v15086_v29 = vunpack.i.h.bf16 %v9325_v23  ;;  %v9588_v31 = vperm.slane %v1913_v53, %v8623_v59 }
 0x16b   : > { %7402 = vrot.lane.b32.xlu0 %v7401_v14, %s8356_s15  ;;  %v1258_v9 = vsel %vm383_vm1, %v9431_v27, %v1257_v57  ;;  %v1323_v22 = vrot.slane %v9439_v36, 4  ;;  %v1890_v25 = vrot.slane %v9560_v46, 4  ;;  %v1946_v53 = vrot.slane %v9563_v28, 4 }
 0x16c   : > { %v1911_v51 = vsel %vm383_vm1, %v1910_v47, %v15086_v29  ;;  %v9598_v6 = vperm.slane %v1258_v9, %v8675_v35  ;;  %v1314_v47 = vsel %vm383_vm1, %v9405_v55, %v1313_v1  ;;  %v1268_v38 = vsel %vm383_vm1, %v1267_v26, %v9313_v42 }
 0x16d   : > { %v9606_v14 = vperm.slane %v1314_v47, %v8675_v35  ;;  %v9609_v36 = vperm.slane %v1268_v38, %v8675_v35  ;;  %v1324_v37 = vsel %vm383_vm1, %v1323_v22, %v9316_v19  ;;  %v1531_v12 = vrot.slane %v9496_v34, 4 }
 0x16e   : > { %v9566_v8 = vpop.permute.xlu1 %7242  ;;  %v1865_v57 = vperm.slane %v1857_v61, %v8623_v59  ;;  %v7426_v1 = vpack.i.bf16 %v9580_v48, %v9577_v32  ;;  %v9618_v42 = vperm.slane %v1324_v37, %v8675_v35  ;;  %v9622_v26 = vperm.slane %v9508_v0, %v8623_v59 }
 0x16f   : > { %15085 = vst [vmem:[#allocation25_spill] sm:$0xff] %v9566_v8  ;;  %v15087_v29 = vunpack.i.l.bf16 %v9325_v23  ;;  %v7406_v19 = vpack.i.bf16 %v9606_v14, %v9598_v6  ;;  %v15088_v34 = vrot.slane %v9349_v10, 4  ;;  %v9634_v22 = vperm.slane %v1911_v51, %v8623_v59 }
 0x170   : > { %v1948_v47 = vrot.slane %v9588_v31, 4  ;;  %v15089_v0 = vunpack.i.l.bf16 %v9389_v41  ;;  %v1891_v23 = vsel %vm383_vm1, %v1890_v25, %v1865_v57  ;;  %v15090_v37 = vunpack.i.h.bf16 %v9389_v41 }
 0x171   : > { %v1855_v9 = vsel %vm383_vm1, %v1854_v11, %v15087_v29  ;;  %v2075_v61 = vsel %vm383_vm1, %v9594_v45, %v15088_v34  ;;  %7427 = vrot.lane.b32.xlu2 %v7426_v1, %s8350_s29  ;;  %7407 = vrot.lane.b32.xlu1 %v7406_v19, %s8352_s17  ;;  %v7411_v51 = vpack.i.bf16 %v9618_v42, %v9609_v36  ;;  %v1936_v30 = vrot.slane %v9634_v22, 4 }
 0x172   : > { %v1866_v38 = vrot.slane %v15089_v0, 4  ;;  %v1922_v29 = vrot.slane %v15090_v37, 4  ;;  %v1947_v34 = vsel %vm383_vm1, %v1946_v53, %v9588_v31  ;;  %v1476_v0 = vsel %vm383_vm1, %v9449_v7, %v1475_v63 }
 0x173   : > { %v9653_v1 = vperm.slane %v1855_v9, %v8623_v59  ;;  %v9656_v25 = vperm.slane %v2075_v61, %v8623_v59  ;;  %v9659_v41 = vperm.slane %v1891_v23, %v8675_v35  ;;  %v9662_v19 = vperm.slane %v1947_v34, %v8675_v35  ;;  %7412 = vrot.lane.b32.xlu0 %v7411_v51, %s8350_s29  ;;  %v9676_v34 = vpop.permute.xlu2 %7262 }
 0x174   : > { %v9666_v37 = vperm.slane %v1476_v0, %v8675_v35  ;;  %v1532_v7 = vsel %vm383_vm1, %v9452_v21, %v1531_v12  ;;  %v1463_v63 = vrot.slane %v9622_v26, 4  ;;  %v1519_v31 = vrot.slane %v9493_v15, 4  ;;  %15092 = vst [vmem:[#allocation26_spill] sm:$0xff] %v9676_v34 }
 0x175   : > { %v1892_v53 = vrot.slane %v1865_v57, 4  ;;  %v15091_v9 = vunpack.i.l.bf16 %v9269_v17  ;;  %v2062_v23 = vrot.slane %v9428_v13, 4  ;;  %v9679_v51 = vperm.slane %v1532_v7, %v8675_v35 }
 0x176   : > { %v9641_v11 = vpop.permute.xlu1 %7252  ;;  %v15093_v0 = vunpack.i.h.bf16 %v9269_v17  ;;  %v2060_v12 = vrot.slane %v9503_v50, 4  ;;  %v1464_v57 = vsel %vm383_vm1, %v9487_v2, %v1463_v63  ;;  %v1520_v18 = vsel %vm383_vm1, %v9468_v43, %v1519_v31 }
 0x177   : > { %v1867_v61 = vsel %vm383_vm1, %v1866_v38, %v15091_v9  ;;  %v9689_v38 = vpop.permute.xlu0 %7232  ;;  %v2063_v9 = vsel %vm383_vm1, %v9503_v50, %v2062_v23  ;;  %v7441_v7 = vpack.i.bf16 %v9662_v19, %v9659_v41  ;;  %v9696_v17 = vperm.slane %v1464_v57, %v8675_v35 }
 0x178   : > { %v1923_v21 = vsel %vm383_vm1, %v1922_v29, %v15093_v0  ;;  %v9699_v29 = vperm.slane %v1520_v18, %v8675_v35  ;;  %v9702_v0 = vperm.slane %v1867_v61, %v8623_v59  ;;  %v2096_v63 = vrot.slane %v9656_v25, 4 }
 0x179   : > { %v7431_v31 = vpack.i.bf16 %v9679_v51, %v9666_v37  ;;  %v9708_v5 = vperm.slane %v1923_v21, %v8623_v59  ;;  %7442 = vrot.lane.b32.xlu2 %v7441_v7, %s8350_s29  ;;  %v1893_v50 = vsel %vm383_vm1, %v9560_v46, %v1892_v53  ;;  %v1949_v18 = vsel %vm383_vm1, %v9563_v28, %v1948_v47 }
 0x17a   : > { %v2071_v61 = vperm.slane %v2063_v9, %v8623_v59  ;;  %v7421_v57 = vpack.i.bf16 %v9699_v29, %v9696_v17  ;;  %v1880_v21 = vrot.slane %v9653_v1, 4  ;;  %v2061_v7 = vsel %vm383_vm1, %v2060_v12, %v9428_v13 }
 0x17b   : > { %7432 = vrot.lane.b32.xlu1 %v7431_v31, %s8351_s8  ;;  %v9728_v46 = vperm.slane %v1893_v50, %v8675_v35  ;;  %v9731_v47 = vperm.slane %v1949_v18, %v8675_v35  ;;  %v1517_v9 = vrot.slane %v9468_v43, 4  ;;  %v1937_v13 = vsel %vm383_vm1, %v9708_v5, %v1936_v30 }
 0x17c   : > { %7422 = vrot.lane.b32.xlu0 %v7421_v57, %s8352_s17  ;;  %v2097_v28 = vsel %vm383_vm1, %v2096_v63, %v2071_v61  ;;  %v1881_v53 = vsel %vm383_vm1, %v9702_v0, %v1880_v21  ;;  %v9739_v12 = vperm.slane %v2061_v7, %v8623_v59  ;;  %v2072_v31 = vrot.slane %v9594_v45, 4  ;;  %v9749_v57 = vpop.permute.xlu2 %7267 }
 0x17d   : > { %v9743_v63 = vperm.slane %v1881_v53, %v8675_v35  ;;  %v9746_v50 = vperm.slane %v1937_v13, %v8675_v35  ;;  %v1461_v18 = vrot.slane %v9487_v2, 4  ;;  %v9752_v43 = vperm.slane %v2097_v28, %v8675_v35 }
 0x17e   : > { %v9715_v23 = vpop.permute.xlu1 %7272  ;;  %v1281_v30 = vrot.slane %v9598_v6, 4  ;;  %v1337_v21 = vrot.slane %v9606_v14, 4  ;;  %v1311_v7 = vrot.slane %v9405_v55, 4  ;;  %v1255_v45 = vrot.slane %v9431_v27, 4 }
 0x17f   : > { %v7446_v53 = vpack.i.bf16 %v9731_v47, %v9728_v46  ;;  %v9760_v13 = vpop.permute.xlu0 %7257  ;;  %v2098_v33 = vrot.slane %v2071_v61, 4  ;;  %v2073_v6 = vsel %vm383_vm1, %v2072_v31, %v9349_v10  ;;  %v7436_v55 = vpack.i.bf16 %v9746_v50, %v9743_v63 }
 0x180   : > { %v2086_v27 = vrot.slane %v9739_v12, 4  ;;  %v1282_v14 = vsel %vm383_vm1, 0.0, %v1281_v30  ;;  %v1338_v28 = vsel %vm383_vm1, 0.0, %v1337_v21  ;;  %v1462_v61 = vsel %vm383_vm1, %v1461_v18, %v9622_v26 }
 0x181   : > { %2185 = vrot.lane.b32.xlu2 %v9752_v43, %s8350_s29  ;;  %v9780_v10 = vperm.slane %v1462_v61, %v8675_v35  ;;  %v1312_v30 = vsel %vm383_vm1, %v1311_v7, %v9358_v4  ;;  %v9790_v21 = vperm.slane %v2073_v6, %v8623_v59  ;;  %v7456_v26 = vpack.i.bf16 %v1338_v28, %v1282_v14 }
 0x182   : > { %v1878_v61 = vrot.slane %v9702_v0, 4 }
 0x183   : > { %7447 = vrot.lane.b32.xlu1 %v7446_v53, %s8351_s8  ;;  %v1256_v53 = vsel %vm383_vm1, %v1255_v45, %v9354_v24  ;;  %v1485_v4 = vrot.slane %v9780_v10, 4 }
 0x184   : > { %7437 = vrot.lane.b32.xlu0 %v7436_v55, %s8352_s17  ;;  %v9797_v18 = vperm.slane %v1256_v53, %v8675_v35  ;;  %v9807_v45 = vpop.permute.xlu2 %7292  ;;  %v1934_v53 = vrot.slane %v9708_v5, 4 }
 0x185   : > { %v1486_v14 = vsel %vm383_vm1, 0.0, %v1485_v4  ;;  %v1879_v4 = vsel %vm383_vm1, %v1878_v61, %v9653_v1 }
 0x186   : > { %v9764_v2 = vpop.permute.xlu1 %7282  ;;  %15095 = vst [vmem:[#allocation28_spill] sm:$0xff] %v9797_v18  ;;  %v1279_v55 = vrot.slane %v9797_v18, 4  ;;  %v1906_v18 = vrot.slane %v9659_v41, 4 }
 0x187   : > { %15094 = vst [vmem:[#allocation27_spill] sm:$0xff] %v9764_v2  ;;  %v1518_v2 = vsel %vm383_vm1, %v1517_v9, %v9493_v15  ;;  %v2099_v15 = vsel %vm383_vm1, %v9656_v25, %v2098_v33  ;;  %v2087_v9 = vsel %vm383_vm1, %v9790_v21, %v2086_v27  ;;  %v9817_v6 = vpop.permute.xlu0 %7277 }
 0x188   : > { %v9783_v31 = vperm.slane %v1518_v2, %v8675_v35  ;;  %v9800_v2 = vperm.slane %v1312_v30, %v8675_v35  ;;  %v9803_v24 = vperm.slane %v2099_v15, %v8675_v35  ;;  %v9815_v25 = vperm.slane %v2087_v9, %v8675_v35 }
 0x189   : > { %7457 = vrot.lane.b32.xlu2 %v7456_v26, %s8354_s18  ;;  %v1280_v15 = vsel %vm383_vm1, 0.0, %v1279_v55  ;;  %v1491_v9 = vrot.slane %v9666_v37, 4  ;;  %v1285_v55 = vrot.slane %v9528_v3, 4 }
 0x18a   : > { %15096 = vst [vmem:[#allocation29_spill] sm:$0xff] %v9800_v2  ;;  %v1541_v7 = vrot.slane %v9783_v31, 4  ;;  %v1335_v27 = vrot.slane %v9800_v2, 4  ;;  %v1547_v2 = vrot.slane %v9679_v51, 4 }
 0x18b   : > { %2193 = vrot.lane.b32.xlu1 %v9803_v24, %s8351_s8  ;;  %v1492_v51 = vsel %vm383_vm1, 0.0, %v1491_v9  ;;  %v1545_v9 = vrot.slane %v9580_v48, 4 }
 0x18c   : > { %2177 = vrot.lane.b32.xlu0 %v9815_v25, %s8352_s17  ;;  %v1542_v28 = vsel %vm383_vm1, 0.0, %v1541_v7  ;;  %v1336_v26 = vsel %vm383_vm1, 0.0, %v1335_v27  ;;  %v1935_v7 = vsel %vm383_vm1, %v1934_v53, %v9634_v22  ;;  %v1341_v27 = vrot.slane %v9537_v58, 4 }
 0x18d   : > { %v7471_v30 = vpack.i.bf16 %v1542_v28, %v1486_v14  ;;  %v7451_v5 = vpack.i.bf16 %v1336_v26, %v1280_v15  ;;  %v9838_v14 = vpop.permute.xlu2 %7307  ;;  %v1548_v1 = vsel %vm383_vm1, 0.0, %v1547_v2  ;;  %v9848_v28 = vperm.slane %v1879_v4, %v8675_v35 }
 0x18e   : > { %v9810_v33 = vpop.permute.xlu1 %7297  ;;  %v9851_v22 = vperm.slane %v1935_v7, %v8675_v35  ;;  %v7486_v61 = vpack.i.bf16 %v1548_v1, %v1492_v51  ;;  %v1286_v53 = vsel %vm383_vm1, 0.0, %v1285_v55  ;;  %v1342_v3 = vsel %vm383_vm1, 0.0, %v1341_v27 }
 0x18f   : > { %v9843_v37 = vpop.permute.xlu0 %7287  ;;  %15097 = vst [vmem:[#allocation30_spill] sm:$0xff] %v9848_v28  ;;  %v1902_v58 = vrot.slane %v9848_v28, 4  ;;  %v7466_v2 = vpack.i.bf16 %v1342_v3, %v1286_v53  ;;  %v1489_v26 = vrot.slane %v9577_v32, 4  ;;  %v2116_v4 = vrot.slane %v9420_v54, 4 }
 0x190   : > { %15098 = vst [vmem:[#allocation31_spill] sm:$0xff] %v9851_v22  ;;  %v1546_v48 = vsel %vm383_vm1, 0.0, %v1545_v9  ;;  %v1964_v53 = vrot.slane %v9731_v47, 4  ;;  %v7235_v28 = vunpack.i.h.bf16 %v9689_v38 }
 0x191   : > { %7472 = vrot.lane.b32.xlu2 %v7471_v30, %s8353_s11  ;;  %v1958_v30 = vrot.slane %v9851_v22, 4  ;;  %v1903_v7 = vsel %vm383_vm1, 0.0, %v1902_v58  ;;  %v2117_v27 = vsel %vm383_vm1, %v2116_v4, %v9436_v20  ;;  %v1490_v32 = vsel %vm383_vm1, 0.0, %v1489_v26 }
 0x192   : > { %v2123_v3 = vperm.slane %v2117_v27, %v8623_v59  ;;  %v2084_v58 = vrot.slane %v9790_v21, 4  ;;  %v7234_v22 = vunpack.i.l.bf16 %v9689_v38 }
 0x194   : > { %7452 = vrot.lane.b32.xlu0 %v7451_v5, %s8353_s11  ;;  %v1959_v5 = vsel %vm383_vm1, 0.0, %v1958_v30  ;;  %v2142_v9 = vrot.slane %v2123_v3, 4 }
 0x195   : > { %v9866_v55 = vpop.permute.xlu2 %7322  ;;  %v7491_v1 = vpack.i.bf16 %v1959_v5, %v1903_v7  ;;  %v1962_v7 = vrot.slane %v9662_v19, 4  ;;  %v2085_v5 = vsel %vm383_vm1, %v2084_v58, %v9739_v12  ;;  %v1907_v19 = vsel %vm383_vm1, 0.0, %v1906_v18 }
 0x196   : > { %v9836_v0 = vpop.permute.xlu1 %7312  ;;  %v1283_v12 = vrot.slane %v9609_v36, 4  ;;  %v1339_v58 = vrot.slane %v9618_v42, 4  ;;  %v2112_v36 = vrot.slane %v9752_v43, 4  ;;  %v2118_v43 = vrot.slane %v9436_v20, 4 }
 0x197   : > { %v9870_v51 = vpop.permute.xlu0 %7302 }
 0x199   : > { %7487 = vrot.lane.b32.xlu2 %v7486_v61, %s8356_s15  ;;  %v1908_v61 = vrot.slane %v9728_v46, 4  ;;  %v1965_v46 = vsel %vm383_vm1, 0.0, %v1964_v53 }
 0x19b   : > { %v1909_v26 = vsel %vm383_vm1, 0.0, %v1908_v61  ;;  %v9897_v61 = vperm.slane %v2085_v5, %v8675_v35 }
 0x19c   : > { %7467 = vrot.lane.b32.xlu0 %v7466_v2, %s8356_s15  ;;  %v7481_v2 = vpack.i.bf16 %v1546_v48, %v1490_v32  ;;  %v7506_v41 = vpack.i.bf16 %v1965_v46, %v1909_v26  ;;  %v1340_v26 = vsel %vm383_vm1, 0.0, %v1339_v58  ;;  %v2119_v58 = vsel %vm383_vm1, %v9420_v54, %v2118_v43 }
 0x19d   : > { %v9886_v21 = vpop.permute.xlu2 %7337  ;;  %15099 = vst [vmem:[#allocation32_spill] sm:$0xff] %v9897_v61  ;;  %v2108_v18 = vrot.slane %v9897_v61, 4 }
 0x19e   : > { %v9858_v15 = vpop.permute.xlu1 %7327 }
 0x19f   : > { %v9894_v48 = vpop.permute.xlu0 %7317  ;;  %v2109_v42 = vsel %vm383_vm1, 0.0, %v2108_v18 }
 0x1a1   : > { %7492 = vrot.lane.b32.xlu2 %v7491_v1, %s8353_s11  ;;  %v1963_v1 = vsel %vm383_vm1, 0.0, %v1962_v7  ;;  %v1284_v7 = vsel %vm383_vm1, 0.0, %v1283_v12  ;;  %v2114_v12 = vrot.slane %v9803_v24, 4 }
 0x1a3   : > { %v2115_v20 = vsel %vm383_vm1, 0.0, %v2114_v12 }
 0x1a4   : > { %7482 = vrot.lane.b32.xlu0 %v7481_v2, %s8355_s19  ;;  %v7501_v2 = vpack.i.bf16 %v1963_v1, %v1907_v19  ;;  %v2130_v19 = vrot.slane %v9512_v39, 4 }
 0x1a6   : > { %v2051_v30 = vpop.permute.xlu1 %2050 }
 0x1a7   : > { %v2128_v4 = vrot.slane %v2051_v30, 4  ;;  %v9920_v1 = vpop.permute.xlu0 %7332 }
 0x1a9   : > { %v2129_v47 = vsel %vm383_vm1, %v2128_v4, %v9512_v39  ;;  %7507 = vrot.lane.b32.xlu2 %v7506_v41, %s8356_s15  ;;  %v1543_v41 = vrot.slane %v9699_v29, 4 }
 0x1aa   : > { %v2135_v27 = vperm.slane %v2129_v47, %v8623_v59  ;;  %v9909_v47 = vpop.permute.xlu2 %7362 }
 0x1ab   : > { %v1544_v39 = vsel %vm383_vm1, 0.0, %v1543_v41 }
 0x1ac   : > { %v2143_v32 = vsel %vm383_vm1, %v2135_v27, %v2142_v9  ;;  %v2140_v4 = vrot.slane %v2135_v27, 4  ;;  %7502 = vrot.lane.b32.xlu0 %v7501_v2, %s8355_s19  ;;  %v7461_v9 = vpack.i.bf16 %v1340_v26, %v1284_v7  ;;  %v1487_v27 = vrot.slane %v9696_v17, 4 }
 0x1ad   : > { %v2151_v53 = vperm.slane %v2143_v32, %v8675_v35  ;;  %v2131_v32 = vsel %vm383_vm1, %v2051_v30, %v2130_v19  ;;  %v1904_v30 = vrot.slane %v9743_v63, 4  ;;  %v1960_v7 = vrot.slane %v9746_v50, 4 }
 0x1ae   : > { %v2141_v46 = vsel %vm383_vm1, %v2140_v4, %v2123_v3  ;;  %v2113_v3 = vsel %vm383_vm1, 0.0, %v2112_v36  ;;  %v1488_v29 = vsel %vm383_vm1, 0.0, %v1487_v27  ;;  %v2139_v2 = vperm.slane %v2131_v32, %v8623_v59 }
 0x1af   : > { %2205 = vrot.lane.b32.xlu1 %v2151_v53, %s8352_s17  ;;  %v9915_v5 = vperm.slane %v2141_v46, %v8675_v35  ;;  %v7476_v4 = vpack.i.bf16 %v1544_v39, %v1488_v29  ;;  %v2127_v26 = vperm.slane %v2119_v58, %v8623_v59  ;;  %v2166_v54 = vrot.slane %v2151_v53, 4 }
 0x1b0   : > { %v9942_v46 = vpop.permute.xlu0 %7347  ;;  %v2152_v36 = vrot.slane %v2139_v2, 4  ;;  %v7254_v59 = vunpack.i.l.bf16 %v9641_v11 }
 0x1b1   : > { %2173 = vrot.lane.b32.xlu2 %v2109_v42, %s8353_s11  ;;  %15100 = vst [vmem:[#allocation33_spill] sm:$0xff] %v9915_v5  ;;  %v2164_v17 = vrot.slane %v9915_v5, 4  ;;  %v1905_v42 = vsel %vm383_vm1, 0.0, %v1904_v30  ;;  %v2167_v27 = vsel %vm383_vm1, 0.0, %v2166_v54  ;;  %v2154_v41 = vrot.slane %v2127_v26, 4 }
 0x1b2   : > { %v9935_v18 = vpop.permute.xlu2 %7377  ;;  %v2153_v63 = vsel %vm383_vm1, %v2152_v36, %v2127_v26  ;;  %v7299_v5 = vunpack.i.l.bf16 %v9810_v33 }
 0x1b3   : > { %v2165_v24 = vsel %vm383_vm1, 0.0, %v2164_v17  ;;  %v2155_v50 = vsel %vm383_vm1, %v2139_v2, %v2154_v41  ;;  %v2159_v43 = vperm.slane %v2153_v63, %v8675_v35  ;;  %v9959_v12 = vpop.permute.xlu1 %7342  ;;  %v2110_v17 = vrot.slane %v9815_v25, 4 }
 0x1b4   : > { %2189 = vrot.lane.b32.xlu0 %v2113_v3, %s8355_s19  ;;  %v2163_v32 = vperm.slane %v2155_v50, %v8675_v35  ;;  %v7345_v38 = vunpack.i.h.bf16 %v9959_v12 }
 0x1b5   : > { %v2111_v39 = vsel %vm383_vm1, 0.0, %v2110_v17 }
 0x1b6   : > { %v2170_v29 = vrot.slane %v2163_v32, 4 }
 0x1b7   : > { %7462 = vrot.lane.b32.xlu1 %v7461_v9, %s8355_s19  ;;  %v1961_v9 = vsel %vm383_vm1, 0.0, %v1960_v7 }
 0x1b8   : > { %v7496_v19 = vpack.i.bf16 %v1961_v9, %v1905_v42  ;;  %v2171_v58 = vsel %vm383_vm1, 0.0, %v2170_v29 }
 0x1b9   : > { %2197 = vrot.lane.b32.xlu2 %v2115_v20, %s8356_s15 }
 0x1ba   : > { %v9956_v3 = vpop.permute.xlu2 %7392 }
 0x1bc   : > { %2201 = vrot.lane.b32.xlu0 %v2165_v24, %s8353_s11  ;;  %v9972_v24 = vpop.permute.xlu1 %7352 }
 0x1bd   : > { %v9952_v53 = vpop.permute.xlu0 %7357 }
 0x1bf   : > { %7477 = vrot.lane.b32.xlu1 %v7476_v4, %s8354_s18  ;;  %v2168_v4 = vrot.slane %v2159_v43, 4 }
 0x1c1   : > { %2209 = vrot.lane.b32.xlu2 %v2167_v27, %s8354_s18  ;;  %v2169_v25 = vsel %vm383_vm1, 0.0, %v2168_v4  ;;  %v7249_v4 = vunpack.i.l.bf16 %v9574_v44 }
 0x1c3   : > { %v9970_v20 = vpop.permute.xlu2 %7417 }
 0x1c4   : > { %2213 = vrot.lane.b32.xlu0 %v2159_v43, %s8350_s29 }
 0x1c5   : > { %v9967_v2 = vpop.permute.xlu0 %7372 }
 0x1c7   : > { %7497 = vrot.lane.b32.xlu1 %v7496_v19, %s8354_s18  ;;  %v9980_v26 = vpop.permute.xlu1 %7367 }
 0x1c9   : > { %2221 = vrot.lane.b32.xlu2 %v2163_v32, %s8351_s8 }
 0x1cb   : > { %v9978_v7 = vpop.permute.xlu2 %7427 }
 0x1cc   : > { %2225 = vrot.lane.b32.xlu0 %v2171_v58, %s8356_s15  ;;  %v7250_v58 = vunpack.i.h.bf16 %v9574_v44  ;;  %v552_v44 = vsel %vm551_vm6, %v8983_v56, %v7249_v4  ;;  %v1193_v4 = vsel %vm551_vm6, %v9086_v49, %v7299_v5  ;;  %v7320_v49 = vunpack.i.h.bf16 %v9894_v48 }
 0x1cd   : > { %v7319_v5 = vunpack.i.l.bf16 %v9894_v48  ;;  %v7325_v48 = vunpack.i.h.bf16 %v9866_v55 }
 0x1ce   : > { %v565_v61 = vsel %vm551_vm6, %v8986_v16, %v7250_v58  ;;  %v7244_v58 = vunpack.i.l.bf16 %v9566_v8 }
 0x1cf   : > { %2181 = vrot.lane.b32.xlu1 %v2111_v39, %s8354_s18 }
 0x1d0   : > { %v9986_v42 = vpop.permute.xlu1 %7382 }
 0x1d3   : > { %v9984_v36 = vpop.permute.xlu2 %7442 }
 0x1d5   : > { %v9976_v30 = vpop.permute.xlu0 %7387 }
 0x1d7   : > { %2217 = vrot.lane.b32.xlu1 %v2169_v25, %s8355_s19 }
 0x1da   : > { %v9992_v41 = vpop.permute.xlu1 %7397 }
 0x1db   : > { %v9990_v27 = vpop.permute.xlu2 %2185 }
 0x1dc   : > { %15101 = vst [vmem:[#allocation34_spill] sm:$0xff] %v9990_v27  ;;  %v7300_v27 = vunpack.i.h.bf16 %v9810_v33  ;;  %v7270_v33 = vunpack.i.h.bf16 %v9749_v57 }
 0x1dd   : > { %v9982_v54 = vpop.permute.xlu0 %7402 }
 0x1de   : > { %v1200_v56 = vsel %vm551_vm6, %v9089_v40, %v7300_v27 }
 0x1df   : > { %v1201_v27 = vsel %vm553_vm7, %v1200_v56, %v7270_v33  ;;  %v7324_v33 = vunpack.i.l.bf16 %v9866_v55 }
 0x1e3   : > { %v9996_v50 = vpop.permute.xlu2 %7457  ;;  %v9998_v19 = vpop.permute.xlu1 %7407 }
 0x1e5   : > { %v9988_v9 = vpop.permute.xlu0 %7412 }
 0x1eb   : > { %v10004_v17 = vpop.permute.xlu2 %7472 }
 0x1ed   : > { %v10006_v29 = vpop.permute.xlu1 %7432 }
 0x1ee   : > { %v9994_v63 = vpop.permute.xlu0 %7422 }
 0x1f3   : > { %v10012_v25 = vpop.permute.xlu2 %7487 }
 0x1f4   : > { %15105 = vst [vmem:[#allocation38_spill] sm:$0xff] %v10012_v25  ;;  %v7269_v25 = vunpack.i.l.bf16 %v9749_v57 }
 0x1f5   : > { %v10014_v35 = vpop.permute.xlu1 %7447 }
 0x1f6   : > { %v10000_v43 = vpop.permute.xlu0 %7437  ;;  %15106 = vst [vmem:[#allocation39_spill] sm:$0xff] %v10014_v35  ;;  %v566_v35 = vsel %vm553_vm7, %v565_v61, %v7235_v28  ;;  %v1194_v40 = vsel %vm553_vm7, %v1193_v4, %v7269_v25  ;;  %v7260_v28 = vunpack.i.h.bf16 %v9760_v13  ;;  %v7305_v61 = vunpack.i.h.bf16 %v9870_v51 }
 0x1f7   : > { %15102 = vst [vmem:[#allocation35_spill] sm:$0xff] %v10000_v43  ;;  %v7255_v43 = vunpack.i.h.bf16 %v9641_v11  ;;  %v7279_v4 = vunpack.i.l.bf16 %v9817_v6  ;;  %v1816_v11 = vsel %vm551_vm6, %v9103_v52, %v7319_v5  ;;  %v7314_v52 = vunpack.i.l.bf16 %v9836_v0 }
 0x1f9   : > { %v567_v8 = vsel %vm555_vm8, %v566_v35, %v7255_v43  ;;  %v7275_v43 = vunpack.i.h.bf16 %v9715_v23 }
 0x1fb   : > { %v10054_v35 = vpop.permute.xlu2 %7492 }
 0x1fd   : > { %v10058_v25 = vpop.permute.xlu1 %2193 }
 0x1fe   : > { %v10002_v32 = vpop.permute.xlu0 %2177 }
 0x1ff   : > { %15103 = vst [vmem:[#allocation36_spill] sm:$0xff] %v10002_v32  ;;  %v7239_v32 = vunpack.i.l.bf16 %v9498_v60 }
 0x206   : > { %v10008_v39 = vpop.permute.xlu0 %7452 }
 0x207   : > { %15104 = vst [vmem:[#allocation37_spill] sm:$0xff] %v10008_v39  ;;  %v554_v39 = vsel %vm553_vm7, %v552_v44, %v7234_v22  ;;  %v7259_v22 = vunpack.i.l.bf16 %v9760_v13  ;;  %v1202_v13 = vsel %vm555_vm8, %v1201_v27, %v7305_v61  ;;  %v7289_v61 = vunpack.i.l.bf16 %v9843_v37 }
 0x20e   : > { %v10031_v16 = vpop.permute.xlu0 %7467 }
 0x20f   : > { %15107 = vst [vmem:[#allocation40_spill] sm:$0xff] %v10031_v16  ;;  %v556_v16 = vsel %vm555_vm8, %v554_v39, %v7254_v59  ;;  %v7304_v59 = vunpack.i.l.bf16 %v9870_v51  ;;  %v7274_v39 = vunpack.i.l.bf16 %v9715_v23  ;;  %v1823_v23 = vsel %vm551_vm6, %v9106_v62, %v7320_v49 }
 0x210   : > { %v558_v44 = vsel %vm557_vm9, %v556_v16, %v7239_v32  ;;  %v15108_v32 = vld [vmem:[#allocation27_spill] sm:$0xff] }
 0x211   : > { %v1195_v56 = vsel %vm555_vm8, %v1194_v40, %v7304_v59  ;;  %v7285_v16 = vunpack.i.h.bf16 %v15108_v32  ;;  %v7284_v55 = vunpack.i.l.bf16 %v15108_v32  ;;  %v560_v27 = vsel %vm559_vm10, %v558_v44, %v7259_v22 }
 0x212   : > { %v7290_v40 = vunpack.i.h.bf16 %v9843_v37  ;;  %v1203_v59 = vsel %vm557_vm9, %v1202_v13, %v7275_v43  ;;  %v1196_v62 = vsel %vm557_vm9, %v1195_v56, %v7274_v39  ;;  %v7330_v32 = vunpack.i.h.bf16 %v9858_v15  ;;  %v15113_v13 = vld [vmem:[#allocation21_spill] sm:$0xff] }
 0x213   : > { %v1824_v5 = vsel %vm553_vm7, %v1823_v23, %v7285_v16  ;;  %v1817_v51 = vsel %vm553_vm7, %v1816_v11, %v7284_v55  ;;  %v562_v22 = vsel %vm561_vm11, %v560_v27, %v7244_v58  ;;  %v15109_v44 = vunpack.i.h.bf16 %v9498_v60  ;;  %v10101_v27 = vpop.permute.xlu2 %7507 }
 0x214   : > { %v7340_v43 = vunpack.i.h.bf16 %v9886_v21  ;;  %v7329_v39 = vunpack.i.l.bf16 %v9858_v15  ;;  %v7334_v56 = vunpack.i.l.bf16 %v9920_v1  ;;  %v7339_v23 = vunpack.i.l.bf16 %v9886_v21 }
 0x215   : > { %v568_v37 = vsel %vm557_vm9, %v567_v8, %v15109_v44  ;;  %v7370_v16 = vunpack.i.h.bf16 %v9980_v26  ;;  %v7369_v58 = vunpack.i.l.bf16 %v9980_v26  ;;  %v15110_v15 = vunpack.i.l.bf16 %v9676_v34 }
 0x216   : > { %v10071_v57 = vpop.permute.xlu0 %7482  ;;  %v10109_v21 = vsel %vm559_vm10, %v568_v37, %v7260_v28  ;;  %v1818_v60 = vsel %vm555_vm8, %v1817_v51, %v7324_v33  ;;  %v15112_v28 = vld [vmem:[#allocation22_spill] sm:$0xff]  ;;  %v15114_v33 = vunpack.i.l.bf16 %v9838_v14  ;;  %v7354_v8 = vunpack.i.l.bf16 %v9972_v24 }
 0x217   : > { %v10106_v44 = vsel %vm563_vm12, %v562_v22, %v15110_v15  ;;  %15111 = vst [vmem:[#allocation27_spill] sm:$0xff] %v10109_v21  ;;  %v7344_v22 = vunpack.i.l.bf16 %v9959_v12  ;;  %v7355_v15 = vunpack.i.h.bf16 %v9972_v24  ;;  %v779_v37 = vsel %vm551_vm6, %v15112_v28, %v7370_v16 }
 0x218   : > { %v772_v26 = vsel %vm551_vm6, %v15113_v13, %v7369_v58  ;;  %v1197_v51 = vsel %vm559_vm10, %v1196_v62, %v15114_v33  ;;  %v7360_v11 = vunpack.i.h.bf16 %v9952_v53  ;;  %v1819_v12 = vsel %vm557_vm9, %v1818_v60, %v7289_v61 }
 0x219   : > { %v1825_v49 = vsel %vm555_vm8, %v1824_v5, %v7325_v48  ;;  %v7375_v21 = vunpack.i.h.bf16 %v9967_v2  ;;  %v7374_v16 = vunpack.i.l.bf16 %v9967_v2  ;;  %v1820_v13 = vsel %vm559_vm10, %v1819_v12, %v7329_v39  ;;  %v15118_v12 = vld [vmem:[#allocation24_spill] sm:$0xff] }
 0x21a   : > { %v15115_v58 = vunpack.i.h.bf16 %v9838_v14  ;;  %v773_v62 = vsel %vm553_vm7, %v772_v26, %v7339_v23  ;;  %v780_v24 = vsel %vm553_vm7, %v779_v37, %v7340_v43  ;;  %v7390_v33 = vunpack.i.h.bf16 %v9976_v30  ;;  %v2326_v43 = vld [vmem:[%s14795_s2] sm:$0xf] }
 0x21b   : > { %v1198_v61 = vsel %vm561_vm11, %v1197_v51, %v7279_v4  ;;  %v7359_v48 = vunpack.i.l.bf16 %v9952_v53  ;;  %v7389_v5 = vunpack.i.l.bf16 %v9976_v30  ;;  %v1826_v14 = vsel %vm557_vm9, %v1825_v49, %v7290_v40  ;;  %v15130_v51 = vld [vmem:[#allocation35_spill] sm:$0xff]  ;;  %v7054_v53 = vld [vmem:[%s14796_s3 + $0x4] sm:$0xf] }
 0x21c   : > { %v1204_v28 = vsel %vm559_vm10, %v1203_v59, %v15115_v58  ;;  %v10148_v2 = vsel %vm563_vm12, %v1198_v61, %v7314_v52  ;;  %v15116_v59 = vunpack.i.l.bf16 %v9807_v45  ;;  %v1827_v4 = vsel %vm559_vm10, %v1826_v14, %v7330_v32 }
 0x21d   : > { %v15117_v23 = vunpack.i.h.bf16 %v9817_v6  ;;  %v774_v40 = vsel %vm555_vm8, %v773_v62, %v7374_v16  ;;  %v781_v49 = vsel %vm555_vm8, %v780_v24, %v7375_v21  ;;  %v8357_v37 = vmov 0   ;;  %v15120_v16 = vld [vmem:[#allocation23_spill] sm:$0xff]  ;;  %v4504_v6 = vld [vmem:[%s14799_s6] sm:$0xf] }
 0x21e   : > { %v10124_v34 = vpop.permute.xlu0 %7502  ;;  %v1821_v39 = vsel %vm561_vm11, %v1820_v13, %v15116_v59  ;;  %7511 = vset.pattern.permute.xlu1 %v8357_v37  ;;  %7512 = vset.pattern.permute.xlu2 %v8357_v37  ;;  %v985_v32 = vsel %vm551_vm6, %v15118_v12, %v7390_v33  ;;  %v10168_v13 = vpop.permute.xlu2 %2173  ;;  %v15119_v58 = vunpack.i.h.bf16 %v9836_v0  ;;  %v7429_v21 = vunpack.i.l.bf16 %v9978_v7 }
 0x21f   : > { %v1205_v30 = vsel %vm561_vm11, %v1204_v28, %v15117_v23  ;;  %2329 = vperm.xlu1 %7511, %v2326_v43   ;;  %7513 = vset.pattern.permute.xlu0 %v8357_v37  ;;  %v978_v62 = vsel %vm551_vm6, %v15120_v16, %v7389_v5  ;;  %v10180_v24 = vsel %vm563_vm12, %v1821_v39, %v7334_v56  ;;  %v15121_v33 = vunpack.i.h.bf16 %v9807_v45 }
 0x220   : > { %v10174_v28 = vsel %vm563_vm12, %v1205_v30, %v15119_v58  ;;  %v775_v14 = vsel %vm557_vm9, %v774_v40, %v7344_v22  ;;  %v782_v0 = vsel %vm557_vm9, %v781_v49, %v7345_v38  ;;  %v7475_v59 = vunpack.i.h.bf16 %v10004_v17 }
 0x221   : > { %v10097_v55 = vpop.permute.xlu1 %2205  ;;  %v10185_v61 = vsel %vm561_vm11, %v1827_v4, %v15121_v33  ;;  %v7474_v43 = vunpack.i.l.bf16 %v10004_v17  ;;  %v986_v39 = vsel %vm553_vm7, %v985_v32, %v7355_v15  ;;  %v979_v4 = vsel %vm553_vm7, %v978_v62, %v7354_v8  ;;  %v15125_v17 = vld [vmem:[#allocation38_spill] sm:$0xff] }
 0x222   : > { %v7399_v38 = vunpack.i.l.bf16 %v9992_v41  ;;  %v7425_v49 = vunpack.i.h.bf16 %v9994_v63  ;;  %v7424_v37 = vunpack.i.l.bf16 %v9994_v63  ;;  %v7409_v32 = vunpack.i.l.bf16 %v9998_v19 }
 0x223   : > { %v1612_v8 = vsel %vm551_vm6, %v9783_v31, %v7475_v59  ;;  %v1605_v58 = vsel %vm551_vm6, %v9780_v10, %v7474_v43  ;;  %v15122_v26 = vunpack.i.l.bf16 %v9935_v18  ;;  %v7495_v31 = vunpack.i.h.bf16 %v10054_v35  ;;  %v15123_v10 = vld [vmem:[#allocation37_spill] sm:$0xff] }
 0x224   : > { %v7494_v59 = vunpack.i.l.bf16 %v10054_v35  ;;  %v7454_v43 = vunpack.i.l.bf16 %v15123_v10  ;;  %v7434_v16 = vunpack.i.l.bf16 %v10006_v29  ;;  %v1613_v56 = vsel %vm553_vm7, %v1612_v8, %v7425_v49 }
 0x225   : > { %v776_v63 = vsel %vm559_vm10, %v775_v14, %v15122_v26  ;;  %v1606_v30 = vsel %vm553_vm7, %v1605_v58, %v7424_v37  ;;  %v15124_v26 = vunpack.i.h.bf16 %v9935_v18  ;;  %v15126_v35 = vunpack.i.l.bf16 %v9956_v3  ;;  %v15129_v37 = vld [vmem:[#allocation39_spill] sm:$0xff] }
 0x226   : > { %v10195_v45 = vpop.permute.xlu0 %2189  ;;  %v10232_v52 = vpop.permute.xlu2 %2197  ;;  %v15128_v49 = vunpack.i.h.bf16 %v9956_v3  ;;  %v7449_v58 = vunpack.i.l.bf16 %v15129_v37  ;;  %v15133_v3 = vld [vmem:[#allocation28_spill] sm:$0xff] }
 0x227   : > { %4507 = vperm.xlu1 %7511, %v4504_v6   ;;  %v10229_v14 = vsel %vm559_vm10, %v782_v0, %v15124_v26  ;;  %v980_v15 = vsel %vm555_vm8, %v979_v4, %v15126_v35  ;;  %v15127_v6 = vunpack.i.l.bf16 %v9942_v46  ;;  %v7489_v0 = vunpack.i.l.bf16 %v15125_v17  ;;  %v15131_v35 = vld [vmem:[#allocation31_spill] sm:$0xff] }
 0x228   : > { %v987_v18 = vsel %vm555_vm8, %v986_v39, %v15128_v49  ;;  %v7440_v4 = vunpack.i.h.bf16 %v15130_v51  ;;  %v2029_v40 = vsel %vm551_vm6, %v15131_v35, %v7495_v31  ;;  %v1399_v39 = vsel %vm551_vm6, %v15133_v3, %v7454_v43 }
 0x229   : > { %v10145_v60 = vpop.permute.xlu1 %7462  ;;  %v10240_v62 = vsel %vm561_vm11, %v776_v63, %v15127_v6  ;;  %v15132_v63 = vld [vmem:[#allocation30_spill] sm:$0xff]  ;;  %v7439_v49 = vunpack.i.l.bf16 %v15130_v51  ;;  %v981_v5 = vsel %vm557_vm9, %v980_v15, %v7359_v48  ;;  %v1400_v43 = vsel %vm553_vm7, %v1399_v39, %v7409_v32  ;;  %v15134_v15 = vld [vmem:[#allocation32_spill] sm:$0xff] }
 0x22a   : > { %v2022_v6 = vsel %vm551_vm6, %v15132_v63, %v7494_v59  ;;  %v7484_v51 = vunpack.i.l.bf16 %v10071_v57  ;;  %v2030_v63 = vsel %vm553_vm7, %v2029_v40, %v7440_v4  ;;  %v2228_v32 = vsel %vm551_vm6, %v15134_v15, %v10168_v13  ;;  %v15144_v15 = vld [vmem:[#allocation33_spill] sm:$0xff] }
 0x22b   : > { %v15135_v40 = vunpack.i.l.bf16 %v9984_v36  ;;  %v7464_v4 = vunpack.i.l.bf16 %v10145_v60 }
 0x22e   : > { %v2202_v26 = vpop.permute.xlu0 %2201 }
 0x22f   : > { %4572 = vperm.xlu1 %7511, %v7054_v53   ;;  %v15141_v53 = vld [vmem:[#allocation36_spill] sm:$0xff] }
 0x231   : > { %v7478_v12 = vpop.permute.xlu1 %7477 }
 0x232   : > { %v7479_v33 = vunpack.i.l.bf16 %v7478_v12  ;;  %v7480_v23 = vunpack.i.h.bf16 %v7478_v12  ;;  %v2023_v12 = vsel %vm553_vm7, %v2022_v6, %v7439_v49  ;;  %v15136_v6 = vunpack.i.h.bf16 %v9984_v36 }
 0x233   : > { %v7505_v49 = vunpack.i.h.bf16 %v10124_v34  ;;  %v7485_v36 = vunpack.i.h.bf16 %v10071_v57 }
 0x234   : > { %v1607_v22 = vsel %vm555_vm8, %v1606_v30, %v7479_v33  ;;  %v10263_v30 = vsel %vm557_vm9, %v987_v18, %v7360_v11  ;;  %v7455_v33 = vunpack.i.h.bf16 %v15123_v10  ;;  %v7504_v11 = vunpack.i.l.bf16 %v10124_v34 }
 0x235   : > { %v1608_v31 = vsel %vm557_vm9, %v1607_v22, %v7429_v21  ;;  %v982_v22 = vsel %vm559_vm10, %v981_v5, %v7399_v38  ;;  %v1614_v10 = vsel %vm555_vm8, %v1613_v56, %v7480_v23  ;;  %v15137_v38 = vunpack.i.l.bf16 %v9996_v50  ;;  %v15138_v56 = vld [vmem:[#allocation29_spill] sm:$0xff] }
 0x236   : > { %v7509_v23 = vunpack.i.l.bf16 %v10101_v27  ;;  %v1406_v39 = vsel %vm551_vm6, %v15138_v56, %v7455_v33  ;;  %v2334_v33 = vld [vmem:[%s14796_s3] sm:$0xf]  ;;  %v2214_v34 = vpop.permute.xlu0 %2213 }
 0x237   : > { %v1401_v13 = vsel %vm555_vm8, %v1400_v43, %v15137_v38  ;;  %v15140_v43 = vunpack.i.l.bf16 %v9909_v47  ;;  %2337 = vperm.xlu2 %7512, %v2334_v33  }
 0x239   : > { %v7498_v8 = vpop.permute.xlu1 %7497 }
 0x23a   : > { %v7500_v59 = vunpack.i.h.bf16 %v7498_v8  ;;  %v7499_v35 = vunpack.i.l.bf16 %v7498_v8  ;;  %v1609_v8 = vsel %vm559_vm10, %v1608_v31, %v7484_v51 }
 0x23c   : > { %v2031_v48 = vsel %vm555_vm8, %v2030_v63, %v7500_v59  ;;  %v2024_v21 = vsel %vm555_vm8, %v2023_v12, %v7499_v35  ;;  %v2210_v59 = vpop.permute.xlu2 %2209  ;;  %v15139_v35 = vunpack.i.h.bf16 %v9978_v7  ;;  %v1610_v12 = vsel %vm561_vm11, %v1609_v8, %v7434_v16  ;;  %v15145_v8 = vld [vmem:[#allocation34_spill] sm:$0xff] }
 0x23d   : > { %v2025_v18 = vsel %vm557_vm9, %v2024_v21, %v15135_v40  ;;  %v2032_v3 = vsel %vm557_vm9, %v2031_v48, %v15136_v6  ;;  %v983_v63 = vsel %vm561_vm11, %v982_v22, %v15140_v43  ;;  %v15142_v7 = vunpack.i.l.bf16 %v9988_v9 }
 0x23e   : > { %v2026_v5 = vsel %vm559_vm10, %v2025_v18, %v7504_v11  ;;  %v1615_v51 = vsel %vm557_vm9, %v1614_v10, %v15139_v35  ;;  %v2033_v16 = vsel %vm559_vm10, %v2032_v3, %v7505_v49  ;;  %v15143_v21 = vunpack.i.h.bf16 %v9998_v19 }
 0x23f   : > { %v2027_v31 = vsel %vm561_vm11, %v2026_v5, %v7449_v58  ;;  %v2229_v58 = vsel %vm553_vm7, %v2228_v32, %v15141_v53  ;;  %v1402_v48 = vsel %vm557_vm9, %v1401_v13, %v15142_v7  ;;  %v2235_v10 = vsel %vm551_vm6, %v15144_v15, %v2202_v26 }
 0x240   : > { %v2028_v11 = vsel %vm563_vm12, %v2027_v31, %v7509_v23  ;;  %v1407_v22 = vsel %vm553_vm7, %v1406_v39, %v15143_v21  ;;  %v1403_v32 = vsel %vm559_vm10, %v1402_v48, %v7464_v4  ;;  %v7510_v18 = vunpack.i.h.bf16 %v10101_v27 }
 0x241   : > { %v2182_v57 = vpop.permute.xlu1 %2181  ;;  %v1611_v5 = vsel %vm563_vm12, %v1610_v12, %v7489_v0  ;;  %v1616_v3 = vsel %vm559_vm10, %v1615_v51, %v7485_v36  ;;  %v7465_v19 = vunpack.i.h.bf16 %v10145_v60  ;;  %v2262_v13 = vrot.slane %v2028_v11, 4 }
 0x242   : > { %v2230_v40 = vsel %vm555_vm8, %v2229_v58, %v2182_v57  ;;  %v15146_v26 = vunpack.i.h.bf16 %v15129_v37  ;;  %v2236_v27 = vsel %vm553_vm7, %v2235_v10, %v10097_v55  ;;  %v15147_v0 = vunpack.i.l.bf16 %v9970_v20 }
 0x243   : > { %v2231_v6 = vsel %vm557_vm9, %v2230_v40, %v15145_v8  ;;  %v15148_v60 = vunpack.i.h.bf16 %v9996_v50  ;;  %v2256_v31 = vrot.slane %v1611_v5, 4  ;;  %v15150_v36 = vunpack.i.h.bf16 %v10006_v29 }
 0x244   : > { %v2232_v38 = vsel %vm559_vm10, %v2231_v6, %v10195_v45  ;;  %v2034_v23 = vsel %vm561_vm11, %v2033_v16, %v15146_v26  ;;  %v1404_v56 = vsel %vm561_vm11, %v1403_v32, %v15147_v0  ;;  %v15149_v45 = vld [vmem:[#allocation40_spill] sm:$0xff]  ;;  %v15151_v50 = vunpack.i.l.bf16 %v9982_v54 }
 0x245   : > { %v2233_v4 = vsel %vm561_vm11, %v2232_v38, %v10058_v25  ;;  %v1408_v39 = vsel %vm555_vm8, %v1407_v22, %v15148_v60  ;;  %v7469_v49 = vunpack.i.l.bf16 %v15149_v45  ;;  %v1617_v55 = vsel %vm561_vm11, %v1616_v3, %v15150_v36  ;;  %v7053_v25 = vld [vmem:[%s14795_s2 + $0x4] sm:$0xf]  ;;  %v2226_v22 = vpop.permute.xlu0 %2225 }
 0x246   : > { %v2234_v37 = vsel %vm563_vm12, %v2233_v4, %v10232_v52  ;;  %v984_v35 = vsel %vm563_vm12, %v983_v63, %v15151_v50  ;;  %v15152_v51 = vunpack.i.l.bf16 %v9986_v42  ;;  %v2035_v12 = vsel %vm563_vm12, %v2034_v23, %v7510_v18  ;;  %4563 = vperm.xlu2 %7512, %v7053_v25   ;;  %v15161_v3 = vld [vmem:[#allocation25_spill] sm:$0xff] }
 0x247   : > { %7040 = vmatpush.msk.msra.mxu0 %vm2266_vm13, %v2234_v37  ;;  %v15153_v29 = vunpack.i.h.bf16 %v9992_v41  ;;  %v2237_v33 = vsel %vm555_vm8, %v2236_v27, %v2210_v59  ;;  %v2273_v53 = vsel %vm2266_vm13, %v10180_v24, %v2262_v13  ;;  %v1405_v58 = vsel %vm563_vm12, %v1404_v56, %v7469_v49  ;;  %v2222_v24 = vpop.permute.xlu2 %2221  ;;  %v15162_v27 = vld [vmem:[#allocation27_spill] sm:$0xff]  ;;  %v15163_v56 = vld [vmem:[#allocation26_spill] sm:$0xff]  ;;  %v4496_v49 = vld [vmem:[%s14798_s5] sm:$0xf] }
 0x248   : > { %v778_v52 = vsel %vm563_vm12, %v10240_v62, %v15152_v51  ;;  %v15154_v63 = vunpack.i.h.bf16 %v9988_v9  ;;  %v7385_v62 = vunpack.i.h.bf16 %v9986_v42  ;;  %v2238_v11 = vsel %vm557_vm9, %v2237_v33, %v2214_v34  ;;  %4499 = vperm.xlu0 %7513, %v4496_v49  }
 0x249   : > { %v989_v43 = vsel %vm559_vm10, %v10263_v30, %v15153_v29  ;;  %v2218_v7 = vpop.permute.xlu1 %2217  ;;  %2298 = vmatpush.msra.mxu0 %v2273_v53  ;;  %v15155_v30 = vunpack.i.h.bf16 %v15125_v17  ;;  %v2271_v9 = vsel %vm2266_vm13, %v1405_v58, %v2256_v31  ;;  %v2244_v16 = vrot.slane %v778_v52, 4 }
 0x24a   : > { %v1409_v57 = vsel %vm557_vm9, %v1408_v39, %v15154_v63  ;;  %v2239_v48 = vsel %vm559_vm10, %v2238_v11, %v2218_v7  ;;  %v2263_v21 = vrot.slane %v2035_v12, 4  ;;  %v7405_v42 = vunpack.i.h.bf16 %v9982_v54 }
 0x24b   : > { %v1410_v41 = vsel %vm559_vm10, %v1409_v57, %v7465_v19  ;;  %v1618_v59 = vsel %vm563_vm12, %v1617_v55, %v15155_v30  ;;  %2299 = vmatpush.msra.mxu0 %v2271_v9  ;;  %v2240_v34 = vsel %vm561_vm11, %v2239_v48, %v2222_v24  ;;  %v15156_v15 = vunpack.i.h.bf16 %v9909_v47 }
 0x24c   : > { %v15157_v10 = vunpack.i.h.bf16 %v9942_v46  ;;  %v15158_v32 = vrot.slane %v10148_v2, 4  ;;  %v2241_v8 = vsel %vm563_vm12, %v2240_v34, %v2226_v22  ;;  %v15159_v54 = vunpack.i.h.bf16 %v9970_v20  ;;  %v2275_v2 = vld [vmem:[%s14794_s1] sm:$0xf] }
 0x24d   : > { %v990_v17 = vsel %vm561_vm11, %v989_v43, %v15156_v15  ;;  %v2257_v5 = vrot.slane %v1618_v59, 4  ;;  %v7470_v47 = vunpack.i.h.bf16 %v15149_v45  ;;  %7042 = vmatpush.msk.msra.mxu1 %vm2266_vm13, %v2241_v8  ;;  %v15160_v46 = vunpack.i.h.bf16 %v9920_v1 }
 0x24e   : > { %v784_v40 = vsel %vm561_vm11, %v10229_v14, %v15157_v10  ;;  %v2269_v18 = vsel %vm2266_vm13, %v984_v35, %v15158_v32  ;;  %v1411_v6 = vsel %vm561_vm11, %v1410_v41, %v15159_v54  ;;  %v7245_v19 = vunpack.i.h.bf16 %v15161_v3  ;;  %v15167_v3 = vld [vmem:[#allocation20_spill] sm:$0xff] }
 0x24f   : > { %2300 = vmatpush.msra.mxu0 %v2269_v18  ;;  %v1829_v14 = vsel %vm563_vm12, %v10185_v61, %v15160_v46  ;;  %v785_v20 = vsel %vm563_vm12, %v784_v40, %v7385_v62  ;;  %v2267_v38 = vsel %vm2266_vm13, %v10106_v44, %v2244_v16  ;;  %v1412_v1 = vsel %vm563_vm12, %v1411_v6, %v7470_v47 }
 0x250   : > { %v2274_v13 = vsel %vm2266_vm13, %v1829_v14, %v2263_v21  ;;  %v991_v61 = vsel %vm563_vm12, %v990_v17, %v7405_v42  ;;  %v2272_v26 = vsel %vm2266_vm13, %v1412_v1, %v2257_v5  ;;  %v2251_v23 = vrot.slane %v10174_v28, 4  ;;  %v7048_v28 = vld [vmem:[%s14794_s1 + $0x4] sm:$0xf]  ;;  %v15166_v17 = vld [vmem:[#allocation19_spill] sm:$0xff] }
 0x251   : > { %2301 = vmatpush.msra.mxu0 %v2267_v38  ;;  %2318 = vmatpush.msra.mxu1 %v2274_v13  ;;  %v570_v4 = vsel %vm561_vm11, %v15162_v27, %v7245_v19  ;;  %v2245_v0 = vrot.slane %v785_v20, 4  ;;  %v7265_v44 = vunpack.i.h.bf16 %v15163_v56 }
 0x252   : > { %7041 = vmatmul.msk.f32.vlgmr.msra.gmra.mxu0 %vm2276_vm14, %v2275_v2  ;;  %v2270_v60 = vsel %vm2266_vm13, %v991_v61, %v2251_v23 }
 0x253   : > { %7049 = vmatpush.msk.msrb.mxu0 %vm2266_vm13, %v2234_v37  ;;  %2319 = vmatpush.msra.mxu1 %v2272_v26  ;;  %v571_v39 = vsel %vm563_vm12, %v570_v4, %v7265_v44 }
 0x254   : > { %v2268_v45 = vsel %vm2266_vm13, %v571_v39, %v2245_v0 }
 0x255   : > { %4531 = vmatpush.msrb.mxu0 %v2273_v53  ;;  %2320 = vmatpush.msra.mxu1 %v2270_v60 }
 0x257   : > { %4532 = vmatpush.msrb.mxu0 %v2271_v9  ;;  %2321 = vmatpush.msra.mxu1 %v2268_v45 }
 0x258   : > { %7043 = vmatmul.msk.f32.vlgmr.msra.gmra.mxu1 %vm2276_vm14, %v2275_v2 }
 0x259   : > { %4533 = vmatpush.msrb.mxu0 %v2269_v18  ;;  %7051 = vmatpush.msk.msrb.mxu1 %vm2266_vm13, %v2241_v8 }
 0x25b   : > { %4534 = vmatpush.msrb.mxu0 %v2267_v38  ;;  %4551 = vmatpush.msrb.mxu1 %v2274_v13 }
 0x25c   : > { %7050 = vmatmul.msk.f32.vlgmr.msrb.gmra.mxu0 %vm2276_vm14, %v7048_v28 }
 0x25d   : > { %4552 = vmatpush.msrb.mxu1 %v2272_v26 }
 0x25f   : > { %4553 = vmatpush.msrb.mxu1 %v2270_v60 }
 0x261   : > { %4554 = vmatpush.msrb.mxu1 %v2268_v45 }
 0x262   : > { %7052 = vmatmul.msk.f32.vlgmr.msrb.gmra.mxu1 %vm2276_vm14, %v7048_v28 }
 0x291   : > { %v2330_v37 = vpop.permute.xlu1 %2329  ;;  %v2338_v55 = vpop.permute.xlu2 %2337 }
 0x299   : > { %v10442_v29 = vpop.permute.xlu1 %4507 }
 0x29a   : > { %15164 = vst [vmem:[#allocation22_spill] sm:$0xff] %v10442_v29 }
 0x2a0   : > { %v4564_v33 = vpop.permute.xlu2 %4563 }
 0x2a1   : > { %v4573_v58 = vpop.permute.xlu1 %4572 }
 0x2ba   : > { %v10491_v59 = vpop.permute.xlu0 %4499 }
 0x2bb   : > { %15165 = vst [vmem:[#allocation21_spill] sm:$0xff] %v10491_v59 }
 0x2cf   : > { %v2303_v31 = vpop.f32.mrf.mxu0 }
 0x2d0   : > { %v2332_v36 = vmul.f32 %v2330_v37, %v2303_v31 }
 0x2d2   : > { %v2340_v25 = vadd.f32 %v2338_v55, %v2332_v36 }
 0x2d4   : > { %v2342_v50 = vmax.f32 %v2340_v25, 0.0 }
 0x2d5   : > { %v2323_v35 = vpop.f32.mrf.mxu1 }
 0x2d6   : > { %2363 = vrot.lane.b32.xlu2 %v2342_v50, %s8355_s19  ;;  %2360 = vrot.lane.b32.xlu1 %v2342_v50, %s8351_s8  ;;  %v2333_v51 = vmul.f32 %v2330_v37, %v2323_v35 }
 0x2d7   : > { %2357 = vrot.lane.b32.xlu0 %v2342_v50, %s8356_s15 }
 0x2d8   : > { %v2341_v52 = vadd.f32 %v2338_v55, %v2333_v51 }
 0x2d9   : > { %v4536_v43 = vpop.f32.mrf.mxu0 }
 0x2da   : > { %v10440_v12 = vmax.f32 %v2341_v52, 0.0  ;;  %v4566_v53 = vmul.f32 %v4564_v33, %v4536_v43 }
 0x2dc   : > { %v4575_v63 = vadd.f32 %v4573_v58, %v4566_v53 }
 0x2de   : > { %2372 = vrot.lane.b32.xlu2 %v2342_v50, %s8352_s17  ;;  %2369 = vrot.lane.b32.xlu1 %v2342_v50, %s8354_s18  ;;  %v10455_v57 = vmax.f32 %v4575_v63, 0.0 }
 0x2df   : > { %2366 = vrot.lane.b32.xlu0 %v2342_v50, %s8350_s29  ;;  %v4556_v62 = vpop.f32.mrf.mxu1 }
 0x2e0   : > { %v4567_v11 = vmul.f32 %v4564_v33, %v4556_v62 }
 0x2e2   : > { %v4576_v7 = vadd.f32 %v4573_v58, %v4567_v11 }
 0x2e4   : > { %v10475_v41 = vmax.f32 %v4576_v7, 0.0 }
 0x2e6   : > { %2382 = vrot.lane.b32.xlu2 %v10440_v12, %s8351_s8  ;;  %2379 = vrot.lane.b32.xlu1 %v10440_v12, %s8356_s15 }
 0x2e7   : > { %2375 = vrot.lane.b32.xlu0 %v2342_v50, %s8353_s11 }
 0x2ee   : > { %2391 = vrot.lane.b32.xlu2 %v10440_v12, %s8354_s18  ;;  %2388 = vrot.lane.b32.xlu1 %v10440_v12, %s8350_s29 }
 0x2ef   : > { %2385 = vrot.lane.b32.xlu0 %v10440_v12, %s8355_s19 }
 0x2f6   : > { %4592 = vrot.lane.b32.xlu2 %v10455_v57, %s8356_s15  ;;  %2397 = vrot.lane.b32.xlu1 %v10440_v12, %s8353_s11 }
 0x2f7   : > { %2394 = vrot.lane.b32.xlu0 %v10440_v12, %s8352_s17 }
 0x2fe   : > { %4601 = vrot.lane.b32.xlu2 %v10455_v57, %s8350_s29  ;;  %4598 = vrot.lane.b32.xlu1 %v10455_v57, %s8355_s19 }
 0x2ff   : > { %4595 = vrot.lane.b32.xlu0 %v10455_v57, %s8351_s8 }
 0x306   : > { %4610 = vrot.lane.b32.xlu2 %v10455_v57, %s8353_s11  ;;  %4607 = vrot.lane.b32.xlu1 %v10455_v57, %s8352_s17 }
 0x307   : > { %4604 = vrot.lane.b32.xlu0 %v10455_v57, %s8354_s18 }
 0x30e   : > { %4620 = vrot.lane.b32.xlu2 %v10475_v41, %s8355_s19  ;;  %4617 = vrot.lane.b32.xlu1 %v10475_v41, %s8351_s8 }
 0x30f   : > { %4614 = vrot.lane.b32.xlu0 %v10475_v41, %s8356_s15 }
 0x316   : > { %4629 = vrot.lane.b32.xlu2 %v10475_v41, %s8352_s17  ;;  %4626 = vrot.lane.b32.xlu1 %v10475_v41, %s8354_s18 }
 0x317   : > { %4623 = vrot.lane.b32.xlu0 %v10475_v41, %s8350_s29 }
 0x31f   : > { %4632 = vrot.lane.b32.xlu0 %v10475_v41, %s8353_s11 }
 0x330   : > { %v2364_v30 = vpop.permute.xlu2 %2363 }
 0x331   : > { %v2406_v21 = vrot.slane %v2364_v30, 4 }
 0x338   : > { %v2373_v24 = vpop.permute.xlu2 %2372 }
 0x339   : > { %v2412_v5 = vrot.slane %v2373_v24, 4 }
 0x340   : > { %v2383_v16 = vpop.permute.xlu2 %2382 }
 0x341   : > { %v2456_v61 = vrot.slane %v2383_v16, 4 }
 0x343   : > { %v2457_v45 = vsel %vm383_vm1, %v2456_v61, %v10440_v12 }
 0x344   : > { %v2461_v31 = vperm.slane %v2457_v45, %v15166_v17 }
 0x346   : > { %v2482_v58 = vrot.slane %v2461_v31, 4 }
 0x348   : > { %v2361_v48 = vpop.permute.xlu1 %2360  ;;  %v2392_v32 = vpop.permute.xlu2 %2391 }
 0x349   : > { %v2358_v9 = vpop.permute.xlu0 %2357  ;;  %v2400_v42 = vrot.slane %v2361_v48, 4 }
 0x34a   : > { %v2407_v22 = vsel %vm383_vm1, %v2406_v21, %v2358_v9 }
 0x34b   : > { %v2411_v10 = vperm.slane %v2407_v22, %v15166_v17  ;;  %v2401_v40 = vsel %vm383_vm1, %v2400_v42, %v2342_v50 }
 0x34c   : > { %v2405_v18 = vperm.slane %v2401_v40, %v15166_v17 }
 0x34d   : > { %v2424_v8 = vrot.slane %v2411_v10, 4 }
 0x34e   : > { %v2426_v63 = vrot.slane %v2405_v18, 4 }
 0x34f   : > { %v2425_v46 = vsel %vm383_vm1, %v2424_v8, %v2405_v18 }
 0x350   : > { %v2370_v34 = vpop.permute.xlu1 %2369  ;;  %v2431_v19 = vperm.slane %v2425_v46, %v15167_v3  ;;  %v4593_v26 = vpop.permute.xlu2 %4592 }
 0x351   : > { %v2367_v15 = vpop.permute.xlu0 %2366 }
 0x352   : > { %v2413_v14 = vsel %vm383_vm1, %v2412_v5, %v2367_v15  ;;  %v2450_v56 = vrot.slane %v2431_v19, 4 }
 0x353   : > { %v2417_v38 = vperm.slane %v2413_v14, %v15166_v17 }
 0x355   : > { %v2438_v7 = vrot.slane %v2417_v38, 4 }
 0x358   : > { %v2380_v54 = vpop.permute.xlu1 %2379  ;;  %v4602_v51 = vpop.permute.xlu2 %4601 }
 0x359   : > { %v2376_v6 = vpop.permute.xlu0 %2375 }
 0x35a   : > { %v2418_v47 = vrot.slane %v2376_v6, 4 }
 0x35c   : > { %v2419_v2 = vsel %vm383_vm1, %v2418_v47, %v2370_v34  ;;  %v2427_v34 = vsel %vm383_vm1, %v2411_v10, %v2426_v63 }
 0x35d   : > { %v2423_v20 = vperm.slane %v2419_v2, %v15166_v17  ;;  %v2435_v46 = vperm.slane %v2427_v34, %v15167_v3 }
 0x35f   : > { %v2436_v13 = vrot.slane %v2423_v20, 4  ;;  %v2439_v40 = vsel %vm383_vm1, %v2423_v20, %v2438_v7  ;;  %v2454_v61 = vrot.slane %v2435_v46, 4 }
 0x360   : > { %v2389_v1 = vpop.permute.xlu1 %2388  ;;  %v4611_v5 = vpop.permute.xlu2 %4610  ;;  %v2447_v10 = vperm.slane %v2439_v40, %v15167_v3 }
 0x361   : > { %v2386_v23 = vpop.permute.xlu0 %2385  ;;  %v2437_v27 = vsel %vm383_vm1, %v2436_v13, %v2417_v38 }
 0x362   : > { %v2462_v4 = vrot.slane %v2386_v23, 4  ;;  %v2443_v0 = vperm.slane %v2437_v27, %v15167_v3 }
 0x364   : > { %v2463_v44 = vsel %vm383_vm1, %v2462_v4, %v2380_v54  ;;  %v2451_v60 = vsel %vm383_vm1, %v2443_v0, %v2450_v56  ;;  %v2448_v39 = vrot.slane %v2443_v0, 4 }
 0x365   : > { %v2467_v28 = vperm.slane %v2463_v44, %v15166_v17  ;;  %2524 = vrot.lane.b32.xlu1 %v2451_v60, %s8345_s12  ;;  %v2455_v44 = vsel %vm383_vm1, %v2447_v10, %v2454_v61 }
 0x366   : > { %v2449_v49 = vsel %vm383_vm1, %v2448_v39, %v2431_v19  ;;  %v4653_v19 = vrot.slane %v4611_v5, 4 }
 0x367   : > { %v2480_v37 = vrot.slane %v2467_v28, 4  ;;  %2520 = vrot.lane.b32.xlu2 %v2449_v49, %s8345_s12  ;;  %v2483_v48 = vsel %vm383_vm1, %v2467_v28, %v2482_v58 }
 0x368   : > { %v2398_v36 = vpop.permute.xlu1 %2397  ;;  %v2491_v54 = vperm.slane %v2483_v48, %v15167_v3 }
 0x369   : > { %v2474_v55 = vrot.slane %v2398_v36, 4  ;;  %v2395_v25 = vpop.permute.xlu0 %2394  ;;  %v2481_v35 = vsel %vm383_vm1, %v2480_v37, %v2461_v31 }
 0x36a   : > { %v2468_v50 = vrot.slane %v2395_v25, 4  ;;  %v2487_v53 = vperm.slane %v2481_v35, %v15167_v3 }
 0x36b   : > { %v2475_v52 = vsel %vm383_vm1, %v2474_v55, %v2392_v32 }
 0x36c   : > { %v2479_v12 = vperm.slane %v2475_v52, %v15166_v17  ;;  %v2469_v43 = vsel %vm383_vm1, %v2468_v50, %v2389_v1  ;;  %v2506_v42 = vrot.slane %v2487_v53, 4  ;;  %v2510_v50 = vrot.slane %v2491_v54, 4 }
 0x36d   : > { %v2473_v33 = vperm.slane %v2469_v43, %v15166_v17 }
 0x36e   : > { %v2492_v62 = vrot.slane %v2479_v12, 4 }
 0x36f   : > { %v2494_v11 = vrot.slane %v2473_v33, 4 }
 0x370   : > { %v4599_v30 = vpop.permute.xlu1 %4598  ;;  %v2493_v24 = vsel %vm383_vm1, %v2492_v62, %v2473_v33 }
 0x371   : > { %v4641_v9 = vrot.slane %v4599_v30, 4  ;;  %v4596_v16 = vpop.permute.xlu0 %4595  ;;  %v2499_v21 = vperm.slane %v2493_v24, %v15167_v3  ;;  %v2495_v22 = vsel %vm383_vm1, %v2479_v12, %v2494_v11 }
 0x372   : > { %v2503_v15 = vperm.slane %v2495_v22, %v15167_v3  ;;  %v4635_v14 = vrot.slane %v4596_v16, 4 }
 0x373   : > { %v2507_v32 = vsel %vm383_vm1, %v2499_v21, %v2506_v42  ;;  %v2504_v18 = vrot.slane %v2499_v21, 4  ;;  %v4642_v8 = vsel %vm383_vm1, %v4641_v9, %v4593_v26  ;;  %v2452_v26 = vrot.slane %v2447_v10, 4 }
 0x374   : > { %2526 = vrot.lane.b32.xlu2 %v2507_v32, %s8345_s12  ;;  %v2508_v6 = vrot.slane %v2503_v15, 4  ;;  %v10537_v20 = vperm.slane %v4642_v8, %v15166_v17  ;;  %v4636_v23 = vsel %vm383_vm1, %v4635_v14, %v10455_v57  ;;  %v4621_v57 = vpop.permute.xlu2 %4620  ;;  %v2511_v52 = vsel %vm383_vm1, %v2503_v15, %v2510_v50 }
 0x375   : > { %v2505_v47 = vsel %vm383_vm1, %v2504_v18, %v2487_v53  ;;  %v4640_v39 = vperm.slane %v4636_v23, %v15166_v17  ;;  %v2453_v28 = vsel %vm383_vm1, %v2452_v26, %v2435_v46  ;;  %v4697_v12 = vrot.slane %v4621_v57, 4 }
 0x376   : > { %v2509_v2 = vsel %vm383_vm1, %v2508_v6, %v2491_v54  ;;  %2522 = vrot.lane.b32.xlu0 %v2505_v47, %s8345_s12  ;;  %v4659_v4 = vrot.slane %v10537_v20, 4 }
 0x377   : > { %2530 = vrot.lane.b32.xlu1 %v2509_v2, %s8345_s12  ;;  %v4661_v18 = vrot.slane %v4640_v39, 4 }
 0x378   : > { %v4608_v38 = vpop.permute.xlu1 %4607  ;;  %v4660_v37 = vsel %vm383_vm1, %v4659_v4, %v4640_v39 }
 0x379   : > { %v4647_v13 = vrot.slane %v4608_v38, 4  ;;  %v4605_v1 = vpop.permute.xlu0 %4604  ;;  %v4666_v55 = vperm.slane %v4660_v37, %v15167_v3  ;;  %v15168_v37 = vmov 0.0  }
 0x37a   : > { %v4654_v27 = vsel %vm383_vm1, %v4653_v19, %v4605_v1  ;;  %v4662_v1 = vsel %vm383_vm1, %v10537_v20, %v4661_v18 }
 0x37b   : > { %v4648_v0 = vsel %vm383_vm1, %v4647_v13, %v4602_v51  ;;  %v4658_v56 = vperm.slane %v4654_v27, %v15166_v17  ;;  %v4685_v62 = vrot.slane %v4666_v55, 4  ;;  %v4670_v4 = vperm.slane %v4662_v1, %v15167_v3 }
 0x37c   : > { %v4652_v60 = vperm.slane %v4648_v0, %v15166_v17  ;;  %2532 = vrot.lane.b32.xlu2 %v2455_v44, %s8345_s12  ;;  %v4630_v53 = vpop.permute.xlu2 %4629 }
 0x37d   : > { %v4671_v45 = vrot.slane %v4658_v56, 4  ;;  %v4703_v11 = vrot.slane %v4630_v53, 4 }
 0x37e   : > { %2528 = vrot.lane.b32.xlu0 %v2453_v28, %s8345_s12  ;;  %v4673_v54 = vrot.slane %v4652_v60, 4 }
 0x37f   : > { %v4672_v49 = vsel %vm383_vm1, %v4671_v45, %v4652_v60 }
 0x380   : > { %v4678_v31 = vperm.slane %v4672_v49, %v15167_v3  ;;  %v4618_v51 = vpop.permute.xlu1 %4617  ;;  %v4674_v13 = vsel %vm383_vm1, %v4658_v56, %v4673_v54  ;;  %v4689_v56 = vrot.slane %v4670_v4, 4 }
 0x381   : > { %v4615_v36 = vpop.permute.xlu0 %4614  ;;  %v4691_v43 = vrot.slane %v4618_v51, 4  ;;  %v4682_v0 = vperm.slane %v4674_v13, %v15167_v3 }
 0x382   : > { %v4683_v25 = vrot.slane %v4678_v31, 4  ;;  %v4698_v33 = vsel %vm383_vm1, %v4697_v12, %v4615_v36  ;;  %v4686_v30 = vsel %vm383_vm1, %v4678_v31, %v4685_v62 }
 0x383   : > { %v4702_v63 = vperm.slane %v4698_v33, %v15166_v17  ;;  %v4692_v7 = vsel %vm383_vm1, %v4691_v43, %v10475_v41  ;;  %v4687_v44 = vrot.slane %v4682_v0, 4  ;;  %v4690_v20 = vsel %vm383_vm1, %v4682_v0, %v4689_v56 }
 0x384   : > { %v4684_v35 = vsel %vm383_vm1, %v4683_v25, %v4666_v55  ;;  %v4696_v48 = vperm.slane %v4692_v7, %v15166_v17 }
 0x385   : > { %4755 = vrot.lane.b32.xlu1 %v4684_v35, %s8345_s12  ;;  %v4715_v9 = vrot.slane %v4702_v63, 4  ;;  %v4688_v60 = vsel %vm383_vm1, %v4687_v44, %v4670_v4 }
 0x386   : > { %2534 = vrot.lane.b32.xlu0 %v2511_v52, %s8345_s12  ;;  %v4717_v22 = vrot.slane %v4696_v48, 4 }
 0x387   : > { %v4716_v34 = vsel %vm383_vm1, %v4715_v9, %v4696_v48 }
 0x388   : > { %v4627_v15 = vpop.permute.xlu1 %4626  ;;  %v4722_v8 = vperm.slane %v4716_v34, %v15167_v3  ;;  %v4718_v6 = vsel %vm383_vm1, %v4702_v63, %v4717_v22 }
 0x389   : > { %v4624_v58 = vpop.permute.xlu0 %4623  ;;  %v4726_v14 = vperm.slane %v4718_v6, %v15167_v3 }
 0x38a   : > { %v4704_v24 = vsel %vm383_vm1, %v4703_v11, %v4624_v58  ;;  %v4741_v38 = vrot.slane %v4722_v8, 4 }
 0x38b   : > { %v4708_v16 = vperm.slane %v4704_v24, %v15166_v17  ;;  %v4745_v39 = vrot.slane %v4726_v14, 4 }
 0x38d   : > { %v4729_v41 = vrot.slane %v4708_v16, 4 }
 0x38e   : > { %4759 = vrot.lane.b32.xlu0 %v4686_v30, %s8345_s12 }
 0x391   : > { %v4633_v21 = vpop.permute.xlu0 %4632 }
 0x392   : > { %v4709_v42 = vrot.slane %v4633_v21, 4 }
 0x394   : > { %v4710_v40 = vsel %vm383_vm1, %v4709_v42, %v4627_v15 }
 0x395   : > { %v4714_v32 = vperm.slane %v4710_v40, %v15166_v17 }
 0x397   : > { %v4727_v5 = vrot.slane %v4714_v32, 4  ;;  %v4730_v47 = vsel %vm383_vm1, %v4714_v32, %v4729_v41 }
 0x398   : > { %v4738_v46 = vperm.slane %v4730_v47, %v15167_v3 }
 0x399   : > { %v4728_v10 = vsel %vm383_vm1, %v4727_v5, %v4708_v16 }
 0x39a   : > { %v4743_v2 = vrot.slane %v4738_v46, 4  ;;  %v4734_v19 = vperm.slane %v4728_v10, %v15167_v3  ;;  %v4746_v45 = vsel %vm383_vm1, %v4738_v46, %v4745_v39 }
 0x39c   : > { %v4744_v61 = vsel %vm383_vm1, %v4743_v2, %v4726_v14  ;;  %v4742_v26 = vsel %vm383_vm1, %v4734_v19, %v4741_v38  ;;  %v4739_v23 = vrot.slane %v4734_v19, 4 }
 0x39d   : > { %4765 = vrot.lane.b32.xlu0 %v4744_v61, %s8345_s12  ;;  %4761 = vrot.lane.b32.xlu1 %v4742_v26, %s8345_s12 }
 0x39e   : > { %v4740_v27 = vsel %vm383_vm1, %v4739_v23, %v4722_v8 }
 0x39f   : > { %4757 = vrot.lane.b32.xlu2 %v4740_v27, %s8345_s12 }
 0x3a5   : > { %4767 = vrot.lane.b32.xlu1 %v4690_v20, %s8345_s12 }
 0x3a7   : > { %4763 = vrot.lane.b32.xlu2 %v4688_v60, %s8345_s12 }
 0x3af   : > { %4769 = vrot.lane.b32.xlu2 %v4746_v45, %s8345_s12 }
 0x3c1   : > { %v2521_v28 = vpop.permute.xlu2 %2520 }
 0x3c2   : > { %2544 = vst.msk [vmem:[#allocation3 + $0x1] sm:$0xff] %vm361_vm3, %v2521_v28 }
 0x3c9   : > { %v10598_v49 = vld [vmem:[#allocation3] sm:$0xff] }
 0x3ca   : > { %4579 = vst.msk [vmem:[#allocation3] sm:$0xff] %vm307_vm0, %v15168_v37  ;;  %v3170_v22 = vrot.slane %v10598_v49, 1 }
 0x3ce   : > { %v2527_v57 = vpop.permute.xlu2 %2526 }
 0x3cf   : > { %2547 = vst.msk [vmem:[#allocation3 + $0x21] sm:$0xff] %vm361_vm3, %v2527_v57 }
 0x3d6   : > { %v10602_v31 = vld [vmem:[#allocation3 + $0x28] sm:$0x3]  ;;  %v2533_v36 = vpop.permute.xlu2 %2532 }
 0x3d7   : > { %4584 = vst.msk [vmem:[#allocation3 + $0x28] sm:$0x3] %vm310_vm2, %v15168_v37  ;;  %v2525_v55 = vpop.permute.xlu1 %2524  ;;  %v3178_v13 = vrot.slane %v10602_v31, 1  ;;  %v3800_v27 = vrot.slane %v10602_v31, 2 }
 0x3d8   : > { %2546 = vst.msk [vmem:[#allocation3 + $0x19] sm:$0xff] %vm361_vm3, %v2525_v55 }
 0x3d9   : > { %2550 = vst.msk [vmem:[#allocation3 + $0x49] sm:$0xff] %vm361_vm3, %v2533_v36 }
 0x3df   : > { %v10608_v25 = vld [vmem:[#allocation3 + $0x18] sm:$0xff]  ;;  %v10610_v50 = vld [vmem:[#allocation3 + $0x20] sm:$0xff] }
 0x3e0   : > { %v10614_v35 = vpack.i.bf16 %v10610_v50, %v10608_v25  ;;  %4582 = vst.msk [vmem:[#allocation3 + $0x18] sm:$0xff] %vm307_vm0, %v15168_v37  ;;  %v10622_v51 = vld [vmem:[#allocation3 + $0x48] sm:$0xff]  ;;  %v3175_v2 = vrot.slane %v10608_v25, 1  ;;  %v3176_v19 = vrot.slane %v10610_v50, 1  ;;  %v3797_v26 = vrot.slane %v10608_v25, 2 }
 0x3e1   : > { %4583 = vst.msk [vmem:[#allocation3 + $0x20] sm:$0xff] %vm307_vm0, %v15168_v37  ;;  %v3798_v23 = vrot.slane %v10610_v50, 2  ;;  %v3185_v56 = vrot.slane %v10622_v51, 1  ;;  %v2576_v31 = vrot.slane %v10622_v51, 4  ;;  %v2578_v36 = vrot.slane %v10608_v25, 4 }
 0x3e2   : > { %7520 = vrot.lane.b32.xlu0 %v10614_v35, %s8346_s21  ;;  %4588 = vst.msk [vmem:[#allocation3 + $0x48] sm:$0xff] %vm307_vm0, %v15168_v37  ;;  %v10715_v4 = vsel %vm996_vm4, %v3175_v2, %v3176_v19  ;;  %v10718_v0 = vsel %vm996_vm4, %v3176_v19, %v3178_v13 }
 0x3e3   : > { %v10722_v60 = vsel %vm1619_vm5, %v3797_v26, %v3798_v23  ;;  %v10725_v39 = vsel %vm1619_vm5, %v3798_v23, %v3800_v27 }
 0x3e4   : > { %v7599_v57 = vpack.i.bf16 %v10725_v39, %v10722_v60 }
 0x3e8   : > { %v2523_v52 = vpop.permute.xlu0 %2522 }
 0x3e9   : > { %v2531_v12 = vpop.permute.xlu1 %2530  ;;  %2545 = vst.msk [vmem:[#allocation3 + $0x9] sm:$0xff] %vm361_vm3, %v2523_v52  ;;  %v2579_v52 = vsel %vm383_vm1, %v10622_v51, %v2578_v36 }
 0x3ea   : > { %2549 = vst.msk [vmem:[#allocation3 + $0x39] sm:$0xff] %vm361_vm3, %v2531_v12 }
 0x3f0   : > { %v10628_v43 = vld [vmem:[#allocation3 + $0x10] sm:$0x3]  ;;  %v2529_v33 = vpop.permute.xlu0 %2528  ;;  %v10630_v53 = vld [vmem:[#allocation3 + $0x8] sm:$0xff] }
 0x3f1   : > { %v10632_v58 = vld [vmem:[#allocation3 + $0x40] sm:$0x3]  ;;  %4581 = vst.msk [vmem:[#allocation3 + $0x10] sm:$0x3] %vm310_vm2, %v15168_v37  ;;  %v7514_v63 = vpack.i.bf16 %v10630_v53, %v10598_v49  ;;  %v3171_v48 = vrot.slane %v10630_v53, 1  ;;  %v3173_v46 = vrot.slane %v10628_v43, 1 }
 0x3f2   : > { %4587 = vst.msk [vmem:[#allocation3 + $0x40] sm:$0x3] %vm310_vm2, %v15168_v37  ;;  %v3183_v34 = vrot.slane %v10632_v58, 1  ;;  %v3793_v12 = vrot.slane %v10630_v53, 2 }
 0x3f3   : > { %2548 = vst.msk [vmem:[#allocation3 + $0x31] sm:$0xff] %vm361_vm3, %v2529_v33  ;;  %7515 = vrot.lane.b32.xlu2 %v7514_v63, %s8346_s21  ;;  %v10669_v40 = vsel %vm996_vm4, %v3170_v22, %v3171_v48  ;;  %v10697_v10 = vsel %vm996_vm4, %v3171_v48, %v3173_v46  ;;  %v3795_v33 = vrot.slane %v10628_v43, 2  ;;  %v2622_v46 = vrot.slane %v10630_v53, 4 }
 0x3f4   : > { %4580 = vst.msk [vmem:[#allocation3 + $0x8] sm:$0xff] %vm307_vm0, %v15168_v37  ;;  %v7574_v38 = vpack.i.bf16 %v10697_v10, %v10669_v40 }
 0x3f7   : > { %v4756_v62 = vpop.permute.xlu1 %4755 }
 0x3f8   : > { %4779 = vst.msk [vmem:[#allocation3 + $0x1] sm:$0xff] %vm361_vm3, %v4756_v62  ;;  %v2535_v11 = vpop.permute.xlu0 %2534 }
 0x3f9   : > { %v4758_v7 = vpop.permute.xlu2 %4757  ;;  %2551 = vst.msk [vmem:[#allocation3 + $0x51] sm:$0xff] %vm361_vm3, %v2535_v11 }
 0x3fa   : > { %4780 = vst.msk [vmem:[#allocation3 + $0x9] sm:$0xff] %vm361_vm3, %v4758_v7  ;;  %v10647_v30 = vld [vmem:[#allocation3 + $0x30] sm:$0xff]  ;;  %v10649_v24 = vld [vmem:[#allocation3 + $0x38] sm:$0xff] }
 0x3fb   : > { %v7544_v9 = vpack.i.bf16 %v10649_v24, %v10647_v30  ;;  %4585 = vst.msk [vmem:[#allocation3 + $0x30] sm:$0xff] %vm307_vm0, %v15168_v37  ;;  %v3180_v16 = vrot.slane %v10647_v30, 1  ;;  %v3181_v21 = vrot.slane %v10649_v24, 1  ;;  %v3802_v7 = vrot.slane %v10647_v30, 2 }
 0x3fc   : > { %4586 = vst.msk [vmem:[#allocation3 + $0x38] sm:$0xff] %vm307_vm0, %v15168_v37  ;;  %v3803_v48 = vrot.slane %v10649_v24, 2  ;;  %v2620_v2 = vrot.slane %v10649_v24, 4 }
 0x3fd   : > { %7545 = vrot.lane.b32.xlu0 %v7544_v9, %s8348_s23  ;;  %7525 = vrot.lane.b32.xlu1 %v7544_v9, %s8346_s21  ;;  %v10663_v42 = vsel %vm996_vm4, %v3180_v16, %v3181_v21  ;;  %v10674_v32 = vsel %vm996_vm4, %v3181_v21, %v3183_v34  ;;  %v3805_v9 = vrot.slane %v10632_v58, 2 }
 0x3fe   : > { %v3198_v15 = vrot.slane %v10663_v42, 4  ;;  %v7564_v47 = vpack.i.bf16 %v10674_v32, %v10663_v42  ;;  %v10771_v22 = vsel %vm1619_vm5, %v3802_v7, %v3803_v48 }
 0x3ff   : > { %v10774_v34 = vsel %vm1619_vm5, %v3803_v48, %v3805_v9 }
 0x400   : > { %v10671_v41 = vld [vmem:[#allocation3 + $0x50] sm:$0xff]  ;;  %v10678_v18 = vsel %vm383_vm1, %v3198_v15, %v10669_v40  ;;  %v10680_v8 = vld [vmem:[#allocation3 + $0x58] sm:$0x3]  ;;  %v4760_v6 = vpop.permute.xlu0 %4759  ;;  %v3807_v15 = vrot.slane %v10622_v51, 2 }
 0x401   : > { %4589 = vst.msk [vmem:[#allocation3 + $0x50] sm:$0xff] %vm307_vm0, %v15168_v37  ;;  %v4764_v54 = vpop.permute.xlu2 %4763  ;;  %v7529_v5 = vpack.i.bf16 %v10671_v41, %v10622_v51  ;;  %v3186_v1 = vrot.slane %v10671_v41, 1  ;;  %v3188_v61 = vrot.slane %v10680_v8, 1  ;;  %v3808_v16 = vrot.slane %v10671_v41, 2 }
 0x402   : > { %4590 = vst.msk [vmem:[#allocation3 + $0x58] sm:$0x3] %vm310_vm2, %v15168_v37  ;;  %v7559_v37 = vpack.i.bf16 %v10718_v0, %v10715_v4  ;;  %v3810_v21 = vrot.slane %v10680_v8, 2  ;;  %v7604_v8 = vpack.i.bf16 %v10774_v34, %v10771_v22  ;;  %v2587_v51 = vperm.slane %v2579_v52, %v15166_v17 }
 0x403   : > { %4783 = vst.msk [vmem:[#allocation3 + $0x31] sm:$0xff] %vm361_vm3, %v4764_v54  ;;  %7530 = vrot.lane.b32.xlu2 %v7529_v5, %s8346_s21  ;;  %v10729_v45 = vsel %vm996_vm4, %v3185_v56, %v3186_v1  ;;  %v10732_v28 = vsel %vm996_vm4, %v3186_v1, %v3188_v61  ;;  %v10778_v54 = vsel %vm1619_vm5, %v3807_v15, %v3808_v16  ;;  %v3200_v61 = vrot.slane %v10669_v40, 4 }
 0x404   : > { %4781 = vst.msk [vmem:[#allocation3 + $0x19] sm:$0xff] %vm361_vm3, %v4760_v6  ;;  %v7589_v55 = vpack.i.bf16 %v10732_v28, %v10729_v45  ;;  %v10781_v58 = vsel %vm1619_vm5, %v3808_v16, %v3810_v21  ;;  %v2600_v1 = vrot.slane %v2587_v51, 4  ;;  %v2632_v36 = vrot.slane %v10671_v41, 4 }
 0x405   : > { %7535 = vrot.lane.b32.xlu1 %v7514_v63, %s8348_s23  ;;  %7565 = vrot.lane.b32.xlu0 %v7564_v47, %s8346_s21  ;;  %v3792_v63 = vrot.slane %v10598_v49, 2  ;;  %v7609_v6 = vpack.i.bf16 %v10781_v58, %v10778_v54  ;;  %v3201_v40 = vsel %vm383_vm1, %v10663_v42, %v3200_v61  ;;  %v3832_v59 = vrot.slane %v10778_v54, 4 }
 0x406   : > { %v2633_v52 = vsel %vm383_vm1, %v2632_v36, %v10610_v50 }
 0x407   : > { %v10755_v11 = vsel %vm1619_vm5, %v3792_v63, %v3793_v12 }
 0x409   : > { %v4770_v14 = vpop.permute.xlu2 %4769 }
 0x40a   : > { %4786 = vst.msk [vmem:[#allocation3 + $0x51] sm:$0xff] %vm361_vm3, %v4770_v14  ;;  %v2564_v14 = vrot.slane %v10647_v30, 4  ;;  %v10913_v36 = vld [vmem:[#allocation3 + $0x30] sm:$0xff] }
 0x40b   : > { %7540 = vrot.lane.b32.xlu2 %v10614_v35, %s8348_s23  ;;  %v2577_v35 = vsel %vm383_vm1, %v2576_v31, %v10608_v25  ;;  %v10758_v25 = vsel %vm1619_vm5, %v3793_v12, %v3795_v33  ;;  %v2639_v12 = vperm.slane %v2633_v52, %v15166_v17 }
 0x40c   : > { %v7594_v43 = vpack.i.bf16 %v10758_v25, %v10755_v11  ;;  %v2565_v26 = vsel %vm383_vm1, %v2564_v14, %v10598_v49  ;;  %v3254_v14 = vrot.slane %v10674_v32, 4 }
 0x40d   : > { %7575 = vrot.lane.b32.xlu0 %v7574_v38, %s8348_s23  ;;  %7550 = vrot.lane.b32.xlu1 %v7529_v5, %s8348_s23  ;;  %v2583_v5 = vperm.slane %v2577_v35, %v15166_v17  ;;  %v2571_v27 = vperm.slane %v2565_v26, %v15166_v17  ;;  %v2644_v9 = vrot.slane %v2639_v12, 4 }
 0x40f   : > { %v4762_v44 = vpop.permute.xlu1 %4761  ;;  %v4766_v20 = vpop.permute.xlu0 %4765  ;;  %v2588_v23 = vrot.slane %v2583_v5, 4 }
 0x410   : > { %4782 = vst.msk [vmem:[#allocation3 + $0x21] sm:$0xff] %vm361_vm3, %v4762_v44  ;;  %v2590_v44 = vrot.slane %v2571_v27, 4 }
 0x411   : > { %4784 = vst.msk [vmem:[#allocation3 + $0x39] sm:$0xff] %vm361_vm3, %v4766_v20 }
 0x412   : > { %v2591_v31 = vsel %vm383_vm1, %v2583_v5, %v2590_v44 }
 0x413   : > { %7560 = vrot.lane.b32.xlu2 %v7559_v37, %s8346_s21  ;;  %v10849_v16 = vperm.slane %v2591_v31, %v15167_v3 }
 0x415   : > { %7555 = vrot.lane.b32.xlu1 %v7574_v38, %s8346_s21  ;;  %7590 = vrot.lane.b32.xlu0 %v7589_v55, %s8348_s23  ;;  %v2623_v38 = vsel %vm383_vm1, %v10649_v24, %v2622_v46  ;;  %v3212_v46 = vrot.slane %v10715_v4, 4 }
 0x416   : > { %v2631_v20 = vperm.slane %v2623_v38, %v15166_v17 }
 0x417   : > { %v4768_v62 = vpop.permute.xlu1 %4767  ;;  %v3213_v38 = vsel %vm383_vm1, %v10729_v45, %v3212_v46  ;;  %v3878_v46 = vrot.slane %v10758_v25, 4 }
 0x418   : > { %4785 = vst.msk [vmem:[#allocation3 + $0x49] sm:$0xff] %vm361_vm3, %v4768_v62  ;;  %v2658_v35 = vrot.slane %v2631_v20, 4  ;;  %v10895_v44 = vld [vmem:[#allocation3 + $0x38] sm:$0xff]  ;;  %v3221_v52 = vperm.slane %v3213_v38, %v15166_v17  ;;  %v4795_v5 = vld [vmem:[#allocation3 + $0x40] sm:$0x3] }
 0x41b   : > { %7585 = vrot.lane.b32.xlu2 %v7564_v47, %s8348_s23  ;;  %v2566_v47 = vrot.slane %v10598_v49, 4  ;;  %v2634_v49 = vrot.slane %v10610_v50, 4 }
 0x41d   : > { %7595 = vrot.lane.b32.xlu0 %v7594_v43, %s8346_s21  ;;  %7570 = vrot.lane.b32.xlu1 %v7589_v55, %s8346_s21  ;;  %v2567_v19 = vsel %vm383_vm1, %v10647_v30, %v2566_v47  ;;  %v2621_v30 = vsel %vm383_vm1, %v2620_v2, %v10630_v53  ;;  %v2635_v42 = vsel %vm383_vm1, %v10671_v41, %v2634_v49 }
 0x41e   : > { %v2575_v13 = vperm.slane %v2567_v19, %v15166_v17  ;;  %v2627_v53 = vperm.slane %v2621_v30, %v15166_v17  ;;  %v2643_v55 = vperm.slane %v2635_v42, %v15166_v17  ;;  %v2614_v19 = vrot.slane %v10849_v16, 4 }
 0x41f   : > { %v3209_v30 = vperm.slane %v3201_v40, %v15166_v17 }
 0x420   : > { %v2601_v24 = vsel %vm383_vm1, %v2600_v1, %v2575_v13  ;;  %v2602_v56 = vrot.slane %v2575_v13, 4  ;;  %v2646_v33 = vrot.slane %v2627_v53, 4  ;;  %v2656_v63 = vrot.slane %v2643_v55, 4  ;;  %v10879_v13 = vld [vmem:[#allocation3 + $0x20] sm:$0xff] }
 0x421   : > { %v2659_v62 = vsel %vm383_vm1, %v2643_v55, %v2658_v35  ;;  %v10838_v41 = vperm.slane %v2601_v24, %v15167_v3  ;;  %v10891_v24 = vld [vmem:[#allocation3 + $0x8] sm:$0xff]  ;;  %v10906_v31 = vsel %vm383_vm1, 0.0, %v2614_v19  ;;  %v5411_v38 = vrot.slane %v10879_v13, 1 }
 0x422   : > { %v10844_v48 = vperm.slane %v2659_v62, %v15167_v3  ;;  %v2647_v43 = vsel %vm383_vm1, %v2639_v12, %v2646_v33  ;;  %v2657_v50 = vsel %vm383_vm1, %v2656_v63, %v2631_v20  ;;  %15171 = vst [vmem:[#allocation37_spill] sm:$0xff] %v10906_v31  ;;  %v7624_v33 = vpack.i.bf16 %v10895_v44, %v10913_v36  ;;  %v10930_v63 = vld [vmem:[#allocation3 + $0x48] sm:$0xff]  ;;  %v10932_v62 = vld [vmem:[#allocation3 + $0x50] sm:$0xff] }
 0x423   : > { %7605 = vrot.lane.b32.xlu2 %v7604_v8, %s8346_s21  ;;  %v10852_v21 = vperm.slane %v2647_v43, %v15167_v3  ;;  %v10855_v15 = vperm.slane %v2657_v50, %v15167_v3  ;;  %v2616_v47 = vrot.slane %v10838_v41, 4  ;;  %v3256_v50 = vrot.slane %v10697_v10, 4 }
 0x424   : > { %v7629_v43 = vpack.i.bf16 %v10932_v62, %v10930_v63 }
 0x425   : > { %7610 = vrot.lane.b32.xlu0 %v7609_v6, %s8346_s21  ;;  %7580 = vrot.lane.b32.xlu1 %v7559_v37, %s8348_s23  ;;  %v10818_v37 = vsel %vm383_vm1, %v2588_v23, %v2571_v27  ;;  %v10860_v6 = vsel %vm383_vm1, %v2644_v9, %v2627_v53  ;;  %v2672_v2 = vrot.slane %v10855_v15, 4  ;;  %v2670_v1 = vrot.slane %v10852_v21, 4  ;;  %v10911_v53 = vld [vmem:[#allocation3] sm:$0xff] }
 0x426   : > { %v10884_v26 = vsel %vm383_vm1, 0.0, %v2616_v47  ;;  %v2674_v27 = vrot.slane %v10844_v48, 4  ;;  %v7614_v12 = vpack.i.bf16 %v10891_v24, %v10911_v53  ;;  %v3236_v9 = vrot.slane %v3209_v30, 4 }
 0x427   : > { %15169 = vst [vmem:[#allocation24_spill] sm:$0xff] %v10884_v26  ;;  %v10887_v23 = vsel %vm383_vm1, 0.0, %v2672_v2  ;;  %v10909_v40 = vsel %vm383_vm1, 0.0, %v2670_v1  ;;  %v3268_v47 = vrot.slane %v10718_v0, 4  ;;  %v4792_v2 = vld [vmem:[#allocation3 + $0x28] sm:$0x3] }
 0x428   : > { %15170 = vst [vmem:[#allocation23_spill] sm:$0xff] %v10887_v23  ;;  %v10921_v35 = vsel %vm383_vm1, 0.0, %v2674_v27  ;;  %v4798_v1 = vld [vmem:[#allocation3 + $0x58] sm:$0x3]  ;;  %v5413_v42 = vrot.slane %v4792_v2, 1 }
 0x429   : > { %15172 = vst [vmem:[#allocation38_spill] sm:$0xff] %v10909_v40  ;;  %v3269_v27 = vsel %vm383_vm1, %v10732_v28, %v3268_v47  ;;  %v5418_v40 = vrot.slane %v4795_v5, 1 }
 0x42a   : > { %15174 = vst [vmem:[#allocation35_spill] sm:$0xff] %v10921_v35 }
 0x42b   : > { %4208 = vrot.lane.b32.xlu2 %v10755_v11, %s8348_s23 }
 0x42d   : > { %4210 = vrot.lane.b32.xlu0 %v10758_v25, %s8348_s23  ;;  %7600 = vrot.lane.b32.xlu1 %v7599_v57, %s8346_s21  ;;  %v2603_v57 = vsel %vm383_vm1, %v2587_v51, %v2602_v56  ;;  %v10893_v56 = vld [vmem:[#allocation3 + $0x18] sm:$0xff]  ;;  %v10958_v51 = vsel %vm996_vm4, %v5411_v38, %v5413_v42  ;;  %v6035_v42 = vrot.slane %v4792_v2, 2  ;;  %v3822_v2 = vrot.slane %v10755_v11, 4 }
 0x42e   : > { %v10841_v7 = vperm.slane %v2603_v57, %v15167_v3  ;;  %v3255_v57 = vsel %vm383_vm1, %v3254_v14, %v10697_v10  ;;  %v10903_v49 = vpack.i.bf16 %v10879_v13, %v10893_v56  ;;  %v3234_v14 = vrot.slane %v3221_v52, 4 }
 0x42f   : > { %v5410_v19 = vrot.slane %v10893_v56, 1  ;;  %v10947_v10 = vperm.slane %v3255_v57, %v15166_v17  ;;  %v5421_v57 = vrot.slane %v10932_v62, 1  ;;  %v5503_v47 = vrot.slane %v10958_v51, 4 }
 0x430   : > { %v2618_v61 = vrot.slane %v10841_v7, 4  ;;  %v3235_v8 = vsel %vm383_vm1, %v3234_v14, %v3209_v30  ;;  %v3210_v14 = vrot.slane %v10729_v45, 4 }
 0x431   : > { %v10954_v20 = vsel %vm996_vm4, %v5410_v19, %v5411_v38  ;;  %v3277_v19 = vperm.slane %v3269_v27, %v15166_v17  ;;  %v10974_v38 = vld [vmem:[#allocation3 + $0x10] sm:$0x3] }
 0x432   : > { %v10918_v55 = vsel %vm383_vm1, 0.0, %v2618_v61  ;;  %v10944_v61 = vsel %vm383_vm1, %v3221_v52, %v3236_v9  ;;  %v5420_v52 = vrot.slane %v10930_v63, 1  ;;  %v5423_v9 = vrot.slane %v4798_v1, 1 }
 0x433   : > { %4214 = vrot.lane.b32.xlu2 %v10725_v39, %s8348_s23  ;;  %15173 = vst [vmem:[#allocation39_spill] sm:$0xff] %v10918_v55  ;;  %v5447_v29 = vrot.slane %v10954_v20, 4 }
 0x434   : > { %v10967_v55 = vsel %vm996_vm4, %v5420_v52, %v5421_v57  ;;  %v10970_v30 = vsel %vm996_vm4, %v5421_v57, %v5423_v9  ;;  %v6040_v52 = vrot.slane %v4795_v5, 2  ;;  %v10984_v57 = vperm.slane %v10678_v18, %v15166_v17 }
 0x435   : > { %4216 = vrot.lane.b32.xlu0 %v10771_v22, %s8348_s23  ;;  %4212 = vrot.lane.b32.xlu1 %v10722_v60, %s8348_s23  ;;  %v5501_v35 = vrot.slane %v10970_v30, 4  ;;  %v5445_v31 = vrot.slane %v10967_v55, 4  ;;  %v10980_v27 = vsel %vm383_vm1, %v10967_v55, %v5447_v29  ;;  %v10993_v9 = vsel %vm383_vm1, %v10970_v30, %v5503_v47 }
 0x436   : > { %15175 = vst [vmem:[#allocation31_spill] sm:$0xff] %v10980_v27  ;;  %v11010_v47 = vsel %vm383_vm1, %v10771_v22, %v3822_v2  ;;  %v3266_v2 = vrot.slane %v10732_v28, 4  ;;  %v5415_v27 = vrot.slane %v10913_v36, 1  ;;  %v15181_v28 = vpack.i.bf16 %v10852_v21, %v10849_v16 }
 0x437   : > { %15176 = vst [vmem:[#allocation30_spill] sm:$0xff] %v10993_v9  ;;  %v10999_v29 = vsel %vm383_vm1, %v5445_v31, %v10954_v20  ;;  %v11003_v18 = vsel %vm383_vm1, %v5501_v35, %v10958_v51  ;;  %v5416_v31 = vrot.slane %v10895_v44, 1  ;;  %v15182_v5 = vrot.slane %v10891_v24, 2 }
 0x438   : > { %15177 = vst [vmem:[#allocation28_spill] sm:$0xff] %v10999_v29  ;;  %v15179_v29 = vrot.slane %v10879_v13, 2 }
 0x439   : > { %15178 = vst [vmem:[#allocation32_spill] sm:$0xff] %v11003_v18  ;;  %v15180_v18 = vrot.slane %v10895_v44, 2  ;;  %v11038_v45 = vsel %vm996_vm4, %v5415_v27, %v5416_v31  ;;  %v11057_v27 = vperm.slane %v3235_v8, %v15167_v3  ;;  %v3211_v8 = vsel %vm383_vm1, %v3210_v14, %v10715_v4 }
 0x43a   : > { %v11018_v35 = vsel %vm1619_vm5, %v15179_v29, %v6035_v42  ;;  %v14844_v42 = vrot.slane %v10932_v62, 2  ;;  %v6045_v29 = vrot.slane %v4798_v1, 2  ;;  %v3224_v14 = vrot.slane %v10984_v57, 4 }
 0x43b   : > { %4220 = vrot.lane.b32.xlu2 %v10778_v54, %s8348_s23  ;;  %v6125_v26 = vrot.slane %v11018_v35, 4 }
 0x43d   : > { %4222 = vrot.lane.b32.xlu0 %v10781_v58, %s8348_s23  ;;  %4218 = vrot.lane.b32.xlu1 %v10774_v34, %s8348_s23 }
 0x443   : > { %7620 = vrot.lane.b32.xlu2 %v10903_v49, %s8346_s21 }
 0x445   : > { %7615 = vrot.lane.b32.xlu1 %v7614_v12, %s8346_s21  ;;  %7625 = vrot.lane.b32.xlu0 %v7624_v33, %s8346_s21 }
 0x44b   : > { %7645 = vrot.lane.b32.xlu2 %v7624_v33, %s8348_s23  ;;  %v10989_v33 = vsel %vm383_vm1, %v10774_v34, %v3878_v46  ;;  %v3257_v46 = vsel %vm383_vm1, %v10674_v32, %v3256_v50  ;;  %v11023_v32 = vsel %vm1619_vm5, %v15180_v18, %v6040_v52  ;;  %v3290_v50 = vrot.slane %v3277_v19, 4 }
 0x44c   : > { %v3265_v9 = vperm.slane %v3257_v46, %v15166_v17  ;;  %v6111_v52 = vrot.slane %v11023_v32, 4  ;;  %v11043_v18 = vsel %vm1619_vm5, %v14844_v42, %v6045_v29  ;;  %v3890_v29 = vrot.slane %v10725_v39, 4 }
 0x44d   : > { %7630 = vrot.lane.b32.xlu1 %v7629_v43, %s8346_s21  ;;  %7635 = vrot.lane.b32.xlu0 %v7614_v12, %s8348_s23  ;;  %v6030_v12 = vrot.slane %v10974_v38, 2  ;;  %v6123_v23 = vrot.slane %v11043_v18, 4  ;;  %v11054_v16 = vsel %vm383_vm1, %v11043_v18, %v6125_v26  ;;  %v11070_v26 = vperm.slane %v10944_v61, %v15167_v3 }
 0x44e   : > { %v3291_v46 = vsel %vm383_vm1, %v3290_v50, %v3265_v9  ;;  %15183 = vst [vmem:[#allocation29_spill] sm:$0xff] %v11054_v16  ;;  %v3292_v21 = vrot.slane %v3265_v9, 4  ;;  %v5408_v61 = vrot.slane %v10974_v38, 1  ;;  %v3888_v42 = vrot.slane %v10781_v58, 4 }
 0x44f   : > { %v11048_v1 = vsel %vm1619_vm5, %v15182_v5, %v6030_v12  ;;  %v11066_v12 = vsel %vm996_vm4, %v5416_v31, %v5418_v40  ;;  %v6124_v9 = vsel %vm383_vm1, %v6123_v23, %v11018_v35  ;;  %v3834_v40 = vrot.slane %v10722_v60, 4 }
 0x450   : > { %v6112_v50 = vsel %vm383_vm1, %v6111_v52, %v11048_v1  ;;  %v5406_v31 = vrot.slane %v10891_v24, 1  ;;  %v11086_v5 = vperm.slane %v6124_v9, %v15166_v17  ;;  %v11099_v52 = vpack.i.bf16 %v11066_v12, %v11038_v45 }
 0x451   : > { %v3280_v23 = vrot.slane %v10947_v10, 4  ;;  %v3876_v16 = vrot.slane %v10774_v34, 4  ;;  %v15189_v34 = vrot.slane %v10771_v22, 4  ;;  %v3887_v22 = vperm.slane %v10989_v33, %v15166_v17 }
 0x452   : > { %15184 = vst [vmem:[#allocation36_spill] sm:$0xff] %v11086_v5  ;;  %v6135_v38 = vrot.slane %v11086_v5, 4  ;;  %v3891_v5 = vsel %vm383_vm1, %v10781_v58, %v3890_v29 }
 0x453   : > { %7655 = vrot.lane.b32.xlu2 %v15181_v28, %s8352_s17  ;;  %v11060_v28 = vpop.permute.xlu2 %7515  ;;  %v3821_v58 = vsel %vm383_vm1, %v15189_v34, %v10755_v11 }
 0x455   : > { %7640 = vrot.lane.b32.xlu1 %v10903_v49, %s8348_s23  ;;  %7650 = vrot.lane.b32.xlu0 %v7629_v43, %s8348_s23  ;;  %v3293_v49 = vsel %vm383_vm1, %v3277_v19, %v3292_v21  ;;  %v11080_v43 = vperm.slane %v3291_v46, %v15167_v3  ;;  %v11094_v19 = vperm.slane %v3211_v8, %v15166_v17 }
 0x456   : > { %v11089_v4 = vperm.slane %v3293_v49, %v15167_v3  ;;  %v11103_v46 = vperm.slane %v6112_v50, %v15166_v17  ;;  %v3267_v21 = vsel %vm383_vm1, %v3266_v2, %v10718_v0  ;;  %v3835_v2 = vsel %vm383_vm1, %v10778_v54, %v3834_v40 }
 0x457   : > { %v3225_v8 = vsel %vm383_vm1, %v11094_v19, %v3224_v14  ;;  %v11112_v49 = vperm.slane %v3267_v21, %v15166_v17  ;;  %v5405_v14 = vrot.slane %v10911_v53, 1  ;;  %v3843_v9 = vperm.slane %v3835_v2, %v15166_v17 }
 0x458   : > { %15185 = vst [vmem:[#allocation33_spill] sm:$0xff] %v11103_v46  ;;  %v11120_v50 = vsel %vm383_vm1, %v6135_v38, %v11103_v46  ;;  %v11123_v0 = vperm.slane %v3225_v8, %v15167_v3  ;;  %v15187_v38 = vpack.i.bf16 %v10855_v15, %v10838_v41  ;;  %v15188_v54 = vpack.i.bf16 %v10844_v48, %v10841_v7 }
 0x459   : > { %15186 = vst [vmem:[#allocation34_spill] sm:$0xff] %v11120_v50  ;;  %v3281_v21 = vsel %vm383_vm1, %v11112_v49, %v3280_v23  ;;  %v3899_v8 = vperm.slane %v3891_v5, %v15166_v17  ;;  %v3833_v41 = vsel %vm383_vm1, %v3832_v59, %v10722_v60  ;;  %v11155_v15 = vsel %vm996_vm4, %v5405_v14, %v5406_v31 }
 0x45a   : > { %v11145_v23 = vperm.slane %v3281_v21, %v15167_v3  ;;  %v11158_v7 = vsel %vm996_vm4, %v5406_v31, %v5408_v61  ;;  %v3856_v48 = vrot.slane %v3843_v9, 4  ;;  %v3831_v5 = vperm.slane %v11010_v47, %v15166_v17 }
 0x45b   : > { %7680 = vrot.lane.b32.xlu2 %v11099_v52, %s8346_s21  ;;  %v3912_v11 = vrot.slane %v3899_v8, 4  ;;  %v3889_v59 = vsel %vm383_vm1, %v3888_v42, %v10725_v39  ;;  %v3827_v60 = vperm.slane %v3821_v58, %v15166_v17  ;;  %v7689_v31 = vpack.i.bf16 %v11158_v7, %v11155_v15 }
 0x45c   : > { %v3857_v61 = vsel %vm383_vm1, %v3856_v48, %v3831_v5  ;;  %v3877_v14 = vsel %vm383_vm1, %v3876_v16, %v10758_v25  ;;  %v3839_v39 = vperm.slane %v3833_v41, %v15166_v17  ;;  %v7674_v42 = vpack.i.bf16 %v10958_v51, %v10954_v20 }
 0x45d   : > { %7660 = vrot.lane.b32.xlu1 %v15187_v38, %s8350_s29  ;;  %7665 = vrot.lane.b32.xlu0 %v15188_v54, %s8351_s8  ;;  %v11142_v40 = vpop.permute.xlu2 %7530  ;;  %v3913_v2 = vsel %vm383_vm1, %v3912_v11, %v3887_v22  ;;  %v11176_v47 = vperm.slane %v3857_v61, %v15167_v3  ;;  %v3858_v21 = vrot.slane %v3831_v5, 4  ;;  %v3846_v54 = vrot.slane %v3827_v60, 4  ;;  %v11200_v11 = vpop.permute.xlu0 %7520 }
 0x45e   : > { %v11179_v33 = vperm.slane %v3913_v2, %v15167_v3  ;;  %v3883_v25 = vperm.slane %v3877_v14, %v15166_v17  ;;  %v3895_v16 = vperm.slane %v3889_v59, %v15166_v17  ;;  %v3278_v58 = vrot.slane %v11112_v49, 4 }
 0x45f   : > { %v3222_v51 = vrot.slane %v11094_v19, 4  ;;  %v3859_v20 = vsel %vm383_vm1, %v3843_v9, %v3858_v21  ;;  %v7704_v41 = vpack.i.bf16 %v10970_v30, %v10967_v55  ;;  %v6042_v48 = vrot.slane %v10930_v63, 2 }
 0x460   : > { %v3847_v5 = vsel %vm383_vm1, %v3839_v39, %v3846_v54  ;;  %v3900_v59 = vrot.slane %v3895_v16, 4  ;;  %v3902_v61 = vrot.slane %v3883_v25, 4  ;;  %v3914_v2 = vrot.slane %v3887_v22, 4 }
 0x461   : > { %v11203_v14 = vperm.slane %v3847_v5, %v15167_v3  ;;  %v11206_v19 = vperm.slane %v3859_v20, %v15167_v3  ;;  %v3248_v9 = vrot.slane %v11123_v0, 4  ;;  %v3304_v55 = vrot.slane %v11145_v23, 4 }
 0x462   : > { %v3903_v30 = vsel %vm383_vm1, %v3895_v16, %v3902_v61  ;;  %v3915_v49 = vsel %vm383_vm1, %v3899_v8, %v3914_v2  ;;  %v11214_v21 = vsel %vm383_vm1, %v3222_v51, %v10984_v57  ;;  %v11218_v22 = vsel %vm383_vm1, %v3278_v58, %v10947_v10 }
 0x463   : > { %7690 = vrot.lane.b32.xlu2 %v7689_v31, %s8348_s23  ;;  %v11224_v54 = vperm.slane %v3915_v49, %v15167_v3  ;;  %v11227_v20 = vsel %vm383_vm1, 0.0, %v3248_v9  ;;  %v11230_v16 = vsel %vm383_vm1, 0.0, %v3304_v55  ;;  %v3250_v10 = vrot.slane %v11057_v27, 4 }
 0x464   : > { %v3306_v51 = vrot.slane %v11080_v43, 4  ;;  %v15190_v9 = vrot.slane %v10932_v62, 2  ;;  %v15199_v57 = vrot.slane %v10895_v44, 2 }
 0x465   : > { %7675 = vrot.lane.b32.xlu1 %v7674_v42, %s8346_s21  ;;  %7670 = vrot.lane.b32.xlu0 %v7689_v31, %s8346_s21  ;;  %v11191_v34 = vpop.permute.xlu2 %7540  ;;  %v3844_v31 = vrot.slane %v3839_v39, 4  ;;  %v11221_v39 = vperm.slane %v3903_v30, %v15167_v3  ;;  %v11250_v2 = vsel %vm383_vm1, 0.0, %v3250_v10 }
 0x466   : > { %v11255_v55 = vsel %vm1619_vm5, %v6042_v48, %v15190_v9  ;;  %v11258_v30 = vsel %vm383_vm1, 0.0, %v3306_v51  ;;  %v3308_v51 = vrot.slane %v11089_v4, 4 }
 0x467   : > { %v11242_v5 = vsel %vm383_vm1, %v3844_v31, %v3827_v60  ;;  %15191 = vst [vmem:[#allocation40_spill] sm:$0xff] %v11255_v55  ;;  %v11261_v60 = vsel %vm383_vm1, %v3900_v59, %v3883_v25  ;;  %v7714_v49 = vpack.i.bf16 %v11255_v55, %v11023_v32  ;;  %v3252_v25 = vrot.slane %v11070_v26, 4 }
 0x469   : > { %v11284_v9 = vsel %vm383_vm1, 0.0, %v3252_v25  ;;  %v6037_v25 = vrot.slane %v10913_v36, 2 }
 0x46a   : > { %15194 = vst [vmem:[#allocation26_spill] sm:$0xff] %v11284_v9 }
 0x46b   : > { %7705 = vrot.lane.b32.xlu2 %v7704_v41, %s8348_s23  ;;  %v11309_v29 = vsel %vm1619_vm5, %v6037_v25, %v15199_v57  ;;  %v3870_v57 = vrot.slane %v11203_v14, 4  ;;  %v3926_v25 = vrot.slane %v11221_v39, 4 }
 0x46c   : > { %15200 = vst [vmem:[#allocation44_spill] sm:$0xff] %v11309_v29 }
 0x46d   : > { %7685 = vrot.lane.b32.xlu0 %v7704_v41, %s8346_s21  ;;  %7700 = vrot.lane.b32.xlu1 %v11099_v52, %s8348_s23  ;;  %v11247_v61 = vpop.permute.xlu2 %7560 }
 0x46f   : > { %v11263_v41 = vpop.permute.xlu1 %7525  ;;  %v11265_v31 = vpop.permute.xlu0 %7545 }
 0x473   : > { %7715 = vrot.lane.b32.xlu2 %v7714_v49, %s8346_s21  ;;  %v11287_v49 = vsel %vm383_vm1, 0.0, %v3308_v51 }
 0x474   : > { %15195 = vst [vmem:[#allocation20_spill] sm:$0xff] %v11287_v49 }
 0x475   : > { %7695 = vrot.lane.b32.xlu0 %v7674_v42, %s8348_s23  ;;  %6457 = vrot.lane.b32.xlu1 %v11043_v18, %s8348_s23  ;;  %v11275_v48 = vpop.permute.xlu2 %7585  ;;  %v7709_v42 = vpack.i.bf16 %v11018_v35, %v11043_v18  ;;  %v6027_v18 = vrot.slane %v10911_v53, 2 }
 0x476   : > { %15192 = vst [vmem:[#allocation25_spill] sm:$0xff] %v11275_v48 }
 0x477   : > { %v11278_v59 = vpop.permute.xlu1 %7535  ;;  %v11280_v10 = vpop.permute.xlu0 %7565 }
 0x478   : > { %15193 = vst [vmem:[#allocation27_spill] sm:$0xff] %v11280_v10  ;;  %v11346_v10 = vsel %vm383_vm1, 0.0, %v3926_v25 }
 0x479   : > { %15210 = vst [vmem:[#allocation52_spill] sm:$0xff] %v11346_v10  ;;  %v15215_v10 = vld [vmem:[#allocation23_spill] sm:$0xff] }
 0x47b   : > { %6455 = vrot.lane.b32.xlu2 %v11255_v55, %s8348_s23 }
 0x47d   : > { %7710 = vrot.lane.b32.xlu0 %v7709_v42, %s8346_s21  ;;  %6453 = vrot.lane.b32.xlu1 %v11023_v32, %s8348_s23  ;;  %v11298_v58 = vpop.permute.xlu2 %7605  ;;  %v15201_v42 = vrot.slane %v10891_v24, 2 }
 0x47e   : > { %15196 = vst [vmem:[#allocation41_spill] sm:$0xff] %v11298_v58  ;;  %v15206_v58 = vrot.slane %v10879_v13, 2 }
 0x47f   : > { %v11301_v51 = vpop.permute.xlu1 %7550  ;;  %v11303_v8 = vpop.permute.xlu0 %7575  ;;  %v11314_v52 = vsel %vm1619_vm5, %v6027_v18, %v15201_v42  ;;  %v6032_v18 = vrot.slane %v10893_v56, 2 }
 0x480   : > { %15197 = vst [vmem:[#allocation42_spill] sm:$0xff] %v11301_v51  ;;  %v7724_v38 = vpack.i.bf16 %v11314_v52, %v11309_v29 }
 0x481   : > { %15198 = vst [vmem:[#allocation43_spill] sm:$0xff] %v11303_v8  ;;  %v11335_v51 = vsel %vm1619_vm5, %v6032_v18, %v15206_v58 }
 0x482   : > { %15202 = vst [vmem:[#allocation45_spill] sm:$0xff] %v11314_v52  ;;  %v7719_v58 = vpack.i.bf16 %v11335_v51, %v11048_v1 }
 0x483   : > { %6445 = vrot.lane.b32.xlu2 %v11048_v1, %s8348_s23  ;;  %15207 = vst [vmem:[#allocation49_spill] sm:$0xff] %v11335_v51 }
 0x485   : > { %6449 = vrot.lane.b32.xlu0 %v11018_v35, %s8348_s23  ;;  %7725 = vrot.lane.b32.xlu1 %v7724_v38, %s8346_s21  ;;  %v11323_v50 = vpop.permute.xlu2 %4208  ;;  %v11339_v35 = vperm.slane %v10860_v6, %v15167_v3  ;;  %v3874_v38 = vrot.slane %v11206_v19, 4 }
 0x486   : > { %15203 = vst [vmem:[#allocation46_spill] sm:$0xff] %v11323_v50  ;;  %v11343_v50 = vsel %vm383_vm1, 0.0, %v3870_v57 }
 0x487   : > { %v11328_v42 = vpop.permute.xlu1 %7555  ;;  %v11330_v8 = vpop.permute.xlu0 %7590  ;;  %15208 = vst [vmem:[#allocation50_spill] sm:$0xff] %v11339_v35  ;;  %v2668_v6 = vrot.slane %v11339_v35, 4  ;;  %v11361_v25 = vsel %vm383_vm1, 0.0, %v3874_v38  ;;  %v3928_v38 = vrot.slane %v11179_v33, 4 }
 0x488   : > { %15204 = vst [vmem:[#allocation47_spill] sm:$0xff] %v11328_v42  ;;  %v3930_v42 = vrot.slane %v11224_v54, 4 }
 0x489   : > { %15205 = vst [vmem:[#allocation48_spill] sm:$0xff] %v11330_v8  ;;  %v11350_v8 = vperm.slane %v10818_v37, %v15167_v3  ;;  %v2669_v57 = vsel %vm383_vm1, 0.0, %v2668_v6 }
 0x48a   : > { %15209 = vst [vmem:[#allocation51_spill] sm:$0xff] %v11343_v50  ;;  %v11370_v48 = vsel %vm383_vm1, 0.0, %v3930_v42 }
 0x48b   : > { %15211 = vst [vmem:[#allocation53_spill] sm:$0xff] %v11350_v8  ;;  %6443 = vrot.lane.b32.xlu2 %v11314_v52, %s8348_s23  ;;  %v2612_v18 = vrot.slane %v11350_v8, 4  ;;  %v3872_v8 = vrot.slane %v11176_v47, 4 }
 0x48d   : > { %7720 = vrot.lane.b32.xlu0 %v7719_v58, %s8346_s21  ;;  %6451 = vrot.lane.b32.xlu1 %v11309_v29, %s8348_s23  ;;  %v11366_v37 = vpop.permute.xlu2 %4214  ;;  %v2613_v58 = vsel %vm383_vm1, 0.0, %v2612_v18  ;;  %s6945_s21 = scalar_lea.sflag [#allocation6], %s8484_s22 }
 0x48e   : > { %15212 = vst [vmem:[#allocation54_spill] sm:$0xff] %v11366_v37  ;;  %v7729_v50 = vpack.i.bf16 %v2669_v57, %v2613_v58  ;;  %v15216_v37 = vld [vmem:[#allocation24_spill] sm:$0xff]  ;;  %v11396_v57 = vsel %vm383_vm1, 0.0, %v3872_v8  ;;  %v15223_v58 = vld [vmem:[#allocation37_spill] sm:$0xff]  ;;  %v15226_v8 = vld [vmem:[#allocation39_spill] sm:$0xff] }
 0x48f   : > { %v11372_v9 = vpop.permute.xlu1 %7570  ;;  %v11374_v35 = vpop.permute.xlu0 %7595  ;;  %v15217_v49 = vpack.i.bf16 %v15215_v10, %v15216_v37  ;;  %v11399_v10 = vsel %vm383_vm1, 0.0, %v3928_v38  ;;  %v15222_v37 = vld [vmem:[#allocation38_spill] sm:$0xff] }
 0x490   : > { %15213 = vst [vmem:[#allocation55_spill] sm:$0xff] %v11372_v9 }
 0x491   : > { %15214 = vst [vmem:[#allocation56_spill] sm:$0xff] %v11374_v35 }
 0x493   : > { %7740 = vrot.lane.b32.xlu2 %v15217_v49, %s8355_s19 }
 0x495   : > { %6447 = vrot.lane.b32.xlu0 %v11335_v51, %s8348_s23  ;;  %7730 = vrot.lane.b32.xlu1 %v7729_v50, %s8353_s11  ;;  %v11387_v42 = vpop.permute.xlu2 %4220  ;;  %v15221_v50 = vpack.i.bf16 %v11089_v4, %v11070_v26  ;;  %v5433_v26 = vrot.slane %v11038_v45, 4  ;;  %v5489_v4 = vrot.slane %v11066_v12, 4 }
 0x496   : > { %15218 = vst [vmem:[#allocation23_spill] sm:$0xff] %v11387_v42  ;;  %v15224_v42 = vpack.i.bf16 %v15222_v37, %v15223_v58  ;;  %v15231_v58 = vpack.i.bf16 %v11080_v43, %v11057_v27  ;;  %v14873_v27 = vunpack.i.l.bf16 %v11060_v28  ;;  %v7532_v43 = vunpack.i.l.bf16 %v11142_v40 }
 0x497   : > { %v11391_v6 = vpop.permute.xlu1 %7580  ;;  %v11393_v18 = vpop.permute.xlu0 %7610  ;;  %v5434_v37 = vsel %vm383_vm1, %v5433_v26, %v11155_v15  ;;  %v14870_v26 = vunpack.i.h.bf16 %v11060_v28 }
 0x498   : > { %15219 = vst [vmem:[#allocation24_spill] sm:$0xff] %v11391_v6  ;;  %v11469_v49 = vperm.slane %v5434_v37, %v15166_v17  ;;  %v11487_v37 = vrot.slane %v14873_v27, 4 }
 0x499   : > { %15220 = vst [vmem:[#allocation57_spill] sm:$0xff] %v11393_v18  ;;  %v15225_v18 = vld [vmem:[#allocation35_spill] sm:$0xff] }
 0x49a   : > { %v15227_v6 = vpack.i.bf16 %v15225_v18, %v15226_v8  ;;  %v6113_v18 = vrot.slane %v11048_v1, 4  ;;  %v15232_v8 = vpack.i.bf16 %v11145_v23, %v11123_v0  ;;  %v11444_v1 = vperm.slane %v11242_v5, %v15167_v3 }
 0x49b   : > { %7760 = vrot.lane.b32.xlu2 %v15221_v50, %s8351_s8  ;;  %v15230_v50 = vpack.i.bf16 %v11179_v33, %v11176_v47  ;;  %v11448_v33 = vperm.slane %v11261_v60, %v15167_v3  ;;  %v5490_v0 = vsel %vm383_vm1, %v5489_v4, %v11158_v7  ;;  %v7523_v23 = vunpack.i.h.bf16 %v11200_v11 }
 0x49c   : > { %15234 = vst [vmem:[#allocation39_spill] sm:$0xff] %v11444_v1  ;;  %v6114_v5 = vsel %vm383_vm1, %v11023_v32, %v6113_v18  ;;  %v11477_v4 = vperm.slane %v5490_v0, %v15166_v17  ;;  %v3868_v18 = vrot.slane %v11444_v1, 4  ;;  %v15240_v1 = vpack.i.bf16 %v11230_v16, %v11227_v20 }
 0x49d   : > { %7735 = vrot.lane.b32.xlu0 %v15224_v42, %s8354_s18  ;;  %7745 = vrot.lane.b32.xlu1 %v15227_v6, %s8356_s15  ;;  %v11415_v38 = vpop.permute.xlu2 %7620  ;;  %v7522_v6 = vunpack.i.l.bf16 %v11200_v11  ;;  %15235 = vst [vmem:[#allocation58_spill] sm:$0xff] %v11448_v33  ;;  %v6055_v11 = vrot.slane %v11309_v29, 4  ;;  %v11483_v42 = vrot.slane %v14870_v26, 4  ;;  %v2790_v29 = vrot.slane %v7532_v43, 4 }
 0x49e   : > { %15228 = vst [vmem:[#allocation38_spill] sm:$0xff] %v11415_v38  ;;  %v15243_v20 = vpack.i.bf16 %v11221_v39, %v11203_v14  ;;  %v15244_v16 = vpack.i.bf16 %v11224_v54, %v11206_v19  ;;  %v4855_v14 = vrot.slane %v10895_v44, 4 }
 0x49f   : > { %v11417_v35 = vpop.permute.xlu1 %7600  ;;  %v11419_v9 = vpop.permute.xlu0 %4210  ;;  %v2792_v32 = vrot.slane %v7522_v6, 4 }
 0x4a0   : > { %15229 = vst [vmem:[#allocation37_spill] sm:$0xff] %v11419_v9  ;;  %v2848_v9 = vrot.slane %v7523_v23, 4 }
 0x4a1   : > { %v2793_v0 = vsel %vm383_vm1, %v7532_v43, %v2792_v32  ;;  %v4799_v32 = vrot.slane %v10913_v36, 4 }
 0x4a3   : > { %7770 = vrot.lane.b32.xlu2 %v15230_v50, %s8350_s29  ;;  %v7533_v50 = vunpack.i.h.bf16 %v11142_v40  ;;  %v11474_v40 = vperm.slane %v11218_v22, %v15167_v3  ;;  %v11490_v22 = vperm.slane %v6114_v5, %v15166_v17  ;;  %v11505_v5 = vsel %vm383_vm1, %v6055_v11, %v11314_v52 }
 0x4a5   : > { %7755 = vrot.lane.b32.xlu0 %v15231_v58, %s8350_s29  ;;  %7750 = vrot.lane.b32.xlu1 %v15232_v8, %s8352_s17  ;;  %v11440_v47 = vpop.permute.xlu2 %7645  ;;  %v11465_v8 = vperm.slane %v11214_v21, %v15167_v3  ;;  %15238 = vst [vmem:[#allocation61_spill] sm:$0xff] %v11474_v40  ;;  %v3924_v21 = vrot.slane %v11448_v33, 4  ;;  %v15241_v33 = vld [vmem:[#allocation29_spill] sm:$0xff]  ;;  %v2849_v43 = vsel %vm383_vm1, %v7533_v50, %v2848_v9 }
 0x4a6   : > { %15233 = vst [vmem:[#allocation35_spill] sm:$0xff] %v11440_v47  ;;  %v11500_v47 = vperm.slane %v15241_v33, %v15166_v17  ;;  %v3869_v33 = vsel %vm383_vm1, 0.0, %v3868_v18  ;;  %v2791_v9 = vsel %vm383_vm1, %v2790_v29, %v7522_v6  ;;  %v4801_v18 = vrot.slane %v10911_v53, 4 }
 0x4a7   : > { %v11459_v58 = vpop.permute.xlu1 %4212  ;;  %v11461_v60 = vpop.permute.xlu0 %4216  ;;  %15237 = vst [vmem:[#allocation60_spill] sm:$0xff] %v11465_v8  ;;  %v3246_v26 = vrot.slane %v11465_v8, 4  ;;  %v3925_v11 = vsel %vm383_vm1, 0.0, %v3924_v21  ;;  %v4857_v21 = vrot.slane %v10891_v24, 4  ;;  %v11546_v52 = vperm.slane %v2791_v9, %v15166_v17 }
 0x4a8   : > { %15236 = vst [vmem:[#allocation59_spill] sm:$0xff] %v11461_v60  ;;  %v2846_v60 = vrot.slane %v7533_v50, 4  ;;  %v11524_v50 = vperm.slane %v2793_v0, %v15166_v17  ;;  %v7799_v6 = vpack.i.bf16 %v3925_v11, %v3869_v33  ;;  %v4811_v0 = vrot.slane %v10930_v63, 4 }
 0x4a9   : > { %15239 = vst [vmem:[#allocation62_spill] sm:$0xff] %v11490_v22  ;;  %v3302_v22 = vrot.slane %v11474_v40, 4  ;;  %v3247_v54 = vsel %vm383_vm1, 0.0, %v3246_v26  ;;  %v4858_v27 = vsel %vm383_vm1, %v10895_v44, %v4857_v21  ;;  %v4869_v26 = vrot.slane %v10879_v13, 4 }
 0x4aa   : > { %15242 = vst [vmem:[#allocation29_spill] sm:$0xff] %v11500_v47  ;;  %v2847_v39 = vsel %vm383_vm1, %v2846_v60, %v7523_v23  ;;  %v4802_v23 = vsel %vm383_vm1, %v10913_v36, %v4801_v18  ;;  %v4813_v60 = vrot.slane %v10893_v56, 4  ;;  %v4800_v33 = vsel %vm383_vm1, %v4799_v32, %v10911_v53 }
 0x4ab   : > { %7785 = vrot.lane.b32.xlu2 %v15240_v1, %s8354_s18  ;;  %v3303_v29 = vsel %vm383_vm1, 0.0, %v3302_v22  ;;  %v11549_v22 = vperm.slane %v2849_v43, %v15166_v17  ;;  %v4856_v11 = vsel %vm383_vm1, %v4855_v14, %v10891_v24  ;;  %v11556_v36 = vperm.slane %v2847_v39, %v15166_v17 }
 0x4ac   : > { %v7779_v18 = vpack.i.bf16 %v3303_v29, %v3247_v54  ;;  %v4814_v44 = vsel %vm383_vm1, %v10930_v63, %v4813_v60  ;;  %v4870_v9 = vsel %vm383_vm1, %v10932_v62, %v4869_v26  ;;  %v4810_v43 = vperm.slane %v4802_v23, %v15166_v17 }
 0x4ad   : > { %7765 = vrot.lane.b32.xlu0 %v15243_v20, %s8352_s17  ;;  %7775 = vrot.lane.b32.xlu1 %v15244_v16, %s8351_s8  ;;  %v11518_v1 = vpop.permute.xlu2 %7655  ;;  %v4867_v16 = vrot.slane %v10932_v62, 4  ;;  %v4866_v21 = vperm.slane %v4858_v27, %v15166_v17  ;;  %v4812_v53 = vsel %vm383_vm1, %v4811_v0, %v10893_v56  ;;  %v14876_v32 = vunpack.i.h.bf16 %v11191_v34 }
 0x4ae   : > { %15245 = vst [vmem:[#allocation63_spill] sm:$0xff] %v11518_v1  ;;  %v15247_v63 = vpack.i.bf16 %v11258_v30, %v11250_v2  ;;  %v11579_v27 = vperm.slane %v4800_v33, %v15166_v17  ;;  %v11582_v56 = vperm.slane %v4856_v11, %v15166_v17  ;;  %v4822_v54 = vperm.slane %v4814_v44, %v15166_v17  ;;  %v15257_v44 = vld [vmem:[#allocation51_spill] sm:$0xff] }
 0x4af   : > { %v11529_v20 = vpop.permute.xlu1 %4218  ;;  %v11531_v19 = vpop.permute.xlu0 %4222  ;;  %v4868_v24 = vsel %vm383_vm1, %v4867_v16, %v10879_v13  ;;  %v4878_v29 = vperm.slane %v4870_v9, %v15166_v17  ;;  %v11595_v16 = vperm.slane %v4812_v53, %v15166_v17  ;;  %v7528_v60 = vunpack.i.h.bf16 %v11263_v41 }
 0x4b0   : > { %15246 = vst [vmem:[#allocation64_spill] sm:$0xff] %v11531_v19  ;;  %v11598_v23 = vperm.slane %v4868_v24, %v15166_v17  ;;  %v7527_v26 = vunpack.i.l.bf16 %v11263_v41  ;;  %v4837_v33 = vrot.slane %v4810_v43, 4  ;;  %v4893_v11 = vrot.slane %v4866_v21, 4 }
 0x4b1   : > { %v4825_v9 = vrot.slane %v11579_v27, 4  ;;  %v4881_v53 = vrot.slane %v11582_v56, 4  ;;  %v4835_v14 = vrot.slane %v4822_v54, 4  ;;  %v4891_v2 = vrot.slane %v4878_v29, 4 }
 0x4b2   : > { %v4894_v24 = vsel %vm383_vm1, %v4878_v29, %v4893_v11  ;;  %v15251_v39 = vpack.i.bf16 %v11370_v48, %v11361_v25  ;;  %v2778_v29 = vrot.slane %v7527_v26, 4  ;;  %v7547_v11 = vunpack.i.l.bf16 %v11265_v31  ;;  %v15252_v48 = vld [vmem:[#allocation20_spill] sm:$0xff]  ;;  %v15253_v25 = vld [vmem:[#allocation26_spill] sm:$0xff] }
 0x4b3   : > { %7800 = vrot.lane.b32.xlu2 %v7799_v6, %s8353_s11  ;;  %v4826_v13 = vsel %vm383_vm1, %v11595_v16, %v4825_v9  ;;  %v2781_v6 = vsel %vm383_vm1, %v7527_v26, %v11487_v37  ;;  %v7537_v41 = vunpack.i.l.bf16 %v11278_v59  ;;  %v7548_v40 = vunpack.i.h.bf16 %v11265_v31 }
 0x4b4   : > { %v4834_v37 = vperm.slane %v4826_v13, %v15167_v3 }
 0x4b5   : > { %7780 = vrot.lane.b32.xlu0 %v7779_v18, %s8353_s11  ;;  %7790 = vrot.lane.b32.xlu1 %v15247_v63, %s8355_s19  ;;  %v11576_v62 = vpop.permute.xlu2 %7680  ;;  %v11604_v18 = vrot.slane %v14876_v32, 4  ;;  %v4838_v63 = vsel %vm383_vm1, %v4822_v54, %v4837_v33  ;;  %v4882_v32 = vsel %vm383_vm1, %v11598_v23, %v4881_v53  ;;  %v2834_v33 = vrot.slane %v7528_v60, 4 }
 0x4b6   : > { %15248 = vst [vmem:[#allocation65_spill] sm:$0xff] %v11576_v62  ;;  %v2837_v54 = vsel %vm383_vm1, %v7528_v60, %v11483_v42  ;;  %v11634_v53 = vperm.slane %v4838_v63, %v15167_v3  ;;  %v11637_v42 = vperm.slane %v4894_v24, %v15167_v3  ;;  %v15256_v60 = vld [vmem:[#allocation52_spill] sm:$0xff]  ;;  %v4890_v26 = vperm.slane %v4882_v32, %v15167_v3 }
 0x4b7   : > { %v11590_v30 = vpop.permute.xlu1 %7615  ;;  %v11592_v0 = vpop.permute.xlu0 %7625  ;;  %v15258_v8 = vpack.i.bf16 %v15256_v60, %v15257_v44  ;;  %v11652_v24 = vperm.slane %v2837_v54, %v15166_v17  ;;  %v7538_v44 = vunpack.i.h.bf16 %v11278_v59  ;;  %v15262_v32 = vunpack.i.h.bf16 %v11060_v28 }
 0x4b8   : > { %15249 = vst [vmem:[#allocation66_spill] sm:$0xff] %v11590_v30  ;;  %v15264_v54 = vunpack.i.h.bf16 %v11247_v61  ;;  %v2986_v59 = vrot.slane %v7537_v41, 4  ;;  %v7829_v60 = vpack.i.bf16 %v11637_v42, %v11634_v53  ;;  %v3040_v46 = vrot.slane %v7548_v40, 4 }
 0x4b9   : > { %15250 = vst [vmem:[#allocation67_spill] sm:$0xff] %v11592_v0 }
 0x4ba   : > { %v11671_v31 = vrot.slane %v15264_v54, 4  ;;  %v3041_v62 = vsel %vm383_vm1, %v3040_v46, %v7538_v44  ;;  %v15272_v46 = vrot.slane %v11155_v15, 4 }
 0x4bb   : > { %7815 = vrot.lane.b32.xlu2 %v15251_v39, %s8356_s15  ;;  %v15254_v39 = vpack.i.bf16 %v15252_v48, %v15253_v25  ;;  %v4836_v48 = vsel %vm383_vm1, %v4835_v14, %v4810_v43  ;;  %v4892_v25 = vsel %vm383_vm1, %v4891_v2, %v4866_v21  ;;  %v2835_v43 = vsel %vm383_vm1, %v2834_v33, %v15262_v32 }
 0x4bc   : > { %v15263_v21 = vunpack.i.l.bf16 %v11060_v28  ;;  %v11667_v2 = vperm.slane %v2781_v6, %v15166_v17  ;;  %v4898_v47 = vperm.slane %v4892_v25, %v15167_v3  ;;  %v15265_v33 = vunpack.i.l.bf16 %v11247_v61 }
 0x4bd   : > { %7795 = vrot.lane.b32.xlu0 %v15254_v39, %s8356_s15  ;;  %v11631_v9 = vpop.permute.xlu2 %7690  ;;  %7805 = vrot.lane.b32.xlu1 %v15258_v8, %s8354_s18  ;;  %v15259_v39 = vunpack.i.l.bf16 %v11191_v34  ;;  %v4849_v32 = vrot.slane %v4834_v37, 4  ;;  %v4905_v6 = vrot.slane %v4890_v26, 4 }
 0x4be   : > { %15255 = vst [vmem:[#allocation20_spill] sm:$0xff] %v11631_v9  ;;  %v2779_v14 = vsel %vm383_vm1, %v2778_v29, %v15263_v21  ;;  %v11679_v28 = vrot.slane %v15265_v33, 4  ;;  %v2984_v29 = vrot.slane %v7547_v11, 4  ;;  %v11682_v21 = vperm.slane %v2835_v43, %v15166_v17 }
 0x4bf   : > { %v11649_v63 = vrot.slane %v15259_v39, 4  ;;  %v11656_v8 = vpop.permute.xlu1 %7630  ;;  %v11658_v13 = vpop.permute.xlu0 %7635  ;;  %v4842_v39 = vperm.slane %v4836_v48, %v15167_v3  ;;  %v11687_v48 = vperm.slane %v2779_v14, %v15166_v17  ;;  %v7819_v9 = vpack.i.bf16 %v4890_v26, %v4834_v37  ;;  %v15268_v14 = vld [vmem:[#allocation25_spill] sm:$0xff] }
 0x4c0   : > { %15260 = vst [vmem:[#allocation26_spill] sm:$0xff] %v11656_v8  ;;  %v2985_v33 = vsel %vm383_vm1, %v2984_v29, %v7537_v41  ;;  %v2987_v8 = vsel %vm383_vm1, %v7547_v11, %v2986_v59  ;;  %v15266_v43 = vpack.i.bf16 %v11399_v10, %v11396_v57  ;;  %v4907_v0 = vrot.slane %v4898_v47, 4  ;;  %v15269_v57 = vld [vmem:[#allocation27_spill] sm:$0xff] }
 0x4c1   : > { %15261 = vst [vmem:[#allocation52_spill] sm:$0xff] %v11658_v13  ;;  %v3042_v13 = vrot.slane %v7538_v44, 4  ;;  %v14888_v30 = vunpack.i.h.bf16 %v15268_v14  ;;  %v14890_v25 = vunpack.i.l.bf16 %v15268_v14  ;;  %v4850_v41 = vsel %vm383_vm1, 0.0, %v4849_v32 }
 0x4c2   : > { %v4906_v11 = vsel %vm383_vm1, 0.0, %v4905_v6  ;;  %v11717_v32 = vperm.slane %v2987_v8, %v15166_v17  ;;  %v11720_v6 = vperm.slane %v3041_v62, %v15166_v17  ;;  %v5436_v26 = vsel %vm383_vm1, %v11038_v45, %v15272_v46  ;;  %v15276_v46 = vld [vmem:[#allocation41_spill] sm:$0xff] }
 0x4c3   : > { %7830 = vrot.lane.b32.xlu2 %v7829_v60, %s8351_s8  ;;  %v4851_v60 = vrot.slane %v4842_v39, 4  ;;  %v3043_v37 = vsel %vm383_vm1, %v7548_v40, %v3042_v13  ;;  %v4908_v13 = vsel %vm383_vm1, 0.0, %v4907_v0  ;;  %v3666_v8 = vrot.slane %v14888_v30, 4 }
 0x4c4   : > { %v11729_v29 = vperm.slane %v3043_v37, %v15166_v17  ;;  %v15274_v0 = vunpack.i.h.bf16 %v15269_v57  ;;  %v15275_v45 = vunpack.i.l.bf16 %v15269_v57  ;;  %v14894_v37 = vunpack.i.h.bf16 %v15276_v46 }
 0x4c5   : > { %7810 = vrot.lane.b32.xlu0 %v15266_v43, %s8355_s19  ;;  %v11697_v54 = vpop.permute.xlu2 %7705  ;;  %7820 = vrot.lane.b32.xlu1 %v7819_v9, %s8352_s17  ;;  %v11714_v9 = vperm.slane %v2985_v33, %v15166_v17  ;;  %v4852_v40 = vsel %vm383_vm1, 0.0, %v4851_v60  ;;  %v7839_v43 = vpack.i.bf16 %v4906_v11, %v4850_v41  ;;  %v15273_v33 = vld [vmem:[#allocation42_spill] sm:$0xff]  ;;  %v11737_v60 = vrot.slane %v14890_v25, 4 }
 0x4c6   : > { %15267 = vst [vmem:[#allocation51_spill] sm:$0xff] %v11697_v54  ;;  %v7553_v10 = vunpack.i.h.bf16 %v15273_v33  ;;  %v7552_v62 = vunpack.i.l.bf16 %v15273_v33  ;;  %v11741_v15 = vrot.slane %v15274_v0, 4  ;;  %v11745_v41 = vrot.slane %v15275_v45, 4 }
 0x4c7   : > { %v11708_v44 = vpop.permute.xlu1 %7640  ;;  %v11710_v59 = vpop.permute.xlu0 %7650  ;;  %v7824_v11 = vpack.i.bf16 %v4898_v47, %v4842_v39  ;;  %v14896_v30 = vunpack.i.l.bf16 %v15276_v46  ;;  %v7844_v33 = vpack.i.bf16 %v4908_v13, %v4852_v40  ;;  %v15279_v40 = vld [vmem:[#allocation31_spill] sm:$0xff]  ;;  %v4823_v0 = vrot.slane %v11595_v16, 4 }
 0x4c8   : > { %15270 = vst [vmem:[#allocation25_spill] sm:$0xff] %v11708_v44  ;;  %v15277_v44 = vld [vmem:[#allocation43_spill] sm:$0xff]  ;;  %v5456_v13 = vperm.slane %v15279_v40, %v15166_v17  ;;  %v2996_v45 = vrot.slane %v7552_v62, 4  ;;  %v15282_v39 = vrot.slane %v11158_v7, 4 }
 0x4c9   : > { %15271 = vst [vmem:[#allocation27_spill] sm:$0xff] %v11710_v59  ;;  %v5444_v59 = vperm.slane %v5436_v26, %v15166_v17  ;;  %v7578_v1 = vunpack.i.h.bf16 %v15277_v44  ;;  %v3055_v26 = vsel %vm383_vm1, %v7553_v10, %v11604_v18  ;;  %v11778_v18 = vrot.slane %v14894_v37, 4 }
 0x4ca   : > { %v7577_v16 = vunpack.i.l.bf16 %v15277_v44  ;;  %v11789_v7 = vperm.slane %v3055_v26, %v15166_v17  ;;  %v15284_v44 = vunpack.i.l.bf16 %v11191_v34 }
 0x4cb   : > { %7840 = vrot.lane.b32.xlu2 %v7839_v43, %s8354_s18  ;;  %v2999_v43 = vsel %vm383_vm1, %v7552_v62, %v11649_v63  ;;  %v5492_v63 = vsel %vm383_vm1, %v11066_v12, %v15282_v39  ;;  %v11782_v62 = vrot.slane %v14896_v30, 4  ;;  %v3667_v12 = vsel %vm383_vm1, %v3666_v8, %v7578_v1 }
 0x4cc   : > { %v11786_v40 = vperm.slane %v2999_v43, %v15166_v17  ;;  %v5500_v37 = vperm.slane %v5492_v63, %v15166_v17  ;;  %v4824_v43 = vsel %vm383_vm1, %v4823_v0, %v11579_v27 }
 0x4cd   : > { %7825 = vrot.lane.b32.xlu0 %v7824_v11, %s8350_s29  ;;  %v11756_v47 = vpop.permute.xlu2 %7715  ;;  %7845 = vrot.lane.b32.xlu1 %v7844_v33, %s8355_s19  ;;  %v4879_v11 = vrot.slane %v11598_v23, 4  ;;  %v5471_v23 = vrot.slane %v5444_v59, 4  ;;  %v3052_v33 = vrot.slane %v7553_v10, 4  ;;  %v2997_v10 = vsel %vm383_vm1, %v2996_v45, %v15284_v44 }
 0x4ce   : > { %15278 = vst [vmem:[#allocation42_spill] sm:$0xff] %v11756_v47  ;;  %v3668_v47 = vrot.slane %v7578_v1, 4  ;;  %v5527_v8 = vrot.slane %v5500_v37, 4  ;;  %v11805_v63 = vperm.slane %v4824_v43, %v15167_v3 }
 0x4cf   : > { %v11768_v25 = vpop.permute.xlu1 %7660  ;;  %v11770_v54 = vpop.permute.xlu0 %7665  ;;  %v5472_v39 = vsel %vm383_vm1, %v5456_v13, %v5471_v23  ;;  %v4880_v26 = vsel %vm383_vm1, %v4879_v11, %v11582_v56 }
 0x4d0   : > { %15280 = vst [vmem:[#allocation41_spill] sm:$0xff] %v11768_v25  ;;  %v5469_v25 = vrot.slane %v5456_v13, 4  ;;  %v11811_v45 = vperm.slane %v5472_v39, %v15167_v3  ;;  %v11817_v27 = vperm.slane %v4880_v26, %v15167_v3  ;;  %v4847_v0 = vrot.slane %v11805_v63, 4 }
 0x4d1   : > { %15281 = vst [vmem:[#allocation43_spill] sm:$0xff] %v11770_v54  ;;  %v15283_v54 = vld [vmem:[#allocation30_spill] sm:$0xff] }
 0x4d2   : > { %v5512_v30 = vperm.slane %v15283_v54, %v15166_v17  ;;  %v5470_v23 = vsel %vm383_vm1, %v5469_v25, %v5444_v59  ;;  %15285 = vst [vmem:[#allocation31_spill] sm:$0xff] %v11805_v63  ;;  %v15286_v54 = vunpack.i.h.bf16 %v11191_v34  ;;  %v15289_v34 = vrot.slane %v11255_v55, 4 }
 0x4d3   : > { %v11814_v1 = vperm.slane %v5470_v23, %v15167_v3  ;;  %15287 = vst [vmem:[#allocation30_spill] sm:$0xff] %v11817_v27  ;;  %v4903_v44 = vrot.slane %v11817_v27, 4  ;;  %v4848_v23 = vsel %vm383_vm1, 0.0, %v4847_v0  ;;  %v15307_v63 = vunpack.i.h.bf16 %v15269_v57 }
 0x4d4   : > { %v5525_v19 = vrot.slane %v5512_v30, 4  ;;  %v3053_v13 = vsel %vm383_vm1, %v3052_v33, %v15286_v54  ;;  %v5528_v25 = vsel %vm383_vm1, %v5512_v30, %v5527_v8  ;;  %v6068_v11 = vsel %vm383_vm1, %v15289_v34, %v11335_v51  ;;  %v15293_v34 = vld [vmem:[#allocation47_spill] sm:$0xff] }
 0x4d5   : > { %v11819_v56 = vpop.permute.xlu2 %6455  ;;  %v11829_v33 = vperm.slane %v5528_v25, %v15167_v3  ;;  %v11847_v26 = vperm.slane %v3053_v13, %v15166_v17  ;;  %v11850_v8 = vperm.slane %v3667_v12, %v15166_v17  ;;  %v3612_v13 = vrot.slane %v7577_v16, 4 }
 0x4d6   : > { %15288 = vst [vmem:[#allocation68_spill] sm:$0xff] %v11819_v56  ;;  %v5526_v59 = vsel %vm383_vm1, %v5525_v19, %v5500_v37  ;;  %v11841_v19 = vperm.slane %v11505_v5, %v15166_v17  ;;  %v11844_v37 = vperm.slane %v2997_v10, %v15166_v17  ;;  %v4904_v5 = vsel %vm383_vm1, 0.0, %v4903_v44  ;;  %v15295_v44 = vld [vmem:[#allocation28_spill] sm:$0xff] }
 0x4d7   : > { %v11832_v39 = vperm.slane %v5526_v59, %v15167_v3  ;;  %v11835_v43 = vpop.permute.xlu1 %7675  ;;  %v11837_v30 = vpop.permute.xlu0 %7670  ;;  %15292 = vst [vmem:[#allocation71_spill] sm:$0xff] %v11850_v8  ;;  %v7864_v54 = vpack.i.bf16 %v11829_v33, %v11811_v45  ;;  %v11859_v59 = vperm.slane %v6068_v11, %v15166_v17  ;;  %v3611_v10 = vsel %vm383_vm1, %v11737_v60, %v7577_v16 }
 0x4d8   : > { %15290 = vst [vmem:[#allocation69_spill] sm:$0xff] %v11835_v43  ;;  %v7558_v12 = vunpack.i.h.bf16 %v15293_v34  ;;  %v7834_v55 = vpack.i.bf16 %v4904_v5, %v4848_v23  ;;  %v15294_v51 = vunpack.i.h.bf16 %v15268_v14  ;;  %v7557_v43 = vunpack.i.l.bf16 %v15293_v34 }
 0x4d9   : > { %15291 = vst [vmem:[#allocation70_spill] sm:$0xff] %v11837_v30  ;;  %v7859_v25 = vpack.i.bf16 %v11832_v39, %v11814_v1  ;;  %7865 = vrot.lane.b32.xlu1 %v7864_v54, %s8351_s8  ;;  %v6081_v11 = vrot.slane %v11841_v19, 4  ;;  %v11877_v23 = vperm.slane %v15295_v44, %v15166_v17  ;;  %v11886_v5 = vperm.slane %v3611_v10, %v15166_v17 }
 0x4da   : > { %v3669_v56 = vsel %vm383_vm1, %v15294_v51, %v3668_v47  ;;  %7835 = vrot.lane.b32.xlu0 %v7834_v55, %s8353_s11  ;;  %v15296_v51 = vld [vmem:[#allocation32_spill] sm:$0xff]  ;;  %v15299_v44 = vunpack.i.l.bf16 %v15268_v14  ;;  %v3462_v60 = vrot.slane %v7558_v12, 4  ;;  %v3406_v0 = vrot.slane %v7557_v43, 4 }
 0x4db   : > { %7860 = vrot.lane.b32.xlu2 %v7859_v25, %s8350_s29  ;;  %v11881_v47 = vperm.slane %v15296_v51, %v15166_v17  ;;  %15297 = vst [vmem:[#allocation47_spill] sm:$0xff] %v11886_v5  ;;  %v6082_v34 = vsel %vm383_vm1, %v11859_v59, %v6081_v11  ;;  %v11893_v55 = vperm.slane %v3669_v56, %v15166_v17  ;;  %v5457_v54 = vrot.slane %v11877_v23, 4 }
 0x4dc   : > { %v3613_v51 = vsel %vm383_vm1, %v15299_v44, %v3612_v13  ;;  %v4853_v10 = vrot.slane %v11634_v53, 4  ;;  %v4909_v30 = vrot.slane %v11637_v42, 4  ;;  %v3405_v56 = vsel %vm383_vm1, %v11745_v41, %v7557_v43 }
 0x4dd   : > { %v11890_v16 = vpop.permute.xlu2 %6445  ;;  %v5513_v25 = vrot.slane %v11881_v47, 4  ;;  %v3461_v14 = vsel %vm383_vm1, %v11741_v15, %v7558_v12  ;;  %v11911_v13 = vperm.slane %v6082_v34, %v15167_v3  ;;  %v5458_v44 = vsel %vm383_vm1, %v5457_v54, %v11469_v49  ;;  %v15304_v15 = vld [vmem:[#allocation48_spill] sm:$0xff] }
 0x4de   : > { %15298 = vst [vmem:[#allocation28_spill] sm:$0xff] %v11890_v16  ;;  %v11916_v53 = vperm.slane %v5458_v44, %v15167_v3  ;;  %v11923_v41 = vperm.slane %v3613_v51, %v15166_v17  ;;  %v15306_v54 = vunpack.i.l.bf16 %v15269_v57  ;;  %v11940_v51 = vperm.slane %v3405_v56, %v15166_v17  ;;  %v15316_v57 = vld [vmem:[#allocation56_spill] sm:$0xff] }
 0x4df   : > { %v11902_v11 = vpop.permute.xlu1 %7700  ;;  %v11904_v16 = vpop.permute.xlu0 %7685  ;;  %15302 = vst [vmem:[#allocation73_spill] sm:$0xff] %v11911_v13  ;;  %v5514_v42 = vsel %vm383_vm1, %v5513_v25, %v11477_v4  ;;  %v3463_v25 = vsel %vm383_vm1, %v15307_v63, %v3462_v60  ;;  %v15309_v63 = vld [vmem:[#allocation55_spill] sm:$0xff]  ;;  %v7598_v8 = vunpack.i.h.bf16 %v15316_v57  ;;  %v5487_v27 = vrot.slane %v11811_v45, 4 }
 0x4e0   : > { %15300 = vst [vmem:[#allocation32_spill] sm:$0xff] %v11902_v11  ;;  %v4910_v11 = vsel %vm383_vm1, 0.0, %v4909_v30  ;;  %v11927_v12 = vperm.slane %v5514_v42, %v15167_v3  ;;  %v3407_v44 = vsel %vm383_vm1, %v15306_v54, %v3406_v0  ;;  %v5481_v30 = vrot.slane %v11916_v53, 4 }
 0x4e1   : > { %15301 = vst [vmem:[#allocation72_spill] sm:$0xff] %v11904_v16  ;;  %v4854_v16 = vsel %vm383_vm1, 0.0, %v4853_v10  ;;  %6172 = vrot.lane.b32.xlu1 %v11911_v13, %s8352_s17  ;;  %v7573_v60 = vunpack.i.h.bf16 %v15309_v63  ;;  %v7572_v54 = vunpack.i.l.bf16 %v15309_v63  ;;  %v11959_v42 = vperm.slane %v3463_v25, %v15166_v17 }
 0x4e2   : > { %15303 = vst [vmem:[#allocation74_spill] sm:$0xff] %v11916_v53  ;;  %v7849_v34 = vpack.i.bf16 %v4910_v11, %v4854_v16  ;;  %v11943_v16 = vperm.slane %v3461_v14, %v15166_v17  ;;  %v15308_v11 = vld [vmem:[#allocation46_spill] sm:$0xff]  ;;  %v5537_v0 = vrot.slane %v11927_v12, 4  ;;  %v5482_v10 = vsel %vm383_vm1, 0.0, %v5481_v30 }
 0x4e3   : > { %15305 = vst [vmem:[#allocation48_spill] sm:$0xff] %v11927_v12  ;;  %v11956_v14 = vperm.slane %v3407_v44, %v15166_v17  ;;  %v15311_v13 = vunpack.i.h.bf16 %v15304_v15  ;;  %v15312_v30 = vunpack.i.l.bf16 %v15304_v15  ;;  %v7597_v5 = vunpack.i.l.bf16 %v15316_v57 }
 0x4e4   : > { %7850 = vrot.lane.b32.xlu0 %v7849_v34, %s8356_s15  ;;  %v5538_v34 = vsel %vm383_vm1, 0.0, %v5537_v0  ;;  %v15315_v0 = vld [vmem:[#allocation54_spill] sm:$0xff]  ;;  %v4083_v45 = vsel %vm383_vm1, %v11778_v18, %v7598_v8  ;;  %v4084_v57 = vrot.slane %v7598_v8, 4  ;;  %v6079_v8 = vrot.slane %v11859_v59, 4 }
 0x4e5   : > { %v11952_v43 = vpop.permute.xlu2 %6443  ;;  %v11965_v53 = vrot.slane %v15311_v13, 4  ;;  %v11969_v63 = vrot.slane %v15312_v30, 4  ;;  %v3475_v13 = vsel %vm383_vm1, %v7573_v60, %v11671_v31  ;;  %v3419_v30 = vsel %vm383_vm1, %v7572_v54, %v11679_v28 }
 0x4e6   : > { %15310 = vst [vmem:[#allocation46_spill] sm:$0xff] %v11952_v43  ;;  %v7869_v43 = vpack.i.bf16 %v5538_v34, %v5482_v10  ;;  %v5459_v10 = vrot.slane %v11469_v49, 4  ;;  %v5515_v34 = vrot.slane %v11477_v4, 4  ;;  %v11995_v49 = vperm.slane %v3475_v13, %v15166_v17 }
 0x4e7   : > { %v11971_v56 = vpop.permute.xlu1 %6457  ;;  %v11973_v44 = vpop.permute.xlu0 %7695  ;;  %v11998_v4 = vperm.slane %v3419_v30, %v15166_v17  ;;  %v4028_v59 = vrot.slane %v7597_v5, 4 }
 0x4e8   : > { %15313 = vst [vmem:[#allocation55_spill] sm:$0xff] %v11971_v56  ;;  %7870 = vrot.lane.b32.xlu2 %v7869_v43, %s8353_s11  ;;  %v3472_v56 = vrot.slane %v7573_v60, 4  ;;  %v5460_v31 = vsel %vm383_vm1, %v11877_v23, %v5459_v10  ;;  %v5516_v28 = vsel %vm383_vm1, %v11881_v47, %v5515_v34  ;;  %v5543_v23 = vrot.slane %v11829_v33, 4 }
 0x4e9   : > { %15314 = vst [vmem:[#allocation75_spill] sm:$0xff] %v11973_v44  ;;  %v3416_v44 = vrot.slane %v7572_v54, 4  ;;  %v5468_v43 = vperm.slane %v5460_v31, %v15167_v3  ;;  %v5524_v60 = vperm.slane %v5516_v28, %v15167_v3  ;;  %v5488_v54 = vsel %vm383_vm1, 0.0, %v5487_v27 }
 0x4ea   : > { %v15318_v47 = vunpack.i.h.bf16 %v11247_v61  ;;  %v15319_v31 = vunpack.i.l.bf16 %v11247_v61  ;;  %v5544_v18 = vsel %vm383_vm1, 0.0, %v5543_v23  ;;  %v5485_v27 = vrot.slane %v11814_v1, 4 }
 0x4eb   : > { %v5483_v30 = vrot.slane %v5468_v43, 4  ;;  %v5539_v34 = vrot.slane %v5524_v60, 4  ;;  %v7854_v12 = vpack.i.bf16 %v5524_v60, %v5468_v43  ;;  %v7884_v61 = vpack.i.bf16 %v5544_v18, %v5488_v54 }
 0x4ec   : > { %v3473_v13 = vsel %vm383_vm1, %v3472_v56, %v15318_v47  ;;  %v3417_v28 = vsel %vm383_vm1, %v3416_v44, %v15319_v31  ;;  %v4027_v1 = vsel %vm383_vm1, %v11782_v62, %v7597_v5  ;;  %v15323_v47 = vld [vmem:[#allocation24_spill] sm:$0xff]  ;;  %v5486_v5 = vsel %vm383_vm1, 0.0, %v5485_v27 }
 0x4ed   : > { %v12006_v10 = vpop.permute.xlu2 %7740  ;;  %v5484_v56 = vsel %vm383_vm1, 0.0, %v5483_v30  ;;  %v5540_v43 = vsel %vm383_vm1, 0.0, %v5539_v34  ;;  %7855 = vrot.lane.b32.xlu0 %v7854_v12, %s8352_s17  ;;  %v12028_v44 = vperm.slane %v3473_v13, %v15166_v17  ;;  %v7582_v30 = vunpack.i.l.bf16 %v15323_v47 }
 0x4ee   : > { %15317 = vst [vmem:[#allocation54_spill] sm:$0xff] %v12006_v10  ;;  %v12022_v10 = vperm.slane %v4083_v45, %v15166_v17  ;;  %v7874_v60 = vpack.i.bf16 %v5540_v43, %v5484_v56  ;;  %v12034_v45 = vperm.slane %v3417_v28, %v15166_v17  ;;  %v6080_v12 = vsel %vm383_vm1, %v6079_v8, %v11841_v19 }
 0x4ef   : > { %v12017_v33 = vpop.permute.xlu1 %6453  ;;  %v12019_v25 = vpop.permute.xlu0 %7710  ;;  %v7583_v54 = vunpack.i.h.bf16 %v15323_v47  ;;  %v12043_v62 = vperm.slane %v6080_v12, %v15167_v3  ;;  %v5541_v13 = vrot.slane %v11832_v39, 4  ;;  %v15325_v31 = vunpack.i.h.bf16 %v15276_v46 }
 0x4f0   : > { %15320 = vst [vmem:[#allocation56_spill] sm:$0xff] %v12017_v33  ;;  %7885 = vrot.lane.b32.xlu2 %v7884_v61, %s8356_s15  ;;  %7875 = vrot.lane.b32.xlu1 %v7874_v60, %s8354_s18  ;;  %v12052_v18 = vperm.slane %v4027_v1, %v15166_v17  ;;  %v15327_v19 = vrot.slane %v11687_v48, 4  ;;  %v15328_v56 = vunpack.i.l.bf16 %v15276_v46  ;;  %v3624_v60 = vrot.slane %v7582_v30, 4 }
 0x4f1   : > { %15321 = vst [vmem:[#allocation76_spill] sm:$0xff] %v12019_v25  ;;  %v4085_v28 = vsel %vm383_vm1, %v15325_v31, %v4084_v57  ;;  %v6103_v39 = vrot.slane %v12043_v62, 4  ;;  %v5542_v43 = vsel %vm383_vm1, 0.0, %v5541_v13  ;;  %v15330_v12 = vrot.slane %v11682_v21, 4  ;;  %v15334_v31 = vld [vmem:[#allocation57_spill] sm:$0xff] }
 0x4f2   : > { %15322 = vst [vmem:[#allocation77_spill] sm:$0xff] %v12022_v10  ;;  %v2805_v8 = vsel %vm383_vm1, %v11546_v52, %v15327_v19  ;;  %v4029_v27 = vsel %vm383_vm1, %v15328_v56, %v4028_v59  ;;  %v7879_v47 = vpack.i.bf16 %v5542_v43, %v5486_v5  ;;  %v3680_v19 = vrot.slane %v7583_v54, 4  ;;  %v15359_v10 = vld [vmem:[#allocation37_spill] sm:$0xff] }
 0x4f3   : > { %15324 = vst [vmem:[#allocation24_spill] sm:$0xff] %v12043_v62  ;;  %v12064_v61 = vperm.slane %v2805_v8, %v15167_v3  ;;  %v2861_v46 = vsel %vm383_vm1, %v11556_v36, %v15330_v12  ;;  %v12083_v1 = vperm.slane %v4085_v28, %v15166_v17  ;;  %v12086_v5 = vperm.slane %v4029_v27, %v15166_v17  ;;  %v15333_v12 = vld [vmem:[#allocation23_spill] sm:$0xff] }
 0x4f4   : > { %15326 = vst [vmem:[#allocation78_spill] sm:$0xff] %v12052_v18  ;;  %v12076_v13 = vperm.slane %v2861_v46, %v15167_v3  ;;  %v7613_v23 = vunpack.i.h.bf16 %v15334_v31  ;;  %v6104_v46 = vsel %vm383_vm1, 0.0, %v6103_v39  ;;  %v3623_v27 = vsel %vm383_vm1, %v11969_v63, %v7582_v30 }
 0x4f5   : > { %v12066_v57 = vpop.permute.xlu2 %7760  ;;  %7880 = vrot.lane.b32.xlu0 %v7879_v47, %s8355_s19  ;;  %v15336_v43 = vunpack.i.l.bf16 %v15304_v15  ;;  %v3679_v47 = vsel %vm383_vm1, %v11965_v53, %v7583_v54  ;;  %v15337_v39 = vrot.slane %v11652_v24, 4  ;;  %v7602_v63 = vunpack.i.l.bf16 %v11417_v35 }
 0x4f6   : > { %15329 = vst [vmem:[#allocation79_spill] sm:$0xff] %v12066_v57  ;;  %v7889_v34 = vpack.i.bf16 %v12076_v13, %v12064_v61  ;;  %v15335_v57 = vrot.slane %v11667_v2, 4  ;;  %v15339_v53 = vrot.slane %v11524_v50, 4  ;;  %v4290_v18 = vrot.slane %v15359_v10, 4 }
 0x4f7   : > { %v12078_v8 = vpop.permute.xlu1 %7725  ;;  %v12080_v56 = vpop.permute.xlu0 %6449  ;;  %v3625_v59 = vsel %vm383_vm1, %v15336_v43, %v3624_v60 }
 0x4f8   : > { %15331 = vst [vmem:[#allocation80_spill] sm:$0xff] %v12078_v8  ;;  %v2817_v28 = vsel %vm383_vm1, %v11524_v50, %v15335_v57  ;;  %6168 = vrot.lane.b32.xlu2 %v6104_v46, %s8353_s11  ;;  %v15338_v8 = vunpack.i.h.bf16 %v15304_v15  ;;  %7890 = vrot.lane.b32.xlu1 %v7889_v34, %s8352_s17  ;;  %v2815_v54 = vsel %vm383_vm1, %v15339_v53, %v11667_v2  ;;  %v15340_v15 = vrot.slane %v11549_v22, 4 }
 0x4f9   : > { %15332 = vst [vmem:[#allocation81_spill] sm:$0xff] %v12080_v56  ;;  %v2873_v56 = vsel %vm383_vm1, %v11549_v22, %v15337_v39  ;;  %v12117_v30 = vperm.slane %v2817_v28, %v15167_v3  ;;  %v2821_v43 = vperm.slane %v2815_v54, %v15167_v3  ;;  %v15341_v34 = vrot.slane %v11717_v32, 4 }
 0x4fa   : > { %v3681_v57 = vsel %vm383_vm1, %v15338_v8, %v3680_v19  ;;  %v12124_v60 = vperm.slane %v2873_v56, %v15167_v3  ;;  %v2871_v19 = vsel %vm383_vm1, %v15340_v15, %v11652_v24  ;;  %v12136_v46 = vperm.slane %v3623_v27, %v15166_v17 }
 0x4fb   : > { %v3023_v8 = vsel %vm383_vm1, %v11786_v40, %v15341_v34  ;;  %v7612_v50 = vunpack.i.l.bf16 %v15334_v31  ;;  %v7603_v2 = vunpack.i.h.bf16 %v11417_v35  ;;  %v2877_v56 = vperm.slane %v2871_v19, %v15167_v3 }
 0x4fc   : > { %v12145_v24 = vperm.slane %v3679_v47, %v15166_v17  ;;  %v12148_v39 = vperm.slane %v3023_v8, %v15167_v3  ;;  %v15344_v53 = vrot.slane %v11729_v29, 4  ;;  %v12155_v31 = vperm.slane %v3625_v59, %v15166_v17 }
 0x4fd   : > { %v12141_v28 = vpop.permute.xlu2 %7770  ;;  %v12158_v35 = vperm.slane %v3681_v57, %v15166_v17  ;;  %v7894_v54 = vpack.i.bf16 %v2877_v56, %v2821_v43  ;;  %v4094_v8 = vrot.slane %v7613_v23, 4  ;;  %v4040_v22 = vrot.slane %v7602_v63, 4 }
 0x4fe   : > { %15342 = vst [vmem:[#allocation23_spill] sm:$0xff] %v12141_v28  ;;  %v3079_v27 = vsel %vm383_vm1, %v11789_v7, %v15344_v53  ;;  %v7899_v53 = vpack.i.bf16 %v12124_v60, %v12117_v30  ;;  %v4038_v33 = vrot.slane %v7612_v50, 4  ;;  %v4096_v57 = vrot.slane %v7603_v2, 4 }
 0x4ff   : > { %15343 = vst [vmem:[#allocation57_spill] sm:$0xff] %v12145_v24  ;;  %v12161_v15 = vperm.slane %v3079_v27, %v15167_v3  ;;  %v12163_v47 = vpop.permute.xlu1 %6451  ;;  %v12165_v19 = vpop.permute.xlu0 %7720  ;;  %7895 = vrot.lane.b32.xlu0 %v7894_v54, %s8350_s29  ;;  %v15347_v34 = vrot.slane %v11786_v40, 4  ;;  %v15348_v59 = vrot.slane %v11789_v7, 4  ;;  %v4095_v40 = vsel %vm383_vm1, %v4094_v8, %v7603_v2 }
 0x500   : > { %15345 = vst [vmem:[#allocation82_spill] sm:$0xff] %v12163_v47  ;;  %7900 = vrot.lane.b32.xlu2 %v7899_v53, %s8351_s8  ;;  %v4039_v47 = vsel %vm383_vm1, %v4038_v33, %v7602_v63  ;;  %v4041_v53 = vsel %vm383_vm1, %v7612_v50, %v4040_v22  ;;  %v15350_v63 = vrot.slane %v11720_v6, 4  ;;  %v2830_v22 = vrot.slane %v2821_v43, 4 }
 0x501   : > { %15346 = vst [vmem:[#allocation83_spill] sm:$0xff] %v12165_v19  ;;  %v7914_v27 = vpack.i.bf16 %v12161_v15, %v12148_v39  ;;  %v3021_v25 = vsel %vm383_vm1, %v15347_v34, %v11717_v32  ;;  %v3077_v62 = vsel %vm383_vm1, %v15348_v59, %v11729_v29  ;;  %v4097_v29 = vsel %vm383_vm1, %v7613_v23, %v4096_v57 }
 0x502   : > { %v12193_v32 = vperm.slane %v3021_v25, %v15167_v3  ;;  %v12196_v7 = vperm.slane %v3077_v62, %v15167_v3  ;;  %v15349_v34 = vrot.slane %v11714_v9, 4  ;;  %v3067_v50 = vsel %vm383_vm1, %v11847_v26, %v15350_v63 }
 0x503   : > { %7915 = vrot.lane.b32.xlu1 %v7914_v27, %s8351_s8  ;;  %v12208_v2 = vperm.slane %v4039_v47, %v15166_v17  ;;  %v15351_v25 = vunpack.i.h.bf16 %v11415_v38  ;;  %v15352_v23 = vrot.slane %v15333_v12, 4  ;;  %v4246_v27 = vrot.slane %v11459_v58, 4 }
 0x504   : > { %v3011_v33 = vsel %vm383_vm1, %v11844_v37, %v15349_v34  ;;  %v3075_v43 = vperm.slane %v3067_v50, %v15167_v3  ;;  %v2831_v47 = vsel %vm383_vm1, 0.0, %v2830_v22  ;;  %v2886_v34 = vrot.slane %v2877_v56, 4  ;;  %v15356_v50 = vld [vmem:[#allocation35_spill] sm:$0xff] }
 0x505   : > { %v12212_v62 = vrot.slane %v15351_v25, 4  ;;  %v4245_v8 = vsel %vm383_vm1, %v15352_v23, %v11459_v58  ;;  %v3019_v59 = vperm.slane %v3011_v33, %v15167_v3  ;;  %v12219_v57 = vpop.permute.xlu2 %7785  ;;  %v12229_v28 = vperm.slane %v4041_v53, %v15166_v17  ;;  %v15357_v22 = vld [vmem:[#allocation59_spill] sm:$0xff] }
 0x506   : > { %15353 = vst [vmem:[#allocation84_spill] sm:$0xff] %v12219_v57  ;;  %v12232_v23 = vperm.slane %v4095_v40, %v15166_v17  ;;  %v12235_v33 = vperm.slane %v4097_v29, %v15166_v17  ;;  %v7909_v58 = vpack.i.bf16 %v12196_v7, %v12193_v32  ;;  %v4232_v56 = vrot.slane %v15357_v22, 4 }
 0x507   : > { %v12224_v63 = vpop.permute.xlu1 %7730  ;;  %v12226_v25 = vpop.permute.xlu0 %6447  ;;  %v7904_v19 = vpack.i.bf16 %v3075_v43, %v3019_v59  ;;  %v2887_v57 = vsel %vm383_vm1, 0.0, %v2886_v34  ;;  %v12247_v40 = vperm.slane %v4245_v8, %v15166_v17  ;;  %v4247_v54 = vsel %vm383_vm1, %v15333_v12, %v4246_v27 }
 0x508   : > { %15354 = vst [vmem:[#allocation85_spill] sm:$0xff] %v12224_v63  ;;  %7910 = vrot.lane.b32.xlu2 %v7909_v58, %s8350_s29  ;;  %v7929_v63 = vpack.i.bf16 %v2887_v57, %v2831_v47  ;;  %v15360_v24 = vrot.slane %v15308_v11, 4  ;;  %v3090_v57 = vrot.slane %v3075_v43, 4  ;;  %v2828_v47 = vrot.slane %v12064_v61, 4 }
 0x509   : > { %15355 = vst [vmem:[#allocation86_spill] sm:$0xff] %v12226_v25  ;;  %v15358_v25 = vunpack.i.l.bf16 %v11415_v38  ;;  %7905 = vrot.lane.b32.xlu0 %v7904_v19, %s8352_s17  ;;  %v15361_v27 = vunpack.i.h.bf16 %v15356_v50  ;;  %v12272_v19 = vperm.slane %v4247_v54, %v15166_v17  ;;  %v15362_v43 = vunpack.i.l.bf16 %v15356_v50 }
 0x50a   : > { %v4235_v34 = vsel %vm383_vm1, %v15357_v22, %v15360_v24  ;;  %v4233_v24 = vsel %vm383_vm1, %v4232_v56, %v15308_v11  ;;  %v2829_v29 = vsel %vm383_vm1, 0.0, %v2828_v47  ;;  %v2884_v11 = vrot.slane %v12076_v13, 4 }
 0x50b   : > { %v12244_v53 = vrot.slane %v15358_v25, 4  ;;  %v3034_v25 = vrot.slane %v3019_v59, 4  ;;  %7930 = vrot.lane.b32.xlu1 %v7929_v63, %s8355_s19  ;;  %v12267_v38 = vrot.slane %v15361_v27, 4  ;;  %v12277_v63 = vrot.slane %v15362_v43, 4 }
 0x50c   : > { %v12280_v61 = vperm.slane %v4235_v34, %v15166_v17  ;;  %v3091_v27 = vsel %vm383_vm1, 0.0, %v3090_v57  ;;  %v12291_v59 = vperm.slane %v4233_v24, %v15166_v17  ;;  %v4288_v43 = vrot.slane %v11529_v20, 4 }
 0x50d   : > { %v3035_v22 = vsel %vm383_vm1, 0.0, %v3034_v25  ;;  %v15365_v34 = vrot.slane %v11546_v52, 4  ;;  %v15366_v57 = vrot.slane %v11556_v36, 4  ;;  %v4291_v13 = vsel %vm383_vm1, %v11529_v20, %v4290_v18  ;;  %v12311_v58 = vpop.permute.xlu2 %7800  ;;  %v15370_v36 = vld [vmem:[#allocation64_spill] sm:$0xff] }
 0x50e   : > { %v2885_v8 = vsel %vm383_vm1, 0.0, %v2884_v11  ;;  %v4300_v18 = vrot.slane %v15370_v36, 4 }
 0x50f   : > { %v12286_v56 = vpop.permute.xlu1 %7745  ;;  %v12288_v54 = vpop.permute.xlu0 %7735  ;;  %v2803_v25 = vsel %vm383_vm1, %v15365_v34, %v11687_v48  ;;  %v2859_v47 = vsel %vm383_vm1, %v15366_v57, %v11682_v21  ;;  %v15369_v48 = vrot.slane %v15315_v0, 4  ;;  %v7944_v34 = vpack.i.bf16 %v3091_v27, %v3035_v22 }
 0x510   : > { %15363 = vst [vmem:[#allocation35_spill] sm:$0xff] %v12286_v56  ;;  %v12306_v24 = vperm.slane %v2803_v25, %v15167_v3  ;;  %v12309_v12 = vperm.slane %v2859_v47, %v15167_v3  ;;  %v7924_v57 = vpack.i.bf16 %v2885_v8, %v2829_v29  ;;  %v12324_v56 = vperm.slane %v4291_v13, %v15166_v17 }
 0x511   : > { %15364 = vst [vmem:[#allocation59_spill] sm:$0xff] %v12288_v54  ;;  %v4303_v21 = vsel %vm383_vm1, %v15370_v36, %v15369_v48  ;;  %v15372_v29 = vrot.slane %v11956_v14, 4  ;;  %v4289_v22 = vsel %vm383_vm1, %v4288_v43, %v15359_v10  ;;  %v4301_v43 = vsel %vm383_vm1, %v4300_v18, %v15315_v0  ;;  %v15381_v18 = vld [vmem:[#allocation67_spill] sm:$0xff] }
 0x512   : > { %15367 = vst [vmem:[#allocation37_spill] sm:$0xff] %v12306_v24  ;;  %v2826_v11 = vrot.slane %v12306_v24, 4  ;;  %v2882_v25 = vrot.slane %v12309_v12, 4  ;;  %7925 = vrot.lane.b32.xlu2 %v7924_v57, %s8354_s18  ;;  %v12336_v27 = vperm.slane %v4303_v21, %v15166_v17  ;;  %v15373_v57 = vrot.slane %v11959_v42, 4  ;;  %v15375_v21 = vld [vmem:[#allocation66_spill] sm:$0xff] }
 0x513   : > { %15368 = vst [vmem:[#allocation87_spill] sm:$0xff] %v12309_v12  ;;  %7945 = vrot.lane.b32.xlu1 %v7944_v34, %s8354_s18  ;;  %v3443_v8 = vsel %vm383_vm1, %v11998_v4, %v15372_v29  ;;  %v15374_v29 = vrot.slane %v11844_v37, 4  ;;  %v2832_v0 = vrot.slane %v12117_v30, 4 }
 0x514   : > { %v2827_v13 = vsel %vm383_vm1, 0.0, %v2826_v11  ;;  %v2883_v48 = vsel %vm383_vm1, 0.0, %v2882_v25  ;;  %v12341_v34 = vperm.slane %v3443_v8, %v15167_v3  ;;  %v3499_v54 = vsel %vm383_vm1, %v11995_v49, %v15373_v57 }
 0x515   : > { %v7919_v36 = vpack.i.bf16 %v2883_v48, %v2827_v13  ;;  %v3009_v10 = vsel %vm383_vm1, %v15374_v29, %v11714_v9  ;;  %v7618_v11 = vunpack.i.h.bf16 %v15375_v21  ;;  %v12355_v25 = vperm.slane %v3499_v54, %v15167_v3 }
 0x516   : > { %v12358_v8 = vperm.slane %v3009_v10, %v15167_v3  ;;  %v7617_v57 = vunpack.i.l.bf16 %v15375_v21  ;;  %v15380_v9 = vrot.slane %v11847_v26, 4  ;;  %v2888_v54 = vrot.slane %v12124_v60, 4 }
 0x517   : > { %15376 = vst [vmem:[#allocation64_spill] sm:$0xff] %v12355_v25  ;;  %v12360_v13 = vpop.permute.xlu1 %7750  ;;  %v12362_v48 = vpop.permute.xlu0 %7755  ;;  %7920 = vrot.lane.b32.xlu0 %v7919_v36, %s8353_s11  ;;  %v7628_v29 = vunpack.i.h.bf16 %v15381_v18  ;;  %v7627_v10 = vunpack.i.l.bf16 %v15381_v18  ;;  %v12379_v36 = vperm.slane %v4289_v22, %v15166_v17  ;;  %v7969_v30 = vpack.i.bf16 %v12355_v25, %v12341_v34 }
 0x518   : > { %15377 = vst [vmem:[#allocation66_spill] sm:$0xff] %v12358_v8  ;;  %v3065_v37 = vsel %vm383_vm1, %v15380_v9, %v11720_v6  ;;  %v3032_v47 = vrot.slane %v12358_v8, 4  ;;  %v2833_v9 = vsel %vm383_vm1, 0.0, %v2832_v0  ;;  %v2889_v18 = vsel %vm383_vm1, 0.0, %v2888_v54 }
 0x519   : > { %15378 = vst [vmem:[#allocation88_spill] sm:$0xff] %v12360_v13  ;;  %v12376_v20 = vperm.slane %v3065_v37, %v15167_v3  ;;  %v12389_v37 = vpop.permute.xlu2 %7815  ;;  %v12392_v22 = vperm.slane %v4301_v43, %v15166_v17  ;;  %v5015_v6 = vrot.slane %v7617_v57, 4  ;;  %v5069_v13 = vrot.slane %v7628_v29, 4 }
 0x51a   : > { %15379 = vst [vmem:[#allocation89_spill] sm:$0xff] %v12362_v48  ;;  %v3033_v60 = vsel %vm383_vm1, 0.0, %v3032_v47  ;;  %v5071_v48 = vrot.slane %v7618_v11, 4  ;;  %v5013_v52 = vrot.slane %v7627_v10, 4  ;;  %v15384_v0 = vrot.slane %v12155_v31, 4 }
 0x51b   : > { %15382 = vst [vmem:[#allocation67_spill] sm:$0xff] %v12376_v20  ;;  %v3088_v21 = vrot.slane %v12376_v20, 4  ;;  %7970 = vrot.lane.b32.xlu1 %v7969_v30, %s8351_s8  ;;  %v15385_v26 = vrot.slane %v12158_v35, 4  ;;  %v15386_v30 = vld [vmem:[#allocation65_spill] sm:$0xff]  ;;  %v3094_v25 = vrot.slane %v12161_v15, 4 }
 0x51c   : > { %15383 = vst [vmem:[#allocation90_spill] sm:$0xff] %v12389_v37  ;;  %v3647_v54 = vsel %vm383_vm1, %v15384_v0, %v11923_v41  ;;  %v7934_v37 = vpack.i.bf16 %v2889_v18, %v2833_v9  ;;  %v14952_v8 = vunpack.i.h.bf16 %v15386_v30  ;;  %v5072_v18 = vsel %vm383_vm1, %v7628_v29, %v5071_v48 }
 0x51d   : > { %v3089_v47 = vsel %vm383_vm1, 0.0, %v3088_v21  ;;  %v12402_v43 = vperm.slane %v3647_v54, %v15167_v3  ;;  %v3703_v12 = vsel %vm383_vm1, %v15385_v26, %v11893_v55  ;;  %v3038_v21 = vrot.slane %v12148_v39, 4 }
 0x51e   : > { %v7939_v24 = vpack.i.bf16 %v3089_v47, %v3033_v60  ;;  %v12410_v20 = vperm.slane %v3703_v12, %v15167_v3  ;;  %v3036_v26 = vrot.slane %v12193_v32, 4  ;;  %v3092_v12 = vrot.slane %v12196_v7, 4 }
 0x51f   : > { %v12414_v0 = vpop.permute.xlu1 %7775  ;;  %v12416_v60 = vpop.permute.xlu0 %7765  ;;  %7935 = vrot.lane.b32.xlu0 %v7934_v37, %s8356_s15  ;;  %v5070_v39 = vsel %vm383_vm1, %v5069_v13, %v7618_v11  ;;  %v5014_v15 = vsel %vm383_vm1, %v5013_v52, %v7617_v57  ;;  %v5016_v47 = vsel %vm383_vm1, %v7627_v10, %v5015_v6  ;;  %v3039_v9 = vsel %vm383_vm1, 0.0, %v3038_v21 }
 0x520   : > { %15387 = vst [vmem:[#allocation91_spill] sm:$0xff] %v12414_v0  ;;  %7940 = vrot.lane.b32.xlu2 %v7939_v24, %s8353_s11  ;;  %v7979_v54 = vpack.i.bf16 %v12410_v20, %v12402_v43  ;;  %v3095_v48 = vsel %vm383_vm1, 0.0, %v3094_v25  ;;  %v3037_v24 = vsel %vm383_vm1, 0.0, %v3036_v26  ;;  %v3093_v29 = vsel %vm383_vm1, 0.0, %v3092_v12  ;;  %v15395_v26 = vld [vmem:[#allocation26_spill] sm:$0xff] }
 0x521   : > { %v12436_v7 = vrot.slane %v14952_v8, 4  ;;  %v14954_v52 = vunpack.i.l.bf16 %v15386_v30  ;;  %v15389_v11 = vrot.slane %v12229_v28, 4  ;;  %v12444_v57 = vperm.slane %v5070_v39, %v15166_v17  ;;  %v12461_v32 = vpop.permute.xlu2 %7830 }
 0x522   : > { %v12447_v25 = vperm.slane %v5072_v18, %v15166_v17  ;;  %v12450_v10 = vperm.slane %v5016_v47, %v15166_v17  ;;  %v15393_v6 = vrot.slane %v12235_v33, 4  ;;  %v12458_v21 = vperm.slane %v5014_v15, %v15166_v17  ;;  %15396 = vst [vmem:[#allocation26_spill] sm:$0xff] %v12461_v32 }
 0x523   : > { %15388 = vst [vmem:[#allocation92_spill] sm:$0xff] %v12436_v7  ;;  %v4063_v13 = vsel %vm383_vm1, %v15389_v11, %v12086_v5  ;;  %7980 = vrot.lane.b32.xlu1 %v7979_v54, %s8350_s29  ;;  %v7632_v12 = vunpack.i.l.bf16 %v15395_v26  ;;  %v7954_v39 = vpack.i.bf16 %v3095_v48, %v3039_v9  ;;  %v7949_v11 = vpack.i.bf16 %v3093_v29, %v3037_v24  ;;  %v15400_v9 = vld [vmem:[#allocation20_spill] sm:$0xff]  ;;  %v15423_v7 = vld [vmem:[#allocation38_spill] sm:$0xff] }
 0x524   : > { %15390 = vst [vmem:[#allocation93_spill] sm:$0xff] %v12444_v57  ;;  %v4119_v37 = vsel %vm383_vm1, %v15393_v6, %v12083_v1  ;;  %v12464_v18 = vperm.slane %v4063_v13, %v15167_v3  ;;  %v15398_v54 = vrot.slane %v11998_v4, 4  ;;  %v15399_v15 = vrot.slane %v11995_v49, 4  ;;  %v15419_v57 = vld [vmem:[#allocation57_spill] sm:$0xff] }
 0x525   : > { %15391 = vst [vmem:[#allocation94_spill] sm:$0xff] %v12447_v25  ;;  %v12467_v47 = vperm.slane %v4119_v37, %v15167_v3  ;;  %v15401_v29 = vrot.slane %v11940_v51, 4  ;;  %v15402_v37 = vrot.slane %v11943_v16, 4  ;;  %v7633_v24 = vunpack.i.h.bf16 %v15395_v26 }
 0x526   : > { %15392 = vst [vmem:[#allocation95_spill] sm:$0xff] %v12450_v10  ;;  %v3441_v6 = vsel %vm383_vm1, %v15398_v54, %v11956_v14  ;;  %v3497_v8 = vsel %vm383_vm1, %v15399_v15, %v11959_v42  ;;  %v12493_v42 = vrot.slane %v14954_v52, 4  ;;  %v5028_v49 = vsel %vm383_vm1, %v7632_v12, %v12244_v53  ;;  %v15417_v10 = vld [vmem:[#allocation71_spill] sm:$0xff] }
 0x527   : > { %15394 = vst [vmem:[#allocation96_spill] sm:$0xff] %v12458_v21  ;;  %v3431_v13 = vsel %vm383_vm1, %v12034_v45, %v15401_v29  ;;  %v3487_v4 = vsel %vm383_vm1, %v12028_v44, %v15402_v37  ;;  %v12487_v14 = vpop.permute.xlu1 %7790  ;;  %v12489_v54 = vpop.permute.xlu0 %7780  ;;  %7950 = vrot.lane.b32.xlu0 %v7949_v11, %s8355_s19  ;;  %v15406_v37 = vld [vmem:[#allocation52_spill] sm:$0xff]  ;;  %v12503_v32 = vperm.slane %v3441_v6, %v15167_v3  ;;  %v15409_v6 = vunpack.i.h.bf16 %v15400_v9 }
 0x528   : > { %15397 = vst [vmem:[#allocation97_spill] sm:$0xff] %v12467_v47  ;;  %7955 = vrot.lane.b32.xlu2 %v7954_v39, %s8356_s15  ;;  %v7638_v48 = vunpack.i.h.bf16 %v15406_v37  ;;  %v12506_v52 = vperm.slane %v3497_v8, %v15167_v3  ;;  %v7994_v26 = vpack.i.bf16 %v12467_v47, %v12464_v18  ;;  %v12513_v39 = vperm.slane %v3431_v13, %v15167_v3  ;;  %v15426_v47 = vld [vmem:[#allocation58_spill] sm:$0xff] }
 0x529   : > { %15403 = vst [vmem:[#allocation98_spill] sm:$0xff] %v12487_v14  ;;  %v12516_v11 = vperm.slane %v3487_v4, %v15167_v3  ;;  %v12521_v29 = vrot.slane %v15409_v6, 4  ;;  %v15411_v8 = vunpack.i.l.bf16 %v15400_v9  ;;  %v7637_v53 = vunpack.i.l.bf16 %v15406_v37 }
 0x52a   : > { %15404 = vst [vmem:[#allocation99_spill] sm:$0xff] %v12489_v54  ;;  %v5081_v0 = vrot.slane %v7633_v24, 4  ;;  %v5025_v54 = vrot.slane %v7632_v12, 4  ;;  %v5084_v13 = vsel %vm383_vm1, %v7633_v24, %v12212_v62  ;;  %v7803_v4 = vunpack.i.h.bf16 %v12311_v58 }
 0x52b   : > { %15405 = vst [vmem:[#allocation100_spill] sm:$0xff] %v12493_v42  ;;  %v12525_v14 = vrot.slane %v15411_v8, 4  ;;  %7995 = vrot.lane.b32.xlu1 %v7994_v26, %s8350_s29  ;;  %v12533_v15 = vperm.slane %v5028_v49, %v15166_v17  ;;  %v5276_v6 = vsel %vm383_vm1, %v12267_v38, %v7638_v48  ;;  %v7802_v8 = vunpack.i.l.bf16 %v12311_v58  ;;  %v15415_v26 = vld [vmem:[#allocation47_spill] sm:$0xff] }
 0x52c   : > { %15407 = vst [vmem:[#allocation52_spill] sm:$0xff] %v12503_v32  ;;  %v7964_v37 = vpack.i.bf16 %v12506_v52, %v12503_v32  ;;  %v7959_v12 = vpack.i.bf16 %v12516_v11, %v12513_v39  ;;  %v15414_v62 = vrot.slane %v12272_v19, 4  ;;  %v15416_v25 = vrot.slane %v15415_v26, 4 }
 0x52d   : > { %15408 = vst [vmem:[#allocation101_spill] sm:$0xff] %v12506_v52  ;;  %v15418_v38 = vrot.slane %v15417_v10, 4  ;;  %v7768_v21 = vunpack.i.h.bf16 %v12416_v60  ;;  %v7767_v9 = vunpack.i.l.bf16 %v12416_v60  ;;  %v15425_v60 = vunpack.i.h.bf16 %v15423_v7 }
 0x52e   : > { %15410 = vst [vmem:[#allocation102_spill] sm:$0xff] %v12521_v29  ;;  %v4269_v24 = vsel %vm383_vm1, %v15414_v62, %v12280_v61  ;;  %v3637_v49 = vsel %vm383_vm1, %v12136_v46, %v15416_v25  ;;  %v15421_v62 = vrot.slane %v11893_v55, 4  ;;  %v12564_v25 = vpop.permute.xlu2 %7840  ;;  %v5277_v32 = vrot.slane %v7638_v48, 4 }
 0x52f   : > { %15412 = vst [vmem:[#allocation103_spill] sm:$0xff] %v12525_v14  ;;  %v3693_v58 = vsel %vm383_vm1, %v15419_v57, %v15418_v38  ;;  %v15420_v14 = vrot.slane %v11923_v41, 4  ;;  %v12566_v42 = vpop.permute.xlu0 %7795  ;;  %v15424_v38 = vunpack.i.l.bf16 %v15423_v7  ;;  %v5082_v41 = vsel %vm383_vm1, %v5081_v0, %v15425_v60  ;;  %7960 = vrot.lane.b32.xlu0 %v7959_v12, %s8352_s17  ;;  %v7806_v55 = vpop.permute.xlu1 %7805 }
 0x530   : > { %15413 = vst [vmem:[#allocation104_spill] sm:$0xff] %v12533_v15  ;;  %v3705_v30 = vsel %vm383_vm1, %v12158_v35, %v15421_v62  ;;  %7965 = vrot.lane.b32.xlu2 %v7964_v37, %s8350_s29  ;;  %v15427_v35 = vld [vmem:[#allocation39_spill] sm:$0xff]  ;;  %v12581_v62 = vperm.slane %v4269_v24, %v15167_v3  ;;  %v12587_v0 = vperm.slane %v3693_v58, %v15167_v3  ;;  %v7808_v48 = vunpack.i.h.bf16 %v7806_v55 }
 0x531   : > { %v3649_v29 = vsel %vm383_vm1, %v12155_v31, %v15420_v14  ;;  %15422 = vst [vmem:[#allocation47_spill] sm:$0xff] %v12566_v42  ;;  %v5026_v52 = vsel %vm383_vm1, %v5025_v54, %v15424_v38  ;;  %v3995_v31 = vsel %vm551_vm6, %v15426_v47, %v7803_v4  ;;  %v3988_v14 = vsel %vm551_vm6, %v15427_v35, %v7802_v8  ;;  %v15433_v35 = vld [vmem:[#allocation77_spill] sm:$0xff] }
 0x532   : > { %v12584_v54 = vperm.slane %v3637_v49, %v15167_v3  ;;  %v12590_v7 = vperm.slane %v3649_v29, %v15167_v3  ;;  %v12593_v47 = vperm.slane %v3705_v30, %v15167_v3  ;;  %v7807_v4 = vunpack.i.l.bf16 %v7806_v55 }
 0x533   : > { %v12596_v37 = vperm.slane %v5084_v13, %v15166_v17  ;;  %v12599_v8 = vperm.slane %v5276_v6, %v15166_v17  ;;  %v3996_v12 = vsel %vm553_vm7, %v3995_v31, %v7768_v21  ;;  %v3989_v24 = vsel %vm553_vm7, %v3988_v14, %v7767_v9  ;;  %4357 = vrot.lane.b32.xlu1 %v12581_v62, %s8350_s29  ;;  %v15431_v31 = vld [vmem:[#allocation78_spill] sm:$0xff] }
 0x534   : > { %v12604_v49 = vperm.slane %v5026_v52, %v15166_v17  ;;  %v5220_v29 = vsel %vm383_vm1, %v12277_v63, %v7637_v53  ;;  %v3990_v30 = vsel %vm555_vm8, %v3989_v24, %v7807_v4  ;;  %v3997_v13 = vsel %vm555_vm8, %v3996_v12, %v7808_v48  ;;  %v15435_v48 = vld [vmem:[#allocation23_spill] sm:$0xff] }
 0x535   : > { %15428 = vst [vmem:[#allocation71_spill] sm:$0xff] %v12599_v8  ;;  %v12614_v58 = vperm.slane %v5082_v41, %v15166_v17  ;;  %v15429_v21 = vunpack.i.h.bf16 %v15356_v50  ;;  %v15430_v9 = vrot.slane %v12324_v56, 4  ;;  %v7974_v38 = vpack.i.bf16 %v12587_v0, %v12584_v54 }
 0x536   : > { %v7984_v60 = vpack.i.bf16 %v12593_v47, %v12590_v7  ;;  %v15432_v55 = vrot.slane %v15431_v31, 4  ;;  %v15434_v14 = vrot.slane %v15433_v35, 4  ;;  %v7773_v4 = vunpack.i.h.bf16 %v15435_v48 }
 0x537   : > { %v5278_v52 = vsel %vm383_vm1, %v15429_v21, %v5277_v32  ;;  %v4327_v63 = vsel %vm383_vm1, %v12336_v27, %v15430_v9  ;;  %v7772_v12 = vunpack.i.l.bf16 %v15435_v48  ;;  %v15436_v24 = vrot.slane %v12086_v5, 4 }
 0x538   : > { %v4053_v41 = vsel %vm383_vm1, %v12208_v2, %v15432_v55  ;;  %v4109_v32 = vsel %vm383_vm1, %v12232_v23, %v15434_v14  ;;  %v15437_v9 = vrot.slane %v12083_v1, 4  ;;  %v7811_v55 = vpop.permute.xlu0 %7810  ;;  %v5221_v42 = vrot.slane %v7637_v53, 4  ;;  %7975 = vrot.lane.b32.xlu2 %v7974_v38, %s8352_s17  ;;  %7985 = vrot.lane.b32.xlu0 %v7984_v60, %s8351_s8  ;;  %v12656_v1 = vpop.permute.xlu2 %7860 }
 0x539   : > { %v4065_v21 = vsel %vm383_vm1, %v12229_v28, %v15436_v24  ;;  %v12648_v14 = vperm.slane %v4327_v63, %v15167_v3  ;;  %v7813_v48 = vunpack.i.h.bf16 %v7811_v55  ;;  %v7812_v15 = vunpack.i.l.bf16 %v7811_v55 }
 0x53a   : > { %v4121_v6 = vsel %vm383_vm1, %v12235_v33, %v15437_v9  ;;  %v12651_v5 = vperm.slane %v4053_v41, %v15167_v3  ;;  %v12654_v28 = vperm.slane %v4109_v32, %v15167_v3  ;;  %v12658_v33 = vpop.permute.xlu1 %7820  ;;  %v3991_v53 = vsel %vm557_vm9, %v3990_v30, %v7772_v12  ;;  %v15442_v12 = vld [vmem:[#allocation25_spill] sm:$0xff]  ;;  %v15446_v9 = vld [vmem:[#allocation51_spill] sm:$0xff] }
 0x53b   : > { %15438 = vst [vmem:[#allocation57_spill] sm:$0xff] %v12648_v14  ;;  %v3998_v38 = vsel %vm557_vm9, %v3997_v13, %v7773_v4  ;;  %v12663_v60 = vperm.slane %v4065_v21, %v15167_v3  ;;  %v12666_v63 = vperm.slane %v4121_v6, %v15167_v3  ;;  %v12669_v41 = vsel %vm559_vm10, %v3991_v53, %v7812_v15 }
 0x53c   : > { %15439 = vst [vmem:[#allocation38_spill] sm:$0xff] %v12669_v41  ;;  %v12672_v32 = vsel %vm559_vm10, %v3998_v38, %v7813_v48  ;;  %v3454_v30 = vrot.slane %v12513_v39, 4  ;;  %v3510_v13 = vrot.slane %v12516_v11, 4  ;;  %v12679_v4 = vperm.slane %v5220_v29, %v15166_v17  ;;  %4393 = vrot.lane.b32.xlu1 %v12648_v14, %s8351_s8 }
 0x53d   : > { %15440 = vst [vmem:[#allocation58_spill] sm:$0xff] %v12672_v32  ;;  %v14974_v6 = vunpack.i.h.bf16 %v15442_v12  ;;  %v15443_v15 = vrot.slane %v12136_v46, 4  ;;  %v15444_v55 = vrot.slane %v15419_v57, 4  ;;  %v12694_v29 = vperm.slane %v5278_v52, %v15166_v17  ;;  %v15449_v46 = vld [vmem:[#allocation27_spill] sm:$0xff] }
 0x53e   : > { %15441 = vst [vmem:[#allocation39_spill] sm:$0xff] %v12679_v4  ;;  %v15445_v48 = vunpack.i.l.bf16 %v15356_v50  ;;  %v14975_v38 = vunpack.i.l.bf16 %v15442_v12  ;;  %v7989_v57 = vpack.i.bf16 %v12654_v28, %v12651_v5  ;;  %v3511_v52 = vsel %vm383_vm1, 0.0, %v3510_v13 }
 0x53f   : > { %v3635_v21 = vsel %vm383_vm1, %v15443_v15, %v15415_v26  ;;  %v3691_v39 = vsel %vm383_vm1, %v15444_v55, %v15417_v10  ;;  %v14976_v26 = vunpack.i.h.bf16 %v15446_v9  ;;  %v7999_v10 = vpack.i.bf16 %v12666_v63, %v12663_v60 }
 0x540   : > { %v5222_v53 = vsel %vm383_vm1, %v15445_v48, %v5221_v42  ;;  %v3455_v15 = vsel %vm383_vm1, 0.0, %v3454_v30  ;;  %v12709_v50 = vperm.slane %v3635_v21, %v15167_v3  ;;  %v12712_v42 = vperm.slane %v3691_v39, %v15167_v3  ;;  %7990 = vrot.lane.b32.xlu2 %v7989_v57, %s8352_s17 }
 0x541   : > { %v12715_v55 = vperm.slane %v5222_v53, %v15166_v17  ;;  %v5289_v48 = vrot.slane %v14974_v6, 4  ;;  %v7653_v11 = vunpack.i.h.bf16 %v15449_v46  ;;  %8000 = vrot.lane.b32.xlu0 %v7999_v10, %s8351_s8  ;;  %v3458_v30 = vrot.slane %v12341_v34, 4  ;;  %v15453_v6 = vld [vmem:[#allocation64_spill] sm:$0xff] }
 0x542   : > { %15447 = vst [vmem:[#allocation78_spill] sm:$0xff] %v12709_v50  ;;  %v5233_v39 = vrot.slane %v14975_v38, 4  ;;  %v7652_v53 = vunpack.i.l.bf16 %v15449_v46  ;;  %v12730_v24 = vrot.slane %v14976_v26, 4  ;;  %v8009_v57 = vpack.i.bf16 %v3511_v52, %v3455_v15  ;;  %v12741_v38 = vpop.permute.xlu2 %7870  ;;  %v12745_v32 = vpop.permute.xlu1 %7845 }
 0x543   : > { %15448 = vst [vmem:[#allocation77_spill] sm:$0xff] %v12712_v42  ;;  %v15450_v10 = vrot.slane %v12291_v59, 4  ;;  %v15451_v13 = vrot.slane %v12280_v61, 4  ;;  %v3658_v46 = vrot.slane %v12709_v50, 4  ;;  %v3714_v26 = vrot.slane %v12712_v42, 4  ;;  %v15465_v42 = vld [vmem:[#allocation29_spill] sm:$0xff] }
 0x544   : > { %15452 = vst [vmem:[#allocation23_spill] sm:$0xff] %v12745_v32  ;;  %v3514_v15 = vrot.slane %v15453_v6, 4  ;;  %v12749_v41 = vrot.slane %v7653_v11, 4  ;;  %8010 = vrot.lane.b32.xlu1 %v8009_v57, %s8354_s18  ;;  %v12758_v61 = vsel %vm383_vm1, 0.0, %v3458_v30  ;;  %v12763_v32 = vsel %vm383_vm1, %v7652_v53, %v5233_v39 }
 0x545   : > { %v4259_v34 = vsel %vm383_vm1, %v12247_v40, %v15450_v10  ;;  %v4271_v21 = vsel %vm383_vm1, %v12272_v19, %v15451_v13  ;;  %v12752_v10 = vsel %vm383_vm1, %v7653_v11, %v5289_v48  ;;  %v12755_v19 = vpop.permute.xlu0 %7825  ;;  %v12760_v13 = vrot.slane %v7652_v53, 4 }
 0x546   : > { %15454 = vst [vmem:[#allocation25_spill] sm:$0xff] %v12755_v19  ;;  %v12767_v52 = vsel %vm383_vm1, 0.0, %v3514_v15  ;;  %v12770_v11 = vperm.slane %v4259_v34, %v15167_v3  ;;  %v12773_v48 = vperm.slane %v4271_v21, %v15167_v3  ;;  %v15455_v30 = vrot.slane %v12336_v27, 4  ;;  %v15464_v19 = vld [vmem:[#allocation62_spill] sm:$0xff] }
 0x547   : > { %v15456_v39 = vrot.slane %v12034_v45, 4  ;;  %v3659_v6 = vsel %vm383_vm1, 0.0, %v3658_v46  ;;  %v3715_v15 = vsel %vm383_vm1, 0.0, %v3714_v26  ;;  %v15457_v34 = vrot.slane %v12028_v44, 4  ;;  %v15460_v46 = vld [vmem:[#allocation33_spill] sm:$0xff] }
 0x548   : > { %v4325_v57 = vsel %vm383_vm1, %v15455_v30, %v12324_v56  ;;  %4349 = vrot.lane.b32.xlu2 %v12770_v11, %s8352_s17  ;;  %v3664_v56 = vrot.slane %v12590_v7, 4  ;;  %v3662_v44 = vrot.slane %v12402_v43, 4  ;;  %v3720_v27 = vrot.slane %v12593_v47, 4 }
 0x549   : > { %v3429_v53 = vsel %vm383_vm1, %v15456_v39, %v11940_v51  ;;  %v3485_v21 = vsel %vm383_vm1, %v15457_v34, %v11943_v16  ;;  %4365 = vrot.lane.b32.xlu0 %v12773_v48, %s8351_s8  ;;  %v15458_v51 = vrot.slane %v12379_v36, 4  ;;  %v3718_v16 = vrot.slane %v12410_v20, 4  ;;  %v15462_v39 = vld [vmem:[#allocation36_spill] sm:$0xff] }
 0x54a   : > { %v12804_v26 = vperm.slane %v3429_v53, %v15167_v3  ;;  %v15461_v30 = vrot.slane %v15460_v46, 4  ;;  %v8024_v43 = vpack.i.bf16 %v3715_v15, %v3659_v6  ;;  %v12819_v20 = vperm.slane %v3485_v21, %v15167_v3  ;;  %v12840_v21 = vpop.permute.xlu2 %7885  ;;  %v15473_v15 = vld [vmem:[#allocation52_spill] sm:$0xff] }
 0x54b   : > { %v4315_v45 = vsel %vm383_vm1, %v12392_v22, %v15458_v51  ;;  %v15466_v51 = vrot.slane %v15465_v42, 4  ;;  %v12822_v47 = vsel %vm383_vm1, 0.0, %v3662_v44  ;;  %v12825_v53 = vsel %vm383_vm1, 0.0, %v3718_v16  ;;  %15470 = vst [vmem:[#allocation36_spill] sm:$0xff] %v12840_v21  ;;  %v12853_v21 = vpop.permute.xlu1 %7865 }
 0x54c   : > { %15459 = vst [vmem:[#allocation51_spill] sm:$0xff] %v12804_v26  ;;  %v12810_v34 = vsel %vm383_vm1, %v15462_v39, %v15461_v30  ;;  %v12828_v46 = vperm.slane %v4325_v57, %v15167_v3  ;;  %v12831_v30 = vperm.slane %v4315_v45, %v15167_v3  ;;  %v15469_v39 = vrot.slane %v12208_v2, 4  ;;  %8025 = vrot.lane.b32.xlu1 %v8024_v43, %s8353_s11  ;;  %v15474_v43 = vld [vmem:[#allocation101_spill] sm:$0xff] }
 0x54d   : > { %15463 = vst [vmem:[#allocation27_spill] sm:$0xff] %v12810_v34  ;;  %v12816_v7 = vsel %vm383_vm1, %v15466_v51, %v15464_v19  ;;  %v3665_v44 = vsel %vm383_vm1, 0.0, %v3664_v56  ;;  %v15471_v57 = vrot.slane %v12232_v23, 4  ;;  %v4078_v16 = vrot.slane %v12464_v18, 4  ;;  %v15472_v51 = vld [vmem:[#allocation97_spill] sm:$0xff]  ;;  %v7836_v34 = vpop.permute.xlu0 %7835 }
 0x54e   : > { %15467 = vst [vmem:[#allocation64_spill] sm:$0xff] %v12816_v7  ;;  %v4051_v6 = vsel %vm383_vm1, %v15469_v39, %v15431_v31  ;;  %v4134_v2 = vrot.slane %v15472_v51, 4  ;;  %v3721_v31 = vsel %vm383_vm1, 0.0, %v3720_v27  ;;  %v3452_v39 = vrot.slane %v12804_v26, 4  ;;  %v15479_v26 = vld [vmem:[#allocation31_spill] sm:$0xff] }
 0x54f   : > { %15468 = vst [vmem:[#allocation33_spill] sm:$0xff] %v12819_v20  ;;  %v4107_v45 = vsel %vm383_vm1, %v15471_v57, %v15433_v35  ;;  %v3456_v50 = vrot.slane %v15473_v15, 4  ;;  %v3512_v7 = vrot.slane %v15474_v43, 4  ;;  %v3508_v56 = vrot.slane %v12819_v20, 4 }
 0x550   : > { %15475 = vst [vmem:[#allocation62_spill] sm:$0xff] %v12853_v21  ;;  %v12857_v23 = vperm.slane %v4051_v6, %v15167_v3  ;;  %v12860_v18 = vsel %vm383_vm1, 0.0, %v4078_v16  ;;  %v12863_v35 = vsel %vm383_vm1, 0.0, %v4134_v2  ;;  %v7838_v27 = vunpack.i.h.bf16 %v7836_v34  ;;  %4385 = vrot.lane.b32.xlu2 %v12828_v46, %s8350_s29  ;;  %v15478_v2 = vld [vmem:[#allocation30_spill] sm:$0xff] }
 0x551   : > { %v7837_v57 = vunpack.i.l.bf16 %v7836_v34  ;;  %v12866_v15 = vperm.slane %v4107_v45, %v15167_v3  ;;  %v7842_v43 = vunpack.i.l.bf16 %v12564_v25  ;;  %v7823_v21 = vunpack.i.h.bf16 %v12658_v33  ;;  %4377 = vrot.lane.b32.xlu0 %v12831_v30, %s8352_s17 }
 0x552   : > { %15476 = vst [vmem:[#allocation29_spill] sm:$0xff] %v12857_v23  ;;  %v7822_v6 = vunpack.i.l.bf16 %v12658_v33  ;;  %v8039_v16 = vpack.i.bf16 %v3721_v31, %v3665_v44  ;;  %v3453_v34 = vsel %vm383_vm1, 0.0, %v3452_v39  ;;  %v3457_v45 = vsel %vm383_vm1, 0.0, %v3456_v50 }
 0x553   : > { %15477 = vst [vmem:[#allocation97_spill] sm:$0xff] %v12866_v15  ;;  %v4974_v51 = vsel %vm551_vm6, %v15478_v2, %v7838_v27  ;;  %v4967_v20 = vsel %vm551_vm6, %v15479_v26, %v7837_v57  ;;  %v3509_v8 = vsel %vm383_vm1, 0.0, %v3508_v56  ;;  %v3513_v33 = vsel %vm383_vm1, 0.0, %v3512_v7  ;;  %v15488_v2 = vld [vmem:[#allocation24_spill] sm:$0xff] }
 0x554   : > { %v4975_v4 = vsel %vm553_vm7, %v4974_v51, %v7823_v21  ;;  %v4968_v14 = vsel %vm553_vm7, %v4967_v20, %v7822_v6  ;;  %v15480_v44 = vunpack.i.h.bf16 %v12564_v25  ;;  %v4074_v39 = vrot.slane %v12857_v23, 4  ;;  %8040 = vrot.lane.b32.xlu1 %v8039_v16, %s8356_s15  ;;  %v15486_v51 = vld [vmem:[#allocation42_spill] sm:$0xff] }
 0x555   : > { %v12893_v50 = vsel %vm555_vm8, %v4968_v14, %v7842_v43  ;;  %v4130_v26 = vrot.slane %v12866_v15, 4  ;;  %v15483_v56 = vunpack.i.l.bf16 %v15446_v9  ;;  %v15484_v7 = vunpack.i.h.bf16 %v15442_v12  ;;  %v15487_v6 = vld [vmem:[#allocation70_spill] sm:$0xff] }
 0x556   : > { %v12890_v31 = vsel %vm555_vm8, %v4975_v4, %v15480_v44  ;;  %15482 = vst [vmem:[#allocation101_spill] sm:$0xff] %v12893_v50  ;;  %v12907_v25 = vperm.slane %v12752_v10, %v15166_v17  ;;  %v12911_v14 = vperm.slane %v12763_v32, %v15166_v17  ;;  %v6169_v4 = vpop.permute.xlu2 %6168  ;;  %v15485_v21 = vunpack.i.l.bf16 %v15442_v12  ;;  %v6173_v44 = vpop.permute.xlu1 %6172 }
 0x557   : > { %15481 = vst [vmem:[#allocation52_spill] sm:$0xff] %v12890_v31  ;;  %v12899_v27 = vrot.slane %v15483_v56, 4  ;;  %v5288_v20 = vsel %vm383_vm1, %v12749_v41, %v15484_v7  ;;  %v7673_v41 = vunpack.i.h.bf16 %v15487_v6  ;;  %v6223_v10 = vsel %vm551_vm6, %v15488_v2, %v6169_v4 }
 0x558   : > { %v5232_v57 = vsel %vm383_vm1, %v12760_v13, %v15485_v21  ;;  %v8004_v56 = vpack.i.bf16 %v3509_v8, %v3453_v34  ;;  %v8014_v7 = vpack.i.bf16 %v3513_v33, %v3457_v45  ;;  %v12923_v32 = vsel %vm553_vm7, %v6223_v10, %v6173_v44 }
 0x559   : > { %15489 = vst [vmem:[#allocation30_spill] sm:$0xff] %v12923_v32  ;;  %v6149_v16 = vrot.slane %v15464_v19, 4  ;;  %v4075_v12 = vsel %vm383_vm1, 0.0, %v4074_v39  ;;  %v4131_v50 = vsel %vm383_vm1, 0.0, %v4130_v26  ;;  %v3660_v13 = vrot.slane %v12584_v54, 4  ;;  %v12939_v19 = vpop.permute.xlu0 %7850  ;;  %v15495_v54 = vld [vmem:[#allocation69_spill] sm:$0xff] }
 0x55a   : > { %v3716_v21 = vrot.slane %v12587_v0, 4  ;;  %v12931_v43 = vperm.slane %v5288_v20, %v15166_v17  ;;  %v12934_v4 = vperm.slane %v5232_v57, %v15166_v17  ;;  %v14990_v8 = vunpack.i.l.bf16 %v15486_v51  ;;  %8005 = vrot.lane.b32.xlu2 %v8004_v56, %s8353_s11  ;;  %8015 = vrot.lane.b32.xlu0 %v8014_v7, %s8355_s19  ;;  %15490 = vst [vmem:[#allocation31_spill] sm:$0xff] %v12939_v19  ;;  %v15494_v57 = vld [vmem:[#allocation92_spill] sm:$0xff]  ;;  %v15501_v32 = vld [vmem:[#allocation65_spill] sm:$0xff] }
 0x55b   : > { %v12943_v34 = vsel %vm383_vm1, %v15465_v42, %v6149_v16  ;;  %v7672_v39 = vunpack.i.l.bf16 %v15487_v6  ;;  %v15493_v26 = vunpack.i.h.bf16 %v15486_v51  ;;  %v5696_v2 = vsel %vm383_vm1, %v15494_v57, %v7673_v41  ;;  %v15500_v6 = vld [vmem:[#allocation100_spill] sm:$0xff] }
 0x55c   : > { %15491 = vst [vmem:[#allocation42_spill] sm:$0xff] %v12943_v34  ;;  %v5697_v10 = vrot.slane %v7673_v41, 4  ;;  %v8044_v44 = vpack.i.bf16 %v4131_v50, %v4075_v12  ;;  %v3661_v42 = vsel %vm383_vm1, 0.0, %v3660_v13  ;;  %v3717_v56 = vsel %vm383_vm1, 0.0, %v3716_v21  ;;  %v15498_v13 = vld [vmem:[#allocation68_spill] sm:$0xff] }
 0x55d   : > { %v12951_v20 = vrot.slane %v15493_v26, 4  ;;  %v4080_v7 = vrot.slane %v12663_v60, 4  ;;  %v4136_v16 = vrot.slane %v12666_v63, 4  ;;  %v12963_v26 = vrot.slane %v14990_v8, 4 }
 0x55e   : > { %8045 = vrot.lane.b32.xlu1 %v8044_v44, %s8353_s11  ;;  %v12967_v50 = vpop.permute.xlu2 %7900  ;;  %v5641_v21 = vrot.slane %v7672_v39, 4  ;;  %v12973_v33 = vperm.slane %v5696_v2, %v15166_v17  ;;  %v5640_v8 = vsel %vm383_vm1, %v15500_v6, %v7672_v39  ;;  %v8029_v0 = vpack.i.bf16 %v3717_v56, %v3661_v42 }
 0x55f   : > { %15496 = vst [vmem:[#allocation70_spill] sm:$0xff] %v12967_v50  ;;  %v4076_v57 = vrot.slane %v12651_v5, 4  ;;  %v15502_v44 = vunpack.i.h.bf16 %v15501_v32  ;;  %v4081_v12 = vsel %vm383_vm1, 0.0, %v4080_v7  ;;  %v4137_v60 = vsel %vm383_vm1, 0.0, %v4136_v16 }
 0x560   : > { %15499 = vst [vmem:[#allocation24_spill] sm:$0xff] %v12973_v33  ;;  %v4132_v63 = vrot.slane %v12654_v28, 4  ;;  %v15503_v19 = vunpack.i.h.bf16 %v15495_v54  ;;  %v7873_v34 = vunpack.i.h.bf16 %v12741_v38  ;;  %v7872_v39 = vunpack.i.l.bf16 %v12741_v38 }
 0x561   : > { %v5698_v31 = vsel %vm383_vm1, %v15502_v44, %v5697_v10  ;;  %v15504_v5 = vpack.i.bf16 %v12767_v52, %v12758_v61  ;;  %v15505_v10 = vrot.slane %v12247_v40, 4  ;;  %v15506_v42 = vunpack.i.l.bf16 %v15495_v54  ;;  %v15508_v52 = vld [vmem:[#allocation32_spill] sm:$0xff]  ;;  %v7856_v6 = vpop.permute.xlu0 %7855 }
 0x562   : > { %v12986_v2 = vrot.slane %v15503_v19, 4  ;;  %8030 = vrot.lane.b32.xlu0 %v8029_v0, %s8354_s18  ;;  %v15507_v56 = vunpack.i.l.bf16 %v15501_v32  ;;  %v13007_v7 = vperm.slane %v5640_v8, %v15166_v17  ;;  %v7703_v61 = vunpack.i.h.bf16 %v15508_v52 }
 0x563   : > { %8020 = vrot.lane.b32.xlu2 %v15504_v5, %s8356_s15  ;;  %v4257_v28 = vsel %vm383_vm1, %v15505_v10, %v12291_v59  ;;  %v13001_v19 = vrot.slane %v15506_v42, 4  ;;  %v13011_v0 = vperm.slane %v5698_v31, %v15166_v17  ;;  %v8059_v16 = vpack.i.bf16 %v4137_v60, %v4081_v12  ;;  %v15510_v31 = vld [vmem:[#allocation48_spill] sm:$0xff] }
 0x564   : > { %v5642_v38 = vsel %vm383_vm1, %v15507_v56, %v5641_v21  ;;  %v4077_v59 = vsel %vm383_vm1, 0.0, %v4076_v57  ;;  %v4133_v44 = vsel %vm383_vm1, 0.0, %v4132_v63  ;;  %v7858_v5 = vunpack.i.h.bf16 %v7856_v6  ;;  %v15511_v56 = vld [vmem:[#allocation74_spill] sm:$0xff]  ;;  %v15512_v60 = vld [vmem:[#allocation72_spill] sm:$0xff] }
 0x565   : > { %v7857_v32 = vunpack.i.l.bf16 %v7856_v6  ;;  %v13017_v21 = vperm.slane %v4257_v28, %v15167_v3  ;;  %v13020_v8 = vperm.slane %v5642_v38, %v15166_v17  ;;  %v7702_v10 = vunpack.i.l.bf16 %v15508_v52  ;;  %v7876_v6 = vpop.permute.xlu1 %7875 }
 0x566   : > { %v5608_v42 = vsel %vm551_vm6, %v15510_v31, %v7873_v34  ;;  %v5601_v12 = vsel %vm551_vm6, %v15511_v56, %v7872_v39  ;;  %8060 = vrot.lane.b32.xlu1 %v8059_v16, %s8356_s15  ;;  %v5901_v57 = vrot.slane %v7703_v61, 4  ;;  %v7688_v63 = vunpack.i.h.bf16 %v15512_v60  ;;  %v13032_v23 = vpop.permute.xlu2 %7910  ;;  %v15513_v34 = vld [vmem:[#allocation102_spill] sm:$0xff] }
 0x567   : > { %15509 = vst [vmem:[#allocation92_spill] sm:$0xff] %v13017_v21  ;;  %v5609_v28 = vsel %vm553_vm7, %v5608_v42, %v7858_v5  ;;  %v5602_v40 = vsel %vm553_vm7, %v5601_v12, %v7857_v32  ;;  %v7687_v38 = vunpack.i.l.bf16 %v15512_v60  ;;  %v8049_v41 = vpack.i.bf16 %v4133_v44, %v4077_v59  ;;  %v15514_v5 = vld [vmem:[#allocation103_spill] sm:$0xff]  ;;  %v15516_v42 = vld [vmem:[#allocation20_spill] sm:$0xff] }
 0x568   : > { %v7878_v52 = vunpack.i.h.bf16 %v7876_v6  ;;  %v7877_v45 = vunpack.i.l.bf16 %v7876_v6  ;;  %v5904_v39 = vsel %vm383_vm1, %v7703_v61, %v15513_v34  ;;  %v7863_v16 = vunpack.i.h.bf16 %v12656_v1  ;;  %v15543_v34 = vld [vmem:[#allocation55_spill] sm:$0xff] }
 0x569   : > { %v7862_v31 = vunpack.i.l.bf16 %v12656_v1  ;;  %v4280_v56 = vrot.slane %v13017_v21, 4  ;;  %v5845_v15 = vrot.slane %v7702_v10, 4  ;;  %v5848_v32 = vsel %vm383_vm1, %v7702_v10, %v15514_v5  ;;  %v15518_v5 = vld [vmem:[#allocation28_spill] sm:$0xff]  ;;  %v7881_v21 = vpop.permute.xlu0 %7880 }
 0x56a   : > { %v15515_v59 = vpack.i.bf16 %v12825_v53, %v12822_v47  ;;  %8050 = vrot.lane.b32.xlu0 %v8049_v41, %s8354_s18  ;;  %v5610_v44 = vsel %vm555_vm8, %v5609_v28, %v7878_v52  ;;  %v5603_v61 = vsel %vm555_vm8, %v5602_v40, %v7877_v45  ;;  %v15517_v12 = vunpack.i.h.bf16 %v15516_v42  ;;  %v15547_v47 = vld [vmem:[#allocation104_spill] sm:$0xff] }
 0x56b   : > { %v5707_v60 = vrot.slane %v7688_v63, 4  ;;  %v5604_v6 = vsel %vm557_vm9, %v5603_v61, %v7862_v31  ;;  %v5611_v10 = vsel %vm557_vm9, %v5610_v44, %v7863_v16  ;;  %v5651_v53 = vrot.slane %v7687_v38, 4 }
 0x56c   : > { %8035 = vrot.lane.b32.xlu2 %v15515_v59, %s8355_s19  ;;  %v5902_v1 = vsel %vm383_vm1, %v5901_v57, %v15517_v12  ;;  %v15519_v59 = vld [vmem:[#allocation75_spill] sm:$0xff]  ;;  %v4281_v28 = vsel %vm383_vm1, 0.0, %v4280_v56  ;;  %v4282_v45 = vrot.slane %v12770_v11, 4  ;;  %v7883_v40 = vunpack.i.h.bf16 %v7881_v21 }
 0x56d   : > { %v7698_v41 = vunpack.i.h.bf16 %v15519_v59  ;;  %v7882_v52 = vunpack.i.l.bf16 %v7881_v21  ;;  %v15520_v57 = vunpack.i.l.bf16 %v15516_v42  ;;  %v13062_v16 = vperm.slane %v5848_v32, %v15166_v17  ;;  %v13082_v42 = vpop.permute.xlu1 %7890 }
 0x56e   : > { %v13065_v44 = vperm.slane %v5902_v1, %v15166_v17  ;;  %v13068_v61 = vperm.slane %v5904_v39, %v15166_v17  ;;  %4345 = vrot.lane.b32.xlu1 %v4281_v28, %s8353_s11  ;;  %v15523_v56 = vunpack.i.h.bf16 %v15495_v54  ;;  %v5710_v21 = vsel %vm383_vm1, %v7688_v63, %v12986_v2 }
 0x56f   : > { %v5846_v31 = vsel %vm383_vm1, %v5845_v15, %v15520_v57  ;;  %v13077_v15 = vsel %vm559_vm10, %v5604_v6, %v7882_v52  ;;  %v13080_v32 = vsel %vm559_vm10, %v5611_v10, %v7883_v40  ;;  %v15526_v12 = vunpack.i.l.bf16 %v15495_v54 }
 0x570   : > { %15521 = vst [vmem:[#allocation69_spill] sm:$0xff] %v13065_v44  ;;  %v5708_v11 = vsel %vm383_vm1, %v5707_v60, %v15523_v56  ;;  %v5654_v60 = vsel %vm383_vm1, %v7687_v38, %v13001_v19  ;;  %v7697_v28 = vunpack.i.l.bf16 %v15519_v59  ;;  %v5915_v63 = vrot.slane %v7698_v41, 4  ;;  %v13109_v38 = vpop.permute.xlu2 %7925  ;;  %v15540_v59 = vld [vmem:[#allocation93_spill] sm:$0xff] }
 0x571   : > { %15522 = vst [vmem:[#allocation100_spill] sm:$0xff] %v13068_v61  ;;  %v5652_v1 = vsel %vm383_vm1, %v5651_v53, %v15526_v12  ;;  %v4283_v6 = vsel %vm383_vm1, 0.0, %v4282_v45  ;;  %v4286_v10 = vrot.slane %v12773_v48, 4  ;;  %v13095_v40 = vperm.slane %v5846_v31, %v15166_v17 }
 0x572   : > { %15524 = vst [vmem:[#allocation65_spill] sm:$0xff] %v13077_v15  ;;  %v13099_v54 = vperm.slane %v5708_v11, %v15166_v17  ;;  %v13102_v53 = vperm.slane %v5710_v21, %v15166_v17  ;;  %v15528_v19 = vpack.i.bf16 %v12863_v35, %v12860_v18  ;;  %4353 = vrot.lane.b32.xlu0 %v4283_v6, %s8354_s18  ;;  %v5859_v35 = vrot.slane %v7697_v28, 4 }
 0x573   : > { %15525 = vst [vmem:[#allocation32_spill] sm:$0xff] %v13080_v32  ;;  %v13114_v45 = vperm.slane %v5652_v1, %v15166_v17  ;;  %v13117_v57 = vperm.slane %v5654_v60, %v15166_v17  ;;  %v5914_v31 = vsel %vm383_vm1, %v12730_v24, %v7698_v41  ;;  %v5858_v18 = vsel %vm383_vm1, %v12899_v27, %v7697_v28  ;;  %v13133_v24 = vpop.permute.xlu0 %7895  ;;  %v15532_v28 = vld [vmem:[#allocation76_spill] sm:$0xff]  ;;  %v15545_v41 = vld [vmem:[#allocation95_spill] sm:$0xff] }
 0x574   : > { %15527 = vst [vmem:[#allocation48_spill] sm:$0xff] %v13099_v54  ;;  %8055 = vrot.lane.b32.xlu2 %v15528_v19, %s8355_s19  ;;  %v15529_v56 = vrot.slane %v12392_v22, 4  ;;  %v15530_v21 = vunpack.i.h.bf16 %v15446_v9  ;;  %v4287_v1 = vsel %vm383_vm1, 0.0, %v4286_v10  ;;  %v4284_v60 = vrot.slane %v12581_v62, 4  ;;  %v15544_v10 = vld [vmem:[#allocation56_spill] sm:$0xff] }
 0x575   : > { %v4340_v6 = vrot.slane %v12828_v46, 4  ;;  %15531 = vst [vmem:[#allocation74_spill] sm:$0xff] %v13133_v24  ;;  %v7713_v22 = vunpack.i.h.bf16 %v15532_v28  ;;  %v13143_v62 = vperm.slane %v5914_v31, %v15166_v17  ;;  %v13145_v46 = vpop.permute.xlu1 %7915  ;;  %v15541_v52 = vrot.slane %v15540_v59, 4 }
 0x576   : > { %v4313_v11 = vsel %vm383_vm1, %v15529_v56, %v12379_v36  ;;  %v5916_v12 = vsel %vm383_vm1, %v15530_v21, %v5915_v63  ;;  %v7712_v36 = vunpack.i.l.bf16 %v15532_v28  ;;  %4369 = vrot.lane.b32.xlu1 %v4287_v1, %s8356_s15  ;;  %15534 = vst [vmem:[#allocation102_spill] sm:$0xff] %v13145_v46  ;;  %v13154_v21 = vperm.slane %v5858_v18, %v15166_v17  ;;  %v15538_v28 = vld [vmem:[#allocation96_spill] sm:$0xff] }
 0x577   : > { %15533 = vst [vmem:[#allocation72_spill] sm:$0xff] %v13143_v62  ;;  %v13148_v19 = vperm.slane %v4313_v11, %v15167_v3  ;;  %v13151_v56 = vperm.slane %v5916_v12, %v15166_v17  ;;  %v15539_v1 = vrot.slane %v15538_v28, 4  ;;  %v5096_v31 = vsel %vm383_vm1, %v12614_v58, %v15541_v52 }
 0x578   : > { %15537 = vst [vmem:[#allocation28_spill] sm:$0xff] %v13154_v21  ;;  %v15542_v27 = vunpack.i.l.bf16 %v15446_v9  ;;  %v4285_v12 = vsel %vm383_vm1, 0.0, %v4284_v60  ;;  %v4341_v63 = vsel %vm383_vm1, 0.0, %v4340_v6  ;;  %v4338_v18 = vrot.slane %v12831_v30, 4  ;;  %v15548_v9 = vld [vmem:[#allocation94_spill] sm:$0xff] }
 0x579   : > { %15535 = vst [vmem:[#allocation103_spill] sm:$0xff] %v13148_v19  ;;  %v5040_v48 = vsel %vm383_vm1, %v12604_v49, %v15539_v1  ;;  %v6523_v39 = vrot.slane %v15544_v10, 4  ;;  %v6331_v1 = vrot.slane %v7713_v22, 4  ;;  %v6329_v2 = vrot.slane %v7712_v36, 4 }
 0x57a   : > { %15536 = vst [vmem:[#allocation20_spill] sm:$0xff] %v13151_v56  ;;  %v5860_v11 = vsel %vm383_vm1, %v15542_v27, %v5859_v35  ;;  %4389 = vrot.lane.b32.xlu0 %v4341_v63, %s8355_s19  ;;  %v4336_v52 = vrot.slane %v13148_v19, 4  ;;  %v13177_v35 = vperm.slane %v5040_v48, %v15167_v3  ;;  %v13180_v60 = vperm.slane %v5096_v31, %v15167_v3  ;;  %v7941_v27 = vpop.permute.xlu2 %7940  ;;  %v15566_v56 = vld [vmem:[#allocation71_spill] sm:$0xff] }
 0x57b   : > { %v13183_v30 = vperm.slane %v5860_v11, %v15166_v17  ;;  %v15549_v15 = vrot.slane %v15548_v9, 4  ;;  %v7943_v31 = vunpack.i.h.bf16 %v7941_v27  ;;  %v7942_v19 = vunpack.i.l.bf16 %v7941_v27 }
 0x57c   : > { %4361 = vrot.lane.b32.xlu2 %v4285_v12, %s8355_s19  ;;  %v15546_v12 = vrot.slane %v15545_v41, 4  ;;  %v4339_v11 = vsel %vm383_vm1, 0.0, %v4338_v18  ;;  %v6524_v6 = vsel %vm383_vm1, %v6523_v39, %v15518_v5  ;;  %v15550_v62 = vrot.slane %v15518_v5, 4  ;;  %v7906_v18 = vpop.permute.xlu0 %7905 }
 0x57d   : > { %v5108_v48 = vsel %vm383_vm1, %v12596_v37, %v15549_v15  ;;  %v6332_v61 = vsel %vm383_vm1, %v7712_v36, %v6331_v1  ;;  %v4337_v15 = vsel %vm383_vm1, 0.0, %v4336_v52  ;;  %v8064_v27 = vpack.i.bf16 %v13180_v60, %v13177_v35  ;;  %v15554_v52 = vld [vmem:[#allocation67_spill] sm:$0xff] }
 0x57e   : > { %v5052_v63 = vsel %vm383_vm1, %v15547_v47, %v15546_v12  ;;  %v6526_v44 = vsel %vm383_vm1, %v15544_v10, %v15550_v62  ;;  %v6330_v12 = vsel %vm383_vm1, %v6329_v2, %v7713_v22  ;;  %4381 = vrot.lane.b32.xlu1 %v4339_v11, %s8354_s18  ;;  %v13212_v5 = vperm.slane %v5108_v48, %v15167_v3  ;;  %v13214_v62 = vpop.permute.xlu1 %7930  ;;  %v15555_v11 = vld [vmem:[#allocation66_spill] sm:$0xff] }
 0x57f   : > { %v13209_v32 = vperm.slane %v5052_v63, %v15167_v3  ;;  %v7908_v39 = vunpack.i.h.bf16 %v7906_v18  ;;  %v7907_v10 = vunpack.i.l.bf16 %v7906_v18  ;;  %15551 = vst [vmem:[#allocation75_spill] sm:$0xff] %v13214_v62  ;;  %v15552_v2 = vrot.slane %v15547_v47, 4 }
 0x580   : > { %v15553_v36 = vrot.slane %v12596_v37, 4  ;;  %v3159_v63 = vsel %vm551_vm6, %v15554_v52, %v7943_v31  ;;  %v3152_v48 = vsel %vm551_vm6, %v15555_v11, %v7942_v19  ;;  %v15556_v18 = vrot.slane %v12715_v55, 4  ;;  %v15559_v31 = vld [vmem:[#allocation57_spill] sm:$0xff] }
 0x581   : > { %v5050_v22 = vsel %vm383_vm1, %v15552_v2, %v15545_v41  ;;  %v15557_v47 = vrot.slane %v12694_v29, 4  ;;  %v15558_v2 = vld [vmem:[#allocation80_spill] sm:$0xff]  ;;  %v3160_v19 = vsel %vm553_vm7, %v3159_v63, %v7908_v39  ;;  %v15560_v52 = vrot.slane %v12911_v14, 4 }
 0x582   : > { %v5106_v1 = vsel %vm383_vm1, %v15553_v36, %v15548_v9  ;;  %v5258_v62 = vsel %vm383_vm1, %v12911_v14, %v15556_v18  ;;  %v15003_v37 = vunpack.i.h.bf16 %v15558_v2  ;;  %8065 = vrot.lane.b32.xlu0 %v8064_v27, %s8352_s17  ;;  %v3153_v9 = vsel %vm553_vm7, %v3152_v48, %v7907_v10  ;;  %v13259_v10 = vpop.permute.xlu2 %7955 }
 0x583   : > { %v5314_v41 = vsel %vm383_vm1, %v12907_v25, %v15557_v47  ;;  %v4342_v36 = vrot.slane %v15559_v31, 4  ;;  %v5256_v11 = vsel %vm383_vm1, %v15560_v52, %v12715_v55  ;;  %v15561_v18 = vrot.slane %v12907_v25, 4  ;;  %15563 = vst [vmem:[#allocation96_spill] sm:$0xff] %v13259_v10 }
 0x584   : > { %4373 = vrot.lane.b32.xlu2 %v4337_v15, %s8353_s11  ;;  %v13251_v15 = vperm.slane %v5050_v22, %v15167_v3  ;;  %v13254_v27 = vperm.slane %v5106_v1, %v15167_v3  ;;  %v13257_v39 = vperm.slane %v6526_v44, %v15166_v17  ;;  %v8074_v14 = vpack.i.bf16 %v13212_v5, %v13209_v32  ;;  %v15564_v1 = vld [vmem:[#allocation39_spill] sm:$0xff] }
 0x585   : > { %v5312_v47 = vsel %vm383_vm1, %v15561_v18, %v12694_v29  ;;  %v13264_v55 = vperm.slane %v5258_v62, %v15167_v3  ;;  %v13267_v25 = vperm.slane %v5314_v41, %v15167_v3  ;;  %v13270_v29 = vperm.slane %v6524_v6, %v15166_v17 }
 0x586   : > { %15562 = vst [vmem:[#allocation76_spill] sm:$0xff] %v13257_v39  ;;  %v13273_v22 = vperm.slane %v6330_v12, %v15166_v17  ;;  %v13276_v44 = vperm.slane %v6332_v61, %v15166_v17  ;;  %v13281_v63 = vrot.slane %v15003_v37, 4  ;;  %8075 = vrot.lane.b32.xlu1 %v8074_v14, %s8351_s8  ;;  %v4343_v62 = vsel %vm383_vm1, 0.0, %v4342_v36  ;;  %v7946_v14 = vpop.permute.xlu1 %7945 }
 0x587   : > { %v13286_v48 = vperm.slane %v5256_v11, %v15167_v3  ;;  %v13289_v6 = vperm.slane %v5312_v47, %v15167_v3  ;;  %v7913_v12 = vunpack.i.h.bf16 %v13032_v23  ;;  %v7912_v61 = vunpack.i.l.bf16 %v13032_v23 }
 0x588   : > { %v5065_v41 = vrot.slane %v13251_v15, 4  ;;  %v5121_v31 = vrot.slane %v13254_v27, 4  ;;  %v7893_v52 = vunpack.i.h.bf16 %v13082_v42  ;;  %v7892_v18 = vunpack.i.l.bf16 %v13082_v42 }
 0x589   : > { %v7928_v36 = vunpack.i.h.bf16 %v13109_v38  ;;  %v8089_v11 = vpack.i.bf16 %v13267_v25, %v13264_v55  ;;  %v7948_v47 = vunpack.i.h.bf16 %v7946_v14  ;;  %v7947_v37 = vunpack.i.l.bf16 %v7946_v14 }
 0x58a   : > { %v15565_v10 = vrot.slane %v15564_v1, 4  ;;  %v15567_v46 = vrot.slane %v15566_v56, 4  ;;  %v7927_v42 = vunpack.i.l.bf16 %v13109_v38  ;;  %v8084_v39 = vpack.i.bf16 %v13289_v6, %v13286_v48  ;;  %v13319_v38 = vpop.permute.xlu2 %7965 }
 0x58b   : > { %8090 = vrot.lane.b32.xlu0 %v8089_v11, %s8351_s8  ;;  %v5063_v14 = vrot.slane %v13177_v35, 4  ;;  %v5119_v50 = vrot.slane %v13180_v60, 4  ;;  %v3161_v21 = vsel %vm555_vm8, %v3160_v19, %v7948_v47  ;;  %v5066_v54 = vsel %vm383_vm1, 0.0, %v5065_v41 }
 0x58c   : > { %v5246_v23 = vsel %vm383_vm1, %v12934_v4, %v15565_v10  ;;  %v5302_v24 = vsel %vm383_vm1, %v12931_v43, %v15567_v46  ;;  %4397 = vrot.lane.b32.xlu2 %v4343_v62, %s8356_s15  ;;  %v3154_v10 = vsel %vm555_vm8, %v3153_v9, %v7947_v37  ;;  %v5122_v46 = vsel %vm383_vm1, 0.0, %v5121_v31  ;;  %v7921_v62 = vpop.permute.xlu0 %7920 }
 0x58d   : > { %v13322_v11 = vperm.slane %v5246_v23, %v15167_v3  ;;  %v13325_v33 = vperm.slane %v5302_v24, %v15167_v3  ;;  %v13328_v35 = vsel %vm557_vm9, %v3154_v10, %v7912_v61  ;;  %v13331_v60 = vsel %vm557_vm9, %v3161_v21, %v7913_v12  ;;  %v15573_v23 = vld [vmem:[#allocation37_spill] sm:$0xff] }
 0x58e   : > { %v7923_v37 = vunpack.i.h.bf16 %v7921_v62  ;;  %v7922_v9 = vunpack.i.l.bf16 %v7921_v62  ;;  %v15568_v19 = vrot.slane %v12604_v49, 4  ;;  %v15569_v31 = vrot.slane %v12614_v58, 4  ;;  %8085 = vrot.lane.b32.xlu1 %v8084_v39, %s8350_s29  ;;  %v15572_v58 = vld [vmem:[#allocation87_spill] sm:$0xff] }
 0x58f   : > { %v8069_v24 = vpack.i.bf16 %v13254_v27, %v13251_v15  ;;  %v5064_v21 = vsel %vm383_vm1, 0.0, %v5063_v14  ;;  %v15570_v12 = vrot.slane %v12934_v4, 4  ;;  %v15571_v49 = vrot.slane %v12931_v43, 4  ;;  %v13360_v14 = vpop.permute.xlu1 %7970 }
 0x590   : > { %v5038_v41 = vsel %vm383_vm1, %v15568_v19, %v15538_v28  ;;  %v5094_v47 = vsel %vm383_vm1, %v15569_v31, %v15540_v59  ;;  %v2953_v59 = vsel %vm551_vm6, %v15572_v58, %v7923_v37  ;;  %v2946_v39 = vsel %vm551_vm6, %v15573_v23, %v7922_v9 }
 0x591   : > { %v5244_v61 = vsel %vm383_vm1, %v15570_v12, %v15564_v1  ;;  %v5300_v28 = vsel %vm383_vm1, %v15571_v49, %v15566_v56  ;;  %v8104_v10 = vpack.i.bf16 %v5122_v46, %v5066_v54  ;;  %v5120_v15 = vsel %vm383_vm1, 0.0, %v5119_v50 }
 0x592   : > { %v2954_v27 = vsel %vm553_vm7, %v2953_v59, %v7893_v52  ;;  %v2947_v4 = vsel %vm553_vm7, %v2946_v39, %v7892_v18  ;;  %v5269_v1 = vrot.slane %v13322_v11, 4  ;;  %v5325_v43 = vrot.slane %v13325_v33, 4  ;;  %v13397_v23 = vpop.permute.xlu2 %7975  ;;  %v15624_v18 = vld [vmem:[#allocation24_spill] sm:$0xff] }
 0x593   : > { %v13365_v56 = vsel %vm555_vm8, %v2954_v27, %v7928_v36  ;;  %v13368_v62 = vsel %vm555_vm8, %v2947_v4, %v7927_v42  ;;  %v13371_v54 = vperm.slane %v5244_v61, %v15167_v3  ;;  %v13374_v50 = vperm.slane %v5300_v28, %v15167_v3  ;;  %8105 = vrot.lane.b32.xlu0 %v8104_v10, %s8355_s19  ;;  %v15580_v42 = vld [vmem:[#allocation81_spill] sm:$0xff]  ;;  %v15582_v61 = vld [vmem:[#allocation83_spill] sm:$0xff] }
 0x594   : > { %15574 = vst [vmem:[#allocation93_spill] sm:$0xff] %v13365_v56  ;;  %v15579_v9 = vunpack.i.l.bf16 %v15558_v2  ;;  %8070 = vrot.lane.b32.xlu2 %v8069_v24, %s8350_s29  ;;  %v15581_v31 = vrot.slane %v15543_v34, 4  ;;  %v7723_v49 = vunpack.i.h.bf16 %v15582_v61  ;;  %v13390_v28 = vperm.slane %v5038_v41, %v15167_v3  ;;  %v13399_v39 = vpop.permute.xlu0 %7935 }
 0x595   : > { %15575 = vst [vmem:[#allocation55_spill] sm:$0xff] %v13368_v62  ;;  %v6537_v24 = vrot.slane %v15580_v42, 4  ;;  %v8099_v10 = vpack.i.bf16 %v5120_v15, %v5064_v21  ;;  %v13402_v27 = vperm.slane %v5094_v47, %v15167_v3  ;;  %v5270_v4 = vsel %vm383_vm1, 0.0, %v5269_v1  ;;  %v15588_v21 = vld [vmem:[#allocation82_spill] sm:$0xff]  ;;  %v15656_v62 = vld [vmem:[#allocation20_spill] sm:$0xff] }
 0x596   : > { %15576 = vst [vmem:[#allocation56_spill] sm:$0xff] %v13371_v54  ;;  %v6261_v19 = vrot.slane %v15579_v9, 4  ;;  %v6536_v12 = vsel %vm383_vm1, %v15581_v31, %v15580_v42  ;;  %v15584_v58 = vmov %v15579_v9  ;;  %v5326_v41 = vsel %vm383_vm1, 0.0, %v5325_v43 }
 0x597   : > { %15577 = vst [vmem:[#allocation95_spill] sm:$0xff] %v13374_v50  ;;  %v6264_v59 = vsel %vm383_vm1, %v15584_v58, %v13281_v63  ;;  %v5267_v9 = vrot.slane %v13371_v54, 4  ;;  %v5323_v31 = vrot.slane %v13374_v50, 4  ;;  %v15586_v63 = vunpack.i.h.bf16 %v15558_v2  ;;  %8100 = vrot.lane.b32.xlu1 %v8099_v10, %s8354_s18 }
 0x598   : > { %15583 = vst [vmem:[#allocation104_spill] sm:$0xff] %v13390_v28  ;;  %v13413_v36 = vperm.slane %v6536_v12, %v15166_v17  ;;  %v6467_v47 = vrot.slane %v15588_v21, 4  ;;  %v13418_v15 = vperm.slane %v6264_v59, %v15166_v17  ;;  %v6275_v1 = vrot.slane %v7723_v49, 4 }
 0x599   : > { %15585 = vst [vmem:[#allocation94_spill] sm:$0xff] %v13402_v27  ;;  %v6262_v42 = vsel %vm383_vm1, %v6261_v19, %v15586_v63  ;;  %v7722_v43 = vunpack.i.l.bf16 %v15582_v61  ;;  %v5061_v37 = vrot.slane %v13390_v28, 4  ;;  %v6538_v2 = vsel %vm383_vm1, %v15543_v34, %v6537_v24  ;;  %v13426_v63 = vpop.permute.xlu1 %7980  ;;  %v15591_v24 = vld [vmem:[#allocation46_spill] sm:$0xff] }
 0x59a   : > { %v8079_v19 = vpack.i.bf16 %v13325_v33, %v13322_v11  ;;  %v8119_v12 = vpack.i.bf16 %v5326_v41, %v5270_v4  ;;  %v5117_v46 = vrot.slane %v13402_v27, 4  ;;  %v5268_v10 = vsel %vm383_vm1, 0.0, %v5267_v9  ;;  %v13455_v11 = vpop.permute.xlu2 %7990  ;;  %v15608_v27 = vld [vmem:[#allocation99_spill] sm:$0xff] }
 0x59b   : > { %v5324_v59 = vsel %vm383_vm1, 0.0, %v5323_v31  ;;  %v15589_v52 = vrot.slane %v13020_v8, 4  ;;  %v15590_v54 = vrot.slane %v13011_v0, 4  ;;  %v13440_v33 = vperm.slane %v6262_v42, %v15166_v17 }
 0x59c   : > { %v6468_v4 = vsel %vm383_vm1, %v6467_v47, %v15591_v24  ;;  %v6274_v41 = vsel %vm383_vm1, %v12951_v20, %v7723_v49  ;;  %8080 = vrot.lane.b32.xlu2 %v8079_v19, %s8352_s17  ;;  %8120 = vrot.lane.b32.xlu0 %v8119_v12, %s8354_s18  ;;  %v6319_v31 = vrot.slane %v7722_v43, 4  ;;  %v5062_v42 = vsel %vm383_vm1, 0.0, %v5061_v37  ;;  %v7951_v47 = vpop.permute.xlu0 %7950  ;;  %v15613_v24 = vld [vmem:[#allocation88_spill] sm:$0xff] }
 0x59d   : > { %v5678_v61 = vsel %vm383_vm1, %v13117_v57, %v15589_v52  ;;  %v5734_v34 = vsel %vm383_vm1, %v13102_v53, %v15590_v54  ;;  %v15592_v52 = vunpack.i.h.bf16 %v15486_v51  ;;  %v6318_v54 = vsel %vm383_vm1, %v12963_v26, %v7722_v43 }
 0x59e   : > { %v8114_v50 = vpack.i.bf16 %v5324_v59, %v5268_v10  ;;  %v5118_v20 = vsel %vm383_vm1, 0.0, %v5117_v46  ;;  %v13459_v49 = vperm.slane %v5678_v61, %v15167_v3  ;;  %v13462_v19 = vperm.slane %v5734_v34, %v15167_v3 }
 0x59f   : > { %v6276_v9 = vsel %vm383_vm1, %v15592_v52, %v6275_v1  ;;  %v7953_v12 = vunpack.i.h.bf16 %v7951_v47  ;;  %v7952_v1 = vunpack.i.l.bf16 %v7951_v47  ;;  %v5273_v52 = vrot.slane %v13264_v55, 4 }
 0x5a0   : > { %v5329_v26 = vrot.slane %v13267_v25, 4  ;;  %v13467_v37 = vperm.slane %v6538_v2, %v15166_v17  ;;  %v13471_v10 = vperm.slane %v6468_v4, %v15166_v17  ;;  %v13474_v46 = vperm.slane %v6274_v41, %v15166_v17  ;;  %8115 = vrot.lane.b32.xlu1 %v8114_v50, %s8353_s11 }
 0x5a1   : > { %v13478_v59 = vperm.slane %v6276_v9, %v15166_v17  ;;  %v15595_v55 = vunpack.i.l.bf16 %v15486_v51  ;;  %v13485_v2 = vsel %vm559_vm10, %v13331_v60, %v7953_v12  ;;  %v13489_v61 = vsel %vm559_vm10, %v13328_v35, %v7952_v1  ;;  %v13496_v41 = vpop.permute.xlu1 %7995 }
 0x5a2   : > { %15593 = vst [vmem:[#allocation67_spill] sm:$0xff] %v13467_v37  ;;  %v13492_v34 = vperm.slane %v6318_v54, %v15166_v17  ;;  %v8094_v4 = vpack.i.bf16 %v5118_v20, %v5062_v42  ;;  %v8144_v50 = vpack.i.bf16 %v13462_v19, %v13459_v49  ;;  %v5067_v51 = vrot.slane %v13209_v32, 4  ;;  %v15597_v20 = vld [vmem:[#allocation85_spill] sm:$0xff]  ;;  %v13520_v47 = vpop.permute.xlu2 %4349 }
 0x5a3   : > { %15594 = vst [vmem:[#allocation66_spill] sm:$0xff] %v13478_v59  ;;  %v6320_v25 = vsel %vm383_vm1, %v15595_v55, %v6319_v31  ;;  %v5274_v9 = vsel %vm383_vm1, 0.0, %v5273_v52  ;;  %v5330_v60 = vsel %vm383_vm1, 0.0, %v5329_v26  ;;  %v5123_v31 = vrot.slane %v13212_v5, 4  ;;  %v15598_v52 = vld [vmem:[#allocation86_spill] sm:$0xff] }
 0x5a4   : > { %15596 = vst [vmem:[#allocation80_spill] sm:$0xff] %v13485_v2  ;;  %v5881_v35 = vrot.slane %v13183_v30, 4  ;;  %v13506_v42 = vperm.slane %v6320_v25, %v15166_v17  ;;  %v7732_v12 = vunpack.i.l.bf16 %v15597_v20  ;;  %8095 = vrot.lane.b32.xlu2 %v8094_v4, %s8353_s11  ;;  %8145 = vrot.lane.b32.xlu0 %v8144_v50, %s8351_s8  ;;  %v7733_v5 = vunpack.i.h.bf16 %v15597_v20  ;;  %v13522_v4 = vpop.permute.xlu0 %7960 }
 0x5a5   : > { %v15599_v26 = vrot.slane %v15498_v13, 4  ;;  %15600 = vst [vmem:[#allocation57_spill] sm:$0xff] %v13520_v47  ;;  %v8129_v50 = vpack.i.bf16 %v5330_v60, %v5274_v9  ;;  %v5068_v32 = vsel %vm383_vm1, 0.0, %v5067_v51  ;;  %v5124_v1 = vsel %vm383_vm1, 0.0, %v5123_v31  ;;  %v15603_v9 = vld [vmem:[#allocation53_spill] sm:$0xff]  ;;  %v15604_v31 = vld [vmem:[#allocation59_spill] sm:$0xff] }
 0x5a6   : > { %v5882_v20 = vsel %vm383_vm1, %v5881_v35, %v13062_v16  ;;  %v15601_v54 = vrot.slane %v13117_v57, 4  ;;  %v15602_v25 = vrot.slane %v13102_v53, 4  ;;  %v2732_v51 = vsel %vm551_vm6, %v15603_v9, %v7732_v12  ;;  %v15605_v57 = vld [vmem:[#allocation50_spill] sm:$0xff]  ;;  %v15632_v47 = vld [vmem:[#allocation28_spill] sm:$0xff] }
 0x5a7   : > { %v6480_v55 = vsel %vm383_vm1, %v15599_v26, %v15598_v52  ;;  %v7737_v35 = vunpack.i.l.bf16 %v15604_v31  ;;  %v8109_v28 = vpack.i.bf16 %v5124_v1, %v5068_v32  ;;  %v13552_v12 = vperm.slane %v5882_v20, %v15167_v3  ;;  %v15616_v1 = vld [vmem:[#allocation34_spill] sm:$0xff] }
 0x5a8   : > { %v5676_v26 = vsel %vm383_vm1, %v15601_v54, %v13020_v8  ;;  %v5732_v43 = vsel %vm383_vm1, %v15602_v25, %v13011_v0  ;;  %v13540_v60 = vperm.slane %v6480_v55, %v15166_v17  ;;  %8130 = vrot.lane.b32.xlu1 %v8129_v50, %s8356_s15  ;;  %v13546_v8 = vsel %vm551_vm6, %v15605_v57, %v7733_v5  ;;  %v15607_v54 = vld [vmem:[#allocation84_spill] sm:$0xff]  ;;  %v15610_v57 = vld [vmem:[#allocation63_spill] sm:$0xff] }
 0x5a9   : > { %15606 = vst [vmem:[#allocation39_spill] sm:$0xff] %v13546_v8  ;;  %v7788_v53 = vunpack.i.h.bf16 %v15607_v54  ;;  %v7783_v0 = vunpack.i.h.bf16 %v15608_v27  ;;  %v7782_v25 = vunpack.i.l.bf16 %v15608_v27  ;;  %v13554_v55 = vpop.permute.xlu1 %4357  ;;  %v13557_v9 = vperm.slane %v5676_v26, %v15167_v3 }
 0x5aa   : > { %15609 = vst [vmem:[#allocation71_spill] sm:$0xff] %v13554_v55  ;;  %v13560_v50 = vperm.slane %v5732_v43, %v15167_v3  ;;  %v7787_v5 = vunpack.i.l.bf16 %v15607_v54  ;;  %v15611_v21 = vunpack.i.l.bf16 %v15610_v57  ;;  %v5271_v27 = vrot.slane %v13286_v48, 4  ;;  %v13589_v8 = vpop.permute.xlu2 %4385 }
 0x5ab   : > { %v5327_v32 = vrot.slane %v13289_v6, 4  ;;  %v7753_v43 = vunpack.i.h.bf16 %v15613_v24  ;;  %v15615_v6 = vld [vmem:[#allocation60_spill] sm:$0xff]  ;;  %v13584_v20 = vperm.slane %v15616_v1, %v15167_v3  ;;  %15620 = vst [vmem:[#allocation81_spill] sm:$0xff] %v13589_v8  ;;  %v15625_v31 = vrot.slane %v15624_v18, 4 }
 0x5ac   : > { %v2733_v17 = vsel %vm553_vm7, %v2732_v51, %v15611_v21  ;;  %8110 = vrot.lane.b32.xlu2 %v8109_v28, %s8356_s15  ;;  %5970 = vrot.lane.b32.xlu0 %v13552_v12, %s8350_s29  ;;  %v7752_v21 = vunpack.i.l.bf16 %v15613_v24  ;;  %v15614_v51 = vld [vmem:[#allocation61_spill] sm:$0xff]  ;;  %v3366_v54 = vsel %vm551_vm6, %v15615_v6, %v7782_v25  ;;  %v13591_v57 = vpop.permute.xlu0 %7985  ;;  %v8139_v24 = vpack.i.bf16 %v13560_v50, %v13557_v9 }
 0x5ad   : > { %v13571_v26 = vsel %vm555_vm8, %v2733_v17, %v7737_v35  ;;  %v3373_v48 = vsel %vm551_vm6, %v15614_v51, %v7783_v0  ;;  %15617 = vst [vmem:[#allocation37_spill] sm:$0xff] %v13584_v20  ;;  %v15618_v17 = vld [vmem:[#allocation90_spill] sm:$0xff]  ;;  %v15619_v28 = vld [vmem:[#allocation89_spill] sm:$0xff]  ;;  %v5272_v25 = vsel %vm383_vm1, 0.0, %v5271_v27  ;;  %v5328_v1 = vsel %vm383_vm1, 0.0, %v5327_v32  ;;  %v15622_v35 = vld [vmem:[#allocation91_spill] sm:$0xff] }
 0x5ae   : > { %15612 = vst [vmem:[#allocation87_spill] sm:$0xff] %v13571_v26  ;;  %v15621_v51 = vrot.slane %v13270_v29, 4  ;;  %v3374_v8 = vsel %vm553_vm7, %v3373_v48, %v7753_v43  ;;  %v3367_v56 = vsel %vm553_vm7, %v3366_v54, %v7752_v21  ;;  %v5871_v0 = vrot.slane %v13095_v40, 4 }
 0x5af   : > { %v15623_v27 = vrot.slane %v13007_v7, 4  ;;  %v6159_v13 = vrot.slane %v13584_v20, 4  ;;  %v8124_v48 = vpack.i.bf16 %v5328_v1, %v5272_v25  ;;  %v13625_v55 = vsel %vm555_vm8, %v3374_v8, %v7788_v53 }
 0x5b0   : > { %v6550_v6 = vsel %vm383_vm1, %v13413_v36, %v15621_v51  ;;  %8140 = vrot.lane.b32.xlu1 %v8139_v24, %s8350_s29  ;;  %v15626_v51 = vld [vmem:[#allocation48_spill] sm:$0xff]  ;;  %15630 = vst [vmem:[#allocation53_spill] sm:$0xff] %v13625_v55  ;;  %v5872_v20 = vsel %vm383_vm1, %v15632_v47, %v5871_v0  ;;  %v7967_v58 = vunpack.i.l.bf16 %v13319_v38 }
 0x5b1   : > { %v5666_v32 = vsel %vm383_vm1, %v13114_v45, %v15623_v27  ;;  %v5722_v52 = vsel %vm383_vm1, %v15626_v51, %v15625_v31  ;;  %v13620_v54 = vperm.slane %v6550_v6, %v15167_v3  ;;  %v13622_v24 = vpop.permute.xlu1 %4393  ;;  %v13628_v27 = vsel %vm555_vm8, %v3367_v56, %v7787_v5  ;;  %v15633_v56 = vld [vmem:[#allocation27_spill] sm:$0xff]  ;;  %v15636_v0 = vld [vmem:[#allocation76_spill] sm:$0xff] }
 0x5b2   : > { %15629 = vst [vmem:[#allocation85_spill] sm:$0xff] %v13622_v24  ;;  %v13638_v25 = vperm.slane %v5666_v32, %v15167_v3  ;;  %v13641_v8 = vperm.slane %v5722_v52, %v15167_v3  ;;  %v13645_v53 = vperm.slane %v15633_v56, %v15167_v3  ;;  %v15637_v6 = vrot.slane %v13467_v37, 4  ;;  %v15638_v31 = vld [vmem:[#allocation64_spill] sm:$0xff]  ;;  %v15640_v52 = vld [vmem:[#allocation74_spill] sm:$0xff] }
 0x5b3   : > { %15628 = vst [vmem:[#allocation83_spill] sm:$0xff] %v13620_v54  ;;  %v13654_v43 = vperm.slane %v15638_v31, %v15167_v3  ;;  %v13657_v32 = vsel %vm383_vm1, 0.0, %v6159_v13  ;;  %v13664_v1 = vperm.slane %v5872_v20, %v15167_v3  ;;  %v15642_v37 = vrot.slane %v13440_v33, 4 }
 0x5b4   : > { %8125 = vrot.lane.b32.xlu2 %v8124_v48, %s8355_s19  ;;  %6612 = vrot.lane.b32.xlu0 %v13620_v54, %s8352_s17  ;;  %15634 = vst [vmem:[#allocation50_spill] sm:$0xff] %v13645_v53  ;;  %v6560_v48 = vsel %vm383_vm1, %v15637_v6, %v15636_v0  ;;  %v8006_v56 = vpop.permute.xlu2 %8005  ;;  %v13661_v55 = vpop.permute.xlu0 %8000  ;;  %v15643_v13 = vrot.slane %v13114_v45, 4  ;;  %v15644_v24 = vrot.slane %v15626_v51, 4  ;;  %v15647_v45 = vld [vmem:[#allocation33_spill] sm:$0xff]  ;;  %v7963_v5 = vunpack.i.h.bf16 %v13522_v4 }
 0x5b5   : > { %15639 = vst [vmem:[#allocation84_spill] sm:$0xff] %v13657_v32  ;;  %v6288_v6 = vsel %vm383_vm1, %v13474_v46, %v15642_v37  ;;  %v8008_v31 = vunpack.i.h.bf16 %v8006_v56  ;;  %v8007_v0 = vunpack.i.l.bf16 %v8006_v56  ;;  %v15645_v32 = vld [vmem:[#allocation102_spill] sm:$0xff]  ;;  %v8134_v37 = vpack.i.bf16 %v13641_v8, %v13638_v25 }
 0x5b6   : > { %15641 = vst [vmem:[#allocation99_spill] sm:$0xff] %v13664_v1  ;;  %v5664_v21 = vsel %vm383_vm1, %v15643_v13, %v13007_v7  ;;  %v5720_v54 = vsel %vm383_vm1, %v15644_v24, %v15624_v18  ;;  %v13685_v56 = vperm.slane %v6560_v48, %v15167_v3  ;;  %v15648_v13 = vld [vmem:[#allocation51_spill] sm:$0xff]  ;;  %v13692_v18 = vperm.slane %v6288_v6, %v15167_v3 }
 0x5b7   : > { %v3579_v7 = vsel %vm551_vm6, %v15647_v45, %v8008_v31  ;;  %v3572_v51 = vsel %vm551_vm6, %v15648_v13, %v8007_v0  ;;  %v15650_v24 = vrot.slane %v13506_v42, 4  ;;  %v13701_v2 = vperm.slane %v5664_v21, %v15167_v3 }
 0x5b8   : > { %5962 = vrot.lane.b32.xlu1 %v13664_v1, %s8352_s17  ;;  %15646 = vst [vmem:[#allocation88_spill] sm:$0xff] %v13685_v56  ;;  %v7962_v1 = vunpack.i.l.bf16 %v13522_v4  ;;  %v13704_v31 = vperm.slane %v5720_v54, %v15167_v3  ;;  %v7968_v0 = vunpack.i.h.bf16 %v13319_v38  ;;  %v15653_v13 = vrot.slane %v13062_v16, 4  ;;  %v15654_v54 = vld [vmem:[#allocation100_spill] sm:$0xff] }
 0x5b9   : > { %15649 = vst [vmem:[#allocation61_spill] sm:$0xff] %v13692_v18  ;;  %v6356_v20 = vsel %vm383_vm1, %v13276_v44, %v15650_v24  ;;  %v8011_v48 = vpop.permute.xlu1 %8010  ;;  %v3580_v21 = vsel %vm553_vm7, %v3579_v7, %v7963_v5  ;;  %v15655_v26 = vrot.slane %v15654_v54, 4  ;;  %v8154_v38 = vpack.i.bf16 %v13692_v18, %v13645_v53  ;;  %v15682_v18 = vld [vmem:[#allocation77_spill] sm:$0xff] }
 0x5ba   : > { %15651 = vst [vmem:[#allocation60_spill] sm:$0xff] %v13701_v2  ;;  %v8013_v6 = vunpack.i.h.bf16 %v8011_v48  ;;  %v8012_v45 = vunpack.i.l.bf16 %v8011_v48  ;;  %v5884_v24 = vsel %vm383_vm1, %v13183_v30, %v15653_v13  ;;  %v3573_v4 = vsel %vm553_vm7, %v3572_v51, %v7962_v1 }
 0x5bb   : > { %15652 = vst [vmem:[#allocation34_spill] sm:$0xff] %v13704_v31  ;;  %v5940_v48 = vsel %vm383_vm1, %v15656_v62, %v15655_v26  ;;  %v5687_v5 = vrot.slane %v13701_v2, 4  ;;  %v5743_v7 = vrot.slane %v13704_v31, 4  ;;  %v15665_v53 = vrot.slane %v13492_v34, 4 }
 0x5bc   : > { %8135 = vrot.lane.b32.xlu2 %v8134_v37, %s8352_s17  ;;  %6620 = vrot.lane.b32.xlu0 %v13685_v56, %s8350_s29  ;;  %v3574_v16 = vsel %vm555_vm8, %v3573_v4, %v8012_v45  ;;  %v3581_v30 = vsel %vm555_vm8, %v3580_v21, %v8013_v6  ;;  %v13726_v37 = vperm.slane %v6356_v20, %v15167_v3  ;;  %v13730_v1 = vpop.permute.xlu0 %4365  ;;  %v15659_v6 = vld [vmem:[#allocation75_spill] sm:$0xff]  ;;  %v15660_v4 = vld [vmem:[#allocation96_spill] sm:$0xff]  ;;  %v5689_v31 = vrot.slane %v13638_v25, 4 }
 0x5bd   : > { %v13728_v13 = vpop.permute.xlu2 %8020  ;;  %15657 = vst [vmem:[#allocation90_spill] sm:$0xff] %v13730_v1  ;;  %v13735_v26 = vsel %vm557_vm9, %v3574_v16, %v7967_v58  ;;  %v13738_v51 = vsel %vm557_vm9, %v3581_v30, %v7968_v0  ;;  %v13744_v56 = vperm.slane %v5940_v48, %v15167_v3  ;;  %v13752_v0 = vperm.slane %v5884_v24, %v15167_v3  ;;  %v15662_v30 = vld [vmem:[#allocation69_spill] sm:$0xff]  ;;  %v15664_v48 = vld [vmem:[#allocation72_spill] sm:$0xff] }
 0x5be   : > { %15658 = vst [vmem:[#allocation89_spill] sm:$0xff] %v13738_v51  ;;  %v15663_v21 = vrot.slane %v15662_v30, 4  ;;  %v6344_v20 = vsel %vm383_vm1, %v13273_v22, %v15665_v53  ;;  %v5744_v24 = vsel %vm383_vm1, 0.0, %v5743_v7  ;;  %v5745_v58 = vrot.slane %v13641_v8, 4 }
 0x5bf   : > { %15661 = vst [vmem:[#allocation91_spill] sm:$0xff] %v13744_v56  ;;  %v8169_v16 = vpack.i.bf16 %v13744_v56, %v13726_v37  ;;  %v15666_v1 = vrot.slane %v15632_v47, 4  ;;  %v13782_v25 = vperm.slane %v6344_v20, %v15167_v3  ;;  %v5693_v8 = vrot.slane %v13459_v49, 4 }
 0x5c0   : > { %8155 = vrot.lane.b32.xlu1 %v8154_v38, %s8352_s17  ;;  %v5928_v45 = vsel %vm383_vm1, %v15664_v48, %v15663_v21  ;;  %v5688_v38 = vsel %vm383_vm1, 0.0, %v5687_v5  ;;  %v5749_v5 = vrot.slane %v13462_v19, 4  ;;  %v5690_v20 = vsel %vm383_vm1, 0.0, %v5689_v31 }
 0x5c1   : > { %v13764_v2 = vpop.permute.xlu1 %8025  ;;  %v5870_v53 = vsel %vm383_vm1, %v15666_v1, %v13095_v40  ;;  %v8174_v56 = vpack.i.bf16 %v5744_v24, %v5688_v38  ;;  %v13788_v47 = vperm.slane %v5928_v45, %v15167_v3  ;;  %v15667_v40 = vrot.slane %v13276_v44, 4 }
 0x5c2   : > { %v5746_v49 = vsel %vm383_vm1, 0.0, %v5745_v58  ;;  %v15668_v19 = vrot.slane %v15656_v62, 4  ;;  %v13805_v45 = vperm.slane %v5870_v53, %v15167_v3  ;;  %v5899_v24 = vrot.slane %v13752_v0, 4 }
 0x5c3   : > { %v6354_v1 = vsel %vm383_vm1, %v15667_v40, %v13506_v42  ;;  %v15670_v40 = vrot.slane %v13273_v22, 4  ;;  %v8149_v62 = vpack.i.bf16 %v13788_v47, %v13782_v25  ;;  %v5750_v58 = vsel %vm383_vm1, 0.0, %v5749_v5 }
 0x5c4   : > { %5978 = vrot.lane.b32.xlu2 %v13752_v0, %s8351_s8  ;;  %8170 = vrot.lane.b32.xlu0 %v8169_v16, %s8351_s8  ;;  %v13796_v16 = vpop.permute.xlu0 %4377  ;;  %v5938_v38 = vsel %vm383_vm1, %v15668_v19, %v15654_v54  ;;  %15669 = vst [vmem:[#allocation24_spill] sm:$0xff] %v13805_v45  ;;  %v5694_v54 = vsel %vm383_vm1, 0.0, %v5693_v8  ;;  %v13820_v53 = vperm.slane %v6354_v1, %v15167_v3  ;;  %v15671_v22 = vrot.slane %v15664_v48, 4 }
 0x5c5   : > { %v6342_v31 = vsel %vm383_vm1, %v15670_v40, %v13492_v34  ;;  %v8179_v0 = vpack.i.bf16 %v5746_v49, %v5690_v20  ;;  %v13824_v42 = vperm.slane %v5938_v38, %v15167_v3  ;;  %v5893_v8 = vrot.slane %v13805_v45, 4  ;;  %v15679_v38 = vld [vmem:[#allocation78_spill] sm:$0xff] }
 0x5c6   : > { %v13794_v51 = vpop.permute.xlu2 %8035  ;;  %v5926_v34 = vsel %vm383_vm1, %v15671_v22, %v15662_v30  ;;  %v5897_v5 = vrot.slane %v13552_v12, 4  ;;  %v13835_v1 = vperm.slane %v6342_v31, %v15167_v3  ;;  %v15673_v20 = vrot.slane %v13413_v36, 4 }
 0x5c7   : > { %v8189_v40 = vpack.i.bf16 %v5750_v58, %v5694_v54  ;;  %v15674_v48 = vrot.slane %v13471_v10, 4  ;;  %v6371_v22 = vrot.slane %v13726_v37, 4  ;;  %v8027_v31 = vunpack.i.l.bf16 %v13764_v2 }
 0x5c8   : > { %8175 = vrot.lane.b32.xlu1 %v8174_v56, %s8353_s11  ;;  %15672 = vst [vmem:[#allocation48_spill] sm:$0xff] %v13835_v1  ;;  %v6548_v49 = vsel %vm383_vm1, %v15673_v20, %v13270_v29  ;;  %v8159_v29 = vpack.i.bf16 %v13824_v42, %v13820_v53  ;;  %v13854_v36 = vperm.slane %v5926_v34, %v15167_v3  ;;  %v8028_v58 = vunpack.i.h.bf16 %v13764_v2 }
 0x5c9   : > { %v13830_v56 = vpop.permute.xlu1 %8040  ;;  %v6494_v30 = vsel %vm383_vm1, %v13540_v60, %v15674_v48  ;;  %v15676_v37 = vrot.slane %v13478_v59, 4  ;;  %v13863_v48 = vperm.slane %v6548_v49, %v15167_v3  ;;  %v5894_v19 = vsel %vm383_vm1, 0.0, %v5893_v8 }
 0x5ca   : > { %15675 = vst [vmem:[#allocation28_spill] sm:$0xff] %v13854_v36  ;;  %v5898_v34 = vsel %vm383_vm1, 0.0, %v5897_v5  ;;  %v13872_v12 = vperm.slane %v6494_v30, %v15167_v3  ;;  %v6365_v2 = vrot.slane %v13835_v1, 4  ;;  %v6372_v49 = vsel %vm383_vm1, 0.0, %v6371_v22 }
 0x5cb   : > { %v6298_v20 = vsel %vm383_vm1, %v15676_v37, %v13418_v15  ;;  %15677 = vst [vmem:[#allocation27_spill] sm:$0xff] %v13863_v48  ;;  %v5900_v37 = vsel %vm383_vm1, 0.0, %v5899_v24  ;;  %v15678_v44 = vrot.slane %v13474_v46, 4  ;;  %v3778_v8 = vsel %vm551_vm6, %v15679_v38, %v8027_v31  ;;  %v15681_v24 = vld [vmem:[#allocation38_spill] sm:$0xff] }
 0x5cc   : > { %8150 = vrot.lane.b32.xlu2 %v8149_v62, %s8352_s17  ;;  %8180 = vrot.lane.b32.xlu0 %v8179_v0, %s8354_s18  ;;  %v13867_v0 = vpop.permute.xlu0 %8015  ;;  %v5949_v5 = vrot.slane %v13854_v36, 4  ;;  %v13887_v30 = vperm.slane %v6298_v20, %v15167_v3  ;;  %v15680_v21 = vunpack.i.l.bf16 %v15622_v35  ;;  %v3785_v46 = vsel %vm551_vm6, %v15682_v18, %v8028_v58 }
 0x5cd   : > { %v8017_v54 = vunpack.i.l.bf16 %v13867_v0  ;;  %v6286_v7 = vsel %vm383_vm1, %v15678_v44, %v13440_v33  ;;  %v6571_v44 = vrot.slane %v13863_v48, 4  ;;  %v15683_v38 = vunpack.i.l.bf16 %v15618_v17 }
 0x5ce   : > { %v13865_v62 = vpop.permute.xlu2 %8055  ;;  %v3993_v22 = vsel %vm561_vm11, %v15681_v24, %v15680_v21  ;;  %v13904_v20 = vsel %vm383_vm1, 0.0, %v6365_v2  ;;  %v13907_v1 = vperm.slane %v6286_v7, %v15167_v3  ;;  %v5691_v21 = vrot.slane %v13557_v9, 4 }
 0x5cf   : > { %v3576_v33 = vsel %vm559_vm10, %v13735_v26, %v8017_v54  ;;  %v5747_v18 = vrot.slane %v13560_v50, 4  ;;  %v8022_v54 = vunpack.i.l.bf16 %v13728_v13  ;;  %v15685_v58 = vunpack.i.l.bf16 %v13397_v23 }
 0x5d0   : > { %8190 = vrot.lane.b32.xlu1 %v8189_v40, %s8356_s15  ;;  %v13901_v40 = vsel %vm563_vm12, %v3993_v22, %v15683_v38  ;;  %15684 = vst [vmem:[#allocation64_spill] sm:$0xff] %v13907_v1  ;;  %v8194_v22 = vpack.i.bf16 %v6372_v49, %v5900_v37  ;;  %v15686_v7 = vunpack.i.h.bf16 %v13397_v23  ;;  %v5950_v9 = vsel %vm383_vm1, 0.0, %v5949_v5 }
 0x5d1   : > { %v8046_v31 = vpop.permute.xlu1 %8045  ;;  %v3779_v24 = vsel %vm553_vm7, %v3778_v8, %v15685_v58  ;;  %v15687_v38 = vunpack.i.l.bf16 %v13360_v14  ;;  %v8037_v37 = vunpack.i.l.bf16 %v13794_v51  ;;  %v13938_v58 = vsel %vm383_vm1, 0.0, %v5691_v21 }
 0x5d2   : > { %v3786_v2 = vsel %vm553_vm7, %v3785_v46, %v15686_v7  ;;  %v6309_v46 = vrot.slane %v13907_v1, 4  ;;  %v8048_v8 = vunpack.i.h.bf16 %v8046_v31  ;;  %v15690_v21 = vunpack.i.l.bf16 %v15660_v4 }
 0x5d3   : > { %v3577_v26 = vsel %vm561_vm11, %v3576_v33, %v15687_v38  ;;  %v13941_v33 = vsel %vm383_vm1, 0.0, %v5747_v18  ;;  %v15691_v50 = vunpack.i.l.bf16 %v15619_v28  ;;  %v8047_v1 = vunpack.i.l.bf16 %v8046_v31  ;;  %v15698_v31 = vld [vmem:[#allocation79_spill] sm:$0xff] }
 0x5d4   : > { %8160 = vrot.lane.b32.xlu2 %v8159_v29, %s8350_s29  ;;  %5958 = vrot.lane.b32.xlu0 %v5894_v19, %s8353_s11  ;;  %v8199_v29 = vpack.i.bf16 %v5950_v9, %v13904_v20  ;;  %v13931_v19 = vsel %vm383_vm1, 0.0, %v6571_v44  ;;  %v8031_v5 = vpop.permute.xlu0 %8030  ;;  %v15688_v20 = vrot.slane %v13540_v60, 4  ;;  %v15689_v9 = vunpack.i.l.bf16 %v15645_v32 }
 0x5d5   : > { %v8033_v7 = vunpack.i.h.bf16 %v8031_v5  ;;  %v8032_v38 = vunpack.i.l.bf16 %v8031_v5  ;;  %v3369_v5 = vsel %vm557_vm9, %v13628_v27, %v15691_v50  ;;  %v15692_v60 = vunpack.i.l.bf16 %v15640_v52 }
 0x5d6   : > { %v13934_v49 = vpop.permute.xlu2 %4361  ;;  %v6492_v44 = vsel %vm383_vm1, %v15688_v20, %v13471_v10  ;;  %v3157_v23 = vsel %vm561_vm11, %v13489_v61, %v15689_v9  ;;  %v15693_v10 = vld [vmem:[#allocation55_spill] sm:$0xff]  ;;  %v15697_v50 = vunpack.i.l.bf16 %v13426_v63  ;;  %v8018_v59 = vunpack.i.h.bf16 %v13867_v0 }
 0x5d7   : > { %v3158_v18 = vsel %vm563_vm12, %v3157_v23, %v15690_v21  ;;  %v2949_v20 = vsel %vm557_vm9, %v15693_v10, %v15692_v60  ;;  %v3787_v61 = vsel %vm555_vm8, %v3786_v2, %v8033_v7  ;;  %v3780_v9 = vsel %vm555_vm8, %v3779_v24, %v8032_v38  ;;  %v15700_v38 = vld [vmem:[#allocation47_spill] sm:$0xff] }
 0x5d8   : > { %5974 = vrot.lane.b32.xlu1 %v5898_v34, %s8355_s19  ;;  %v15694_v34 = vld [vmem:[#allocation98_spill] sm:$0xff]  ;;  %v8042_v23 = vunpack.i.l.bf16 %v13830_v56  ;;  %v15696_v21 = vunpack.i.h.bf16 %v13426_v63  ;;  %v3781_v45 = vsel %vm557_vm9, %v3780_v9, %v15697_v50  ;;  %v15699_v10 = vunpack.i.l.bf16 %v15698_v31 }
 0x5d9   : > { %v15695_v48 = vunpack.i.l.bf16 %v15694_v34  ;;  %v8061_v60 = vpop.permute.xlu1 %8060  ;;  %v13979_v24 = vsel %vm383_vm1, 0.0, %v6309_v46  ;;  %v3782_v7 = vsel %vm559_vm10, %v3781_v45, %v8037_v37  ;;  %v13991_v63 = vperm.slane %v6492_v44, %v15167_v3  ;;  %v15705_v37 = vld [vmem:[#allocation97_spill] sm:$0xff] }
 0x5da   : > { %v3788_v27 = vsel %vm557_vm9, %v3787_v61, %v15696_v21  ;;  %v15704_v21 = vunpack.i.l.bf16 %v15659_v6  ;;  %v4201_v50 = vsel %vm551_vm6, %v15705_v37, %v8048_v8  ;;  %v15709_v8 = vunpack.i.l.bf16 %v13399_v39 }
 0x5db   : > { %v3370_v36 = vsel %vm559_vm10, %v3369_v5, %v15695_v48  ;;  %v15701_v5 = vunpack.i.l.bf16 %v15700_v38  ;;  %15702 = vst [vmem:[#allocation74_spill] sm:$0xff] %v13991_v63  ;;  %v8058_v0 = vunpack.i.h.bf16 %v13865_v62 }
 0x5dc   : > { %v3371_v2 = vsel %vm561_vm11, %v3370_v36, %v15699_v10  ;;  %6584 = vrot.lane.b32.xlu2 %v13872_v12, %s8352_s17  ;;  %8195 = vrot.lane.b32.xlu0 %v8194_v22, %s8356_s15  ;;  %v15703_v36 = vunpack.i.l.bf16 %v13591_v57  ;;  %v2950_v45 = vsel %vm559_vm10, %v2949_v20, %v15704_v21  ;;  %v15706_v10 = vld [vmem:[#allocation29_spill] sm:$0xff] }
 0x5dd   : > { %v3372_v61 = vsel %vm563_vm12, %v3371_v2, %v15701_v5  ;;  %v4194_v2 = vsel %vm551_vm6, %v15706_v10, %v8047_v1  ;;  %v15707_v5 = vld [vmem:[#allocation70_spill] sm:$0xff]  ;;  %v15711_v10 = vunpack.i.l.bf16 %v13455_v11 }
 0x5de   : > { %v3783_v46 = vsel %vm561_vm11, %v3782_v7, %v15703_v36  ;;  %v4422_v9 = vrot.slane %v3372_v61, 4  ;;  %v15708_v44 = vunpack.i.l.bf16 %v15707_v5  ;;  %v14008_v7 = vpop.permute.xlu2 %4373  ;;  %v8051_v61 = vpop.permute.xlu0 %8050 }
 0x5df   : > { %v3784_v22 = vsel %vm563_vm12, %v3783_v46, %v8042_v23  ;;  %v8053_v1 = vunpack.i.h.bf16 %v8051_v61  ;;  %v8052_v23 = vunpack.i.l.bf16 %v8051_v61  ;;  %v15710_v46 = vld [vmem:[#allocation84_spill] sm:$0xff]  ;;  %v15713_v61 = vld [vmem:[#allocation89_spill] sm:$0xff] }
 0x5e0   : > { %v2951_v48 = vsel %vm561_vm11, %v2950_v45, %v15708_v44  ;;  %v4428_v36 = vrot.slane %v3784_v22, 4  ;;  %v14011_v20 = vsel %vm2266_vm13, %v3158_v18, %v4422_v9  ;;  %v8204_v37 = vpack.i.bf16 %v13979_v24, %v15710_v46  ;;  %8200 = vrot.lane.b32.xlu1 %v8199_v29, %s8353_s11 }
 0x5e1   : > { %v14016_v21 = vsel %vm563_vm12, %v2951_v48, %v15709_v8  ;;  %v3578_v45 = vsel %vm563_vm12, %v3577_v26, %v8022_v54  ;;  %v4195_v22 = vsel %vm553_vm7, %v4194_v2, %v15711_v10  ;;  %v15712_v18 = vunpack.i.h.bf16 %v13455_v11  ;;  %v4346_v46 = vpop.permute.xlu1 %4345  ;;  %v15718_v10 = vld [vmem:[#allocation58_spill] sm:$0xff] }
 0x5e2   : > { %v14030_v48 = vsel %vm2266_vm13, %v3578_v45, %v4428_v36  ;;  %v8057_v44 = vunpack.i.l.bf16 %v13865_v62  ;;  %v4196_v26 = vsel %vm555_vm8, %v4195_v22, %v8052_v23  ;;  %v6515_v54 = vrot.slane %v13991_v63, 4  ;;  %v15716_v62 = vld [vmem:[#allocation92_spill] sm:$0xff] }
 0x5e3   : > { %v4202_v9 = vsel %vm553_vm7, %v4201_v50, %v15712_v18  ;;  %v3583_v2 = vsel %vm559_vm10, %v15713_v61, %v8018_v59  ;;  %v8062_v8 = vunpack.i.l.bf16 %v8061_v60  ;;  %v15714_v11 = vunpack.i.h.bf16 %v13496_v41  ;;  %v15723_v61 = vld [vmem:[#allocation83_spill] sm:$0xff] }
 0x5e4   : > { %v4203_v24 = vsel %vm555_vm8, %v4202_v9, %v8053_v1  ;;  %v15715_v29 = vunpack.i.l.bf16 %v13496_v41  ;;  %v4400_v1 = vsel %vm551_vm6, %v15716_v62, %v4346_v46  ;;  %v15717_v45 = vunpack.i.h.bf16 %v15622_v35  ;;  %6608 = vrot.lane.b32.xlu0 %v13931_v19, %s8353_s11  ;;  %v15720_v9 = vld [vmem:[#allocation57_spill] sm:$0xff] }
 0x5e5   : > { %v4204_v50 = vsel %vm557_vm9, %v4203_v24, %v15714_v11  ;;  %v8063_v18 = vunpack.i.h.bf16 %v8061_v60  ;;  %v15719_v41 = vpack.i.bf16 %v13887_v30, %v13654_v43  ;;  %v4401_v24 = vsel %vm553_vm7, %v4400_v1, %v15720_v9 }
 0x5e6   : > { %v4197_v36 = vsel %vm557_vm9, %v4196_v26, %v15715_v29  ;;  %v4000_v59 = vsel %vm561_vm11, %v15718_v10, %v15717_v45  ;;  %v4205_v22 = vsel %vm559_vm10, %v4204_v50, %v8058_v0  ;;  %v15722_v26 = vunpack.i.h.bf16 %v15618_v17  ;;  %v14074_v46 = vpop.permute.xlu2 %4397  ;;  %v4354_v62 = vpop.permute.xlu0 %4353 }
 0x5e7   : > { %v4198_v23 = vsel %vm559_vm10, %v4197_v36, %v8057_v44  ;;  %8165 = vrot.lane.b32.xlu2 %v15719_v41, %s8350_s29  ;;  %v15721_v44 = vunpack.i.l.bf16 %v13661_v55  ;;  %v6573_v11 = vrot.slane %v15723_v61, 4  ;;  %v15724_v50 = vunpack.i.h.bf16 %v13661_v55 }
 0x5e8   : > { %v4001_v0 = vsel %vm563_vm12, %v4000_v59, %v15722_v26  ;;  %v15725_v19 = vunpack.i.h.bf16 %v13360_v14  ;;  %v6516_v1 = vsel %vm383_vm1, 0.0, %v6515_v54  ;;  %v4402_v55 = vsel %vm555_vm8, %v4401_v24, %v4354_v62  ;;  %v15730_v54 = vld [vmem:[#allocation71_spill] sm:$0xff]  ;;  %8205 = vrot.lane.b32.xlu1 %v8204_v37, %s8353_s11  ;;  %v15734_v26 = vld [vmem:[#allocation53_spill] sm:$0xff] }
 0x5e9   : > { %v4199_v35 = vsel %vm561_vm11, %v4198_v23, %v15721_v44  ;;  %v4206_v29 = vsel %vm561_vm11, %v4205_v22, %v15724_v50  ;;  %v15727_v59 = vunpack.i.h.bf16 %v13591_v57  ;;  %v15729_v22 = vld [vmem:[#allocation80_spill] sm:$0xff]  ;;  %v4403_v9 = vsel %vm557_vm9, %v4402_v55, %v15730_v54  ;;  %v15736_v50 = vld [vmem:[#allocation41_spill] sm:$0xff]  ;;  %v15747_v54 = vld [vmem:[#allocation54_spill] sm:$0xff] }
 0x5ea   : > { %v4200_v60 = vsel %vm563_vm12, %v4199_v35, %v8062_v8  ;;  %v3584_v36 = vsel %vm561_vm11, %v3583_v2, %v15725_v19  ;;  %v4207_v23 = vsel %vm563_vm12, %v4206_v29, %v8063_v18  ;;  %v15726_v8 = vunpack.i.h.bf16 %v13794_v51  ;;  %v15738_v29 = vld [vmem:[#allocation87_spill] sm:$0xff] }
 0x5eb   : > { %v4434_v17 = vrot.slane %v4200_v60, 4  ;;  %v4435_v10 = vrot.slane %v4207_v23, 4  ;;  %v15728_v2 = vunpack.i.h.bf16 %v15645_v32  ;;  %v15732_v57 = vunpack.i.h.bf16 %v15660_v4  ;;  %v4370_v60 = vpop.permute.xlu1 %4369  ;;  %v15741_v23 = vld [vmem:[#allocation61_spill] sm:$0xff] }
 0x5ec   : > { %v3789_v45 = vsel %vm559_vm10, %v3788_v27, %v15726_v8  ;;  %v15731_v27 = vunpack.i.h.bf16 %v13830_v56  ;;  %v4404_v32 = vsel %vm559_vm10, %v4403_v9, %v13934_v49  ;;  %v15733_v37 = vunpack.i.h.bf16 %v15619_v28  ;;  %v15735_v56 = vld [vmem:[#allocation90_spill] sm:$0xff]  ;;  %6580 = vrot.lane.b32.xlu0 %v6516_v1, %s8353_s11 }
 0x5ed   : > { %v3790_v14 = vsel %vm561_vm11, %v3789_v45, %v15727_v59  ;;  %v3164_v41 = vsel %vm561_vm11, %v15729_v22, %v15728_v2  ;;  %v4444_v51 = vsel %vm2266_vm13, %v13901_v40, %v4434_v17  ;;  %v14103_v44 = vsel %vm2266_vm13, %v4001_v0, %v4435_v10  ;;  %v15743_v59 = vld [vmem:[#allocation59_spill] sm:$0xff] }
 0x5ee   : > { %v3791_v18 = vsel %vm563_vm12, %v3790_v14, %v15731_v27  ;;  %v3165_v24 = vsel %vm563_vm12, %v3164_v41, %v15732_v57  ;;  %v3376_v40 = vsel %vm557_vm9, %v15734_v26, %v15733_v37  ;;  %v4405_v61 = vsel %vm561_vm11, %v4404_v32, %v15735_v56  ;;  %v14150_v57 = vpop.permute.xlu2 %8070  ;;  %v15752_v26 = vld [vmem:[#allocation103_spill] sm:$0xff] }
 0x5ef   : > { %v4429_v35 = vrot.slane %v3791_v18, 4  ;;  %v15737_v4 = vunpack.i.l.bf16 %v15736_v50  ;;  %v15739_v49 = vunpack.i.h.bf16 %v13728_v13  ;;  %v15740_v62 = vunpack.i.h.bf16 %v15694_v34  ;;  %v15753_v56 = vld [vmem:[#allocation35_spill] sm:$0xff] }
 0x5f0   : > { %v4406_v17 = vsel %vm563_vm12, %v4405_v61, %v4370_v60  ;;  %v6311_v8 = vrot.slane %v15741_v23, 4  ;;  %v15742_v55 = vunpack.i.h.bf16 %v15698_v31  ;;  %v7738_v14 = vunpack.i.h.bf16 %v15743_v59 }
 0x5f1   : > { %v2735_v19 = vsel %vm557_vm9, %v15738_v29, %v15737_v4  ;;  %v3585_v0 = vsel %vm563_vm12, %v3584_v36, %v15739_v49  ;;  %v3377_v28 = vsel %vm559_vm10, %v3376_v40, %v15740_v62  ;;  %v7933_v13 = vunpack.i.h.bf16 %v15659_v6  ;;  %v15745_v36 = vld [vmem:[#allocation50_spill] sm:$0xff]  ;;  %7044 = vmatpush.msk.msra.mxu2 %vm2266_vm13, %v4406_v17 }
 0x5f2   : > { %v14124_v45 = vsel %vm2266_vm13, %v3585_v0, %v4429_v35  ;;  %v3378_v10 = vsel %vm561_vm11, %v3377_v28, %v15742_v55  ;;  %v15744_v34 = vpack.i.bf16 %v13941_v33, %v13938_v58  ;;  %v6161_v2 = vrot.slane %v15745_v36, 4  ;;  %v15750_v33 = vld [vmem:[#allocation93_spill] sm:$0xff]  ;;  %v15758_v0 = vld [vmem:[#allocation39_spill] sm:$0xff]  ;;  %v15760_v36 = vld [vmem:[#allocation86_spill] sm:$0xff] }
 0x5f3   : > { %v15746_v22 = vunpack.i.h.bf16 %v15700_v38  ;;  %v7938_v31 = vunpack.i.h.bf16 %v13399_v39  ;;  %v15748_v9 = vunpack.i.l.bf16 %v15747_v54  ;;  %v15749_v58 = vunpack.i.h.bf16 %v15640_v52  ;;  %v4390_v38 = vpop.permute.xlu0 %4389  ;;  %v15751_v39 = vld [vmem:[#allocation99_spill] sm:$0xff]  ;;  %4468 = vmatpush.msra.mxu2 %v4444_v51 }
 0x5f4   : > { %8185 = vrot.lane.b32.xlu2 %v15744_v34, %s8355_s19  ;;  %v7903_v18 = vunpack.i.h.bf16 %v15707_v5  ;;  %v6574_v32 = vsel %vm383_vm1, 0.0, %v6573_v11  ;;  %v5895_v35 = vrot.slane %v15751_v39, 4  ;;  %v4407_v40 = vsel %vm551_vm6, %v15752_v26, %v14008_v7  ;;  %v15754_v11 = vld [vmem:[#allocation43_spill] sm:$0xff]  ;;  %v15764_v39 = vld [vmem:[#allocation73_spill] sm:$0xff] }
 0x5f5   : > { %v3379_v41 = vsel %vm563_vm12, %v3378_v10, %v15746_v22  ;;  %v2736_v6 = vsel %vm559_vm10, %v2735_v19, %v15748_v9  ;;  %v2956_v1 = vsel %vm557_vm9, %v15750_v33, %v15749_v58  ;;  %v6312_v52 = vsel %vm383_vm1, 0.0, %v6311_v8  ;;  %6616 = vrot.lane.b32.xlu1 %v6574_v32, %s8354_s18  ;;  %v15756_v51 = vld [vmem:[#allocation63_spill] sm:$0xff]  ;;  %4469 = vmatpush.msra.mxu2 %v14030_v48  ;;  %v4382_v8 = vpop.permute.xlu1 %4381  ;;  %v15762_v22 = vld [vmem:[#allocation68_spill] sm:$0xff]  ;;  %v15763_v58 = vld [vmem:[#allocation85_spill] sm:$0xff] }
 0x5f6   : > { %v4423_v27 = vrot.slane %v3379_v41, 4  ;;  %v2957_v37 = vsel %vm559_vm10, %v2956_v1, %v7933_v13  ;;  %v6369_v60 = vrot.slane %v13820_v53, 4  ;;  %v7747_v61 = vunpack.i.l.bf16 %v15753_v56  ;;  %v14207_v9 = vpop.permute.xlu2 %8080 }
 0x5f7   : > { %v15755_v4 = vunpack.i.l.bf16 %v15754_v11  ;;  %v4416_v19 = vrot.slane %v14016_v21, 4  ;;  %v2958_v7 = vsel %vm561_vm11, %v2957_v37, %v7903_v18  ;;  %v15757_v49 = vunpack.i.h.bf16 %v15756_v51  ;;  %4470 = vmatpush.msra.mxu2 %v14011_v20  ;;  %v15766_v37 = vld [vmem:[#allocation19_spill] sm:$0xff] }
 0x5f8   : > { %v14161_v5 = vsel %vm2266_vm13, %v3165_v24, %v4423_v27  ;;  %v6162_v24 = vsel %vm383_vm1, 0.0, %v6161_v2  ;;  %v5953_v62 = vrot.slane %v13824_v42, 4  ;;  %v14178_v28 = vsel %vm563_vm12, %v2958_v7, %v7938_v31  ;;  %v14190_v42 = vld [vmem:[%s14797_s4] sm:$0xf] }
 0x5f9   : > { %v2737_v29 = vsel %vm561_vm11, %v2736_v6, %v15755_v4  ;;  %v2740_v53 = vsel %vm553_vm7, %v15758_v0, %v15757_v49  ;;  %v5896_v21 = vsel %vm383_vm1, 0.0, %v5895_v35  ;;  %v8214_v23 = vpack.i.bf16 %v6312_v52, %v6162_v24  ;;  %v15765_v35 = vld [vmem:[#allocation46_spill] sm:$0xff]  ;;  %v15767_v52 = vld [vmem:[#allocation49_spill] sm:$0xff]  ;;  %v15769_v0 = vld [vmem:[#allocation40_spill] sm:$0xff] }
 0x5fa   : > { %v2741_v17 = vsel %vm555_vm8, %v2740_v53, %v7738_v14  ;;  %v4408_v55 = vsel %vm553_vm7, %v4407_v40, %v13796_v16  ;;  %v2738_v48 = vsel %vm563_vm12, %v2737_v29, %v7747_v61  ;;  %v6370_v59 = vsel %vm383_vm1, 0.0, %v6369_v60  ;;  %v15759_v16 = vld [vmem:[#allocation81_spill] sm:$0xff]  ;;  %v15768_v29 = vld [vmem:[#allocation82_spill] sm:$0xff]  ;;  %v15770_v24 = vld [vmem:[#allocation76_spill] sm:$0xff] }
 0x5fb   : > { %v4409_v10 = vsel %vm555_vm8, %v4408_v55, %v4382_v8  ;;  %v6367_v14 = vrot.slane %v13782_v25, 4  ;;  %v7663_v13 = vunpack.i.h.bf16 %v15736_v50  ;;  %8215 = vrot.lane.b32.xlu0 %v8214_v23, %s8354_s18  ;;  %v4438_v34 = vsel %vm2266_vm13, %v2738_v48, %v4416_v19  ;;  %v8066_v6 = vpop.permute.xlu0 %8065 }
 0x5fc   : > { %5966 = vrot.lane.b32.xlu2 %v5896_v21, %s8354_s18  ;;  %v4410_v20 = vsel %vm557_vm9, %v4409_v10, %v15759_v16  ;;  %v15761_v2 = vrot.slane %v15760_v36, 4  ;;  %4471 = vmatpush.msra.mxu2 %v4438_v34  ;;  %v5954_v31 = vsel %vm383_vm1, 0.0, %v5953_v62  ;;  %v5951_v25 = vrot.slane %v13788_v47, 4 }
 0x5fd   : > { %v4411_v50 = vsel %vm559_vm10, %v4410_v20, %v4390_v38  ;;  %7045 = vmatmul.msk.f32.vlgmr.msra.gmra.mxu2 %vm2276_vm14, %v14190_v42  ;;  %v8219_v27 = vpack.i.bf16 %v5954_v31, %v6370_v59  ;;  %v2742_v1 = vsel %vm557_vm9, %v2741_v17, %v7663_v13  ;;  %v7743_v18 = vunpack.i.h.bf16 %v15747_v54  ;;  %v14231_v51 = vpop.permute.xlu1 %8075  ;;  %v15772_v59 = vld [vmem:[#allocation88_spill] sm:$0xff]  ;;  %v15773_v13 = vld [vmem:[#allocation67_spill] sm:$0xff]  ;;  %v15774_v31 = vld [vmem:[#allocation94_spill] sm:$0xff] }
 0x5fe   : > { %v6482_v41 = vsel %vm383_vm1, %v15762_v22, %v15761_v2  ;;  %v4412_v33 = vsel %vm561_vm11, %v4411_v50, %v15763_v58  ;;  %v6368_v32 = vsel %vm383_vm1, 0.0, %v6367_v14  ;;  %v6105_v47 = vrot.slane %v15764_v39, 4  ;;  %v8096_v55 = vpop.permute.xlu2 %8095  ;;  %v15775_v50 = vld [vmem:[#allocation104_spill] sm:$0xff] }
 0x5ff   : > { %v6469_v38 = vrot.slane %v15765_v35, 4  ;;  %v14219_v26 = vperm.slane %v6482_v41, %v15766_v37  ;;  %8220 = vrot.lane.b32.xlu1 %v8219_v27, %s8355_s19  ;;  %v4413_v40 = vsel %vm563_vm12, %v4412_v33, %v14074_v46  ;;  %v6069_v60 = vrot.slane %v15767_v52, 4 }
 0x600   : > { %v5952_v61 = vsel %vm383_vm1, 0.0, %v5951_v25  ;;  %7046 = vmatpush.msk.msra.mxu3 %vm2266_vm13, %v4413_v40  ;;  %v2743_v54 = vsel %vm559_vm10, %v2742_v1, %v7743_v18  ;;  %v7668_v4 = vunpack.i.h.bf16 %v15754_v11  ;;  %v6517_v49 = vrot.slane %v13872_v12, 4  ;;  %v15771_v12 = vld [vmem:[#allocation45_spill] sm:$0xff]  ;;  %v15776_v1 = vld [vmem:[#allocation44_spill] sm:$0xff] }
 0x601   : > { %v6470_v19 = vsel %vm383_vm1, %v15768_v29, %v6469_v38  ;;  %v8209_v7 = vpack.i.bf16 %v5952_v61, %v6368_v32  ;;  %v6106_v46 = vsel %vm383_vm1, 0.0, %v6105_v47  ;;  %v6070_v53 = vsel %vm383_vm1, %v15769_v0, %v6069_v60 }
 0x602   : > { %4488 = vmatpush.msra.mxu3 %v14103_v44  ;;  %v6561_v62 = vrot.slane %v15770_v24, 4  ;;  %v6503_v17 = vrot.slane %v14219_v26, 4  ;;  %v2744_v11 = vsel %vm561_vm11, %v2743_v54, %v7668_v4  ;;  %v4417_v21 = vrot.slane %v14178_v28, 4 }
 0x603   : > { %6176 = vrot.lane.b32.xlu0 %v6106_v46, %s8354_s18  ;;  %v6057_v23 = vrot.slane %v15771_v12, 4  ;;  %v14246_v8 = vperm.slane %v6470_v19, %v15766_v37  ;;  %v7748_v44 = vunpack.i.h.bf16 %v15753_v56  ;;  %v14250_v10 = vpop.permute.xlu0 %8090  ;;  %v6518_v48 = vsel %vm383_vm1, 0.0, %v6517_v49  ;;  %v15777_v46 = vld [vmem:[#allocation66_spill] sm:$0xff] }
 0x604   : > { %8210 = vrot.lane.b32.xlu2 %v8209_v7, %s8354_s18  ;;  %4489 = vmatpush.msra.mxu3 %v14124_v45  ;;  %v6575_v14 = vrot.slane %v15772_v59, 4  ;;  %v6562_v16 = vsel %vm383_vm1, %v15773_v13, %v6561_v62  ;;  %v6078_v28 = vperm.slane %v6070_v53, %v15766_v37  ;;  %v8098_v20 = vunpack.i.h.bf16 %v8096_v55 }
 0x605   : > { %v8097_v34 = vunpack.i.l.bf16 %v8096_v55  ;;  %v2745_v56 = vsel %vm563_vm12, %v2744_v11, %v7748_v44  ;;  %v6313_v45 = vrot.slane %v13887_v30, 4  ;;  %v8068_v36 = vunpack.i.h.bf16 %v8066_v6  ;;  %v15778_v55 = vld [vmem:[#allocation42_spill] sm:$0xff] }
 0x606   : > { %4490 = vmatpush.msra.mxu3 %v14161_v5  ;;  %v8067_v2 = vunpack.i.l.bf16 %v8066_v6  ;;  %v4439_v22 = vsel %vm2266_vm13, %v2745_v56, %v4417_v21  ;;  %v6504_v41 = vsel %vm383_vm1, %v6503_v17, %v14246_v8  ;;  %v5188_v25 = vsel %vm551_vm6, %v15774_v31, %v8098_v20  ;;  %v14274_v6 = vpop.permute.xlu1 %8085  ;;  %v14288_v38 = vpop.permute.xlu2 %8110 }
 0x607   : > { %6588 = vrot.lane.b32.xlu1 %v6518_v48, %s8354_s18  ;;  %v5181_v27 = vsel %vm551_vm6, %v15775_v50, %v8097_v34  ;;  %v6163_v5 = vrot.slane %v13654_v43, 4  ;;  %v14270_v30 = vperm.slane %v6562_v16, %v15167_v3  ;;  %v5189_v33 = vsel %vm553_vm7, %v5188_v25, %v8068_v36  ;;  %v15780_v50 = vld [vmem:[#allocation95_spill] sm:$0xff] }
 0x608   : > { %4491 = vmatpush.msra.mxu3 %v4439_v22  ;;  %v5182_v58 = vsel %vm553_vm7, %v5181_v27, %v8067_v2  ;;  %v6058_v18 = vsel %vm383_vm1, %v15776_v1, %v6057_v23  ;;  %v6576_v32 = vsel %vm383_vm1, 0.0, %v6575_v14  ;;  %v6314_v39 = vsel %vm383_vm1, 0.0, %v6313_v45  ;;  %v15779_v45 = vld [vmem:[#allocation91_spill] sm:$0xff] }
 0x609   : > { %7047 = vmatmul.msk.f32.vlgmr.msra.gmra.mxu3 %vm2276_vm14, %v14190_v42  ;;  %v6510_v43 = vperm.slane %v6504_v41, %v15167_v3  ;;  %v6091_v47 = vrot.slane %v6078_v28, 4  ;;  %v6164_v42 = vsel %vm383_vm1, 0.0, %v6163_v5  ;;  %v6066_v35 = vperm.slane %v6058_v18, %v15766_v37  ;;  %v15781_v5 = vld [vmem:[#allocation56_spill] sm:$0xff] }
 0x60a   : > { %v8224_v52 = vpack.i.bf16 %v6314_v39, %v6164_v42  ;;  %v6299_v54 = vrot.slane %v13418_v15, 4  ;;  %v8073_v53 = vunpack.i.h.bf16 %v14150_v57  ;;  %v8072_v24 = vunpack.i.l.bf16 %v14150_v57 }
 0x60b   : > { %6628 = vrot.lane.b32.xlu0 %v14270_v30, %s8351_s8  ;;  %v14290_v40 = vpop.permute.xlu0 %8105  ;;  %v6519_v60 = vrot.slane %v6510_v43, 4  ;;  %v6092_v61 = vsel %vm383_vm1, %v6091_v47, %v6066_v35  ;;  %v6093_v44 = vrot.slane %v6066_v35, 4  ;;  %v6158_v48 = vperm.slane %v15778_v55, %v15167_v3 }
 0x60c   : > { %6624 = vrot.lane.b32.xlu2 %v6576_v32, %s8355_s19  ;;  %v6098_v29 = vperm.slane %v6092_v61, %v15167_v3  ;;  %v6300_v0 = vsel %vm383_vm1, %v15777_v46, %v6299_v54  ;;  %v6577_v16 = vrot.slane %v14270_v30, 4  ;;  %v5955_v36 = vrot.slane %v15779_v45, 4  ;;  %v15784_v45 = vld [vmem:[#allocation60_spill] sm:$0xff] }
 0x60d   : > { %v6520_v19 = vsel %vm383_vm1, 0.0, %v6519_v60  ;;  %v6308_v23 = vperm.slane %v6300_v0, %v15167_v3  ;;  %v6094_v59 = vsel %vm383_vm1, %v6078_v28, %v6093_v44  ;;  %v8083_v2 = vunpack.i.h.bf16 %v14207_v9 }
 0x60e   : > { %v8101_v4 = vpop.permute.xlu1 %8100  ;;  %v14311_v21 = vpop.permute.xlu2 %8125  ;;  %v6107_v57 = vrot.slane %v6098_v29, 4  ;;  %v8082_v22 = vunpack.i.l.bf16 %v14207_v9  ;;  %v6165_v41 = vrot.slane %v6158_v48, 4  ;;  %v6102_v28 = vperm.slane %v6094_v59, %v15167_v3 }
 0x60f   : > { %8225 = vrot.lane.b32.xlu1 %v8224_v52, %s8355_s19  ;;  %v8103_v7 = vunpack.i.h.bf16 %v8101_v4  ;;  %v8102_v49 = vunpack.i.l.bf16 %v8101_v4  ;;  %v8229_v14 = vpack.i.bf16 %v6308_v23, %v6158_v48  ;;  %v6578_v18 = vsel %vm383_vm1, 0.0, %v6577_v16 }
 0x610   : > { %v6108_v20 = vsel %vm383_vm1, 0.0, %v6107_v57  ;;  %v6315_v47 = vrot.slane %v6308_v23, 4  ;;  %v6166_v42 = vsel %vm383_vm1, 0.0, %v6165_v41  ;;  %v6109_v35 = vrot.slane %v6102_v28, 4 }
 0x611   : > { %v5183_v15 = vsel %vm555_vm8, %v5182_v58, %v8102_v49  ;;  %v5190_v62 = vsel %vm555_vm8, %v5189_v33, %v8103_v7  ;;  %v6505_v52 = vrot.slane %v14246_v8, 4 }
 0x612   : > { %v14306_v17 = vsel %vm557_vm9, %v5183_v15, %v8072_v24  ;;  %v14309_v11 = vsel %vm557_vm9, %v5190_v62, %v8073_v53  ;;  %v6316_v54 = vsel %vm383_vm1, 0.0, %v6315_v47 }
 0x613   : > { %6596 = vrot.lane.b32.xlu0 %v6520_v19, %s8355_s19  ;;  %v8121_v12 = vpop.permute.xlu0 %8120  ;;  %v6506_v4 = vsel %vm383_vm1, %v14219_v26, %v6505_v52  ;;  %v7060_v26 = vld [vmem:[%s14798_s5 + $0x4] sm:$0xf] }
 0x614   : > { %6592 = vrot.lane.b32.xlu2 %v6510_v43, %s8350_s29  ;;  %v8123_v31 = vunpack.i.h.bf16 %v8121_v12  ;;  %v8122_v25 = vunpack.i.l.bf16 %v8121_v12  ;;  %v5956_v43 = vsel %vm383_vm1, 0.0, %v5955_v36  ;;  %v6514_v8 = vperm.slane %v6506_v4, %v15167_v3  ;;  %v7061_v12 = vld [vmem:[%s14799_s6 + $0x4] sm:$0xf] }
 0x615   : > { %v8234_v60 = vpack.i.bf16 %v6166_v42, %v5956_v43  ;;  %v15785_v42 = vld [vmem:[#allocation24_spill] sm:$0xff] }
 0x616   : > { %v8116_v13 = vpop.permute.xlu1 %8115  ;;  %v8136_v9 = vpop.permute.xlu2 %8135  ;;  %v6521_v0 = vrot.slane %v6514_v8, 4 }
 0x617   : > { %6180 = vrot.lane.b32.xlu1 %v6098_v29, %s8350_s29  ;;  %v8118_v34 = vunpack.i.h.bf16 %v8116_v13  ;;  %v8117_v56 = vunpack.i.l.bf16 %v8116_v13  ;;  %v6110_v29 = vsel %vm383_vm1, 0.0, %v6109_v35  ;;  %v8138_v16 = vunpack.i.h.bf16 %v8136_v9 }
 0x618   : > { %v8239_v49 = vpack.i.bf16 %v6110_v29, %v6316_v54  ;;  %v6522_v15 = vsel %vm383_vm1, 0.0, %v6521_v0 }
 0x619   : > { %v5394_v27 = vsel %vm551_vm6, %v15780_v50, %v8118_v34  ;;  %v5387_v30 = vsel %vm551_vm6, %v15781_v5, %v8117_v56  ;;  %v15783_v34 = vld [vmem:[#allocation34_spill] sm:$0xff] }
 0x61a   : > { %v5388_v58 = vsel %vm553_vm7, %v5387_v30, %v8082_v22  ;;  %v5395_v33 = vsel %vm553_vm7, %v5394_v27, %v8083_v2 }
 0x61b   : > { %6184 = vrot.lane.b32.xlu0 %v6108_v20, %s8355_s19  ;;  %v14332_v1 = vpop.permute.xlu0 %8145  ;;  %v14336_v32 = vsel %vm555_vm8, %v5388_v58, %v8122_v25  ;;  %v14339_v39 = vsel %vm555_vm8, %v5395_v33, %v8123_v31  ;;  %v8137_v20 = vunpack.i.l.bf16 %v8136_v9 }
 0x61c   : > { %8230 = vrot.lane.b32.xlu2 %v8229_v14, %s8351_s8 }
 0x61e   : > { %v14345_v61 = vpop.permute.xlu1 %8130  ;;  %v14353_v19 = vpop.permute.xlu2 %5978 }
 0x61f   : > { %6632 = vrot.lane.b32.xlu1 %v6578_v18, %s8356_s15 }
 0x623   : > { %6188 = vrot.lane.b32.xlu0 %v6102_v28, %s8351_s8  ;;  %v5971_v7 = vpop.permute.xlu0 %5970 }
 0x624   : > { %8235 = vrot.lane.b32.xlu2 %v8234_v60, %s8356_s15 }
 0x626   : > { %v8141_v46 = vpop.permute.xlu1 %8140  ;;  %v8151_v53 = vpop.permute.xlu2 %8150 }
 0x627   : > { %8240 = vrot.lane.b32.xlu1 %v8239_v49, %s8356_s15  ;;  %v8143_v50 = vunpack.i.h.bf16 %v8141_v46  ;;  %v8142_v27 = vunpack.i.l.bf16 %v8141_v46 }
 0x62b   : > { %v14358_v24 = vpop.permute.xlu0 %6612 }
 0x62c   : > { %6600 = vrot.lane.b32.xlu2 %v6514_v8, %s8351_s8 }
 0x62e   : > { %v5963_v62 = vpop.permute.xlu1 %5962  ;;  %v8161_v23 = vpop.permute.xlu2 %8160 }
 0x62f   : > { %6604 = vrot.lane.b32.xlu1 %v6522_v15, %s8356_s15 }
 0x633   : > { %v14368_v57 = vpop.permute.xlu0 %6620 }
 0x634   : > { %6736 = vperm.xlu2 %7512, %v7060_v26  }
 0x636   : > { %v14370_v44 = vpop.permute.xlu1 %8155  ;;  %v14372_v55 = vpop.permute.xlu2 %6584 }
 0x637   : > { %6745 = vperm.xlu1 %7511, %v7061_v12   ;;  %15782 = vst [vmem:[#allocation102_spill] sm:$0xff] %v14372_v55  ;;  %v8153_v12 = vunpack.i.h.bf16 %v8151_v53 }
 0x63b   : > { %v14374_v48 = vpop.permute.xlu0 %8170 }
 0x63e   : > { %v8176_v59 = vpop.permute.xlu1 %8175 }
 0x63f   : > { %v8178_v14 = vunpack.i.h.bf16 %v8176_v59  ;;  %v8177_v13 = vunpack.i.l.bf16 %v8176_v59  ;;  %v8152_v59 = vunpack.i.l.bf16 %v8151_v53 }
 0x641   : > { %v5814_v56 = vsel %vm551_vm6, %v15783_v34, %v8178_v14  ;;  %v5807_v36 = vsel %vm551_vm6, %v15784_v45, %v8177_v13  ;;  %v14380_v2 = vpop.permute.xlu2 %8165  ;;  %v15787_v13 = vld [vmem:[#allocation48_spill] sm:$0xff] }
 0x642   : > { %v5808_v22 = vsel %vm553_vm7, %v5807_v36, %v8137_v20  ;;  %v5815_v41 = vsel %vm553_vm7, %v5814_v56, %v8138_v16 }
 0x643   : > { %v8181_v28 = vpop.permute.xlu0 %8180 }
 0x644   : > { %v8183_v31 = vunpack.i.h.bf16 %v8181_v28  ;;  %v8182_v25 = vunpack.i.l.bf16 %v8181_v28 }
 0x646   : > { %v5816_v5 = vsel %vm555_vm8, %v5815_v41, %v8183_v31  ;;  %v5809_v30 = vsel %vm555_vm8, %v5808_v22, %v8182_v25  ;;  %v14386_v58 = vpop.permute.xlu1 %8190  ;;  %v8163_v22 = vunpack.i.h.bf16 %v8161_v23  ;;  %v8162_v41 = vunpack.i.l.bf16 %v8161_v23  ;;  %v15790_v23 = vld [vmem:[#allocation14_spill] sm:$0xff] }
 0x647   : > { %v5810_v33 = vsel %vm557_vm9, %v5809_v30, %v8142_v27  ;;  %v14390_v9 = vsel %vm557_vm9, %v5816_v5, %v8143_v50  ;;  %v15788_v27 = vld [vmem:[#allocation16_spill] sm:$0xff]  ;;  %v15789_v30 = vld [vmem:[#allocation11_spill] sm:$0xff] }
 0x648   : > { %v14426_v5 = vperm.slane %v15788_v27, %v15766_v37 }
 0x64b   : > { %v5959_v43 = vpop.permute.xlu0 %5958 }
 0x64c   : > { %v6013_v35 = vsel %vm551_vm6, %v15785_v42, %v5959_v43  ;;  %v14434_v43 = vperm.slane %v15790_v23, %v15766_v37  ;;  %v15800_v23 = vld [vmem:[#allocation23_spill] sm:$0xff] }
 0x64d   : > { %v6014_v52 = vsel %vm553_vm7, %v6013_v35, %v5963_v62  ;;  %v15786_v62 = vld [vmem:[#allocation28_spill] sm:$0xff]  ;;  %v15791_v35 = vld [vmem:[#allocation13_spill] sm:$0xff] }
 0x64e   : > { %v14392_v18 = vpop.permute.xlu2 %8185  ;;  %v5975_v54 = vpop.permute.xlu1 %5974 }
 0x64f   : > { %v8187_v47 = vunpack.i.l.bf16 %v14392_v18 }
 0x651   : > { %v14399_v60 = vsel %vm559_vm10, %v5810_v33, %v8187_v47  ;;  %v14430_v33 = vperm.slane %v15789_v30, %v15766_v37 }
 0x653   : > { %v14401_v29 = vpop.permute.xlu0 %8195 }
 0x656   : > { %v5967_v4 = vpop.permute.xlu2 %5966  ;;  %v8201_v0 = vpop.permute.xlu1 %8200 }
 0x657   : > { %v6015_v49 = vsel %vm555_vm8, %v6014_v52, %v5967_v4  ;;  %v8203_v15 = vunpack.i.h.bf16 %v8201_v0  ;;  %v8202_v26 = vunpack.i.l.bf16 %v8201_v0  ;;  %v14442_v52 = vperm.slane %v15791_v35, %v15766_v37 }
 0x658   : > { %v6016_v8 = vsel %vm557_vm9, %v6015_v49, %v5971_v7  ;;  %v15793_v49 = vld [vmem:[#allocation18_spill] sm:$0xff]  ;;  %v6834_v0 = vrot.slane %v14426_v5, 4  ;;  %v7848_v35 = vunpack.i.h.bf16 %v15800_v23 }
 0x659   : > { %v14406_v46 = vsel %vm559_vm10, %v6016_v8, %v5975_v54  ;;  %v6020_v14 = vsel %vm551_vm6, %v15786_v62, %v8203_v15  ;;  %v6436_v16 = vsel %vm551_vm6, %v15787_v13, %v8202_v26  ;;  %v15792_v54 = vld [vmem:[#allocation27_spill] sm:$0xff]  ;;  %v14448_v8 = vperm.slane %v15793_v49, %v15766_v37  ;;  %v15794_v15 = vld [vmem:[#allocation12_spill] sm:$0xff] }
 0x65a   : > { %v6021_v34 = vsel %vm553_vm7, %v6020_v14, %v8153_v12  ;;  %v6437_v56 = vsel %vm553_vm7, %v6436_v16, %v8152_v59  ;;  %v14453_v26 = vperm.slane %v15794_v15, %v15766_v37  ;;  %v6778_v12 = vrot.slane %v14430_v33, 4  ;;  %v15795_v59 = vld [vmem:[#allocation17_spill] sm:$0xff]  ;;  %v15796_v14 = vld [vmem:[#allocation15_spill] sm:$0xff] }
 0x65b   : > { %v6609_v7 = vpop.permute.xlu0 %6608  ;;  %v14458_v62 = vperm.slane %v15795_v59, %v15766_v37  ;;  %v14462_v13 = vperm.slane %v15796_v14, %v15766_v37  ;;  %v15798_v37 = vld [vmem:[#allocation26_spill] sm:$0xff]  ;;  %v15802_v14 = vld [vmem:[#allocation64_spill] sm:$0xff] }
 0x65c   : > { %v6642_v4 = vsel %vm551_vm6, %v15792_v54, %v6609_v7  ;;  %v15806_v59 = vld [vmem:[#allocation52_spill] sm:$0xff] }
 0x65e   : > { %v8211_v20 = vpop.permute.xlu2 %8210  ;;  %v14416_v31 = vpop.permute.xlu1 %8205 }
 0x65f   : > { %v8213_v45 = vunpack.i.h.bf16 %v8211_v20  ;;  %v8212_v36 = vunpack.i.l.bf16 %v8211_v20  ;;  %v8208_v20 = vunpack.i.h.bf16 %v14416_v31 }
 0x661   : > { %v6022_v28 = vsel %vm555_vm8, %v6021_v34, %v8213_v45  ;;  %v6438_v53 = vsel %vm555_vm8, %v6437_v56, %v8212_v36  ;;  %v6835_v34 = vsel %vm383_vm1, %v6834_v0, %v14448_v8  ;;  %v6643_v36 = vsel %vm553_vm7, %v6642_v4, %v14358_v24  ;;  %v15801_v0 = vld [vmem:[#allocation36_spill] sm:$0xff] }
 0x662   : > { %v14419_v25 = vsel %vm557_vm9, %v6022_v28, %v8163_v22  ;;  %v14422_v50 = vsel %vm557_vm9, %v6438_v53, %v8162_v41  ;;  %v14473_v22 = vperm.slane %v6835_v34, %v15167_v3  ;;  %v7833_v41 = vunpack.i.h.bf16 %v15798_v37  ;;  %v15799_v53 = vld [vmem:[#allocation25_spill] sm:$0xff] }
 0x663   : > { %v14438_v42 = vpop.permute.xlu0 %6580  ;;  %v7832_v28 = vunpack.i.l.bf16 %v15798_v37  ;;  %v7828_v27 = vunpack.i.h.bf16 %v15799_v53  ;;  %v7827_v54 = vunpack.i.l.bf16 %v15799_v53  ;;  %v7847_v4 = vunpack.i.l.bf16 %v15800_v23  ;;  %v15805_v23 = vld [vmem:[#allocation31_spill] sm:$0xff] }
 0x664   : > { %15797 = vst [vmem:[#allocation33_spill] sm:$0xff] %v14473_v22  ;;  %v6858_v24 = vrot.slane %v14473_v22, 4  ;;  %v6429_v34 = vsel %vm551_vm6, %v15802_v14, %v8208_v20  ;;  %v8158_v53 = vunpack.i.h.bf16 %v14370_v44  ;;  %v7853_v7 = vunpack.i.h.bf16 %v15805_v23 }
 0x665   : > { %v7852_v15 = vunpack.i.l.bf16 %v15805_v23  ;;  %v8168_v14 = vunpack.i.h.bf16 %v14380_v2  ;;  %v8188_v37 = vunpack.i.h.bf16 %v14392_v18  ;;  %v6779_v56 = vsel %vm383_vm1, %v6778_v12, %v14462_v13 }
 0x666   : > { %v14436_v47 = vpop.permute.xlu2 %6624  ;;  %v14512_v23 = vperm.slane %v6779_v56, %v15167_v3 }
 0x667   : > { %v6617_v45 = vpop.permute.xlu1 %6616 }
 0x668   : > { %v6644_v30 = vsel %vm555_vm8, %v6643_v36, %v6617_v45  ;;  %v15803_v45 = vld [vmem:[#allocation62_spill] sm:$0xff]  ;;  %v6430_v36 = vsel %vm553_vm7, %v6429_v34, %v8158_v53  ;;  %v15807_v53 = vld [vmem:[#allocation101_spill] sm:$0xff] }
 0x669   : > { %v14483_v49 = vsel %vm557_vm9, %v6644_v30, %v14368_v57  ;;  %v6859_v30 = vsel %vm383_vm1, 0.0, %v6858_v24  ;;  %v4970_v12 = vsel %vm557_vm9, %v15807_v53, %v7827_v54 }
 0x66a   : > { %6895 = vrot.lane.b32.xlu0 %v6859_v30, %s8353_s11  ;;  %v8093_v30 = vunpack.i.h.bf16 %v14250_v10 }
 0x66d   : > { %v14496_v57 = vpop.permute.xlu0 %8215 }
 0x66e   : > { %v14494_v16 = vpop.permute.xlu2 %6592  ;;  %v8218_v20 = vunpack.i.h.bf16 %v14496_v57 }
 0x66f   : > { %15804 = vst [vmem:[#allocation51_spill] sm:$0xff] %v14494_v16  ;;  %v4977_v16 = vsel %vm557_vm9, %v15806_v59, %v7828_v27  ;;  %v8172_v27 = vunpack.i.l.bf16 %v14374_v48  ;;  %v5818_v59 = vsel %vm559_vm10, %v14390_v9, %v8188_v37 }
 0x670   : > { %v6431_v22 = vsel %vm555_vm8, %v6430_v36, %v8218_v20  ;;  %v4978_v34 = vsel %vm559_vm10, %v4977_v16, %v7848_v35  ;;  %v6802_v36 = vrot.slane %v14512_v23, 4  ;;  %v8148_v20 = vunpack.i.h.bf16 %v14332_v1 }
 0x671   : > { %v8221_v55 = vpop.permute.xlu1 %8220  ;;  %v14518_v18 = vsel %vm557_vm9, %v6431_v22, %v8168_v14  ;;  %v4979_v56 = vsel %vm561_vm11, %v4978_v34, %v7833_v41  ;;  %v4971_v22 = vsel %vm559_vm10, %v4970_v12, %v7847_v4  ;;  %v8173_v41 = vunpack.i.h.bf16 %v14374_v48 }
 0x672   : > { %v8223_v24 = vunpack.i.h.bf16 %v8221_v55  ;;  %v8222_v63 = vunpack.i.l.bf16 %v8221_v55  ;;  %v6803_v55 = vsel %vm383_vm1, 0.0, %v6802_v36  ;;  %v4972_v54 = vsel %vm561_vm11, %v4971_v22, %v7832_v28 }
 0x673   : > { %v8207_v14 = vunpack.i.l.bf16 %v14416_v31  ;;  %v4980_v9 = vsel %vm563_vm12, %v4979_v56, %v7853_v7  ;;  %v14544_v4 = vsel %vm563_vm12, %v4972_v54, %v7852_v15  ;;  %6867 = vrot.lane.b32.xlu0 %v6803_v55, %s8353_s11  ;;  %v8113_v31 = vunpack.i.h.bf16 %v14288_v38  ;;  %s7068_s11 = sshll.u32 %s8419_s28, 3 }
 0x674   : > { %v6024_v16 = vsel %vm559_vm10, %v14419_v25, %v8223_v24  ;;  %v6440_v35 = vsel %vm559_vm10, %v14422_v50, %v8222_v63  ;;  %v8092_v25 = vunpack.i.l.bf16 %v14250_v10  ;;  %v8088_v63 = vunpack.i.h.bf16 %v14274_v6 }
 0x675   : > { %v14540_v53 = vpop.permute.xlu0 %6176  ;;  %v8193_v50 = vunpack.i.h.bf16 %v14386_v58  ;;  %v6441_v48 = vsel %vm561_vm11, %v6440_v35, %v8172_v27  ;;  %v6836_v28 = vrot.slane %v14448_v8, 4  ;;  %v5819_v37 = vsel %vm561_vm11, %v5818_v59, %v8148_v20  ;;  %v15809_v8 = vld [vmem:[#allocation37_spill] sm:$0xff] }
 0x676   : > { %v14538_v34 = vpop.permute.xlu2 %8230  ;;  %v6025_v7 = vsel %vm561_vm11, %v6024_v16, %v8173_v41  ;;  %v8108_v15 = vunpack.i.h.bf16 %v14290_v40  ;;  %v8128_v24 = vunpack.i.h.bf16 %v14311_v21  ;;  %v15808_v36 = vrot.slane %v14434_v43, 4 }
 0x677   : > { %v5820_v12 = vsel %vm563_vm12, %v5819_v37, %v8193_v50  ;;  %v8133_v27 = vunpack.i.h.bf16 %v14345_v61  ;;  %v8157_v22 = vunpack.i.l.bf16 %v14370_v44  ;;  %v6230_v20 = vsel %vm551_vm6, %v15809_v8, %v8207_v14  ;;  %v15811_v50 = vld [vmem:[#allocation32_spill] sm:$0xff] }
 0x678   : > { %v6847_v56 = vsel %vm383_vm1, %v15808_v36, %v14458_v62  ;;  %v6837_v16 = vsel %vm383_vm1, %v14426_v5, %v6836_v28  ;;  %v5397_v54 = vsel %vm557_vm9, %v14339_v39, %v8088_v63  ;;  %v15810_v41 = vunpack.i.h.bf16 %v15803_v45 }
 0x679   : > { %v14566_v59 = vpop.permute.xlu1 %6588  ;;  %v6845_v35 = vperm.slane %v6837_v16, %v15167_v3  ;;  %v14572_v55 = vperm.slane %v6847_v56, %v15167_v3  ;;  %v8217_v14 = vunpack.i.l.bf16 %v14496_v57  ;;  %v5398_v37 = vsel %vm559_vm10, %v5397_v54, %v8128_v24 }
 0x67a   : > { %v5613_v44 = vsel %vm561_vm11, %v15811_v50, %v15810_v41  ;;  %v15812_v36 = vunpack.i.h.bf16 %v15801_v0  ;;  %v5192_v28 = vsel %vm559_vm10, %v14309_v11, %v8108_v15  ;;  %v5399_v8 = vsel %vm561_vm11, %v5398_v37, %v8093_v30 }
 0x67b   : > { %v6860_v56 = vrot.slane %v6845_v35, 4  ;;  %v15813_v63 = vunpack.i.h.bf16 %v14231_v51  ;;  %6899 = vrot.lane.b32.xlu2 %v6845_v35, %s8352_s17  ;;  %v5400_v24 = vsel %vm563_vm12, %v5399_v8, %v8133_v27  ;;  %v6780_v50 = vrot.slane %v14462_v13, 4  ;;  %6907 = vrot.lane.b32.xlu0 %v14572_v55, %s8350_s29 }
 0x67c   : > { %v5614_v5 = vsel %vm563_vm12, %v5613_v44, %v15812_v36  ;;  %v6790_v11 = vrot.slane %v14453_v26, 4  ;;  %v8087_v30 = vunpack.i.l.bf16 %v14274_v6  ;;  %v6231_v15 = vsel %vm553_vm7, %v6230_v20, %v8157_v22 }
 0x67d   : > { %v6658_v39 = vrot.slane %v5614_v5, 4  ;;  %v5193_v16 = vsel %vm561_vm11, %v5192_v28, %v15813_v63  ;;  %v14592_v41 = vpop.permute.xlu0 %6628  ;;  %v6861_v37 = vsel %vm383_vm1, 0.0, %v6860_v56  ;;  %v6781_v13 = vsel %vm383_vm1, %v14430_v33, %v6780_v50 }
 0x67e   : > { %v8236_v57 = vpop.permute.xlu2 %8235  ;;  %v5194_v54 = vsel %vm563_vm12, %v5193_v16, %v8113_v31  ;;  %6903 = vrot.lane.b32.xlu1 %v6861_v37, %s8354_s18  ;;  %v6791_v6 = vsel %vm383_vm1, %v6790_v11, %v14442_v52  ;;  %v8198_v22 = vunpack.i.h.bf16 %v14401_v29  ;;  %v6232_v20 = vsel %vm555_vm8, %v6231_v15, %v8217_v14 }
 0x67f   : > { %v8237_v44 = vunpack.i.l.bf16 %v8236_v57  ;;  %v14605_v27 = vsel %vm2266_vm13, %v5400_v24, %v6658_v39  ;;  %v6652_v31 = vrot.slane %v5194_v54, 4  ;;  %v6789_v36 = vperm.slane %v6781_v13, %v15167_v3 }
 0x680   : > { %v8107_v5 = vunpack.i.l.bf16 %v14290_v40  ;;  %v8167_v28 = vunpack.i.l.bf16 %v14380_v2  ;;  %v6442_v63 = vsel %vm563_vm12, %v6441_v48, %v8198_v22  ;;  %v6797_v14 = vperm.slane %v6791_v6, %v15167_v3 }
 0x681   : > { %v6026_v35 = vsel %vm563_vm12, %v6025_v7, %v8237_v44  ;;  %v14617_v56 = vpop.permute.xlu1 %8225  ;;  %v14620_v33 = vsel %vm2266_vm13, %v4980_v9, %v6652_v31  ;;  %v6804_v16 = vrot.slane %v6789_v36, 4  ;;  %v8147_v7 = vunpack.i.l.bf16 %v14332_v1 }
 0x682   : > { %v6664_v8 = vrot.slane %v6026_v35, 4  ;;  %v8227_v39 = vunpack.i.l.bf16 %v14617_v56  ;;  %v8232_v24 = vunpack.i.l.bf16 %v14538_v34  ;;  %v6233_v40 = vsel %vm557_vm9, %v6232_v20, %v8167_v28 }
 0x683   : > { %v8192_v54 = vunpack.i.l.bf16 %v14386_v58  ;;  %v8238_v50 = vunpack.i.h.bf16 %v8236_v57  ;;  %v6805_v11 = vsel %vm383_vm1, 0.0, %v6804_v16  ;;  %6871 = vrot.lane.b32.xlu2 %v6789_v36, %s8352_s17  ;;  %v6670_v15 = vrot.slane %v6442_v63, 4  ;;  %6879 = vrot.lane.b32.xlu0 %v6797_v14, %s8350_s29  ;;  %s7039_s17 = sshll.u32 %s8484_s22, 3  ;;  %s8294_s29 = scalar_lea.hbm %s14800_s7, 16 }
 0x684   : > { %v6678_v2 = vsel %vm2266_vm13, %v5820_v12, %v6664_v8  ;;  %v6234_v9 = vsel %vm559_vm10, %v6233_v40, %v8227_v39  ;;  %v15814_v1 = vrot.slane %v14458_v62, 4  ;;  %v5812_v12 = vsel %vm561_vm11, %v14399_v60, %v8147_v7  ;;  %s298_s28 = scalar_lea.vmem [#allocation7], %s7039_s17 }
 0x685   : > { %v6235_v48 = vsel %vm561_vm11, %v6234_v9, %v8232_v24  ;;  %v8197_v58 = vunpack.i.l.bf16 %v14401_v29  ;;  %v14641_v57 = vpop.permute.xlu0 %6596  ;;  %v5813_v13 = vsel %vm563_vm12, %v5812_v12, %v8192_v54  ;;  %v8127_v62 = vunpack.i.l.bf16 %v14311_v21  ;;  %s6958_s16 = sshll.u32 %s298_s28, 4  ;;  %s6959_s16 = int_to_ptr.vmem [resolvable:$true] %s6958_s16 }
 0x686   : > { %v6849_v44 = vsel %vm383_vm1, %v14434_v43, %v15814_v1  ;;  %v6236_v37 = vsel %vm563_vm12, %v6235_v48, %v8238_v50  ;;  %6875 = vrot.lane.b32.xlu1 %v6805_v11, %s8354_s18  ;;  %v6018_v60 = vsel %vm561_vm11, %v14406_v46, %v14353_v19  ;;  %v15815_v29 = vunpack.i.l.bf16 %v15803_v45  ;;  %v15816_v43 = vld [vmem:[#allocation65_spill] sm:$0xff]  ;;  %v15820_v1 = vld [vmem:[#allocation74_spill] sm:$0xff] }
 0x687   : > { %v6857_v31 = vperm.slane %v6849_v44, %v15167_v3  ;;  %v6680_v6 = vsel %vm2266_vm13, %v6236_v37, %v6670_v15  ;;  %v8132_v20 = vunpack.i.l.bf16 %v14345_v61  ;;  %v6019_v35 = vsel %vm563_vm12, %v6018_v60, %v8197_v58 }
 0x688   : > { %v5606_v22 = vsel %vm561_vm11, %v15816_v43, %v15815_v29  ;;  %v15817_v21 = vunpack.i.l.bf16 %v15801_v0  ;;  %v8112_v8 = vunpack.i.l.bf16 %v14288_v38  ;;  %v6663_v63 = vrot.slane %v6019_v35, 4  ;;  %v6601_v43 = vpop.permute.xlu2 %6600 }
 0x689   : > { %v6864_v36 = vrot.slane %v6857_v31, 4  ;;  %v6181_v39 = vpop.permute.xlu1 %6180  ;;  %v5390_v19 = vsel %vm557_vm9, %v14336_v32, %v8087_v30  ;;  %v5185_v46 = vsel %vm559_vm10, %v14306_v17, %v8107_v5  ;;  %v15818_v16 = vunpack.i.l.bf16 %v14231_v51 }
 0x68a   : > { %v5607_v28 = vsel %vm563_vm12, %v5606_v22, %v15817_v21  ;;  %v5391_v45 = vsel %vm559_vm10, %v5390_v19, %v8127_v62  ;;  %v6677_v0 = vsel %vm2266_vm13, %v5813_v13, %v6663_v63  ;;  %v15819_v5 = vrot.slane %v14442_v52, 4  ;;  %v15823_v62 = vld [vmem:[#allocation51_spill] sm:$0xff] }
 0x68b   : > { %v6657_v61 = vrot.slane %v5607_v28, 4  ;;  %v5186_v7 = vsel %vm561_vm11, %v5185_v46, %v15818_v16  ;;  %v6865_v24 = vsel %vm383_vm1, 0.0, %v6864_v36  ;;  %v5392_v38 = vsel %vm561_vm11, %v5391_v45, %v8092_v25 }
 0x68c   : > { %v5187_v32 = vsel %vm563_vm12, %v5186_v7, %v8112_v8  ;;  %v5393_v30 = vsel %vm563_vm12, %v5392_v38, %v8132_v20  ;;  %v6793_v51 = vsel %vm383_vm1, %v14453_v26, %v15819_v5  ;;  %v6862_v40 = vrot.slane %v14572_v55, 4  ;;  %6919 = vrot.lane.b32.xlu0 %v6865_v24, %s8356_s15  ;;  %v4493_v45 = vpop.f32.mrf.mxu3  ;;  %v15824_v24 = vld [vmem:[#allocation33_spill] sm:$0xff] }
 0x68d   : > { %v6651_v17 = vrot.slane %v5187_v32, 4  ;;  %v6675_v54 = vsel %vm2266_vm13, %v5393_v30, %v6657_v61  ;;  %v6646_v52 = vsel %vm559_vm10, %v14483_v49, %v14436_v47  ;;  %v6185_v26 = vpop.permute.xlu0 %6184  ;;  %v6806_v9 = vrot.slane %v6797_v14, 4  ;;  %v15821_v49 = vld [vmem:[#allocation30_spill] sm:$0xff]  ;;  %v15825_v5 = vld [vmem:[#allocation21_spill] sm:$0xff] }
 0x68e   : > { %v6863_v25 = vsel %vm383_vm1, 0.0, %v6862_v40  ;;  %6915 = vrot.lane.b32.xlu1 %v6857_v31, %s8351_s8  ;;  %v6647_v55 = vsel %vm561_vm11, %v6646_v52, %v14592_v41  ;;  %v8228_v48 = vunpack.i.h.bf16 %v14617_v56  ;;  %v6635_v47 = vsel %vm551_vm6, %v15820_v1, %v14438_v42  ;;  %v15822_v56 = vld [vmem:[#allocation102_spill] sm:$0xff] }
 0x68f   : > { %v6673_v10 = vsel %vm2266_vm13, %v14544_v4, %v6651_v17  ;;  %6911 = vrot.lane.b32.xlu2 %v6863_v25, %s8355_s19  ;;  %v6801_v4 = vperm.slane %v6793_v51, %v15167_v3  ;;  %v6807_v15 = vsel %vm383_vm1, 0.0, %v6806_v9  ;;  %v6225_v41 = vsel %vm555_vm8, %v15821_v49, %v14540_v53 }
 0x690   : > { %v6433_v14 = vsel %vm559_vm10, %v14518_v18, %v8228_v48  ;;  %v8233_v3 = vunpack.i.h.bf16 %v14538_v34  ;;  %v6636_v44 = vsel %vm553_vm7, %v6635_v47, %v15822_v56  ;;  %v6226_v12 = vsel %vm557_vm9, %v6225_v41, %v6181_v39 }
 0x691   : > { %v6633_v50 = vpop.permute.xlu1 %6632  ;;  %v6808_v53 = vrot.slane %v6801_v4, 4  ;;  %v6637_v18 = vsel %vm555_vm8, %v6636_v44, %v14566_v59  ;;  %v6227_v13 = vsel %vm559_vm10, %v6226_v12, %v6185_v26  ;;  %v4503_v51 = vmul.f32 %v15825_v5, %v4493_v45 }
 0x692   : > { %v6648_v11 = vsel %vm563_vm12, %v6647_v55, %v6633_v50  ;;  %v6434_v34 = vsel %vm561_vm11, %v6433_v14, %v8233_v3  ;;  %v15826_v55 = vld [vmem:[#allocation22_spill] sm:$0xff] }
 0x693   : > { %7058 = vmatpush.msk.msrb.mxu3 %vm2266_vm13, %v6648_v11  ;;  %v6809_v59 = vsel %vm383_vm1, 0.0, %v6808_v53  ;;  %v4511_v50 = vadd.f32 %v15826_v55, %v4503_v51 }
 0x695   : > { %6724 = vmatpush.msrb.mxu3 %v6680_v6  ;;  %v6189_v58 = vpop.permute.xlu0 %6188  ;;  %v6638_v6 = vsel %vm557_vm9, %v6637_v18, %v15823_v62 }
 0x696   : > { %6887 = vrot.lane.b32.xlu1 %v6801_v4, %s8351_s8  ;;  %v6228_v60 = vsel %vm561_vm11, %v6227_v13, %v6189_v58 }
 0x697   : > { %6725 = vmatpush.msrb.mxu3 %v6678_v2  ;;  %6883 = vrot.lane.b32.xlu2 %v6807_v15, %s8355_s19  ;;  %v7055_v2 = vld [vmem:[%s14797_s4 + $0x4] sm:$0xf] }
 0x699   : > { %v8241_v42 = vpop.permute.xlu1 %8240  ;;  %6726 = vmatpush.msrb.mxu3 %v14605_v27 }
 0x69a   : > { %v8243_v37 = vunpack.i.h.bf16 %v8241_v42  ;;  %v8242_v31 = vunpack.i.l.bf16 %v8241_v42 }
 0x69b   : > { %6727 = vmatpush.msrb.mxu3 %v14620_v33  ;;  %v6639_v33 = vsel %vm559_vm10, %v6638_v6, %v14641_v57  ;;  %v6737_v57 = vpop.permute.xlu2 %6736 }
 0x69c   : > { %7059 = vmatmul.msk.f32.vlgmr.msrb.gmra.mxu3 %vm2276_vm14, %v7055_v2  ;;  %v6435_v27 = vsel %vm563_vm12, %v6434_v34, %v8242_v31  ;;  %v6229_v22 = vsel %vm563_vm12, %v6228_v60, %v8243_v37  ;;  %v6640_v36 = vsel %vm561_vm11, %v6639_v33, %v6601_v43 }
 0x69d   : > { %v6669_v29 = vrot.slane %v6435_v27, 4 }
 0x69f   : > { %v6679_v20 = vsel %vm2266_vm13, %v6229_v22, %v6669_v29  ;;  %6891 = vrot.lane.b32.xlu2 %v6809_v59, %s8356_s15  ;;  %s6956_s15 = scalar_lea.hbm %s14800_s7, %s7068_s11 }
 0x6a0   : > { %s6960_s12 = sshll.u32 %s6956_s15, 4  ;;  %s6961_s12 = int_to_ptr.hbm [resolvable:$true] %s6960_s12 }
 0x6a1   : > { %v6605_v35 = vpop.permute.xlu1 %6604  ;;  %s8288_s23 = sshra.s32 %s6961_s12, 4  ;;  %s8289_s23 = int_to_ptr.hbm [resolvable:$true] %s8288_s23 }
 0x6a2   : > { %v6641_v21 = vsel %vm563_vm12, %v6640_v36, %v6605_v35  ;;  %s8290_s20 = scalar_lea.hbm %s8289_s23, 8  ;;  %p8295_p0 = scmp.lt.s32.totalorder %s8289_s23, %s14800_s7 }
 0x6a3   : > { %7056 = vmatpush.msk.msrb.mxu2 %vm2266_vm13, %v6641_v21  ;;  %p8291_p6 = scmp.ne.s32.totalorder %s8289_s23, %s8290_s20  ;;  %p8296_p1 = scmp.lt.s32.totalorder %s8294_s29, %s8290_s20 }
 0x6a5   : > { %6704 = vmatpush.msrb.mxu2 %v6679_v20  ;;  %p8292_p9 = pnand %p8291_p6, %p8448_p11  ;;  %p8297_p3 = por %p8296_p1, %p8295_p0 }
 0x6a7   : > { %6705 = vmatpush.msrb.mxu2 %v6677_v0  ;;  %p8293_p13 = pneg %p8292_p9 }
 0x6a9   : > { %6706 = vmatpush.msrb.mxu2 %v6675_v54  ;;  %v6746_v8 = vpop.permute.xlu1 %6745  ;;  %v4473_v54 = vpop.f32.mrf.mxu2  ;;  %p8298_p4 = pnand %p8297_p3, %p8293_p13 }
 0x6aa   : > { %v4502_v15 = vmul.f32 %v15825_v5, %v4473_v54 }
 0x6ab   : > { %6707 = vmatpush.msrb.mxu2 %v6673_v10 }
 0x6ac   : > { %7057 = vmatmul.msk.f32.vlgmr.msrb.gmra.mxu2 %vm2276_vm14, %v7055_v2  ;;  %v4510_v12 = vadd.f32 %v15826_v55, %v4502_v15 }
 0x6d5   : > { %v6900_v39 = vpop.permute.xlu2 %6899 }
 0x6dc   : > { %v6896_v28 = vpop.permute.xlu0 %6895 }
 0x6dd   : > { %v6872_v46 = vpop.permute.xlu2 %6871  ;;  %v6929_v38 = vsel %vm551_vm6, %v15824_v24, %v6896_v28 }
 0x6de   : > { %v6930_v0 = vsel %vm553_vm7, %v6929_v38, %v6900_v39 }
 0x6e5   : > { %v6868_v63 = vpop.permute.xlu0 %6867 }
 0x6e6   : > { %v6922_v17 = vsel %vm551_vm6, %v14512_v23, %v6868_v63 }
 0x6e7   : > { %v6923_v52 = vsel %vm553_vm7, %v6922_v17, %v6872_v46 }
 0x6e9   : > { %v6912_v7 = vpop.permute.xlu2 %6911 }
 0x6ed   : > { %v6908_v61 = vpop.permute.xlu0 %6907 }
 0x6f0   : > { %v6904_v19 = vpop.permute.xlu1 %6903 }
 0x6f1   : > { %v6931_v10 = vsel %vm555_vm8, %v6930_v0, %v6904_v19  ;;  %v6884_v11 = vpop.permute.xlu2 %6883 }
 0x6f2   : > { %v6932_v9 = vsel %vm557_vm9, %v6931_v10, %v6908_v61 }
 0x6f3   : > { %v6933_v48 = vsel %vm559_vm10, %v6932_v9, %v6912_v7 }
 0x6f5   : > { %v6880_v40 = vpop.permute.xlu0 %6879 }
 0x6f8   : > { %v6876_v16 = vpop.permute.xlu1 %6875 }
 0x6f9   : > { %v6924_v4 = vsel %vm555_vm8, %v6923_v52, %v6876_v16  ;;  %v6892_v58 = vpop.permute.xlu2 %6891 }
 0x6fa   : > { %v6925_v1 = vsel %vm557_vm9, %v6924_v4, %v6880_v40 }
 0x6fb   : > { %v6926_v56 = vsel %vm559_vm10, %v6925_v1, %v6884_v11 }
 0x6fe   : > { %v6920_v41 = vpop.permute.xlu0 %6919 }
 0x700   : > { %v6916_v25 = vpop.permute.xlu1 %6915 }
 0x701   : > { %v6934_v49 = vsel %vm561_vm11, %v6933_v48, %v6916_v25 }
 0x702   : > { %v6935_v2 = vsel %vm563_vm12, %v6934_v49, %v6920_v41 }
 0x708   : > { %v6888_v44 = vpop.permute.xlu1 %6887 }
 0x709   : > { %v6927_v18 = vsel %vm561_vm11, %v6926_v56, %v6888_v44 }
 0x70a   : > { %v6928_v34 = vsel %vm563_vm12, %v6927_v18, %v6892_v58 }
 0x71f   : > { %v6729_v32 = vpop.f32.mrf.mxu3 }
 0x720   : > { %v6740_v30 = vmul.f32 %v6737_v57, %v6729_v32 }
 0x722   : > { %v6749_v26 = vadd.f32 %v6746_v8, %v6740_v30 }
 0x724   : > { %v6751_v23 = vadd.f32 %v6749_v26, %v4511_v50 }
 0x726   : > { %v6753_v14 = vmul.f32 0.5, %v6751_v23 }
 0x728   : > { %v6937_v53 = vadd.f32 %v6935_v2, %v6753_v14 }
 0x72a   : > { %v6940_v13 = vrot.slane %v6937_v53, 4 }
 0x72f   : > { %v6709_v47 = vpop.f32.mrf.mxu2 }
 0x730   : > { %v6739_v3 = vmul.f32 %v6737_v57, %v6709_v47 }
 0x732   : > { %v6748_v42 = vadd.f32 %v6746_v8, %v6739_v3 }
 0x734   : > { %v6750_v37 = vadd.f32 %v6748_v42, %v4510_v12 }
 0x736   : > { %v6752_v31 = vmul.f32 0.5, %v6750_v37 }
 0x738   : > { %v6936_v27 = vadd.f32 %v6928_v34, %v6752_v31 }
 0x73a   : > { %v6941_v62 = vsel %vm2266_vm13, %v6936_v27, %v6940_v13 }
 0x73b   : > { %6943 = vst [vmem:[%s298_s28] sm:$0xff] %v6941_v62 }
 0x73c   : > { %8301 = shalt.err (!%p8298_p4)
}
 0x73d   : > { %7071 = dma.vmem_to_hbm [thread:$0]  (%p8448_p11), %s6959_s16, 128, %s6961_s12, %s6945_s21  }
 0x73e PF: > { %s6972_s22 = sand.u32 1, %s8328_s24   ;;  %p15827_p7 = scmp.ge.s32.totalorder %s8340_s27, 2 }
 0x73f   : > { %s6973_s11 = scalar_lea.sflag [#allocation6], %s6972_s22 }
 0x740   : > { %p7078_p5 = pnand %p15827_p7, %p8452_p12 }
 0x742   : > { %p7079_p8 = pneg %p7078_p5 }
 0x744   : > { %8323 = dma.done.wait (%p7079_p8), %s6973_s11, 128  }
 0x745   : > { %8325 = vsyncadd (%p7079_p8), %s6973_s11, 4294967168  ;;  %s15828_s18 = sld [smem:[#allocation10_spill]]  ;;  %p20_p10 = scmp.ge.s32.totalorder %s8423_s30, 4  }
 0x746   : > { %s15829_s24 = smov %s8332_s25  ;;  %s15830_s25 = smov %s8336_s26 }
 0x747   : > { %s15832_s27 = smov %s8423_s30  ;;  %22 = sbr.rel (!%p20_p10) target bundleno = 5 (0x5), region = 99 }
 0x74b   : > { %s15831_s26 = smov %s15828_s18 }
 0x74c   :  { %6979 = vsyncpa [#allocation5], 1 }
 0x74d   :  { %6981 = vsyncpa [#allocation5 + $0x1], 1 }
 0x74e   :  { %6982 = vsyncpa [#allocation6], 1 }
 0x74f   :  { %6984 = vsyncpa [#allocation6 + $0x1], 1 }

</bundles_post_ra>
